<compile_context>
chip_gen: v7x
topology: tpu7x:2x2x1
jax: 0.10.0
libtpu: 0.0.40
codegen_flags: <defaults>
</compile_context>

<pallas_src>
import jax
import jax.numpy as jnp
from jax.experimental import pallas as pl
from jax.experimental.pallas import tpu as pltpu

HIDDEN = 32           # module hidden size
H4 = 128              # Block expansion (hidden*4) == full lane width, no padding needed
K_IN = 32             # fused input row: 19 one-hot | 7 numeric | 1 const | 4 idx | 1 pad
TILE_M = 512          # batch rows per grid step (sweep 256-1024; keep >=2 tiles on v7x)
BATCH = 8

# fused-input column layout
OFF_PHO, OFF_INTENT, OFF_GRADE, OFF_CPDOF = 0, 4, 10, 17
N_CAT = 19
NUM_COL0 = 19         # numeric features occupy cols 19:26
ONE_COL = 26          # constant-1 column (carries b_num@w1 + b1)
IDX_COL0 = 27         # pre-offset categorical indices as exact small-int floats, cols 27:30
                      # (their W_A rows are zero, so they contribute nothing to the matmul)

# weight-slab row layout (all rows are 128 lanes wide, f32)
R_WA = 0              # rows  0:32   W_A  = fused (embeddings | w_num | b_num,b1) @ w1
R_W2OUT = 32          # row   32     w2 @ w_out   (lin2 and lin_to_out folded)
R_C = 33              # row   33     scalar c = b2 @ w_out + b_out (broadcast across lanes)
R_SLAB = 40           # padded to a sublane multiple

NUM_NAMES = ("age", "income", "pel", "amnt", "rate", "pincome", "cbpch")


def fused_mlp_kernel(x_ref, slab_ref, out_ref):
    tm = x_ref.shape[0]
    row = x_ref[...]                                                   # (TM, 32) f32

    # Rebuild the fused one-hot from the 4 pre-offset indices stored as floats in
    # cols 27:30 (values 0..18, exact in f32). The four offset ranges are disjoint,
    # so OR == additive sum of the 4 embeddings' one-hots. NOTE: padded batch rows
    # carry idx=0 / zero numerics / constant-1 column = 0 -> junk rows, sliced off
    # by the wrapper; no divide/log happens on them, leave as-is.
    col = jax.lax.broadcasted_iota(jnp.int32, (tm, K_IN), 1).astype(jnp.float32)
    onehot = ((col == row[:, IDX_COL0 + 0:IDX_COL0 + 1]) |
              (col == row[:, IDX_COL0 + 1:IDX_COL0 + 2]) |
              (col == row[:, IDX_COL0 + 2:IDX_COL0 + 3]) |
              (col == row[:, IDX_COL0 + 3:IDX_COL0 + 4])).astype(jnp.float32)
    x_in = onehot + row                                                # (TM, 32)

    # emb + num_lin + lin1 (+ b_num, b1 via the constant-1 column) -> ReLU
    w_a = slab_ref[R_WA:R_WA + K_IN, :]                                # (32, 128)
    h = jnp.maximum(jnp.dot(x_in, w_a, preferred_element_type=jnp.float32), 0.0)

    # lin2 + lin_to_out folded: y = h @ (w2 @ w_out) + (b2 @ w_out + b_out)
    w2out = slab_ref[R_W2OUT:R_W2OUT + 1, :]                           # (1, 128)
    y = jnp.sum(h * w2out, axis=-1)                                    # (TM,)
    out_ref[...] = y[None, :] + slab_ref[R_C:R_C + 1, 0:1]             # (1, TM), lane-dense


def _pallas_forward(row, slab):
    b_pad = row.shape[0]
    n_tiles = b_pad // TILE_M
    return pl.pallas_call(
        fused_mlp_kernel,
        out_shape=jax.ShapeDtypeStruct((n_tiles, TILE_M), jnp.float32),
        grid_spec=pltpu.PrefetchScalarGridSpec(
            num_scalar_prefetch=0,
            grid=(n_tiles,),
            in_specs=[
                pl.BlockSpec((TILE_M, K_IN), lambda i: (i, 0)),
                pl.BlockSpec((R_SLAB, H4), lambda i: (0, 0)),
            ],
            out_specs=pl.BlockSpec((1, TILE_M), lambda i: (i, 0)),
        ),
        compiler_params=pltpu.CompilerParams(
            dimension_semantics=("parallel",)),
    )(row, slab)


@jax.jit
def simple_model_forward(cat_features, numeric_features, slab):
    B = cat_features["pho"].shape[0]

    stacked = jnp.stack([numeric_features[k] for k in NUM_NAMES],
                        axis=-1).astype(jnp.float32)                   # (B, 7)
    idx = jnp.stack([
        cat_features["pho"].astype(jnp.float32) + OFF_PHO,
        cat_features["intent"].astype(jnp.float32) + OFF_INTENT,
        cat_features["grade"].astype(jnp.float32) + OFF_GRADE,
        cat_features["cpdof"].astype(jnp.float32) + OFF_CPDOF,
    ], axis=-1)                                                        # (B, 4) exact ints

    # Packed row: [19 zeros (one-hot slots) | 7 numerics | 1.0 | 4 idx floats | 0]
    row = jnp.concatenate([
        jnp.zeros((B, N_CAT), jnp.float32),
        stacked,
        jnp.ones((B, 1), jnp.float32),
        idx,
        jnp.zeros((B, 1), jnp.float32),
    ], axis=-1)                                                        # (B, 32)

    b_pad = ((B + TILE_M - 1) // TILE_M) * TILE_M
    pad = b_pad - B
    if pad:
        row = jnp.pad(row, ((0, pad), (0, 0)))                         # junk rows, sliced off

    out = _pallas_forward(row, slab)                                   # (tiles, TILE_M)
    return out.reshape(-1)[:B]


def pack_params(p):
    """Fold + pack all 16 parameter tensors into one (R_SLAB, 128) f32 slab (done once)."""
    H, Hx4 = p["w1"].shape
    assert H == HIDDEN and Hx4 == H4
    w1, b1 = p["w1"], p["b1"]

    # W_A: fused input weight times w1 (embeddings / num_lin / biases folded into lin1).
    cat_w = jnp.concatenate(
        [p["emb_pho"], p["emb_intent"], p["emb_grade"], p["emb_cpdof"]], axis=0)  # (19, 32)
    w_a = jnp.zeros((K_IN, H4), jnp.float32)
    w_a = w_a.at[0:N_CAT, :].set(cat_w @ w1)                           # one-hot rows
    w_a = w_a.at[NUM_COL0:NUM_COL0 + 7, :].set(p["w_num"] @ w1)        # numeric rows
    w_a = w_a.at[ONE_COL, :].set(p["b_num"] @ w1 + b1)                 # constant-1 row
    # rows 27:32 stay zero -> the idx-carrier columns of x_in contribute nothing

    w2out = (p["w2"] @ p["w_out"])[:, 0]                               # (128,)
    c = p["b2"] @ p["w_out"][:, 0] + p["b_out"][0]                     # scalar

    slab = jnp.zeros((R_SLAB, H4), jnp.float32)
    slab = slab.at[R_WA:R_WA + K_IN, :].set(w_a)
    slab = slab.at[R_W2OUT, :].set(w2out)
    slab = slab.at[R_C, :].set(c)
    return slab


def init_params(key, hidden=HIDDEN):
    ks = jax.random.split(key, 12)

    def lin(kw, kb, fan_in, fan_out):
        bound = 1.0 / jnp.sqrt(fan_in)
        w = jax.random.uniform(kw, (fan_in, fan_out), jnp.float32, -bound, bound)
        b = jax.random.uniform(kb, (fan_out,), jnp.float32, -bound, bound)
        return w, b

    params = {
        "emb_pho": jax.random.normal(ks[0], (4, hidden), jnp.float32),
        "emb_intent": jax.random.normal(ks[1], (6, hidden), jnp.float32),
        "emb_grade": jax.random.normal(ks[2], (7, hidden), jnp.float32),
        "emb_cpdof": jax.random.normal(ks[3], (2, hidden), jnp.float32),
    }
    params["w_num"], params["b_num"] = lin(ks[4], ks[5], 7, hidden)
    params["w1"], params["b1"] = lin(ks[6], ks[7], hidden, hidden * 4)
    params["w2"], params["b2"] = lin(ks[8], ks[9], hidden * 4, hidden)
    params["w_out"], params["b_out"] = lin(ks[10], ks[11], hidden, 1)
    return params


def reference_forward(cat_features, numeric_features, params):
    x = (params["emb_pho"][cat_features["pho"]]
         + params["emb_intent"][cat_features["intent"]]
         + params["emb_grade"][cat_features["grade"]]
         + params["emb_cpdof"][cat_features["cpdof"]])
    stacked = jnp.stack([numeric_features[k] for k in NUM_NAMES], axis=-1)
    x = x + stacked @ params["w_num"] + params["b_num"]
    h = jnp.maximum(x @ params["w1"] + params["b1"], 0.0)
    x = h @ params["w2"] + params["b2"]
    return (x @ params["w_out"] + params["b_out"]).squeeze(-1)


if __name__ == "__main__":
    key = jax.random.PRNGKey(0)
    k_params, k_cat, k_num = jax.random.split(key, 3)
    params = init_params(k_params)
    slab = jax.block_until_ready(pack_params(params))    # folded + packed once, reused per call

    kc = jax.random.split(k_cat, 4)
    cat_features = {
        "pho": jax.random.randint(kc[0], (BATCH,), 0, 4, jnp.int32),
        "intent": jax.random.randint(kc[1], (BATCH,), 0, 6, jnp.int32),
        "grade": jax.random.randint(kc[2], (BATCH,), 0, 7, jnp.int32),
        "cpdof": jax.random.randint(kc[3], (BATCH,), 0, 2, jnp.int32),
    }
    kn = jax.random.split(k_num, 7)
    numeric_features = {
        name: jax.random.normal(kn[i], (BATCH,), jnp.float32)
        for i, name in enumerate(NUM_NAMES)
    }

    out = simple_model_forward(cat_features, numeric_features, slab)
    out = jax.block_until_ready(out)

    ref = reference_forward(cat_features, numeric_features, params)
    assert out.shape == (BATCH,)
    assert jnp.allclose(out, ref, atol=1e-4, rtol=1e-4), (out, ref)
    print("KERNEL_OK")
</pallas_src>

<mosaic_0001>
module attributes {stable_mosaic.version = 11 : i64} {
  func.func @fused_mlp_kernel(%arg0: i32, %arg1: memref<512x32xf32, #tpu.memory_space<vmem>>, %arg2: memref<40x128xf32, #tpu.memory_space<vmem>>, %arg3: memref<1x512xf32, #tpu.memory_space<vmem>>) attributes {dimension_semantics = [#tpu.dimension_semantics<parallel>], iteration_bounds = array<i64: 1>, scalar_prefetch = 0 : i64, scratch_operands = 0 : i64, tpu.core_type = #tpu.core_type<tc>, window_params = [{transform_indices = @transform_0, window_bounds = array<i64: 512, 32>}, {pipeline_mode = #tpu.pipeline_mode<synchronous>, transform_indices = @transform_1, window_bounds = array<i64: 40, 128>}, {transform_indices = @transform_2, window_bounds = array<i64: 1, 512>}]} {
    %c0 = arith.constant 0 : index
    %c0_0 = arith.constant 0 : index
    %0 = vector.load %arg1[%c0, %c0_0] : memref<512x32xf32, #tpu.memory_space<vmem>>, vector<512x32xf32>
    %1 = tpu.iota {dimensions = array<i32: 1>} : vector<512x32xi32>
    %2 = arith.sitofp %1 : vector<512x32xi32> to vector<512x32xf32>
    %3 = vector.extract_strided_slice %0 {offsets = [0, 27], sizes = [512, 1], strides = [1, 1]} : vector<512x32xf32> to vector<512x1xf32>
    %4 = vector.broadcast %3 : vector<512x1xf32> to vector<512x32xf32>
    %5 = arith.cmpf oeq, %2, %4 : vector<512x32xf32>
    %6 = vector.extract_strided_slice %0 {offsets = [0, 28], sizes = [512, 1], strides = [1, 1]} : vector<512x32xf32> to vector<512x1xf32>
    %7 = vector.broadcast %6 : vector<512x1xf32> to vector<512x32xf32>
    %8 = arith.cmpf oeq, %2, %7 : vector<512x32xf32>
    %9 = arith.ori %5, %8 : vector<512x32xi1>
    %10 = vector.extract_strided_slice %0 {offsets = [0, 29], sizes = [512, 1], strides = [1, 1]} : vector<512x32xf32> to vector<512x1xf32>
    %11 = vector.broadcast %10 : vector<512x1xf32> to vector<512x32xf32>
    %12 = arith.cmpf oeq, %2, %11 : vector<512x32xf32>
    %13 = arith.ori %9, %12 : vector<512x32xi1>
    %14 = vector.extract_strided_slice %0 {offsets = [0, 30], sizes = [512, 1], strides = [1, 1]} : vector<512x32xf32> to vector<512x1xf32>
    %15 = vector.broadcast %14 : vector<512x1xf32> to vector<512x32xf32>
    %16 = arith.cmpf oeq, %2, %15 : vector<512x32xf32>
    %17 = arith.ori %13, %16 : vector<512x32xi1>
    %18 = arith.extui %17 : vector<512x32xi1> to vector<512x32xi32>
    %19 = arith.sitofp %18 : vector<512x32xi32> to vector<512x32xf32>
    %20 = arith.addf %19, %0 : vector<512x32xf32>
    %c0_1 = arith.constant 0 : index
    %c0_2 = arith.constant 0 : index
    %21 = vector.load %arg2[%c0_1, %c0_2] : memref<40x128xf32, #tpu.memory_space<vmem>>, vector<32x128xf32>
    %cst = arith.constant dense<0.000000e+00> : vector<512x128xf32>
    %22 = tpu.matmul %20, %21, %cst {dimension_numbers = #tpu.dot_dimension_numbers<[1], [0], [0], [1], [0, 0, 1, 1], [], []>} : vector<512x32xf32>, vector<32x128xf32>, vector<512x128xf32> -> vector<512x128xf32>
    %cst_3 = arith.constant 0.000000e+00 : f32
    %23 = vector.broadcast %cst_3 : f32 to vector<512x128xf32>
    %24 = arith.maximumf %22, %23 : vector<512x128xf32>
    %c32 = arith.constant 32 : index
    %c0_4 = arith.constant 0 : index
    %25 = vector.load %arg2[%c32, %c0_4] : memref<40x128xf32, #tpu.memory_space<vmem>>, vector<1x128xf32>
    %26 = vector.broadcast %25 : vector<1x128xf32> to vector<512x128xf32>
    %27 = arith.mulf %24, %26 : vector<512x128xf32>
    %cst_5 = arith.constant dense<0.000000e+00> : vector<512xf32>
    %28 = vector.multi_reduction <add>, %27, %cst_5 [1] : vector<512x128xf32> to vector<512xf32>
    %29 = vector.shape_cast %28 : vector<512xf32> to vector<1x512xf32>
    %c33 = arith.constant 33 : index
    %c0_6 = arith.constant 0 : index
    %30 = vector.load %arg2[%c33, %c0_6] : memref<40x128xf32, #tpu.memory_space<vmem>>, vector<1x1xf32>
    %31 = vector.broadcast %30 : vector<1x1xf32> to vector<1x512xf32>
    %32 = arith.addf %29, %31 : vector<1x512xf32>
    %c0_7 = arith.constant 0 : index
    %c0_8 = arith.constant 0 : index
    %33 = vector.load %arg3[%c0_7, %c0_8] : memref<1x512xf32, #tpu.memory_space<vmem>>, vector<1x512xf32>
    tpu.vector_store %arg3[%c0_7, %c0_8], %32 {strides = array<i32>} : memref<1x512xf32, #tpu.memory_space<vmem>>, vector<1x512xf32>,
    return
  }
  func.func @transform_0(%arg0: i32) -> (i32, i32) {
    %c0_i32 = arith.constant 0 : i32
    %c0_i32_0 = arith.constant 0 : i32
    return %arg0, %c0_i32 : i32, i32
  }
  func.func @transform_1(%arg0: i32) -> (i32, i32) {
    %c0_i32 = arith.constant 0 : i32
    %c0_i32_0 = arith.constant 0 : i32
    %c0_i32_1 = arith.constant 0 : i32
    return %c0_i32, %c0_i32_0 : i32, i32
  }
  func.func @transform_2(%arg0: i32) -> (i32, i32) {
    %c0_i32 = arith.constant 0 : i32
    %c0_i32_0 = arith.constant 0 : i32
    return %arg0, %c0_i32 : i32, i32
  }
}

</mosaic_0001>

<bundles_post_ra>
// kernel: simple_model_forward.1
= control target key start
LH: loop header
LB: loop body
LE: loop exit
PB: predicated region body
PF: predicated region fallthrough
CT: control target
= control target key end

     0   :  { %v10153_v0 = vmov 27   ;;  %vm17674_vm11 = vcmask 261120   ;;  %s17572_s0 = inlined_call_operand.vmem [shape: f32[512,32], index: 0, kind: input, shape index: {}]   ;;  %s17573_s1 = inlined_call_operand.vmem [shape: f32[40,128], index: 1, kind: input, shape index: {}]   ;;  %s17574_s2 = inlined_call_operand.vmem [shape: f32[1,512], index: 2, kind: output, shape index: {}]  }
   0x1   :  { %10080 = vset.pattern.permute.xlu1 %v10153_v0  ;;  %10079 = vset.pattern.permute.xlu0 %v10153_v0  ;;  %v10178_v1 = vld [vmem:[%s17572_s0 + $0x10] sm:$0xff]  ;;  %v10183_v2 = vld [vmem:[%s17572_s0] sm:$0xff]  ;;  %v10190_v3 = vld [vmem:[%s17572_s0 + $0x18] sm:$0xff] }
   0x2   :  { %90 = vperm.xlu1 %10080, %v10178_v1   ;;  %80 = vperm.xlu0 %10079, %v10183_v2   ;;  %v10195_v4 = vld [vmem:[%s17572_s0 + $0x8] sm:$0xff]  ;;  %v10207_v6 = vld [vmem:[%s17572_s0 + $0x20] sm:$0xff]  ;;  %v10214_v7 = vld [vmem:[%s17572_s0 + $0x38] sm:$0xff] }
   0x3   :  { %v10202_v5 = vld [vmem:[%s17572_s0 + $0x28] sm:$0xff]  ;;  %v10219_v8 = vld [vmem:[%s17572_s0 + $0x30] sm:$0xff]  ;;  %v10231_v10 = vld [vmem:[%s17572_s0 + $0x40] sm:$0xff] }
   0x4   :  { %v10226_v9 = vld [vmem:[%s17572_s0 + $0x48] sm:$0xff]  ;;  %v10238_v11 = vld [vmem:[%s17572_s0 + $0x58] sm:$0xff]  ;;  %v10243_v12 = vld [vmem:[%s17572_s0 + $0x50] sm:$0xff] }
   0x5   :  { %v10250_v13 = vld [vmem:[%s17572_s0 + $0x68] sm:$0xff]  ;;  %v10255_v14 = vld [vmem:[%s17572_s0 + $0x60] sm:$0xff]  ;;  %v10262_v15 = vld [vmem:[%s17572_s0 + $0x78] sm:$0xff] }
   0x6   :  { %95 = vperm.xlu1 %10080, %v10190_v3   ;;  %85 = vperm.xlu0 %10079, %v10195_v4   ;;  %v10267_v16 = vld [vmem:[%s17572_s0 + $0x70] sm:$0xff]  ;;  %v10274_v17 = vld [vmem:[%s17572_s0 + $0x88] sm:$0xff]  ;;  %v10279_v18 = vld [vmem:[%s17572_s0 + $0x80] sm:$0xff] }
   0x7   :  { %v10286_v19 = vld [vmem:[%s17572_s0 + $0x98] sm:$0xff]  ;;  %v10291_v20 = vld [vmem:[%s17572_s0 + $0x90] sm:$0xff]  ;;  %v10298_v21 = vld [vmem:[%s17572_s0 + $0xa8] sm:$0xff] }
   0x8   :  { %v10303_v22 = vld [vmem:[%s17572_s0 + $0xa0] sm:$0xff]  ;;  %v10310_v23 = vld [vmem:[%s17572_s0 + $0xb8] sm:$0xff]  ;;  %v10315_v24 = vld [vmem:[%s17572_s0 + $0xb0] sm:$0xff] }
   0x9   :  { %v10322_v25 = vld [vmem:[%s17572_s0 + $0xc8] sm:$0xff]  ;;  %v10327_v26 = vld [vmem:[%s17572_s0 + $0xc0] sm:$0xff]  ;;  %v10334_v27 = vld [vmem:[%s17572_s0 + $0xd8] sm:$0xff] }
   0xa   :  { %105 = vperm.xlu1 %10080, %v10202_v5   ;;  %100 = vperm.xlu0 %10079, %v10207_v6   ;;  %v10339_v28 = vld [vmem:[%s17572_s0 + $0xd0] sm:$0xff]  ;;  %v10346_v29 = vld [vmem:[%s17572_s0 + $0xe8] sm:$0xff]  ;;  %v10351_v30 = vld [vmem:[%s17572_s0 + $0xe0] sm:$0xff] }
   0xb   :  { %v10358_v31 = vld [vmem:[%s17572_s0 + $0xf8] sm:$0xff]  ;;  %v10363_v32 = vld [vmem:[%s17572_s0 + $0xf0] sm:$0xff]  ;;  %v10370_v33 = vld [vmem:[%s17572_s0 + $0x108] sm:$0xff] }
   0xc   :  { %v10375_v34 = vld [vmem:[%s17572_s0 + $0x100] sm:$0xff]  ;;  %v10382_v35 = vld [vmem:[%s17572_s0 + $0x118] sm:$0xff]  ;;  %v10387_v36 = vld [vmem:[%s17572_s0 + $0x110] sm:$0xff] }
   0xd   :  { %v10394_v37 = vld [vmem:[%s17572_s0 + $0x128] sm:$0xff]  ;;  %v10399_v38 = vld [vmem:[%s17572_s0 + $0x120] sm:$0xff]  ;;  %v10406_v39 = vld [vmem:[%s17572_s0 + $0x138] sm:$0xff] }
   0xe   :  { %115 = vperm.xlu1 %10080, %v10214_v7   ;;  %110 = vperm.xlu0 %10079, %v10219_v8   ;;  %v10411_v40 = vld [vmem:[%s17572_s0 + $0x130] sm:$0xff]  ;;  %v10418_v41 = vld [vmem:[%s17572_s0 + $0x148] sm:$0xff]  ;;  %v10423_v42 = vld [vmem:[%s17572_s0 + $0x140] sm:$0xff] }
   0xf   :  { %v10430_v43 = vld [vmem:[%s17572_s0 + $0x158] sm:$0xff]  ;;  %v10435_v44 = vld [vmem:[%s17572_s0 + $0x150] sm:$0xff]  ;;  %v10442_v45 = vld [vmem:[%s17572_s0 + $0x168] sm:$0xff] }
  0x10   :  { %v10447_v46 = vld [vmem:[%s17572_s0 + $0x160] sm:$0xff]  ;;  %v10454_v47 = vld [vmem:[%s17572_s0 + $0x178] sm:$0xff]  ;;  %v10459_v48 = vld [vmem:[%s17572_s0 + $0x170] sm:$0xff] }
  0x11   :  { %18201 = vst [vmem:[#allocation2_spill] sm:$0xff] %v10459_v48  ;;  %v10466_v49 = vld [vmem:[%s17572_s0 + $0x188] sm:$0xff]  ;;  %v10471_v50 = vld [vmem:[%s17572_s0 + $0x180] sm:$0xff]  ;;  %v10478_v51 = vld [vmem:[%s17572_s0 + $0x198] sm:$0xff] }
  0x12   :  { %125 = vperm.xlu1 %10080, %v10226_v9   ;;  %120 = vperm.xlu0 %10079, %v10231_v10   ;;  %18202 = vst [vmem:[#allocation3_spill] sm:$0xff] %v10471_v50  ;;  %18203 = vst [vmem:[#allocation4_spill] sm:$0xff] %v10478_v51  ;;  %v10483_v52 = vld [vmem:[%s17572_s0 + $0x190] sm:$0xff]  ;;  %v10490_v53 = vld [vmem:[%s17572_s0 + $0x1a8] sm:$0xff] }
  0x13   :  { %18204 = vst [vmem:[#allocation5_spill] sm:$0xff] %v10483_v52  ;;  %18205 = vst [vmem:[#allocation6_spill] sm:$0xff] %v10490_v53  ;;  %v10495_v54 = vld [vmem:[%s17572_s0 + $0x1a0] sm:$0xff]  ;;  %v10502_v55 = vld [vmem:[%s17572_s0 + $0x1b8] sm:$0xff] }
  0x14   :  { %18206 = vst [vmem:[#allocation7_spill] sm:$0xff] %v10495_v54  ;;  %18207 = vst [vmem:[#allocation8_spill] sm:$0xff] %v10502_v55  ;;  %v10507_v56 = vld [vmem:[%s17572_s0 + $0x1b0] sm:$0xff]  ;;  %v10514_v57 = vld [vmem:[%s17572_s0 + $0x1c8] sm:$0xff] }
  0x15   :  { %18208 = vst [vmem:[#allocation9_spill] sm:$0xff] %v10507_v56  ;;  %18209 = vst [vmem:[#allocation10_spill] sm:$0xff] %v10514_v57  ;;  %v10519_v58 = vld [vmem:[%s17572_s0 + $0x1c0] sm:$0xff]  ;;  %v10526_v59 = vld [vmem:[%s17572_s0 + $0x1d8] sm:$0xff] }
  0x16   :  { %135 = vperm.xlu1 %10080, %v10238_v11   ;;  %130 = vperm.xlu0 %10079, %v10243_v12   ;;  %18210 = vst [vmem:[#allocation11_spill] sm:$0xff] %v10519_v58  ;;  %18211 = vst [vmem:[#allocation12_spill] sm:$0xff] %v10526_v59  ;;  %v10531_v60 = vld [vmem:[%s17572_s0 + $0x1d0] sm:$0xff]  ;;  %v10538_v61 = vld [vmem:[%s17572_s0 + $0x1e8] sm:$0xff] }
  0x17   :  { %18212 = vst [vmem:[#allocation13_spill] sm:$0xff] %v10531_v60  ;;  %18213 = vst [vmem:[#allocation14_spill] sm:$0xff] %v10538_v61  ;;  %v10543_v62 = vld [vmem:[%s17572_s0 + $0x1e0] sm:$0xff]  ;;  %v10550_v63 = vld [vmem:[%s17572_s0 + $0x1f8] sm:$0xff] }
  0x18   :  { %18214 = vst [vmem:[#allocation15_spill] sm:$0xff] %v10543_v62  ;;  %18215 = vst [vmem:[#allocation16_spill] sm:$0xff] %v10550_v63  ;;  %v10555_v0 = vld [vmem:[%s17572_s0 + $0x1f0] sm:$0xff] }
  0x19   :  { %18216 = vst [vmem:[#allocation17_spill] sm:$0xff] %v10555_v0 }
  0x1a   :  { %145 = vperm.xlu1 %10080, %v10250_v13   ;;  %140 = vperm.xlu0 %10079, %v10255_v14  }
  0x1e   :  { %155 = vperm.xlu1 %10080, %v10262_v15   ;;  %150 = vperm.xlu0 %10079, %v10267_v16  }
  0x22   :  { %165 = vperm.xlu1 %10080, %v10274_v17   ;;  %160 = vperm.xlu0 %10079, %v10279_v18  }
  0x26   :  { %175 = vperm.xlu1 %10080, %v10286_v19   ;;  %170 = vperm.xlu0 %10079, %v10291_v20  }
  0x2a   :  { %185 = vperm.xlu1 %10080, %v10298_v21   ;;  %180 = vperm.xlu0 %10079, %v10303_v22  }
  0x2e   :  { %195 = vperm.xlu1 %10080, %v10310_v23   ;;  %190 = vperm.xlu0 %10079, %v10315_v24  }
  0x32   :  { %205 = vperm.xlu1 %10080, %v10322_v25   ;;  %200 = vperm.xlu0 %10079, %v10327_v26  }
  0x36   :  { %215 = vperm.xlu1 %10080, %v10334_v27   ;;  %210 = vperm.xlu0 %10079, %v10339_v28  }
  0x3a   :  { %225 = vperm.xlu1 %10080, %v10346_v29   ;;  %220 = vperm.xlu0 %10079, %v10351_v30  }
  0x3e   :  { %235 = vperm.xlu1 %10080, %v10358_v31   ;;  %230 = vperm.xlu0 %10079, %v10363_v32  }
  0x42   :  { %245 = vperm.xlu1 %10080, %v10370_v33   ;;  %240 = vperm.xlu0 %10079, %v10375_v34  }
  0x46   :  { %255 = vperm.xlu1 %10080, %v10382_v35   ;;  %250 = vperm.xlu0 %10079, %v10387_v36  }
  0x4a   :  { %265 = vperm.xlu1 %10080, %v10394_v37   ;;  %260 = vperm.xlu0 %10079, %v10399_v38  }
  0x4e   :  { %275 = vperm.xlu1 %10080, %v10406_v39   ;;  %270 = vperm.xlu0 %10079, %v10411_v40  }
  0x52   :  { %285 = vperm.xlu1 %10080, %v10418_v41   ;;  %280 = vperm.xlu0 %10079, %v10423_v42  }
  0x56   :  { %295 = vperm.xlu1 %10080, %v10430_v43   ;;  %290 = vperm.xlu0 %10079, %v10435_v44  }
  0x5a   :  { %305 = vperm.xlu1 %10080, %v10442_v45   ;;  %300 = vperm.xlu0 %10079, %v10447_v46  }
  0x5e   :  { %315 = vperm.xlu1 %10080, %v10454_v47   ;;  %310 = vperm.xlu0 %10079, %v10459_v48  }
  0x62   :  { %325 = vperm.xlu1 %10080, %v10466_v49   ;;  %320 = vperm.xlu0 %10079, %v10471_v50  }
  0x66   :  { %335 = vperm.xlu1 %10080, %v10478_v51   ;;  %330 = vperm.xlu0 %10079, %v10483_v52  }
  0x6a   :  { %345 = vperm.xlu1 %10080, %v10490_v53   ;;  %340 = vperm.xlu0 %10079, %v10495_v54  }
  0x6e   :  { %355 = vperm.xlu1 %10080, %v10502_v55   ;;  %350 = vperm.xlu0 %10079, %v10507_v56  }
  0x72   :  { %365 = vperm.xlu1 %10080, %v10514_v57   ;;  %360 = vperm.xlu0 %10079, %v10519_v58  }
  0x76   :  { %375 = vperm.xlu1 %10080, %v10526_v59   ;;  %370 = vperm.xlu0 %10079, %v10531_v60  }
  0x7a   :  { %385 = vperm.xlu1 %10080, %v10538_v61   ;;  %380 = vperm.xlu0 %10079, %v10543_v62   ;;  %v10154_v61 = vmov 28  }
  0x7e   :  { %395 = vperm.xlu1 %10080, %v10550_v63   ;;  %390 = vperm.xlu0 %10079, %v10555_v0  }
  0x81   :  { %v10559_v59 = vpop.permute.xlu1 %90  ;;  %v10561_v60 = vpop.permute.xlu0 %80 }
  0x82   :  { %18217 = vst [vmem:[#allocation18_spill] sm:$0xff] %v10559_v59  ;;  %18218 = vst [vmem:[#allocation19_spill] sm:$0xff] %v10561_v60  ;;  %10082 = vset.pattern.permute.xlu1 %v10154_v61  ;;  %10081 = vset.pattern.permute.xlu0 %v10154_v61 }
  0x83   :  { %467 = vperm.xlu1 %10082, %v10195_v4   ;;  %463 = vperm.xlu0 %10081, %v10183_v2  }
  0x85   :  { %v10565_v62 = vpop.permute.xlu1 %95  ;;  %v10567_v57 = vpop.permute.xlu0 %85 }
  0x86   :  { %18219 = vst [vmem:[#allocation20_spill] sm:$0xff] %v10565_v62  ;;  %18220 = vst [vmem:[#allocation21_spill] sm:$0xff] %v10567_v57 }
  0x87   :  { %471 = vperm.xlu1 %10082, %v10178_v1   ;;  %475 = vperm.xlu0 %10081, %v10190_v3  }
  0x89   :  { %v10571_v63 = vpop.permute.xlu1 %105  ;;  %v10573_v59 = vpop.permute.xlu0 %100 }
  0x8a   :  { %18221 = vst [vmem:[#allocation22_spill] sm:$0xff] %v10571_v63  ;;  %18222 = vst [vmem:[#allocation23_spill] sm:$0xff] %v10573_v59 }
  0x8b   :  { %479 = vperm.xlu1 %10082, %v10207_v6   ;;  %483 = vperm.xlu0 %10081, %v10202_v5  }
  0x8d   :  { %v10577_v61 = vpop.permute.xlu1 %115  ;;  %v10579_v60 = vpop.permute.xlu0 %110 }
  0x8e   :  { %18223 = vst [vmem:[#allocation24_spill] sm:$0xff] %v10577_v61  ;;  %18224 = vst [vmem:[#allocation25_spill] sm:$0xff] %v10579_v60 }
  0x8f   :  { %487 = vperm.xlu1 %10082, %v10219_v8   ;;  %491 = vperm.xlu0 %10081, %v10214_v7  }
  0x91   :  { %v10583_v62 = vpop.permute.xlu1 %125  ;;  %v10585_v57 = vpop.permute.xlu0 %120 }
  0x92   :  { %18225 = vst [vmem:[#allocation26_spill] sm:$0xff] %v10583_v62  ;;  %18226 = vst [vmem:[#allocation27_spill] sm:$0xff] %v10585_v57 }
  0x93   :  { %495 = vperm.xlu1 %10082, %v10231_v10   ;;  %499 = vperm.xlu0 %10081, %v10226_v9  }
  0x95   :  { %v10589_v59 = vpop.permute.xlu1 %135  ;;  %v10591_v63 = vpop.permute.xlu0 %130 }
  0x96   :  { %18227 = vst [vmem:[#allocation28_spill] sm:$0xff] %v10589_v59  ;;  %18228 = vst [vmem:[#allocation29_spill] sm:$0xff] %v10591_v63 }
  0x97   :  { %503 = vperm.xlu1 %10082, %v10243_v12   ;;  %507 = vperm.xlu0 %10081, %v10238_v11  }
  0x99   :  { %v10595_v60 = vpop.permute.xlu1 %145  ;;  %v10597_v61 = vpop.permute.xlu0 %140 }
  0x9a   :  { %18229 = vst [vmem:[#allocation30_spill] sm:$0xff] %v10595_v60  ;;  %18230 = vst [vmem:[#allocation31_spill] sm:$0xff] %v10597_v61 }
  0x9b   :  { %511 = vperm.xlu1 %10082, %v10255_v14   ;;  %515 = vperm.xlu0 %10081, %v10250_v13  }
  0x9d   :  { %v10601_v57 = vpop.permute.xlu1 %155  ;;  %v10603_v62 = vpop.permute.xlu0 %150 }
  0x9e   :  { %18231 = vst [vmem:[#allocation32_spill] sm:$0xff] %v10601_v57  ;;  %18232 = vst [vmem:[#allocation33_spill] sm:$0xff] %v10603_v62 }
  0x9f   :  { %519 = vperm.xlu1 %10082, %v10267_v16   ;;  %523 = vperm.xlu0 %10081, %v10262_v15  }
  0xa1   :  { %v10607_v63 = vpop.permute.xlu1 %165  ;;  %v10609_v59 = vpop.permute.xlu0 %160 }
  0xa2   :  { %18233 = vst [vmem:[#allocation34_spill] sm:$0xff] %v10607_v63  ;;  %18234 = vst [vmem:[#allocation35_spill] sm:$0xff] %v10609_v59 }
  0xa3   :  { %527 = vperm.xlu1 %10082, %v10279_v18   ;;  %531 = vperm.xlu0 %10081, %v10274_v17  }
  0xa5   :  { %v10613_v61 = vpop.permute.xlu1 %175  ;;  %v10615_v60 = vpop.permute.xlu0 %170 }
  0xa6   :  { %18235 = vst [vmem:[#allocation36_spill] sm:$0xff] %v10613_v61  ;;  %18236 = vst [vmem:[#allocation37_spill] sm:$0xff] %v10615_v60 }
  0xa7   :  { %535 = vperm.xlu1 %10082, %v10291_v20   ;;  %539 = vperm.xlu0 %10081, %v10286_v19  }
  0xa9   :  { %v10619_v62 = vpop.permute.xlu1 %185  ;;  %v10621_v57 = vpop.permute.xlu0 %180 }
  0xaa   :  { %18237 = vst [vmem:[#allocation38_spill] sm:$0xff] %v10619_v62  ;;  %18238 = vst [vmem:[#allocation39_spill] sm:$0xff] %v10621_v57 }
  0xab   :  { %543 = vperm.xlu1 %10082, %v10303_v22   ;;  %547 = vperm.xlu0 %10081, %v10298_v21  }
  0xad   :  { %v10625_v59 = vpop.permute.xlu1 %195  ;;  %v10627_v63 = vpop.permute.xlu0 %190 }
  0xae   :  { %18239 = vst [vmem:[#allocation40_spill] sm:$0xff] %v10625_v59  ;;  %18240 = vst [vmem:[#allocation41_spill] sm:$0xff] %v10627_v63 }
  0xaf   :  { %551 = vperm.xlu1 %10082, %v10315_v24   ;;  %555 = vperm.xlu0 %10081, %v10310_v23  }
  0xb1   :  { %v10631_v60 = vpop.permute.xlu1 %205  ;;  %v10633_v61 = vpop.permute.xlu0 %200 }
  0xb2   :  { %18241 = vst [vmem:[#allocation42_spill] sm:$0xff] %v10631_v60  ;;  %18242 = vst [vmem:[#allocation43_spill] sm:$0xff] %v10633_v61 }
  0xb3   :  { %559 = vperm.xlu1 %10082, %v10327_v26   ;;  %563 = vperm.xlu0 %10081, %v10322_v25  }
  0xb5   :  { %v10637_v57 = vpop.permute.xlu1 %215  ;;  %v10639_v62 = vpop.permute.xlu0 %210 }
  0xb6   :  { %18243 = vst [vmem:[#allocation44_spill] sm:$0xff] %v10637_v57  ;;  %18244 = vst [vmem:[#allocation45_spill] sm:$0xff] %v10639_v62 }
  0xb7   :  { %567 = vperm.xlu1 %10082, %v10339_v28   ;;  %571 = vperm.xlu0 %10081, %v10334_v27  }
  0xb9   :  { %v10643_v63 = vpop.permute.xlu1 %225  ;;  %v10645_v59 = vpop.permute.xlu0 %220 }
  0xba   :  { %18245 = vst [vmem:[#allocation46_spill] sm:$0xff] %v10643_v63  ;;  %18246 = vst [vmem:[#allocation47_spill] sm:$0xff] %v10645_v59 }
  0xbb   :  { %575 = vperm.xlu1 %10082, %v10351_v30   ;;  %579 = vperm.xlu0 %10081, %v10346_v29  }
  0xbd   :  { %v10649_v61 = vpop.permute.xlu1 %235  ;;  %v10651_v60 = vpop.permute.xlu0 %230 }
  0xbe   :  { %18247 = vst [vmem:[#allocation48_spill] sm:$0xff] %v10649_v61  ;;  %18248 = vst [vmem:[#allocation49_spill] sm:$0xff] %v10651_v60 }
  0xbf   :  { %583 = vperm.xlu1 %10082, %v10363_v32   ;;  %587 = vperm.xlu0 %10081, %v10358_v31  }
  0xc1   :  { %v10655_v62 = vpop.permute.xlu1 %245  ;;  %v10657_v57 = vpop.permute.xlu0 %240 }
  0xc2   :  { %18249 = vst [vmem:[#allocation50_spill] sm:$0xff] %v10655_v62  ;;  %18250 = vst [vmem:[#allocation51_spill] sm:$0xff] %v10657_v57 }
  0xc3   :  { %591 = vperm.xlu1 %10082, %v10375_v34   ;;  %595 = vperm.xlu0 %10081, %v10370_v33  }
  0xc5   :  { %v10661_v59 = vpop.permute.xlu1 %255  ;;  %v10663_v63 = vpop.permute.xlu0 %250 }
  0xc6   :  { %18251 = vst [vmem:[#allocation52_spill] sm:$0xff] %v10661_v59  ;;  %18252 = vst [vmem:[#allocation53_spill] sm:$0xff] %v10663_v63 }
  0xc7   :  { %599 = vperm.xlu1 %10082, %v10387_v36   ;;  %603 = vperm.xlu0 %10081, %v10382_v35  }
  0xc9   :  { %v10667_v60 = vpop.permute.xlu1 %265  ;;  %v10669_v61 = vpop.permute.xlu0 %260 }
  0xca   :  { %18253 = vst [vmem:[#allocation54_spill] sm:$0xff] %v10667_v60  ;;  %18254 = vst [vmem:[#allocation55_spill] sm:$0xff] %v10669_v61 }
  0xcb   :  { %607 = vperm.xlu1 %10082, %v10399_v38   ;;  %611 = vperm.xlu0 %10081, %v10394_v37  }
  0xcd   :  { %v10673_v57 = vpop.permute.xlu1 %275  ;;  %v10675_v62 = vpop.permute.xlu0 %270 }
  0xce   :  { %18255 = vst [vmem:[#allocation56_spill] sm:$0xff] %v10673_v57  ;;  %18256 = vst [vmem:[#allocation57_spill] sm:$0xff] %v10675_v62 }
  0xcf   :  { %615 = vperm.xlu1 %10082, %v10411_v40   ;;  %619 = vperm.xlu0 %10081, %v10406_v39  }
  0xd1   :  { %v10679_v63 = vpop.permute.xlu1 %285  ;;  %v10681_v59 = vpop.permute.xlu0 %280 }
  0xd2   :  { %18257 = vst [vmem:[#allocation58_spill] sm:$0xff] %v10679_v63  ;;  %18258 = vst [vmem:[#allocation59_spill] sm:$0xff] %v10681_v59 }
  0xd3   :  { %623 = vperm.xlu1 %10082, %v10423_v42   ;;  %627 = vperm.xlu0 %10081, %v10418_v41  }
  0xd5   :  { %v10685_v61 = vpop.permute.xlu1 %295  ;;  %v10687_v60 = vpop.permute.xlu0 %290 }
  0xd6   :  { %18259 = vst [vmem:[#allocation60_spill] sm:$0xff] %v10685_v61  ;;  %18260 = vst [vmem:[#allocation61_spill] sm:$0xff] %v10687_v60 }
  0xd7   :  { %631 = vperm.xlu1 %10082, %v10435_v44   ;;  %635 = vperm.xlu0 %10081, %v10430_v43  }
  0xd9   :  { %v10691_v62 = vpop.permute.xlu1 %305  ;;  %v10693_v57 = vpop.permute.xlu0 %300 }
  0xda   :  { %18261 = vst [vmem:[#allocation62_spill] sm:$0xff] %v10691_v62  ;;  %18262 = vst [vmem:[#allocation63_spill] sm:$0xff] %v10693_v57 }
  0xdb   :  { %639 = vperm.xlu1 %10082, %v10447_v46   ;;  %643 = vperm.xlu0 %10081, %v10442_v45  }
  0xdd   :  { %v10697_v59 = vpop.permute.xlu1 %315  ;;  %v10699_v63 = vpop.permute.xlu0 %310 }
  0xde   :  { %18263 = vst [vmem:[#allocation64_spill] sm:$0xff] %v10697_v59  ;;  %18264 = vst [vmem:[#allocation65_spill] sm:$0xff] %v10699_v63 }
  0xdf   :  { %647 = vperm.xlu1 %10082, %v10459_v48   ;;  %651 = vperm.xlu0 %10081, %v10454_v47  }
  0xe1   :  { %v10703_v60 = vpop.permute.xlu1 %325  ;;  %v10705_v61 = vpop.permute.xlu0 %320 }
  0xe2   :  { %18265 = vst [vmem:[#allocation66_spill] sm:$0xff] %v10703_v60  ;;  %18266 = vst [vmem:[#allocation67_spill] sm:$0xff] %v10705_v61 }
  0xe3   :  { %655 = vperm.xlu1 %10082, %v10471_v50   ;;  %659 = vperm.xlu0 %10081, %v10466_v49  }
  0xe5   :  { %v10709_v57 = vpop.permute.xlu1 %335  ;;  %v10711_v62 = vpop.permute.xlu0 %330 }
  0xe6   :  { %18267 = vst [vmem:[#allocation68_spill] sm:$0xff] %v10709_v57  ;;  %18268 = vst [vmem:[#allocation69_spill] sm:$0xff] %v10711_v62 }
  0xe7   :  { %663 = vperm.xlu1 %10082, %v10483_v52   ;;  %667 = vperm.xlu0 %10081, %v10478_v51  }
  0xe9   :  { %v10715_v63 = vpop.permute.xlu1 %345  ;;  %v10717_v59 = vpop.permute.xlu0 %340 }
  0xea   :  { %18269 = vst [vmem:[#allocation70_spill] sm:$0xff] %v10715_v63  ;;  %18270 = vst [vmem:[#allocation71_spill] sm:$0xff] %v10717_v59  ;;  %v18275_v63 = vld [vmem:[#allocation10_spill] sm:$0xff] }
  0xeb   :  { %671 = vperm.xlu1 %10082, %v10495_v54   ;;  %675 = vperm.xlu0 %10081, %v10490_v53   ;;  %v18278_v53 = vld [vmem:[#allocation13_spill] sm:$0xff] }
  0xed   :  { %v10721_v61 = vpop.permute.xlu1 %355  ;;  %v10723_v60 = vpop.permute.xlu0 %350 }
  0xee   :  { %18271 = vst [vmem:[#allocation72_spill] sm:$0xff] %v10721_v61  ;;  %18272 = vst [vmem:[#allocation73_spill] sm:$0xff] %v10723_v60  ;;  %v18279_v61 = vld [vmem:[#allocation12_spill] sm:$0xff] }
  0xef   :  { %679 = vperm.xlu1 %10082, %v10507_v56   ;;  %683 = vperm.xlu0 %10081, %v10502_v55   ;;  %v18282_v55 = vld [vmem:[#allocation15_spill] sm:$0xff] }
  0xf1   :  { %v10727_v62 = vpop.permute.xlu1 %365  ;;  %v10729_v57 = vpop.permute.xlu0 %360 }
  0xf2   :  { %18273 = vst [vmem:[#allocation74_spill] sm:$0xff] %v10727_v62  ;;  %18274 = vst [vmem:[#allocation75_spill] sm:$0xff] %v10729_v57  ;;  %v18283_v62 = vld [vmem:[#allocation14_spill] sm:$0xff] }
  0xf3   :  { %687 = vperm.xlu1 %10082, %v10519_v58   ;;  %691 = vperm.xlu0 %10081, %v18275_v63  }
  0xf5   :  { %v10733_v59 = vpop.permute.xlu1 %375  ;;  %v10735_v51 = vpop.permute.xlu0 %370 }
  0xf6   :  { %18276 = vst [vmem:[#allocation76_spill] sm:$0xff] %v10733_v59  ;;  %18277 = vst [vmem:[#allocation77_spill] sm:$0xff] %v10735_v51  ;;  %v18286_v59 = vld [vmem:[#allocation16_spill] sm:$0xff] }
  0xf7   :  { %695 = vperm.xlu1 %10082, %v18278_v53   ;;  %699 = vperm.xlu0 %10081, %v18279_v61   ;;  %v10155_v61 = vmov 29  }
  0xf9   :  { %v10739_v60 = vpop.permute.xlu1 %385  ;;  %v10741_v56 = vpop.permute.xlu0 %380 }
  0xfa   :  { %18280 = vst [vmem:[#allocation13_spill] sm:$0xff] %v10739_v60  ;;  %18281 = vst [vmem:[#allocation78_spill] sm:$0xff] %v10741_v56 }
  0xfb   :  { %703 = vperm.xlu1 %10082, %v18282_v55   ;;  %707 = vperm.xlu0 %10081, %v18283_v62  }
  0xfd   :  { %v10745_v57 = vpop.permute.xlu1 %395  ;;  %v10747_v58 = vpop.permute.xlu0 %390 }
  0xfe   :  { %18284 = vst [vmem:[#allocation14_spill] sm:$0xff] %v10745_v57  ;;  %18285 = vst [vmem:[#allocation79_spill] sm:$0xff] %v10747_v58 }
  0xff   :  { %711 = vperm.xlu1 %10082, %v10555_v0   ;;  %715 = vperm.xlu0 %10081, %v18286_v59  }
 0x102   :  { %v10751_v51 = vpop.permute.xlu1 %467  ;;  %v10753_v63 = vpop.permute.xlu0 %463 }
 0x103   :  { %18287 = vst [vmem:[#allocation16_spill] sm:$0xff] %v10751_v51  ;;  %18288 = vst [vmem:[#allocation80_spill] sm:$0xff] %v10753_v63  ;;  %10083 = vset.pattern.permute.xlu1 %v10155_v61  ;;  %10084 = vset.pattern.permute.xlu0 %v10155_v61  ;;  %v18341_v63 = vld [vmem:[#allocation4_spill] sm:$0xff] }
 0x104   :  { %847 = vperm.xlu1 %10083, %v10183_v2   ;;  %851 = vperm.xlu0 %10084, %v10195_v4  }
 0x106   :  { %v10757_v56 = vpop.permute.xlu1 %471  ;;  %v10759_v57 = vpop.permute.xlu0 %475 }
 0x107   :  { %18289 = vst [vmem:[#allocation81_spill] sm:$0xff] %v10757_v56  ;;  %18290 = vst [vmem:[#allocation82_spill] sm:$0xff] %v10759_v57 }
 0x108   :  { %855 = vperm.xlu1 %10083, %v10178_v1   ;;  %863 = vperm.xlu0 %10084, %v10207_v6  }
 0x10a   :  { %v10763_v58 = vpop.permute.xlu1 %479  ;;  %v10765_v60 = vpop.permute.xlu0 %483 }
 0x10b   :  { %18291 = vst [vmem:[#allocation83_spill] sm:$0xff] %v10763_v58  ;;  %18292 = vst [vmem:[#allocation84_spill] sm:$0xff] %v10765_v60 }
 0x10c   :  { %859 = vperm.xlu1 %10083, %v10190_v3   ;;  %871 = vperm.xlu0 %10084, %v10219_v8  }
 0x10e   :  { %v10769_v61 = vpop.permute.xlu1 %487  ;;  %v10771_v51 = vpop.permute.xlu0 %491 }
 0x10f   :  { %18293 = vst [vmem:[#allocation85_spill] sm:$0xff] %v10769_v61  ;;  %18294 = vst [vmem:[#allocation86_spill] sm:$0xff] %v10771_v51 }
 0x110   :  { %867 = vperm.xlu1 %10083, %v10202_v5   ;;  %879 = vperm.xlu0 %10084, %v10231_v10  }
 0x112   :  { %v10775_v57 = vpop.permute.xlu1 %495  ;;  %v10777_v56 = vpop.permute.xlu0 %499 }
 0x113   :  { %18295 = vst [vmem:[#allocation87_spill] sm:$0xff] %v10775_v57  ;;  %18296 = vst [vmem:[#allocation88_spill] sm:$0xff] %v10777_v56 }
 0x114   :  { %875 = vperm.xlu1 %10083, %v10214_v7   ;;  %887 = vperm.xlu0 %10084, %v10243_v12  }
 0x116   :  { %v10781_v60 = vpop.permute.xlu1 %503  ;;  %v10783_v58 = vpop.permute.xlu0 %507 }
 0x117   :  { %18297 = vst [vmem:[#allocation89_spill] sm:$0xff] %v10781_v60  ;;  %18298 = vst [vmem:[#allocation90_spill] sm:$0xff] %v10783_v58 }
 0x118   :  { %883 = vperm.xlu1 %10083, %v10226_v9   ;;  %895 = vperm.xlu0 %10084, %v10255_v14  }
 0x11a   :  { %v10787_v61 = vpop.permute.xlu1 %511  ;;  %v10789_v51 = vpop.permute.xlu0 %515 }
 0x11b   :  { %18299 = vst [vmem:[#allocation91_spill] sm:$0xff] %v10787_v61  ;;  %18300 = vst [vmem:[#allocation92_spill] sm:$0xff] %v10789_v51 }
 0x11c   :  { %891 = vperm.xlu1 %10083, %v10238_v11   ;;  %903 = vperm.xlu0 %10084, %v10267_v16  }
 0x11e   :  { %v10793_v57 = vpop.permute.xlu1 %519  ;;  %v10795_v56 = vpop.permute.xlu0 %523 }
 0x11f   :  { %18301 = vst [vmem:[#allocation93_spill] sm:$0xff] %v10793_v57  ;;  %18302 = vst [vmem:[#allocation94_spill] sm:$0xff] %v10795_v56 }
 0x120   :  { %899 = vperm.xlu1 %10083, %v10250_v13   ;;  %911 = vperm.xlu0 %10084, %v10279_v18  }
 0x122   :  { %v10799_v60 = vpop.permute.xlu1 %527  ;;  %v10801_v58 = vpop.permute.xlu0 %531 }
 0x123   :  { %18303 = vst [vmem:[#allocation95_spill] sm:$0xff] %v10799_v60  ;;  %18304 = vst [vmem:[#allocation96_spill] sm:$0xff] %v10801_v58 }
 0x124   :  { %907 = vperm.xlu1 %10083, %v10262_v15   ;;  %919 = vperm.xlu0 %10084, %v10291_v20  }
 0x126   :  { %v10805_v61 = vpop.permute.xlu1 %535  ;;  %v10807_v51 = vpop.permute.xlu0 %539 }
 0x127   :  { %18305 = vst [vmem:[#allocation97_spill] sm:$0xff] %v10805_v61  ;;  %18306 = vst [vmem:[#allocation98_spill] sm:$0xff] %v10807_v51 }
 0x128   :  { %915 = vperm.xlu1 %10083, %v10274_v17   ;;  %927 = vperm.xlu0 %10084, %v10303_v22  }
 0x12a   :  { %v10811_v57 = vpop.permute.xlu1 %543  ;;  %v10813_v56 = vpop.permute.xlu0 %547 }
 0x12b   :  { %18307 = vst [vmem:[#allocation99_spill] sm:$0xff] %v10811_v57  ;;  %18308 = vst [vmem:[#allocation100_spill] sm:$0xff] %v10813_v56 }
 0x12c   :  { %923 = vperm.xlu1 %10083, %v10286_v19   ;;  %935 = vperm.xlu0 %10084, %v10315_v24  }
 0x12e   :  { %v10817_v60 = vpop.permute.xlu1 %551  ;;  %v10819_v58 = vpop.permute.xlu0 %555 }
 0x12f   :  { %18309 = vst [vmem:[#allocation101_spill] sm:$0xff] %v10817_v60  ;;  %18310 = vst [vmem:[#allocation102_spill] sm:$0xff] %v10819_v58 }
 0x130   :  { %931 = vperm.xlu1 %10083, %v10298_v21   ;;  %943 = vperm.xlu0 %10084, %v10327_v26  }
 0x132   :  { %v10823_v61 = vpop.permute.xlu1 %559  ;;  %v10825_v51 = vpop.permute.xlu0 %563 }
 0x133   :  { %18311 = vst [vmem:[#allocation103_spill] sm:$0xff] %v10823_v61  ;;  %18312 = vst [vmem:[#allocation104_spill] sm:$0xff] %v10825_v51 }
 0x134   :  { %939 = vperm.xlu1 %10083, %v10310_v23   ;;  %951 = vperm.xlu0 %10084, %v10339_v28  }
 0x136   :  { %v10829_v57 = vpop.permute.xlu1 %567  ;;  %v10831_v56 = vpop.permute.xlu0 %571 }
 0x137   :  { %18313 = vst [vmem:[#allocation105_spill] sm:$0xff] %v10829_v57  ;;  %18314 = vst [vmem:[#allocation106_spill] sm:$0xff] %v10831_v56 }
 0x138   :  { %947 = vperm.xlu1 %10083, %v10322_v25   ;;  %959 = vperm.xlu0 %10084, %v10351_v30  }
 0x13a   :  { %v10835_v60 = vpop.permute.xlu1 %575  ;;  %v10837_v58 = vpop.permute.xlu0 %579 }
 0x13b   :  { %18315 = vst [vmem:[#allocation107_spill] sm:$0xff] %v10835_v60  ;;  %18316 = vst [vmem:[#allocation108_spill] sm:$0xff] %v10837_v58 }
 0x13c   :  { %955 = vperm.xlu1 %10083, %v10334_v27   ;;  %967 = vperm.xlu0 %10084, %v10363_v32  }
 0x13e   :  { %v10841_v61 = vpop.permute.xlu1 %583  ;;  %v10843_v51 = vpop.permute.xlu0 %587 }
 0x13f   :  { %18317 = vst [vmem:[#allocation109_spill] sm:$0xff] %v10841_v61  ;;  %18318 = vst [vmem:[#allocation110_spill] sm:$0xff] %v10843_v51 }
 0x140   :  { %963 = vperm.xlu1 %10083, %v10346_v29   ;;  %975 = vperm.xlu0 %10084, %v10375_v34  }
 0x142   :  { %v10847_v57 = vpop.permute.xlu1 %591  ;;  %v10849_v56 = vpop.permute.xlu0 %595 }
 0x143   :  { %18319 = vst [vmem:[#allocation111_spill] sm:$0xff] %v10847_v57  ;;  %18320 = vst [vmem:[#allocation112_spill] sm:$0xff] %v10849_v56 }
 0x144   :  { %971 = vperm.xlu1 %10083, %v10358_v31   ;;  %983 = vperm.xlu0 %10084, %v10387_v36  }
 0x146   :  { %v10853_v60 = vpop.permute.xlu1 %599  ;;  %v10855_v58 = vpop.permute.xlu0 %603 }
 0x147   :  { %18321 = vst [vmem:[#allocation113_spill] sm:$0xff] %v10853_v60  ;;  %18322 = vst [vmem:[#allocation114_spill] sm:$0xff] %v10855_v58 }
 0x148   :  { %979 = vperm.xlu1 %10083, %v10370_v33   ;;  %991 = vperm.xlu0 %10084, %v10399_v38  }
 0x14a   :  { %v10859_v61 = vpop.permute.xlu1 %607  ;;  %v10861_v51 = vpop.permute.xlu0 %611 }
 0x14b   :  { %18323 = vst [vmem:[#allocation115_spill] sm:$0xff] %v10859_v61  ;;  %18324 = vst [vmem:[#allocation116_spill] sm:$0xff] %v10861_v51 }
 0x14c   :  { %987 = vperm.xlu1 %10083, %v10382_v35   ;;  %999 = vperm.xlu0 %10084, %v10411_v40  }
 0x14e   :  { %v10865_v57 = vpop.permute.xlu1 %615  ;;  %v10867_v56 = vpop.permute.xlu0 %619 }
 0x14f   :  { %18325 = vst [vmem:[#allocation117_spill] sm:$0xff] %v10865_v57  ;;  %18326 = vst [vmem:[#allocation118_spill] sm:$0xff] %v10867_v56 }
 0x150   :  { %995 = vperm.xlu1 %10083, %v10394_v37   ;;  %1007 = vperm.xlu0 %10084, %v10423_v42  }
 0x152   :  { %v10871_v60 = vpop.permute.xlu1 %623  ;;  %v10873_v58 = vpop.permute.xlu0 %627 }
 0x153   :  { %18327 = vst [vmem:[#allocation119_spill] sm:$0xff] %v10871_v60  ;;  %18328 = vst [vmem:[#allocation120_spill] sm:$0xff] %v10873_v58 }
 0x154   :  { %1003 = vperm.xlu1 %10083, %v10406_v39   ;;  %1015 = vperm.xlu0 %10084, %v10435_v44  }
 0x156   :  { %v10877_v61 = vpop.permute.xlu1 %631  ;;  %v10879_v51 = vpop.permute.xlu0 %635 }
 0x157   :  { %18329 = vst [vmem:[#allocation121_spill] sm:$0xff] %v10877_v61  ;;  %18330 = vst [vmem:[#allocation122_spill] sm:$0xff] %v10879_v51 }
 0x158   :  { %1011 = vperm.xlu1 %10083, %v10418_v41   ;;  %1023 = vperm.xlu0 %10084, %v10447_v46  }
 0x15a   :  { %v10883_v57 = vpop.permute.xlu1 %639  ;;  %v10885_v56 = vpop.permute.xlu0 %643 }
 0x15b   :  { %18331 = vst [vmem:[#allocation123_spill] sm:$0xff] %v10883_v57  ;;  %18332 = vst [vmem:[#allocation124_spill] sm:$0xff] %v10885_v56 }
 0x15c   :  { %1019 = vperm.xlu1 %10083, %v10430_v43   ;;  %1031 = vperm.xlu0 %10084, %v10459_v48  }
 0x15e   :  { %v10889_v60 = vpop.permute.xlu1 %647  ;;  %v10891_v58 = vpop.permute.xlu0 %651 }
 0x15f   :  { %18333 = vst [vmem:[#allocation125_spill] sm:$0xff] %v10889_v60  ;;  %18334 = vst [vmem:[#allocation126_spill] sm:$0xff] %v10891_v58 }
 0x160   :  { %1027 = vperm.xlu1 %10083, %v10442_v45   ;;  %1039 = vperm.xlu0 %10084, %v10471_v50  }
 0x162   :  { %v10895_v61 = vpop.permute.xlu1 %655  ;;  %v10897_v51 = vpop.permute.xlu0 %659 }
 0x163   :  { %18335 = vst [vmem:[#allocation127_spill] sm:$0xff] %v10895_v61  ;;  %18336 = vst [vmem:[#allocation128_spill] sm:$0xff] %v10897_v51  ;;  %v18342_v61 = vld [vmem:[#allocation9_spill] sm:$0xff] }
 0x164   :  { %1035 = vperm.xlu1 %10083, %v10454_v47   ;;  %1047 = vperm.xlu0 %10084, %v10483_v52   ;;  %v18345_v52 = vld [vmem:[#allocation6_spill] sm:$0xff] }
 0x166   :  { %v10901_v57 = vpop.permute.xlu1 %663  ;;  %v10903_v56 = vpop.permute.xlu0 %667 }
 0x167   :  { %18337 = vst [vmem:[#allocation129_spill] sm:$0xff] %v10901_v57  ;;  %18338 = vst [vmem:[#allocation130_spill] sm:$0xff] %v10903_v56  ;;  %v18346_v57 = vld [vmem:[#allocation11_spill] sm:$0xff] }
 0x168   :  { %1043 = vperm.xlu1 %10083, %v10466_v49   ;;  %1055 = vperm.xlu0 %10084, %v10495_v54   ;;  %v18349_v54 = vld [vmem:[#allocation8_spill] sm:$0xff] }
 0x16a   :  { %v10907_v60 = vpop.permute.xlu1 %671  ;;  %v10909_v58 = vpop.permute.xlu0 %675 }
 0x16b   :  { %18339 = vst [vmem:[#allocation131_spill] sm:$0xff] %v10907_v60  ;;  %18340 = vst [vmem:[#allocation132_spill] sm:$0xff] %v10909_v58 }
 0x16c   :  { %1051 = vperm.xlu1 %10083, %v18341_v63   ;;  %1063 = vperm.xlu0 %10084, %v18342_v61   ;;  %v18352_v61 = vld [vmem:[#allocation10_spill] sm:$0xff] }
 0x16e   :  { %v10913_v51 = vpop.permute.xlu1 %679  ;;  %v10915_v50 = vpop.permute.xlu0 %683 }
 0x16f   :  { %18343 = vst [vmem:[#allocation4_spill] sm:$0xff] %v10913_v51  ;;  %18344 = vst [vmem:[#allocation133_spill] sm:$0xff] %v10915_v50 }
 0x170   :  { %1059 = vperm.xlu1 %10083, %v18345_v52   ;;  %1071 = vperm.xlu0 %10084, %v18346_v57   ;;  %v18355_v57 = vld [vmem:[#allocation12_spill] sm:$0xff] }
 0x172   :  { %v10919_v56 = vpop.permute.xlu1 %687  ;;  %v10921_v48 = vpop.permute.xlu0 %691 }
 0x173   :  { %18347 = vst [vmem:[#allocation6_spill] sm:$0xff] %v10919_v56  ;;  %18348 = vst [vmem:[#allocation134_spill] sm:$0xff] %v10921_v48 }
 0x174   :  { %1067 = vperm.xlu1 %10083, %v18349_v54   ;;  %1079 = vperm.xlu0 %10084, %v18278_v53  }
 0x176   :  { %v10925_v60 = vpop.permute.xlu1 %695  ;;  %v10927_v58 = vpop.permute.xlu0 %699 }
 0x177   :  { %18350 = vst [vmem:[#allocation8_spill] sm:$0xff] %v10925_v60  ;;  %18351 = vst [vmem:[#allocation135_spill] sm:$0xff] %v10927_v58  ;;  %v10156_v60 = vmov 30  }
 0x178   :  { %1075 = vperm.xlu1 %10083, %v18352_v61   ;;  %1087 = vperm.xlu0 %10084, %v18282_v55  }
 0x17a   :  { %v10931_v51 = vpop.permute.xlu1 %703  ;;  %v10933_v50 = vpop.permute.xlu0 %707 }
 0x17b   :  { %18353 = vst [vmem:[#allocation10_spill] sm:$0xff] %v10931_v51  ;;  %18354 = vst [vmem:[#allocation136_spill] sm:$0xff] %v10933_v50  ;;  %v1806_v51 = vld [vmem:[%s17573_s1] sm:$0xff] }
 0x17c   :  { %1083 = vperm.xlu1 %10083, %v18355_v57   ;;  %1095 = vperm.xlu0 %10084, %v10555_v0   ;;  %v1808_v0 = vld [vmem:[%s17573_s1 + $0x10] sm:$0xff] }
 0x17e   :  { %v10937_v56 = vpop.permute.xlu1 %711  ;;  %v10939_v48 = vpop.permute.xlu0 %715 }
 0x17f   :  { %18356 = vst [vmem:[#allocation12_spill] sm:$0xff] %v10937_v56  ;;  %18357 = vst [vmem:[#allocation137_spill] sm:$0xff] %v10939_v48  ;;  %v1807_v56 = vld [vmem:[%s17573_s1 + $0x8] sm:$0xff] }
 0x180   :  { %1091 = vperm.xlu1 %10083, %v18283_v62   ;;  %10085 = vset.pattern.permute.xlu0 %v10156_v60  ;;  %v10060_v48 = vpack.c.bf16 %v1807_v56, %v1806_v51 }
 0x181   :  { %1231 = vperm.xlu0 %10085, %v10183_v2  }
 0x182   :  { %10061 = vmatprep.subr.bf16.mxu0 %v10060_v48  ;;  %10068 = vmatprep.subr.bf16.mxu1 %v10060_v48 }
 0x183   :  { %v10943_v58 = vpop.permute.xlu1 %847  ;;  %v10945_v55 = vpop.permute.xlu0 %851  ;;  %10063 = vmatpush3.bf16.msra.mxu0 %v10060_v48  ;;  %10070 = vmatpush3.bf16.msra.mxu1 %v10060_v48 }
 0x184   :  { %18358 = vst [vmem:[#allocation138_spill] sm:$0xff] %v10945_v55  ;;  %1099 = vperm.xlu1 %10083, %v18286_v59   ;;  %v1809_v55 = vld [vmem:[%s17573_s1 + $0x18] sm:$0xff] }
 0x185   :  { %1243 = vperm.xlu0 %10085, %v10190_v3   ;;  %v10064_v3 = vpack.c.bf16 %v1809_v55, %v1808_v0 }
 0x187   :  { %v10955_v50 = vpop.permute.xlu1 %855  ;;  %v10957_v2 = vpop.permute.xlu0 %863  ;;  %10065 = vmatprep.subr.bf16.mxu0 %v10064_v3  ;;  %10069 = vmatprep.subr.bf16.mxu1 %v10064_v3 }
 0x188   :  { %18359 = vst [vmem:[#allocation139_spill] sm:$0xff] %v10957_v2  ;;  %10086 = vset.pattern.permute.xlu1 %v10156_v60  ;;  %10067 = vmatpush3.bf16.msra.mxu0 %v10064_v3 }
 0x189   :  { %1235 = vperm.xlu1 %10086, %v10195_v4   ;;  %1251 = vperm.xlu0 %10085, %v10202_v5  }
 0x18a   :  { %10071 = vmatpush3.bf16.msra.mxu1 %v10064_v3 }
 0x18b   :  { %v10967_v51 = vpop.permute.xlu1 %859  ;;  %v10969_v56 = vpop.permute.xlu0 %871 }
 0x18d   :  { %1239 = vperm.xlu1 %10086, %v10178_v1   ;;  %1259 = vperm.xlu0 %10085, %v10214_v7  }
 0x18f   :  { %v10973_v60 = vpop.permute.xlu1 %867  ;;  %v10975_v2 = vpop.permute.xlu0 %879 }
 0x191   :  { %1247 = vperm.xlu1 %10086, %v10207_v6   ;;  %1267 = vperm.xlu0 %10085, %v10226_v9  }
 0x193   :  { %v10979_v4 = vpop.permute.xlu1 %875  ;;  %v10981_v5 = vpop.permute.xlu0 %887 }
 0x195   :  { %1255 = vperm.xlu1 %10086, %v10219_v8   ;;  %1275 = vperm.xlu0 %10085, %v10238_v11  }
 0x197   :  { %v10985_v1 = vpop.permute.xlu1 %883  ;;  %v10987_v7 = vpop.permute.xlu0 %895 }
 0x199   :  { %1263 = vperm.xlu1 %10086, %v10231_v10   ;;  %1283 = vperm.xlu0 %10085, %v10250_v13  }
 0x19b   :  { %v10991_v48 = vpop.permute.xlu1 %891  ;;  %v10993_v6 = vpop.permute.xlu0 %903 }
 0x19d   :  { %1271 = vperm.xlu1 %10086, %v10243_v12   ;;  %1291 = vperm.xlu0 %10085, %v10262_v15  }
 0x19f   :  { %v10997_v9 = vpop.permute.xlu1 %899  ;;  %v10999_v8 = vpop.permute.xlu0 %911 }
 0x1a1   :  { %1279 = vperm.xlu1 %10086, %v10255_v14   ;;  %1299 = vperm.xlu0 %10085, %v10274_v17  }
 0x1a3   :  { %v11003_v11 = vpop.permute.xlu1 %907  ;;  %v11005_v10 = vpop.permute.xlu0 %919 }
 0x1a5   :  { %1287 = vperm.xlu1 %10086, %v10267_v16   ;;  %1307 = vperm.xlu0 %10085, %v10286_v19  }
 0x1a7   :  { %v11009_v13 = vpop.permute.xlu1 %915  ;;  %v11011_v12 = vpop.permute.xlu0 %927 }
 0x1a9   :  { %1295 = vperm.xlu1 %10086, %v10279_v18   ;;  %1315 = vperm.xlu0 %10085, %v10298_v21  }
 0x1ab   :  { %v11015_v15 = vpop.permute.xlu1 %923  ;;  %v11017_v14 = vpop.permute.xlu0 %935 }
 0x1ad   :  { %1303 = vperm.xlu1 %10086, %v10291_v20   ;;  %1323 = vperm.xlu0 %10085, %v10310_v23  }
 0x1af   :  { %v11021_v17 = vpop.permute.xlu1 %931  ;;  %v11023_v16 = vpop.permute.xlu0 %943 }
 0x1b1   :  { %1311 = vperm.xlu1 %10086, %v10303_v22   ;;  %1331 = vperm.xlu0 %10085, %v10322_v25  }
 0x1b3   :  { %v11027_v19 = vpop.permute.xlu1 %939  ;;  %v11029_v18 = vpop.permute.xlu0 %951 }
 0x1b5   :  { %1319 = vperm.xlu1 %10086, %v10315_v24   ;;  %1339 = vperm.xlu0 %10085, %v10334_v27  }
 0x1b7   :  { %v11033_v21 = vpop.permute.xlu1 %947  ;;  %v11035_v20 = vpop.permute.xlu0 %959 }
 0x1b9   :  { %1327 = vperm.xlu1 %10086, %v10327_v26   ;;  %1347 = vperm.xlu0 %10085, %v10346_v29  }
 0x1bb   :  { %v11039_v23 = vpop.permute.xlu1 %955  ;;  %v11041_v22 = vpop.permute.xlu0 %967 }
 0x1bd   :  { %1335 = vperm.xlu1 %10086, %v10339_v28   ;;  %1355 = vperm.xlu0 %10085, %v10358_v31  }
 0x1bf   :  { %v11045_v25 = vpop.permute.xlu1 %963  ;;  %v11047_v24 = vpop.permute.xlu0 %975 }
 0x1c1   :  { %1343 = vperm.xlu1 %10086, %v10351_v30   ;;  %1363 = vperm.xlu0 %10085, %v10370_v33  }
 0x1c3   :  { %v11051_v27 = vpop.permute.xlu1 %971  ;;  %v11053_v26 = vpop.permute.xlu0 %983 }
 0x1c5   :  { %1351 = vperm.xlu1 %10086, %v10363_v32   ;;  %1371 = vperm.xlu0 %10085, %v10382_v35  }
 0x1c7   :  { %v11057_v29 = vpop.permute.xlu1 %979  ;;  %v11059_v28 = vpop.permute.xlu0 %991 }
 0x1c9   :  { %1359 = vperm.xlu1 %10086, %v10375_v34   ;;  %1379 = vperm.xlu0 %10085, %v10394_v37  }
 0x1cb   :  { %v11063_v31 = vpop.permute.xlu1 %987  ;;  %v11065_v30 = vpop.permute.xlu0 %999 }
 0x1cd   :  { %1367 = vperm.xlu1 %10086, %v10387_v36   ;;  %1387 = vperm.xlu0 %10085, %v10406_v39  }
 0x1cf   :  { %v11069_v33 = vpop.permute.xlu1 %995  ;;  %v11071_v32 = vpop.permute.xlu0 %1007 }
 0x1d1   :  { %1375 = vperm.xlu1 %10086, %v10399_v38   ;;  %1395 = vperm.xlu0 %10085, %v10418_v41  }
 0x1d3   :  { %v11075_v35 = vpop.permute.xlu1 %1003  ;;  %v11077_v34 = vpop.permute.xlu0 %1015 }
 0x1d5   :  { %1383 = vperm.xlu1 %10086, %v10411_v40   ;;  %1403 = vperm.xlu0 %10085, %v10430_v43  }
 0x1d7   :  { %v11081_v37 = vpop.permute.xlu1 %1011  ;;  %v11083_v36 = vpop.permute.xlu0 %1023 }
 0x1d9   :  { %1391 = vperm.xlu1 %10086, %v10423_v42   ;;  %1411 = vperm.xlu0 %10085, %v10442_v45   ;;  %v18361_v45 = vld [vmem:[#allocation2_spill] sm:$0xff] }
 0x1db   :  { %v11087_v39 = vpop.permute.xlu1 %1019  ;;  %v11089_v38 = vpop.permute.xlu0 %1031 }
 0x1dd   :  { %1399 = vperm.xlu1 %10086, %v10435_v44   ;;  %1419 = vperm.xlu0 %10085, %v10454_v47   ;;  %v18363_v47 = vld [vmem:[#allocation3_spill] sm:$0xff] }
 0x1df   :  { %v11093_v41 = vpop.permute.xlu1 %1027  ;;  %v11095_v40 = vpop.permute.xlu0 %1039 }
 0x1e1   :  { %1407 = vperm.xlu1 %10086, %v10447_v46   ;;  %1427 = vperm.xlu0 %10085, %v10466_v49   ;;  %v18365_v49 = vld [vmem:[#allocation5_spill] sm:$0xff] }
 0x1e3   :  { %v11099_v43 = vpop.permute.xlu1 %1035  ;;  %v11101_v42 = vpop.permute.xlu0 %1047 }
 0x1e4   :  { %18360 = vst [vmem:[#allocation140_spill] sm:$0xff] %v11101_v42  ;;  %v18371_v42 = vld [vmem:[#allocation9_spill] sm:$0xff] }
 0x1e5   :  { %1415 = vperm.xlu1 %10086, %v18361_v45   ;;  %1435 = vperm.xlu0 %10085, %v18341_v63   ;;  %v18368_v63 = vld [vmem:[#allocation7_spill] sm:$0xff] }
 0x1e7   :  { %v11105_v55 = vpop.permute.xlu1 %1043  ;;  %v11107_v44 = vpop.permute.xlu0 %1055 }
 0x1e8   :  { %18362 = vst [vmem:[#allocation2_spill] sm:$0xff] %v11107_v44  ;;  %v17664_v44 = vlaneseq }
 0x1e9   :  { %1423 = vperm.xlu1 %10086, %v18363_v47   ;;  %1443 = vperm.xlu0 %10085, %v18345_v52  }
 0x1eb   :  { %v11111_v0 = vpop.permute.xlu1 %1051  ;;  %v11113_v46 = vpop.permute.xlu0 %1063 }
 0x1ec   :  { %18364 = vst [vmem:[#allocation3_spill] sm:$0xff] %v11113_v46 }
 0x1ed   :  { %1431 = vperm.xlu1 %10086, %v18365_v49   ;;  %1451 = vperm.xlu0 %10085, %v18349_v54   ;;  %v11130_v49 = vand.u32 127, %v17664_v44  ;;  %v18381_v44 = vld [vmem:[#allocation16_spill] sm:$0xff] }
 0x1ef   :  { %v11117_v3 = vpop.permute.xlu1 %1059  ;;  %v11119_v45 = vpop.permute.xlu0 %1071  ;;  %18372 = vst [vmem:[#allocation9_spill] sm:$0xff] %v11130_v49 }
 0x1f0   :  { %18366 = vst [vmem:[#allocation5_spill] sm:$0xff] %v11117_v3  ;;  %18367 = vst [vmem:[#allocation141_spill] sm:$0xff] %v11119_v45  ;;  %v18375_v45 = vld [vmem:[#allocation11_spill] sm:$0xff]  ;;  %v18398_v3 = vld [vmem:[#allocation22_spill] sm:$0xff] }
 0x1f1   :  { %1439 = vperm.xlu1 %10086, %v18368_v63   ;;  %1459 = vperm.xlu0 %10085, %v18352_v61   ;;  %v11139_v61 = vcvt.s32.f32 %v11130_v49  ;;  %v17668_v49 = vmov 0.0  }
 0x1f3   :  { %v11123_v47 = vpop.permute.xlu1 %1067  ;;  %v11125_v52 = vpop.permute.xlu0 %1079  ;;  %vm1102_vm1 = vcmp.eq.f32.partialorder %v11139_v61, %v10943_v58  ;;  %vm719_vm4 = vcmp.eq.f32.partialorder %v11139_v61, %v18381_v44  ;;  %v18384_v58 = vld [vmem:[#allocation21_spill] sm:$0xff] }
 0x1f4   :  { %18369 = vst [vmem:[#allocation7_spill] sm:$0xff] %v11123_v47  ;;  %18370 = vst [vmem:[#allocation142_spill] sm:$0xff] %v11125_v52  ;;  %vm399_vm9 = vcmp.eq.f32.partialorder %v11139_v61, %v18384_v58  ;;  %v18391_v58 = vld [vmem:[#allocation84_spill] sm:$0xff]  ;;  %v18397_v47 = vld [vmem:[#allocation17_spill] sm:$0xff] }
 0x1f5   :  { %1447 = vperm.xlu1 %10086, %v18371_v42   ;;  %1467 = vperm.xlu0 %10085, %v18355_v57   ;;  %v18378_v42 = vld [vmem:[#allocation80_spill] sm:$0xff]  ;;  %v18379_v57 = vld [vmem:[#allocation19_spill] sm:$0xff]  ;;  %vm11170_vm13 = vmor %vm399_vm9, %vm719_vm4  ;;  %vm723_vm15 = vcmp.eq.f32.partialorder %v11139_v61, %v18391_v58  ;;  %vm403_vm4 = vcmp.eq.f32.partialorder %v11139_v61, %v18398_v3  ;;  %v18401_v3 = vmov 0 }
 0x1f6   :  { %vm718_vm0 = vcmp.eq.f32.partialorder %v11139_v61, %v18378_v42  ;;  %vm398_vm2 = vcmp.eq.f32.partialorder %v11139_v61, %v18379_v57  ;;  %v18382_v42 = vld [vmem:[#allocation15_spill] sm:$0xff] }
 0x1f7   :  { %v11132_v54 = vpop.permute.xlu1 %1075  ;;  %v11134_v46 = vpop.permute.xlu0 %1087  ;;  %vm782_vm3 = vmor %vm398_vm2, %vm718_vm0  ;;  %v18416_v58 = vld [vmem:[#allocation87_spill] sm:$0xff] }
 0x1f8   :  { %18373 = vst [vmem:[#allocation143_spill] sm:$0xff] %v11132_v54  ;;  %18374 = vst [vmem:[#allocation144_spill] sm:$0xff] %v11134_v46  ;;  %v18396_v54 = vld [vmem:[#allocation138_spill] sm:$0xff] }
 0x1f9   :  { %1455 = vperm.xlu1 %10086, %v18375_v45   ;;  %1475 = vperm.xlu0 %10085, %v18283_v62   ;;  %vm1166_vm5 = vmor %vm782_vm3, %vm1102_vm1  ;;  %vm1103_vm3 = vcmp.eq.f32.partialorder %v11139_v61, %v18396_v54 }
 0x1fb   :  { %v11141_v63 = vpop.permute.xlu1 %1083  ;;  %v11143_v52 = vpop.permute.xlu0 %1095 }
 0x1fc   :  { %18376 = vst [vmem:[#allocation11_spill] sm:$0xff] %v11141_v63  ;;  %18377 = vst [vmem:[#allocation145_spill] sm:$0xff] %v11143_v52  ;;  %v18387_v52 = vld [vmem:[#allocation18_spill] sm:$0xff] }
 0x1fd   :  { %1463 = vperm.xlu1 %10086, %v18278_v53   ;;  %1483 = vperm.xlu0 %10085, %v18286_v59   ;;  %v18383_v53 = vld [vmem:[#allocation81_spill] sm:$0xff]  ;;  %v18385_v59 = vld [vmem:[#allocation82_spill] sm:$0xff]  ;;  %vm400_vm12 = vcmp.eq.f32.partialorder %v11139_v61, %v18387_v52  ;;  %v18422_v52 = vld [vmem:[#allocation27_spill] sm:$0xff] }
 0x1fe   :  { %vm720_vm7 = vcmp.eq.f32.partialorder %v11139_v61, %v18383_v53  ;;  %vm721_vm10 = vcmp.eq.f32.partialorder %v11139_v61, %v18385_v59  ;;  %v18395_v63 = vld [vmem:[#allocation86_spill] sm:$0xff]  ;;  %v18408_v53 = vld [vmem:[#allocation88_spill] sm:$0xff]  ;;  %v18409_v59 = vld [vmem:[#allocation25_spill] sm:$0xff] }
 0x1ff   :  { %v11153_v62 = vpop.permute.xlu1 %1091  ;;  %vm11186_vm1 = vmor %vm400_vm12, %vm720_vm7  ;;  %vm725_vm2 = vcmp.eq.f32.partialorder %v11139_v61, %v18395_v63  ;;  %vm1105_vm7 = vcmp.eq.f32.partialorder %v11139_v61, %v10967_v51  ;;  %v18400_v63 = vld [vmem:[#allocation24_spill] sm:$0xff]  ;;  %v18405_v51 = vld [vmem:[#allocation85_spill] sm:$0xff] }
 0x200   :  { %18380 = vst [vmem:[#allocation80_spill] sm:$0xff] %v11153_v62  ;;  %v1232_v45 = vpop.permute.xlu0 %1231  ;;  %v18392_v62 = vld [vmem:[#allocation20_spill] sm:$0xff]  ;;  %vm11217_vm12 = vmor %vm403_vm4, %vm723_vm15  ;;  %vm727_vm15 = vcmp.eq.f32.partialorder %v11139_v61, %v18408_v53  ;;  %vm1104_vm4 = vcmp.eq.f32.partialorder %v11139_v61, %v10955_v50  ;;  %v18415_v50 = vmov 0.0  }
 0x201   :  { %vm1486_vm6 = vcmp.eq.f32.partialorder %v11139_v61, %v1232_v45  ;;  %1471 = vperm.xlu1 %10086, %v18382_v42   ;;  %v18390_v42 = vld [vmem:[#allocation83_spill] sm:$0xff]  ;;  %vm401_vm0 = vcmp.eq.f32.partialorder %v11139_v61, %v18392_v62 }
 0x202   :  { %vm1550_vm8 = vmor %vm1166_vm5, %vm1486_vm6  ;;  %vm722_vm14 = vcmp.eq.f32.partialorder %v11139_v61, %v18390_v42 }
 0x203   :  { %v11165_v57 = vpop.permute.xlu1 %1099  ;;  %v9631_v44 = vsel %vm1550_vm8, 1.0, %v17668_v49  ;;  %vm785_vm6 = vmor %vm401_vm0, %vm721_vm10  ;;  %vm405_vm8 = vcmp.eq.f32.partialorder %v11139_v61, %v18400_v63  ;;  %vm724_vm10 = vcmp.eq.f32.partialorder %v11139_v61, %v18405_v51  ;;  %v10090_v63 = vld [vmem:[%s17572_s0 + $0x8] sm:$0xff] }
 0x204   :  { %18386 = vst [vmem:[#allocation19_spill] sm:$0xff] %v11165_v57  ;;  %v1244_v46 = vpop.permute.xlu0 %1243  ;;  %v10089_v57 = vld [vmem:[%s17572_s0] sm:$0xff]  ;;  %vm11223_vm0 = vmor %vm405_vm8, %vm725_vm2  ;;  %vm404_vm2 = vcmp.eq.f32.partialorder %v11139_v61, %v18409_v59  ;;  %vm1107_vm8 = vcmp.eq.f32.partialorder %v11139_v61, %v10973_v60 }
 0x205   :  { %v1742_v49 = vadd.f32 %v10089_v57, %v9631_v44  ;;  %1479 = vperm.xlu1 %10086, %v18397_v47   ;;  %v18399_v57 = vld [vmem:[#allocation23_spill] sm:$0xff]  ;;  %v18403_v47 = vmov 0  ;;  %v18410_v44 = vld [vmem:[#allocation26_spill] sm:$0xff] }
 0x206   :  { %vm402_vm5 = vcmp.eq.f32.partialorder %v11139_v61, %v18399_v57  ;;  %v18404_v47 = vsel %vm11217_vm12, 4294967295, %v18403_v47  ;;  %v18417_v57 = vmov 0  ;;  %v18419_v59 = vld [vmem:[#allocation90_spill] sm:$0xff] }
 0x207   :  { %9964 = vmatprep.mubr.msk.f32.mxu0 %vm17674_vm11, %v1742_v49  ;;  %vm11210_vm9 = vmor %vm402_vm5, %vm722_vm14  ;;  %v18406_v49 = vmov 0  ;;  %vm1489_vm5 = vcmp.eq.f32.partialorder %v11139_v61, %v1244_v46 }
 0x208   :  { %v18402_v3 = vsel %vm11210_vm9, 4294967295, %v18401_v3  ;;  %v18407_v49 = vsel %vm11223_vm0, 4294967295, %v18406_v49  ;;  %vm1167_vm14 = vmor %vm11170_vm13, %vm1103_vm3  ;;  %v1236_v54 = vpop.permute.xlu1 %1235  ;;  %v1252_v62 = vpop.permute.xlu0 %1251  ;;  %vm407_vm3 = vcmp.eq.f32.partialorder %v11139_v61, %v18410_v44  ;;  %v18420_v44 = vld [vmem:[#allocation139_spill] sm:$0xff] }
 0x209   :  { %vm1169_vm11 = vmor %vm785_vm6, %vm1105_vm7  ;;  %vm1487_vm9 = vcmp.eq.f32.partialorder %v11139_v61, %v1236_v54 }
 0x20a   :  { %vm1551_vm13 = vmor %vm1167_vm14, %vm1487_vm9  ;;  %vm1106_vm14 = vcmp.eq.f32.partialorder %v11139_v61, %v18420_v44 }
 0x20b   :  { %vm11241_vm0 = vmor %vm404_vm2, %vm724_vm10  ;;  %v9632_v42 = vsel %vm1551_vm13, 1.0, %v18415_v50  ;;  %vm729_vm10 = vcmp.eq.f32.partialorder %v11139_v61, %v18419_v59  ;;  %vm1109_vm2 = vcmp.eq.f32.partialorder %v11139_v61, %v10979_v4 }
 0x20c   :  { %vm11245_vm12 = vmor %vm1169_vm11, %vm1489_vm5  ;;  %v1743_v51 = vadd.f32 %v10090_v63, %v9632_v42  ;;  %vm1491_vm11 = vcmp.eq.f32.partialorder %v11139_v61, %v1252_v62  ;;  %v1240_v54 = vpop.permute.xlu1 %1239  ;;  %v1260_v53 = vpop.permute.xlu0 %1259  ;;  %v18424_v42 = vld [vmem:[#allocation28_spill] sm:$0xff]  ;;  %v18430_v63 = vld [vmem:[#allocation89_spill] sm:$0xff] }
 0x20d   :  { %vm11252_vm7 = vmor %vm407_vm3, %vm727_vm15  ;;  %vm1488_vm15 = vcmp.eq.f32.partialorder %v11139_v61, %v1240_v54  ;;  %v9634_v62 = vsel %vm11245_vm12, 1.0, %v18415_v50  ;;  %vm18423_vm3 = vcmask 261120   ;;  %vm409_vm6 = vcmp.eq.f32.partialorder %v11139_v61, %v18424_v42  ;;  %v10091_v54 = vld [vmem:[%s17572_s0 + $0x10] sm:$0xff] }
 0x20e   :  { %v18418_v57 = vsel %vm11252_vm7, 4294967295, %v18417_v57  ;;  %vm1168_vm9 = vmor %vm11186_vm1, %vm1104_vm4  ;;  %vm18421_vm1 = vnez %v18404_v47  ;;  %vm406_vm4 = vcmp.eq.f32.partialorder %v11139_v61, %v18422_v52  ;;  %9965 = vmatmul.mubr.msk.f32.vlgmr.msra.gmra.mrb[0].mxu0 %vm18423_vm3, %v1743_v51  ;;  %vm728_vm12 = vcmp.eq.f32.partialorder %v11139_v61, %v18430_v63  ;;  %v18436_v42 = vld [vmem:[#allocation92_spill] sm:$0xff]  ;;  %v18474_v51 = vld [vmem:[#allocation34_spill] sm:$0xff] }
 0x20f   :  { %vm1171_vm5 = vmor %vm18421_vm1, %vm1107_vm8  ;;  %vm18425_vm8 = vcmp.eq.f32.partialorder %v11139_v61, %v18416_v58  ;;  %v18480_v47 = vld [vmem:[#allocation95_spill] sm:$0xff]  ;;  %v18491_v63 = vld [vmem:[#allocation36_spill] sm:$0xff] }
 0x210   :  { %vm1552_vm13 = vmor %vm1168_vm9, %vm1488_vm15  ;;  %vm18433_vm15 = vnez %v18402_v3  ;;  %v1248_v44 = vpop.permute.xlu1 %1247  ;;  %v1268_v52 = vpop.permute.xlu0 %1267  ;;  %v10092_v3 = vld [vmem:[%s17572_s0 + $0x18] sm:$0xff] }
 0x211   :  { %vm11285_vm1 = vmor %vm406_vm4, %vm18425_vm8  ;;  %v9633_v45 = vsel %vm1552_vm13, 1.0, %v18415_v50  ;;  %vm1490_vm4 = vcmp.eq.f32.partialorder %v11139_v61, %v1248_v44  ;;  %v10093_v44 = vld [vmem:[%s17572_s0 + $0x20] sm:$0xff] }
 0x212   :  { %vm11289_vm7 = vmor %vm1171_vm5, %vm1491_vm11  ;;  %v1744_v59 = vadd.f32 %v10091_v54, %v9633_v45  ;;  %vm1493_vm11 = vcmp.eq.f32.partialorder %v11139_v61, %v1260_v53  ;;  %v1745_v45 = vadd.f32 %v10092_v3, %v9634_v62  ;;  %v18438_v54 = vld [vmem:[#allocation29_spill] sm:$0xff] }
 0x213   :  { %vm11296_vm9 = vmor %vm409_vm6, %vm729_vm10  ;;  %vm731_vm6 = vcmp.eq.f32.partialorder %v11139_v61, %v18436_v42  ;;  %vm408_vm13 = vcmp.eq.f32.partialorder %v11139_v61, %v18438_v54  ;;  %v9636_v4 = vsel %vm11289_vm7, 1.0, %v18415_v50  ;;  %v18452_v54 = vld [vmem:[#allocation94_spill] sm:$0xff]  ;;  %v18463_v53 = vld [vmem:[#allocation93_spill] sm:$0xff] }
 0x214   :  { %vm11302_vm3 = vmor %vm18433_vm15, %vm1106_vm14  ;;  %vm18437_vm14 = vnez %v18407_v49  ;;  %vm18439_vm15 = vcmask 261120   ;;  %v18440_v49 = vld [vmem:[#allocation30_spill] sm:$0xff]  ;;  %v1256_v42 = vpop.permute.xlu1 %1255 }
 0x215   :  { %vm1173_vm5 = vmor %vm18437_vm14, %vm1109_vm2  ;;  %9967 = vmatprep.mubr.msk.f32.mxu0 %vm18439_vm15, %v1744_v59  ;;  %vm411_vm14 = vcmp.eq.f32.partialorder %v11139_v61, %v18440_v49  ;;  %v18446_v59 = vld [vmem:[#allocation91_spill] sm:$0xff] }
 0x216   :  { %vm1554_vm2 = vmor %vm11302_vm3, %vm1490_vm4  ;;  %vm730_vm3 = vcmp.eq.f32.partialorder %v11139_v61, %v18446_v59  ;;  %vm1495_vm4 = vcmp.eq.f32.partialorder %v11139_v61, %v1268_v52  ;;  %v18455_v49 = vld [vmem:[#allocation31_spill] sm:$0xff]  ;;  %v18508_v59 = vld [vmem:[#allocation38_spill] sm:$0xff] }
 0x217   :  { %vm11338_vm10 = vmor %vm408_vm13, %vm728_vm12  ;;  %v9635_v58 = vsel %vm1554_vm2, 1.0, %v18415_v50  ;;  %vm18454_vm2 = vnez %v18418_v57  ;;  %v18457_v57 = vld [vmem:[#allocation32_spill] sm:$0xff] }
 0x218   :  { %vm11344_vm8 = vmor %vm1173_vm5, %vm1493_vm11  ;;  %vm18449_vm11 = vcmp.eq.f32.partialorder %v11139_v61, %v10969_v56  ;;  %v1746_v3 = vadd.f32 %v10093_v44, %v9635_v58  ;;  %v10094_v56 = vld [vmem:[%s17572_s0 + $0x28] sm:$0xff]  ;;  %vm413_vm13 = vcmp.eq.f32.partialorder %v11139_v61, %v18457_v57  ;;  %v10095_v44 = vld [vmem:[%s17572_s0 + $0x30] sm:$0xff] }
 0x219   :  { %vm18445_vm7 = vmmov %vm18439_vm15  ;;  %v1747_v46 = vadd.f32 %v10094_v56, %v9636_v4  ;;  %v18470_v56 = vld [vmem:[#allocation96_spill] sm:$0xff] }
 0x21a   :  { %9968 = vmatmul.mubr.msk.f32.gmra.mrb[2].mxu0 %vm18445_vm7, %v1745_v45  ;;  %vm11355_vm12 = vmor %vm411_vm14, %vm731_vm6  ;;  %v1276_v45 = vpop.permute.xlu0 %1275  ;;  %vm1492_vm14 = vcmp.eq.f32.partialorder %v11139_v61, %v1256_v42  ;;  %vm410_vm7 = vcmp.eq.f32.partialorder %v11139_v61, %v18455_v49  ;;  %v1264_v42 = vpop.permute.xlu1 %1263 }
 0x21b   :  { %vm11364_vm5 = vmor %vm11241_vm0, %vm18449_vm11  ;;  %vm18453_vm0 = vcmp.eq.f32.partialorder %v11139_v61, %v10985_v1  ;;  %v9638_v1 = vsel %vm11344_vm8, 1.0, %v18415_v50 }
 0x21c   :  { %vm1175_vm15 = vmor %vm18454_vm2, %vm18453_vm0  ;;  %vm18456_vm2 = vcmask 261120  }
 0x21d   :  { %vm1556_vm0 = vmor %vm11364_vm5, %vm1492_vm14  ;;  %9970 = vmatprep.mubr.msk.f32.mxu0 %vm18456_vm2, %v1746_v3  ;;  %vm732_vm5 = vcmp.eq.f32.partialorder %v11139_v61, %v18463_v53  ;;  %vm18464_vm14 = vcmp.eq.f32.partialorder %v11139_v61, %v18452_v54  ;;  %v10097_v53 = vld [vmem:[%s17572_s0 + $0x40] sm:$0xff] }
 0x21e   :  { %vm11400_vm6 = vmor %vm410_vm7, %vm730_vm3  ;;  %v9637_v58 = vsel %vm1556_vm0, 1.0, %v18415_v50  ;;  %vm1497_vm7 = vcmp.eq.f32.partialorder %v11139_v61, %v1276_v45  ;;  %v1284_v54 = vpop.permute.xlu0 %1283  ;;  %vm415_vm0 = vcmp.eq.f32.partialorder %v11139_v61, %v18474_v51  ;;  %v18542_v51 = vld [vmem:[#allocation42_spill] sm:$0xff] }
 0x21f   :  { %vm11406_vm11 = vmor %vm1175_vm15, %vm1495_vm4  ;;  %vm18467_vm4 = vcmp.eq.f32.partialorder %v11139_v61, %v10975_v2  ;;  %v1748_v3 = vadd.f32 %v10095_v44, %v9637_v58  ;;  %v10096_v2 = vld [vmem:[%s17572_s0 + $0x38] sm:$0xff]  ;;  %v1272_v44 = vpop.permute.xlu1 %1271  ;;  %v18525_v58 = vld [vmem:[#allocation40_spill] sm:$0xff] }
 0x220   :  { %vm18462_vm8 = vmmov %vm18456_vm2  ;;  %v1749_v60 = vadd.f32 %v10096_v2, %v9638_v1  ;;  %v10099_v1 = vld [vmem:[%s17572_s0 + $0x50] sm:$0xff] }
 0x221   :  { %9971 = vmatmul.mubr.msk.f32.gmra.mrb[4].mxu0 %vm18462_vm8, %v1747_v46  ;;  %vm11417_vm3 = vmor %vm413_vm13, %vm18464_vm14  ;;  %vm1494_vm8 = vcmp.eq.f32.partialorder %v11139_v61, %v1264_v42  ;;  %v18472_v46 = vld [vmem:[#allocation33_spill] sm:$0xff]  ;;  %v18487_v42 = vld [vmem:[#allocation98_spill] sm:$0xff] }
 0x222   :  { %vm11426_vm15 = vmor %vm11285_vm1, %vm18467_vm4  ;;  %vm18471_vm1 = vcmp.eq.f32.partialorder %v11139_v61, %v10991_v48  ;;  %vm412_vm14 = vcmp.eq.f32.partialorder %v11139_v61, %v18472_v46  ;;  %v9640_v48 = vsel %vm11406_vm11, 1.0, %v18415_v50 }
 0x223   :  { %vm1177_vm2 = vmor %vm11296_vm9, %vm18471_vm1  ;;  %vm18473_vm1 = vcmask 261120  }
 0x224   :  { %vm1558_vm9 = vmor %vm11426_vm15, %vm1494_vm8  ;;  %9973 = vmatprep.mubr.msk.f32.mxu0 %vm18473_vm1, %v1748_v3  ;;  %vm734_vm15 = vcmp.eq.f32.partialorder %v11139_v61, %v18480_v47  ;;  %vm18481_vm8 = vcmp.eq.f32.partialorder %v11139_v61, %v18470_v56  ;;  %v1292_v3 = vpop.permute.xlu0 %1291  ;;  %v18489_v56 = vld [vmem:[#allocation35_spill] sm:$0xff]  ;;  %v1280_v47 = vpop.permute.xlu1 %1279 }
 0x225   :  { %vm11462_vm13 = vmor %vm412_vm14, %vm732_vm5  ;;  %v9639_v57 = vsel %vm1558_vm9, 1.0, %v18415_v50  ;;  %vm1499_vm14 = vcmp.eq.f32.partialorder %v11139_v61, %v1284_v54  ;;  %vm417_vm9 = vcmp.eq.f32.partialorder %v11139_v61, %v18491_v63  ;;  %v18523_v54 = vld [vmem:[#allocation39_spill] sm:$0xff] }
 0x226   :  { %vm11468_vm4 = vmor %vm1177_vm2, %vm1497_vm7  ;;  %vm18484_vm7 = vcmp.eq.f32.partialorder %v11139_v61, %v10981_v5  ;;  %v1750_v52 = vadd.f32 %v10097_v53, %v9639_v57  ;;  %v10098_v5 = vld [vmem:[%s17572_s0 + $0x48] sm:$0xff]  ;;  %v18504_v53 = vld [vmem:[#allocation100_spill] sm:$0xff] }
 0x227   :  { %vm18479_vm11 = vmmov %vm18473_vm1  ;;  %v1751_v62 = vadd.f32 %v10098_v5, %v9640_v48  ;;  %v18497_v48 = vld [vmem:[#allocation97_spill] sm:$0xff] }
 0x228   :  { %9974 = vmatmul.mubr.msk.f32.gmra.mrb[6].mxu0 %vm18479_vm11, %v1749_v60  ;;  %vm11479_vm5 = vmor %vm415_vm0, %vm18481_vm8  ;;  %vm1496_vm11 = vcmp.eq.f32.partialorder %v11139_v61, %v1272_v44  ;;  %vm414_vm8 = vcmp.eq.f32.partialorder %v11139_v61, %v18489_v56  ;;  %v1300_v45 = vpop.permute.xlu0 %1299  ;;  %v1288_v60 = vpop.permute.xlu1 %1287  ;;  %v18559_v56 = vld [vmem:[#allocation44_spill] sm:$0xff] }
 0x229   :  { %vm11488_vm2 = vmor %vm11338_vm10, %vm18484_vm7  ;;  %vm18488_vm10 = vcmp.eq.f32.partialorder %v11139_v61, %v10997_v9  ;;  %v9642_v9 = vsel %vm11468_vm4, 1.0, %v18415_v50 }
 0x22a   :  { %vm1179_vm1 = vmor %vm11355_vm12, %vm18488_vm10  ;;  %vm18490_vm10 = vcmask 261120  }
 0x22b   :  { %vm1560_vm12 = vmor %vm11488_vm2, %vm1496_vm11  ;;  %9976 = vmatprep.mubr.msk.f32.mxu0 %vm18490_vm10, %v1750_v52  ;;  %vm736_vm2 = vcmp.eq.f32.partialorder %v11139_v61, %v18497_v48  ;;  %vm18498_vm11 = vcmp.eq.f32.partialorder %v11139_v61, %v18487_v42  ;;  %v18506_v52 = vld [vmem:[#allocation37_spill] sm:$0xff]  ;;  %v18521_v48 = vld [vmem:[#allocation102_spill] sm:$0xff] }
 0x22c   :  { %vm11524_vm0 = vmor %vm414_vm8, %vm734_vm15  ;;  %v9641_v46 = vsel %vm1560_vm12, 1.0, %v18415_v50  ;;  %vm1501_vm8 = vcmp.eq.f32.partialorder %v11139_v61, %v1292_v3  ;;  %vm419_vm12 = vcmp.eq.f32.partialorder %v11139_v61, %v18508_v59  ;;  %v18538_v42 = vld [vmem:[#allocation104_spill] sm:$0xff] }
 0x22d   :  { %vm11530_vm7 = vmor %vm1179_vm1, %vm1499_vm14  ;;  %vm18501_vm14 = vcmp.eq.f32.partialorder %v11139_v61, %v10987_v7  ;;  %v1752_v57 = vadd.f32 %v10099_v1, %v9641_v46  ;;  %v10100_v7 = vld [vmem:[%s17572_s0 + $0x58] sm:$0xff]  ;;  %v1308_v46 = vpop.permute.xlu0 %1307 }
 0x22e   :  { %vm18496_vm4 = vmmov %vm18490_vm10  ;;  %v1753_v4 = vadd.f32 %v10100_v7, %v9642_v9  ;;  %v10101_v9 = vld [vmem:[%s17572_s0 + $0x60] sm:$0xff] }
 0x22f   :  { %9977 = vmatmul.mubr.msk.f32.gmra.mrb[8].mxu0 %vm18496_vm4, %v1751_v62  ;;  %vm11541_vm15 = vmor %vm417_vm9, %vm18498_vm11  ;;  %vm1498_vm4 = vcmp.eq.f32.partialorder %v11139_v61, %v1280_v47  ;;  %vm416_vm11 = vcmp.eq.f32.partialorder %v11139_v61, %v18506_v52  ;;  %v18514_v62 = vld [vmem:[#allocation99_spill] sm:$0xff]  ;;  %v18576_v7 = vld [vmem:[#allocation46_spill] sm:$0xff] }
 0x230   :  { %vm11550_vm1 = vmor %vm11400_vm6, %vm18501_vm14  ;;  %vm18505_vm6 = vcmp.eq.f32.partialorder %v11139_v61, %v11003_v11  ;;  %v9644_v11 = vsel %vm11530_vm7, 1.0, %v18415_v50 }
 0x231   :  { %vm1181_vm10 = vmor %vm11417_vm3, %vm18505_vm6  ;;  %vm18507_vm6 = vcmask 261120   ;;  %v1316_v59 = vpop.permute.xlu0 %1315 }
 0x232   :  { %vm1562_vm3 = vmor %vm11550_vm1, %vm1498_vm4  ;;  %9979 = vmatprep.mubr.msk.f32.mxu0 %vm18507_vm6, %v1752_v57  ;;  %vm738_vm1 = vcmp.eq.f32.partialorder %v11139_v61, %v18514_v62  ;;  %vm18515_vm4 = vcmp.eq.f32.partialorder %v11139_v61, %v18504_v53  ;;  %v18531_v53 = vld [vmem:[#allocation101_spill] sm:$0xff] }
 0x233   :  { %vm11586_vm9 = vmor %vm416_vm11, %vm736_vm2  ;;  %v9643_v5 = vsel %vm1562_vm3, 1.0, %v18415_v50  ;;  %vm1503_vm11 = vcmp.eq.f32.partialorder %v11139_v61, %v1300_v45  ;;  %vm421_vm3 = vcmp.eq.f32.partialorder %v11139_v61, %v18525_v58  ;;  %v18557_v58 = vld [vmem:[#allocation43_spill] sm:$0xff]  ;;  %v18565_v45 = vld [vmem:[#allocation105_spill] sm:$0xff] }
 0x234   :  { %vm11592_vm14 = vmor %vm1181_vm10, %vm1501_vm8  ;;  %vm18518_vm8 = vcmp.eq.f32.partialorder %v11139_v61, %v10993_v6  ;;  %v1754_v63 = vadd.f32 %v10101_v9, %v9643_v5  ;;  %v10102_v6 = vld [vmem:[%s17572_s0 + $0x68] sm:$0xff]  ;;  %v18540_v5 = vld [vmem:[#allocation41_spill] sm:$0xff] }
 0x235   :  { %vm18513_vm7 = vmmov %vm18507_vm6  ;;  %v1755_v49 = vadd.f32 %v10102_v6, %v9644_v11  ;;  %v1296_v11 = vpop.permute.xlu1 %1295 }
 0x236   :  { %9980 = vmatmul.mubr.msk.f32.gmra.mrb[10].mxu0 %vm18513_vm7, %v1753_v4  ;;  %vm11603_vm2 = vmor %vm419_vm12, %vm18515_vm4  ;;  %vm1500_vm7 = vcmp.eq.f32.partialorder %v11139_v61, %v1288_v60  ;;  %vm418_vm4 = vcmp.eq.f32.partialorder %v11139_v61, %v18523_v54  ;;  %v10103_v4 = vld [vmem:[%s17572_s0 + $0x70] sm:$0xff]  ;;  %v1324_v54 = vpop.permute.xlu0 %1323 }
 0x237   :  { %vm11612_vm10 = vmor %vm11462_vm13, %vm18518_vm8  ;;  %vm18522_vm13 = vcmp.eq.f32.partialorder %v11139_v61, %v11009_v13  ;;  %v9646_v13 = vsel %vm11592_vm14, 1.0, %v18415_v50  ;;  %v18593_v60 = vld [vmem:[#allocation48_spill] sm:$0xff] }
 0x238   :  { %vm1183_vm6 = vmor %vm11479_vm5, %vm18522_vm13  ;;  %vm18524_vm13 = vcmask 261120  }
 0x239   :  { %vm1564_vm5 = vmor %vm11612_vm10, %vm1500_vm7  ;;  %9982 = vmatprep.mubr.msk.f32.mxu0 %vm18524_vm13, %v1754_v63  ;;  %vm740_vm10 = vcmp.eq.f32.partialorder %v11139_v61, %v18531_v53  ;;  %vm18532_vm7 = vcmp.eq.f32.partialorder %v11139_v61, %v18521_v48  ;;  %v18548_v63 = vld [vmem:[#allocation103_spill] sm:$0xff]  ;;  %v10105_v48 = vld [vmem:[%s17572_s0 + $0x80] sm:$0xff] }
 0x23a   :  { %vm11648_vm12 = vmor %vm418_vm4, %vm738_vm1  ;;  %v9645_v47 = vsel %vm1564_vm5, 1.0, %v18415_v50  ;;  %vm1505_vm4 = vcmp.eq.f32.partialorder %v11139_v61, %v1308_v46  ;;  %vm423_vm5 = vcmp.eq.f32.partialorder %v11139_v61, %v18542_v51  ;;  %v10113_v51 = vld [vmem:[%s17572_s0 + $0xc0] sm:$0xff] }
 0x23b   :  { %vm11654_vm8 = vmor %vm1183_vm6, %vm1503_vm11  ;;  %vm18535_vm11 = vcmp.eq.f32.partialorder %v11139_v61, %v10999_v8  ;;  %v1756_v52 = vadd.f32 %v10103_v4, %v9645_v47  ;;  %v10104_v8 = vld [vmem:[%s17572_s0 + $0x78] sm:$0xff]  ;;  %v18610_v4 = vld [vmem:[#allocation50_spill] sm:$0xff] }
 0x23c   :  { %vm18530_vm14 = vmmov %vm18524_vm13  ;;  %v1757_v2 = vadd.f32 %v10104_v8, %v9646_v13  ;;  %v18555_v13 = vld [vmem:[#allocation106_spill] sm:$0xff]  ;;  %v1332_v8 = vpop.permute.xlu0 %1331 }
 0x23d   :  { %9983 = vmatmul.mubr.msk.f32.gmra.mrb[12].mxu0 %vm18530_vm14, %v1755_v49  ;;  %vm11665_vm1 = vmor %vm421_vm3, %vm18532_vm7  ;;  %vm1502_vm14 = vcmp.eq.f32.partialorder %v11139_v61, %v1296_v11  ;;  %vm420_vm7 = vcmp.eq.f32.partialorder %v11139_v61, %v18540_v5  ;;  %v1304_v49 = vpop.permute.xlu1 %1303  ;;  %v10107_v11 = vld [vmem:[%s17572_s0 + $0x90] sm:$0xff]  ;;  %v18574_v5 = vld [vmem:[#allocation45_spill] sm:$0xff] }
 0x23e   :  { %vm11674_vm6 = vmor %vm11524_vm0, %vm18535_vm11  ;;  %vm18539_vm0 = vcmp.eq.f32.partialorder %v11139_v61, %v11015_v15  ;;  %v9648_v15 = vsel %vm11654_vm8, 1.0, %v18415_v50  ;;  %v18644_v47 = vld [vmem:[#allocation54_spill] sm:$0xff] }
 0x23f   :  { %vm1185_vm13 = vmor %vm11541_vm15, %vm18539_vm0  ;;  %vm18541_vm0 = vcmask 261120  }
 0x240   :  { %vm1566_vm15 = vmor %vm11674_vm6, %vm1502_vm14  ;;  %9985 = vmatprep.mubr.msk.f32.mxu0 %vm18541_vm0, %v1756_v52  ;;  %vm742_vm6 = vcmp.eq.f32.partialorder %v11139_v61, %v18548_v63  ;;  %vm18549_vm14 = vcmp.eq.f32.partialorder %v11139_v61, %v18538_v42  ;;  %v18627_v63 = vld [vmem:[#allocation52_spill] sm:$0xff] }
 0x241   :  { %vm11710_vm3 = vmor %vm420_vm7, %vm740_vm10  ;;  %v9647_v9 = vsel %vm1566_vm15, 1.0, %v18415_v50  ;;  %vm1507_vm7 = vcmp.eq.f32.partialorder %v11139_v61, %v1316_v59  ;;  %vm425_vm15 = vcmp.eq.f32.partialorder %v11139_v61, %v18559_v56  ;;  %v1312_v42 = vpop.permute.xlu1 %1311  ;;  %v18599_v56 = vld [vmem:[#allocation109_spill] sm:$0xff] }
 0x242   :  { %vm11716_vm11 = vmor %vm1185_vm13, %vm1505_vm4  ;;  %vm18552_vm4 = vcmp.eq.f32.partialorder %v11139_v61, %v11005_v10  ;;  %v1758_v6 = vadd.f32 %v10105_v48, %v9647_v9  ;;  %v10106_v10 = vld [vmem:[%s17572_s0 + $0x88] sm:$0xff]  ;;  %v10109_v48 = vld [vmem:[%s17572_s0 + $0xa0] sm:$0xff] }
 0x243   :  { %vm18547_vm8 = vmmov %vm18541_vm0  ;;  %v1759_v44 = vadd.f32 %v10106_v10, %v9648_v15  ;;  %v18582_v9 = vld [vmem:[#allocation107_spill] sm:$0xff] }
 0x244   :  { %9986 = vmatmul.mubr.msk.f32.gmra.mrb[14].mxu0 %vm18547_vm8, %v1757_v2  ;;  %vm11727_vm10 = vmor %vm423_vm5, %vm18549_vm14  ;;  %vm1504_vm8 = vcmp.eq.f32.partialorder %v11139_v61, %v1304_v49  ;;  %vm422_vm14 = vcmp.eq.f32.partialorder %v11139_v61, %v18557_v58  ;;  %v18572_v2 = vld [vmem:[#allocation108_spill] sm:$0xff]  ;;  %v18591_v10 = vld [vmem:[#allocation47_spill] sm:$0xff] }
 0x245   :  { %vm11736_vm13 = vmor %vm11586_vm9, %vm18552_vm4  ;;  %vm18556_vm9 = vcmp.eq.f32.partialorder %v11139_v61, %v11021_v17  ;;  %v9650_v17 = vsel %vm11716_vm11, 1.0, %v18415_v50  ;;  %v1320_v49 = vpop.permute.xlu1 %1319 }
 0x246   :  { %vm1187_vm0 = vmor %vm11603_vm2, %vm18556_vm9  ;;  %vm18558_vm9 = vcmask 261120  }
 0x247   :  { %vm1568_vm2 = vmor %vm11736_vm13, %vm1504_vm8  ;;  %9988 = vmatprep.mubr.msk.f32.mxu0 %vm18558_vm9, %v1758_v6  ;;  %vm744_vm13 = vcmp.eq.f32.partialorder %v11139_v61, %v18565_v45  ;;  %vm18566_vm8 = vcmp.eq.f32.partialorder %v11139_v61, %v18555_v13  ;;  %v18589_v13 = vld [vmem:[#allocation110_spill] sm:$0xff]  ;;  %v10111_v45 = vld [vmem:[%s17572_s0 + $0xb0] sm:$0xff] }
 0x248   :  { %vm11772_vm5 = vmor %vm422_vm14, %vm742_vm6  ;;  %v9649_v53 = vsel %vm1568_vm2, 1.0, %v18415_v50  ;;  %vm1509_vm14 = vcmp.eq.f32.partialorder %v11139_v61, %v1324_v54  ;;  %vm427_vm2 = vcmp.eq.f32.partialorder %v11139_v61, %v18576_v7  ;;  %v1340_v54 = vpop.permute.xlu0 %1339  ;;  %v18718_v7 = vld [vmem:[#allocation123_spill] sm:$0xff] }
 0x249   :  { %vm11778_vm4 = vmor %vm1187_vm0, %vm1507_vm7  ;;  %vm18569_vm7 = vcmp.eq.f32.partialorder %v11139_v61, %v11011_v12  ;;  %v1760_v59 = vadd.f32 %v10107_v11, %v9649_v53  ;;  %v10108_v12 = vld [vmem:[%s17572_s0 + $0x98] sm:$0xff]  ;;  %v1328_v11 = vpop.permute.xlu1 %1327 }
 0x24a   :  { %vm18564_vm11 = vmmov %vm18558_vm9  ;;  %v1761_v1 = vadd.f32 %v10108_v12, %v9650_v17  ;;  %v18642_v53 = vld [vmem:[#allocation53_spill] sm:$0xff]  ;;  %v18657_v12 = vld [vmem:[#allocation118_spill] sm:$0xff] }
 0x24b   :  { %9989 = vmatmul.mubr.msk.f32.gmra.mrb[16].mxu0 %vm18564_vm11, %v1759_v44  ;;  %vm11789_vm6 = vmor %vm425_vm15, %vm18566_vm8  ;;  %vm1506_vm11 = vcmp.eq.f32.partialorder %v11139_v61, %v1312_v42  ;;  %vm424_vm8 = vcmp.eq.f32.partialorder %v11139_v61, %v18574_v5  ;;  %v18606_v42 = vld [vmem:[#allocation112_spill] sm:$0xff]  ;;  %v18616_v5 = vld [vmem:[#allocation111_spill] sm:$0xff] }
 0x24c   :  { %vm11798_vm0 = vmor %vm11648_vm12, %vm18569_vm7  ;;  %vm18573_vm12 = vcmp.eq.f32.partialorder %v11139_v61, %v11027_v19  ;;  %v9652_v19 = vsel %vm11778_vm4, 1.0, %v18415_v50 }
 0x24d   :  { %vm1189_vm9 = vmor %vm11665_vm1, %vm18573_vm12  ;;  %vm18575_vm12 = vcmask 261120  }
 0x24e   :  { %vm1570_vm1 = vmor %vm11798_vm0, %vm1506_vm11  ;;  %9991 = vmatprep.mubr.msk.f32.mxu0 %vm18575_vm12, %v1760_v59  ;;  %vm746_vm0 = vcmp.eq.f32.partialorder %v11139_v61, %v18582_v9  ;;  %vm18583_vm11 = vcmp.eq.f32.partialorder %v11139_v61, %v18572_v2  ;;  %v1348_v59 = vpop.permute.xlu0 %1347  ;;  %v1336_v9 = vpop.permute.xlu1 %1335 }
 0x24f   :  { %vm11834_vm15 = vmor %vm424_vm8, %vm744_vm13  ;;  %v9651_v3 = vsel %vm1570_vm1, 1.0, %v18415_v50  ;;  %vm1511_vm8 = vcmp.eq.f32.partialorder %v11139_v61, %v1332_v8  ;;  %vm429_vm1 = vcmp.eq.f32.partialorder %v11139_v61, %v18593_v60  ;;  %v18608_v8 = vld [vmem:[#allocation49_spill] sm:$0xff] }
 0x250   :  { %vm11840_vm7 = vmor %vm1189_vm9, %vm1509_vm14  ;;  %vm18586_vm14 = vcmp.eq.f32.partialorder %v11139_v61, %v11017_v14  ;;  %v1762_v6 = vadd.f32 %v10109_v48, %v9651_v3  ;;  %v10110_v14 = vld [vmem:[%s17572_s0 + $0xa8] sm:$0xff]  ;;  %v18623_v48 = vld [vmem:[#allocation114_spill] sm:$0xff] }
 0x251   :  { %vm18581_vm4 = vmmov %vm18575_vm12  ;;  %v1763_v62 = vadd.f32 %v10110_v14, %v9652_v19  ;;  %v18633_v14 = vld [vmem:[#allocation113_spill] sm:$0xff] }
 0x252   :  { %9992 = vmatmul.mubr.msk.f32.gmra.mrb[18].mxu0 %vm18581_vm4, %v1761_v1  ;;  %vm11851_vm13 = vmor %vm427_vm2, %vm18583_vm11  ;;  %vm1508_vm4 = vcmp.eq.f32.partialorder %v11139_v61, %v1320_v49  ;;  %vm426_vm11 = vcmp.eq.f32.partialorder %v11139_v61, %v18591_v10  ;;  %v1356_v46 = vpop.permute.xlu0 %1355  ;;  %v1344_v58 = vpop.permute.xlu1 %1343  ;;  %v18676_v49 = vld [vmem:[#allocation57_spill] sm:$0xff]  ;;  %v18684_v10 = vld [vmem:[#allocation119_spill] sm:$0xff] }
 0x253   :  { %vm11860_vm9 = vmor %vm11710_vm3, %vm18586_vm14  ;;  %vm18590_vm3 = vcmp.eq.f32.partialorder %v11139_v61, %v11033_v21  ;;  %v9654_v21 = vsel %vm11840_vm7, 1.0, %v18415_v50 }
 0x254   :  { %vm1191_vm12 = vmor %vm11727_vm10, %vm18590_vm3  ;;  %vm18592_vm3 = vcmask 261120  }
 0x255   :  { %vm1572_vm10 = vmor %vm11860_vm9, %vm1508_vm4  ;;  %9994 = vmatprep.mubr.msk.f32.mxu0 %vm18592_vm3, %v1762_v6  ;;  %vm748_vm9 = vcmp.eq.f32.partialorder %v11139_v61, %v18599_v56  ;;  %vm18600_vm4 = vcmp.eq.f32.partialorder %v11139_v61, %v18589_v13  ;;  %v18625_v6 = vld [vmem:[#allocation51_spill] sm:$0xff]  ;;  %v18640_v56 = vld [vmem:[#allocation116_spill] sm:$0xff] }
 0x256   :  { %vm11896_vm2 = vmor %vm426_vm11, %vm746_vm0  ;;  %v9653_v17 = vsel %vm1572_vm10, 1.0, %v18415_v50  ;;  %vm1513_vm11 = vcmp.eq.f32.partialorder %v11139_v61, %v1340_v54  ;;  %vm431_vm10 = vcmp.eq.f32.partialorder %v11139_v61, %v18610_v4  ;;  %v18678_v54 = vld [vmem:[#allocation58_spill] sm:$0xff] }
 0x257   :  { %vm11902_vm14 = vmor %vm1191_vm12, %vm1511_vm8  ;;  %vm18603_vm8 = vcmp.eq.f32.partialorder %v11139_v61, %v11023_v16  ;;  %v1764_v52 = vadd.f32 %v10111_v45, %v9653_v17  ;;  %v10112_v16 = vld [vmem:[%s17572_s0 + $0xb8] sm:$0xff]  ;;  %v1364_v17 = vpop.permute.xlu0 %1363  ;;  %v10129_v45 = vld [vmem:[%s17572_s0 + $0x140] sm:$0xff] }
 0x258   :  { %vm18598_vm7 = vmmov %vm18592_vm3  ;;  %v1765_v57 = vadd.f32 %v10112_v16, %v9654_v21  ;;  %v10115_v21 = vld [vmem:[%s17572_s0 + $0xd0] sm:$0xff] }
 0x259   :  { %9995 = vmatmul.mubr.msk.f32.gmra.mrb[20].mxu0 %vm18598_vm7, %v1763_v62  ;;  %vm11913_vm0 = vmor %vm429_vm1, %vm18600_vm4  ;;  %vm1510_vm7 = vcmp.eq.f32.partialorder %v11139_v61, %v1328_v11  ;;  %vm428_vm4 = vcmp.eq.f32.partialorder %v11139_v61, %v18608_v8 }
 0x25a   :  { %vm11922_vm12 = vmor %vm11772_vm5, %vm18603_vm8  ;;  %vm18607_vm5 = vcmp.eq.f32.partialorder %v11139_v61, %v11039_v23  ;;  %v9656_v23 = vsel %vm11902_vm14, 1.0, %v18415_v50 }
 0x25b   :  { %vm1193_vm3 = vmor %vm11789_vm6, %vm18607_vm5  ;;  %vm18609_vm5 = vcmask 261120   ;;  %v1372_v4 = vpop.permute.xlu0 %1371 }
 0x25c   :  { %vm1574_vm6 = vmor %vm11922_vm12, %vm1510_vm7  ;;  %9997 = vmatprep.mubr.msk.f32.mxu0 %vm18609_vm5, %v1764_v52  ;;  %vm750_vm12 = vcmp.eq.f32.partialorder %v11139_v61, %v18616_v5  ;;  %vm18617_vm7 = vcmp.eq.f32.partialorder %v11139_v61, %v18606_v42  ;;  %v18661_v5 = vld [vmem:[#allocation56_spill] sm:$0xff]  ;;  %v18759_v42 = vld [vmem:[#allocation130_spill] sm:$0xff] }
 0x25d   :  { %vm11958_vm1 = vmor %vm428_vm4, %vm748_vm9  ;;  %v9655_v1 = vsel %vm1574_vm6, 1.0, %v18415_v50  ;;  %vm1515_vm4 = vcmp.eq.f32.partialorder %v11139_v61, %v1348_v59  ;;  %vm433_vm6 = vcmp.eq.f32.partialorder %v11139_v61, %v18627_v63  ;;  %v18650_v59 = vld [vmem:[#allocation115_spill] sm:$0xff] }
 0x25e   :  { %vm11964_vm8 = vmor %vm1193_vm3, %vm1513_vm11  ;;  %vm18620_vm11 = vcmp.eq.f32.partialorder %v11139_v61, %v11029_v18  ;;  %v1766_v3 = vadd.f32 %v10113_v51, %v9655_v1  ;;  %v10114_v18 = vld [vmem:[%s17572_s0 + $0xc8] sm:$0xff] }
 0x25f   :  { %vm18615_vm14 = vmmov %vm18609_vm5  ;;  %v1767_v15 = vadd.f32 %v10114_v18, %v9656_v23  ;;  %v1352_v23 = vpop.permute.xlu1 %1351  ;;  %v18659_v1 = vld [vmem:[#allocation55_spill] sm:$0xff] }
 0x260   :  { %9998 = vmatmul.mubr.msk.f32.gmra.mrb[22].mxu0 %vm18615_vm14, %v1765_v57  ;;  %vm11975_vm9 = vmor %vm431_vm10, %vm18617_vm7  ;;  %vm1512_vm14 = vcmp.eq.f32.partialorder %v11139_v61, %v1336_v9  ;;  %vm430_vm7 = vcmp.eq.f32.partialorder %v11139_v61, %v18625_v6  ;;  %v10117_v57 = vld [vmem:[%s17572_s0 + $0xe0] sm:$0xff]  ;;  %v1380_v6 = vpop.permute.xlu0 %1379 }
 0x261   :  { %vm11984_vm3 = vmor %vm11834_vm15, %vm18620_vm11  ;;  %vm18624_vm15 = vcmp.eq.f32.partialorder %v11139_v61, %v11045_v25  ;;  %v9658_v25 = vsel %vm11964_vm8, 1.0, %v18415_v50  ;;  %v10125_v9 = vld [vmem:[%s17572_s0 + $0x120] sm:$0xff] }
 0x262   :  { %vm1195_vm5 = vmor %vm11851_vm13, %vm18624_vm15  ;;  %vm18626_vm15 = vcmask 261120  }
 0x263   :  { %vm1576_vm13 = vmor %vm11984_vm3, %vm1512_vm14  ;;  %10000 = vmatprep.mubr.msk.f32.mxu0 %vm18626_vm15, %v1766_v3  ;;  %vm752_vm3 = vcmp.eq.f32.partialorder %v11139_v61, %v18633_v14  ;;  %vm18634_vm14 = vcmp.eq.f32.partialorder %v11139_v61, %v18623_v48  ;;  %v18667_v3 = vld [vmem:[#allocation117_spill] sm:$0xff]  ;;  %v10119_v48 = vld [vmem:[%s17572_s0 + $0xf0] sm:$0xff] }
 0x264   :  { %vm12020_vm10 = vmor %vm430_vm7, %vm750_vm12  ;;  %v9657_v13 = vsel %vm1576_vm13, 1.0, %v18415_v50  ;;  %vm1517_vm7 = vcmp.eq.f32.partialorder %v11139_v61, %v1356_v46  ;;  %vm435_vm13 = vcmp.eq.f32.partialorder %v11139_v61, %v18644_v47  ;;  %v18695_v47 = vld [vmem:[#allocation60_spill] sm:$0xff] }
 0x265   :  { %vm12026_vm11 = vmor %vm1195_vm5, %vm1515_vm4  ;;  %vm18637_vm4 = vcmp.eq.f32.partialorder %v11139_v61, %v11035_v20  ;;  %v1768_v60 = vadd.f32 %v10115_v21, %v9657_v13  ;;  %v10116_v20 = vld [vmem:[%s17572_s0 + $0xd8] sm:$0xff] }
 0x266   :  { %vm18632_vm8 = vmmov %vm18626_vm15  ;;  %v1769_v44 = vadd.f32 %v10116_v20, %v9658_v25  ;;  %v18674_v25 = vld [vmem:[#allocation120_spill] sm:$0xff] }
 0x267   :  { %10001 = vmatmul.mubr.msk.f32.gmra.mrb[24].mxu0 %vm18632_vm8, %v1767_v15  ;;  %vm12037_vm12 = vmor %vm433_vm6, %vm18634_vm14  ;;  %vm1514_vm8 = vcmp.eq.f32.partialorder %v11139_v61, %v1344_v58  ;;  %vm432_vm14 = vcmp.eq.f32.partialorder %v11139_v61, %v18642_v53  ;;  %v1360_v15 = vpop.permute.xlu1 %1359 }
 0x268   :  { %vm12046_vm5 = vmor %vm11896_vm2, %vm18637_vm4  ;;  %vm18641_vm2 = vcmp.eq.f32.partialorder %v11139_v61, %v11051_v27  ;;  %v9660_v27 = vsel %vm12026_vm11, 1.0, %v18415_v50 }
 0x269   :  { %vm1197_vm15 = vmor %vm11913_vm0, %vm18641_vm2  ;;  %vm18643_vm2 = vcmask 261120  }
 0x26a   :  { %vm1578_vm0 = vmor %vm12046_vm5, %vm1514_vm8  ;;  %10003 = vmatprep.mubr.msk.f32.mxu0 %vm18643_vm2, %v1768_v60  ;;  %vm754_vm5 = vcmp.eq.f32.partialorder %v11139_v61, %v18650_v59  ;;  %vm18651_vm8 = vcmp.eq.f32.partialorder %v11139_v61, %v18640_v56  ;;  %v10121_v56 = vld [vmem:[%s17572_s0 + $0x100] sm:$0xff]  ;;  %v18701_v59 = vld [vmem:[#allocation121_spill] sm:$0xff] }
 0x26b   :  { %vm12082_vm6 = vmor %vm432_vm14, %vm752_vm3  ;;  %v9659_v11 = vsel %vm1578_vm0, 1.0, %v18415_v50  ;;  %vm1519_vm14 = vcmp.eq.f32.partialorder %v11139_v61, %v1364_v17  ;;  %vm437_vm0 = vcmp.eq.f32.partialorder %v11139_v61, %v18661_v5  ;;  %v1368_v58 = vpop.permute.xlu1 %1367  ;;  %v1388_v17 = vpop.permute.xlu0 %1387 }
 0x26c   :  { %vm12088_vm4 = vmor %vm1197_vm15, %vm1517_vm7  ;;  %vm18654_vm7 = vcmp.eq.f32.partialorder %v11139_v61, %v11041_v22  ;;  %v1770_v8 = vadd.f32 %v10117_v57, %v9659_v11  ;;  %v10118_v22 = vld [vmem:[%s17572_s0 + $0xe8] sm:$0xff]  ;;  %v10123_v57 = vld [vmem:[%s17572_s0 + $0x110] sm:$0xff] }
 0x26d   :  { %vm18649_vm11 = vmmov %vm18643_vm2  ;;  %v1771_v2 = vadd.f32 %v10118_v22, %v9660_v27  ;;  %v18693_v27 = vld [vmem:[#allocation59_spill] sm:$0xff] }
 0x26e   :  { %10004 = vmatmul.mubr.msk.f32.gmra.mrb[26].mxu0 %vm18649_vm11, %v1769_v44  ;;  %vm12099_vm3 = vmor %vm435_vm13, %vm18651_vm8  ;;  %vm1516_vm11 = vcmp.eq.f32.partialorder %v11139_v61, %v1352_v23  ;;  %vm434_vm8 = vcmp.eq.f32.partialorder %v11139_v61, %v18659_v1  ;;  %v18691_v44 = vld [vmem:[#allocation122_spill] sm:$0xff] }
 0x26f   :  { %vm12108_vm15 = vmor %vm11958_vm1, %vm18654_vm7  ;;  %vm18658_vm1 = vcmp.eq.f32.partialorder %v11139_v61, %v11057_v29  ;;  %v9662_v29 = vsel %vm12088_vm4, 1.0, %v18415_v50  ;;  %v1376_v23 = vpop.permute.xlu1 %1375  ;;  %v18712_v1 = vld [vmem:[#allocation62_spill] sm:$0xff] }
 0x270   :  { %vm1199_vm2 = vmor %vm11975_vm9, %vm18658_vm1  ;;  %vm18660_vm1 = vcmask 261120  }
 0x271   :  { %vm1580_vm9 = vmor %vm12108_vm15, %vm1516_vm11  ;;  %10006 = vmatprep.mubr.msk.f32.mxu0 %vm18660_vm1, %v1770_v8  ;;  %vm756_vm15 = vcmp.eq.f32.partialorder %v11139_v61, %v18667_v3  ;;  %vm18668_vm11 = vcmp.eq.f32.partialorder %v11139_v61, %v18657_v12  ;;  %v18708_v12 = vld [vmem:[#allocation124_spill] sm:$0xff]  ;;  %v18780_v3 = vld [vmem:[#allocation70_spill] sm:$0xff] }
 0x272   :  { %vm12144_vm13 = vmor %vm434_vm8, %vm754_vm5  ;;  %v9661_v51 = vsel %vm1580_vm9, 1.0, %v18415_v50  ;;  %vm1521_vm8 = vcmp.eq.f32.partialorder %v11139_v61, %v1372_v4  ;;  %vm439_vm9 = vcmp.eq.f32.partialorder %v11139_v61, %v18678_v54  ;;  %v1396_v4 = vpop.permute.xlu0 %1395  ;;  %v18735_v54 = vld [vmem:[#allocation125_spill] sm:$0xff] }
 0x273   :  { %vm12150_vm7 = vmor %vm1199_vm2, %vm1519_vm14  ;;  %vm18671_vm14 = vcmp.eq.f32.partialorder %v11139_v61, %v11047_v24  ;;  %v1772_v18 = vadd.f32 %v10119_v48, %v9661_v51  ;;  %v10120_v24 = vld [vmem:[%s17572_s0 + $0xf8] sm:$0xff]  ;;  %v1384_v48 = vpop.permute.xlu1 %1383 }
 0x274   :  { %vm18666_vm4 = vmmov %vm18660_vm1  ;;  %v1773_v63 = vadd.f32 %v10120_v24, %v9662_v29  ;;  %v18729_v24 = vld [vmem:[#allocation64_spill] sm:$0xff]  ;;  %v18778_v51 = vld [vmem:[#allocation69_spill] sm:$0xff] }
 0x275   :  { %10007 = vmatmul.mubr.msk.f32.gmra.mrb[28].mxu0 %vm18666_vm4, %v1771_v2  ;;  %vm12161_vm5 = vmor %vm437_vm0, %vm18668_vm11  ;;  %vm1518_vm4 = vcmp.eq.f32.partialorder %v11139_v61, %v1360_v15  ;;  %vm436_vm11 = vcmp.eq.f32.partialorder %v11139_v61, %v18676_v49  ;;  %v18710_v2 = vld [vmem:[#allocation61_spill] sm:$0xff]  ;;  %v18725_v15 = vld [vmem:[#allocation126_spill] sm:$0xff] }
 0x276   :  { %vm12170_vm2 = vmor %vm12020_vm10, %vm18671_vm14  ;;  %vm18675_vm10 = vcmp.eq.f32.partialorder %v11139_v61, %v11063_v31  ;;  %v9664_v31 = vsel %vm12150_vm7, 1.0, %v18415_v50 }
 0x277   :  { %vm1201_vm1 = vmor %vm12037_vm12, %vm18675_vm10  ;;  %vm18677_vm10 = vcmask 261120   ;;  %v1392_v21 = vpop.permute.xlu1 %1391 }
 0x278   :  { %vm1582_vm12 = vmor %vm12170_vm2, %vm1518_vm4  ;;  %10009 = vmatprep.mubr.msk.f32.mxu0 %vm18677_vm10, %v1772_v18  ;;  %vm758_vm2 = vcmp.eq.f32.partialorder %v11139_v61, %v18684_v10  ;;  %vm18685_vm4 = vcmp.eq.f32.partialorder %v11139_v61, %v18674_v25  ;;  %v1404_v18 = vpop.permute.xlu0 %1403  ;;  %v18727_v25 = vld [vmem:[#allocation63_spill] sm:$0xff] }
 0x279   :  { %vm12206_vm0 = vmor %vm436_vm11, %vm756_vm15  ;;  %v9663_v62 = vsel %vm1582_vm12, 1.0, %v18415_v50  ;;  %vm1523_vm11 = vcmp.eq.f32.partialorder %v11139_v61, %v1380_v6  ;;  %vm441_vm12 = vcmp.eq.f32.partialorder %v11139_v61, %v18695_v47  ;;  %v10144_v47 = vld [vmem:[%s17572_s0 + $0x1b8] sm:$0xff] }
 0x27a   :  { %vm12212_vm14 = vmor %vm1201_vm1, %vm1521_vm8  ;;  %vm18688_vm8 = vcmp.eq.f32.partialorder %v11139_v61, %v11053_v26  ;;  %v1774_v20 = vadd.f32 %v10121_v56, %v9663_v62  ;;  %v10122_v26 = vld [vmem:[%s17572_s0 + $0x108] sm:$0xff]  ;;  %v10127_v62 = vld [vmem:[%s17572_s0 + $0x130] sm:$0xff] }
 0x27b   :  { %vm18683_vm7 = vmmov %vm18677_vm10  ;;  %v1775_v53 = vadd.f32 %v10122_v26, %v9664_v31  ;;  %v18744_v56 = vld [vmem:[#allocation65_spill] sm:$0xff] }
 0x27c   :  { %10010 = vmatmul.mubr.msk.f32.gmra.mrb[30].mxu0 %vm18683_vm7, %v1773_v63  ;;  %vm12223_vm15 = vmor %vm439_vm9, %vm18685_vm4  ;;  %vm1520_vm7 = vcmp.eq.f32.partialorder %v11139_v61, %v1368_v58  ;;  %vm438_vm4 = vcmp.eq.f32.partialorder %v11139_v61, %v18693_v27  ;;  %v1412_v60 = vpop.permute.xlu0 %1411  ;;  %v18742_v58 = vld [vmem:[#allocation128_spill] sm:$0xff]  ;;  %v18752_v27 = vld [vmem:[#allocation127_spill] sm:$0xff] }
 0x27d   :  { %vm12232_vm1 = vmor %vm12082_vm6, %vm18688_vm8  ;;  %vm18692_vm6 = vcmp.eq.f32.partialorder %v11139_v61, %v11069_v33  ;;  %v9666_v33 = vsel %vm12212_vm14, 1.0, %v18415_v50  ;;  %v18793_v63 = vld [vmem:[#allocation133_spill] sm:$0xff] }
 0x27e   :  { %vm1203_vm10 = vmor %vm12099_vm3, %vm18692_vm6  ;;  %vm18694_vm6 = vcmask 261120   ;;  %v18813_v26 = vld [vmem:[#allocation73_spill] sm:$0xff] }
 0x27f   :  { %vm1584_vm3 = vmor %vm12232_vm1, %vm1520_vm7  ;;  %10012 = vmatprep.mubr.msk.f32.mxu1 %vm18694_vm6, %v1774_v20  ;;  %vm760_vm1 = vcmp.eq.f32.partialorder %v11139_v61, %v18701_v59  ;;  %vm18702_vm7 = vcmp.eq.f32.partialorder %v11139_v61, %v18691_v44  ;;  %v18746_v20 = vld [vmem:[#allocation66_spill] sm:$0xff] }
 0x280   :  { %vm12268_vm9 = vmor %vm438_vm4, %vm758_vm2  ;;  %v9665_v11 = vsel %vm1584_vm3, 1.0, %v18415_v50  ;;  %vm1525_vm4 = vcmp.eq.f32.partialorder %v11139_v61, %v1388_v17  ;;  %vm443_vm3 = vcmp.eq.f32.partialorder %v11139_v61, %v18712_v1  ;;  %v1420_v59 = vpop.permute.xlu0 %1419 }
 0x281   :  { %vm12274_vm8 = vmor %vm1203_vm10, %vm1523_vm11  ;;  %vm18705_vm11 = vcmp.eq.f32.partialorder %v11139_v61, %v11059_v28  ;;  %v1776_v8 = vadd.f32 %v10123_v57, %v9665_v11  ;;  %v10124_v28 = vld [vmem:[%s17572_s0 + $0x118] sm:$0xff]  ;;  %v1400_v11 = vpop.permute.xlu1 %1399  ;;  %v18761_v57 = vld [vmem:[#allocation67_spill] sm:$0xff] }
 0x282   :  { %vm18700_vm14 = vmmov %vm18694_vm6  ;;  %v1777_v22 = vadd.f32 %v10124_v28, %v9666_v33  ;;  %v18769_v28 = vld [vmem:[#allocation129_spill] sm:$0xff]  ;;  %v18883_v33 = vld [vmem:[#allocation142_spill] sm:$0xff] }
 0x283   :  { %10013 = vmatmul.mubr.msk.f32.vlgmr.msra.gmra.mrb[0].mxu1 %vm18700_vm14, %v1775_v53  ;;  %vm12285_vm2 = vmor %vm441_vm12, %vm18702_vm7  ;;  %vm1522_vm14 = vcmp.eq.f32.partialorder %v11139_v61, %v1376_v23  ;;  %vm440_vm7 = vcmp.eq.f32.partialorder %v11139_v61, %v18710_v2  ;;  %v10138_v23 = vld [vmem:[%s17572_s0 + $0x188] sm:$0xff]  ;;  %v18835_v2 = vld [vmem:[#allocation76_spill] sm:$0xff] }
 0x284   :  { %vm12294_vm10 = vmor %vm12144_vm13, %vm18705_vm11  ;;  %vm18709_vm13 = vcmp.eq.f32.partialorder %v11139_v61, %v11075_v35  ;;  %v9668_v35 = vsel %vm12274_vm8, 1.0, %v18415_v50  ;;  %v1428_v5 = vpop.permute.xlu0 %1427 }
 0x285   :  { %vm1205_vm6 = vmor %vm12161_vm5, %vm18709_vm13  ;;  %vm18711_vm13 = vcmask 261120   ;;  %v1408_v29 = vpop.permute.xlu1 %1407 }
 0x286   :  { %vm1586_vm5 = vmor %vm12294_vm10, %vm1522_vm14  ;;  %10015 = vmatprep.mubr.msk.f32.mxu1 %vm18711_vm13, %v1776_v8  ;;  %vm762_vm10 = vcmp.eq.f32.partialorder %v11139_v61, %v18718_v7  ;;  %vm18719_vm14 = vcmp.eq.f32.partialorder %v11139_v61, %v18708_v12  ;;  %v18763_v8 = vld [vmem:[#allocation68_spill] sm:$0xff] }
 0x287   :  { %vm12330_vm12 = vmor %vm440_vm7, %vm760_vm1  ;;  %v9667_v19 = vsel %vm1586_vm5, 1.0, %v18415_v50  ;;  %vm1527_vm7 = vcmp.eq.f32.partialorder %v11139_v61, %v1396_v4  ;;  %vm445_vm5 = vcmp.eq.f32.partialorder %v11139_v61, %v18729_v24 }
 0x288   :  { %vm12336_vm11 = vmor %vm1205_vm6, %vm1525_vm4  ;;  %vm18722_vm4 = vcmp.eq.f32.partialorder %v11139_v61, %v11065_v30  ;;  %v1778_v46 = vadd.f32 %v10125_v9, %v9667_v19  ;;  %v10126_v30 = vld [vmem:[%s17572_s0 + $0x128] sm:$0xff]  ;;  %v18776_v19 = vld [vmem:[#allocation132_spill] sm:$0xff]  ;;  %v1436_v24 = vpop.permute.xlu0 %1435 }
 0x289   :  { %vm18717_vm8 = vmmov %vm18711_vm13  ;;  %v1779_v6 = vadd.f32 %v10126_v30, %v9668_v35  ;;  %v10131_v35 = vld [vmem:[%s17572_s0 + $0x150] sm:$0xff]  ;;  %v18852_v30 = vld [vmem:[#allocation143_spill] sm:$0xff] }
 0x28a   :  { %10016 = vmatmul.mubr.msk.f32.gmra.mrb[2].mxu1 %vm18717_vm8, %v1777_v22  ;;  %vm12347_vm1 = vmor %vm443_vm3, %vm18719_vm14  ;;  %vm1524_vm8 = vcmp.eq.f32.partialorder %v11139_v61, %v1384_v48  ;;  %vm442_vm14 = vcmp.eq.f32.partialorder %v11139_v61, %v18727_v25  ;;  %v18848_v9 = vld [vmem:[#allocation136_spill] sm:$0xff] }
 0x28b   :  { %vm12356_vm6 = vmor %vm12206_vm0, %vm18722_vm4  ;;  %vm18726_vm0 = vcmp.eq.f32.partialorder %v11139_v61, %v11081_v37  ;;  %v9670_v37 = vsel %vm12336_vm11, 1.0, %v18415_v50 }
 0x28c   :  { %vm1207_vm13 = vmor %vm12223_vm15, %vm18726_vm0  ;;  %vm18728_vm0 = vcmask 261120  }
 0x28d   :  { %vm1588_vm15 = vmor %vm12356_vm6, %vm1524_vm8  ;;  %10018 = vmatprep.mubr.msk.f32.mxu1 %vm18728_vm0, %v1778_v46  ;;  %vm764_vm6 = vcmp.eq.f32.partialorder %v11139_v61, %v18735_v54  ;;  %vm18736_vm8 = vcmp.eq.f32.partialorder %v11139_v61, %v18725_v15  ;;  %v18797_v54 = vld [vmem:[#allocation72_spill] sm:$0xff]  ;;  %v18849_v46 = vld [vmem:[#allocation3_spill] sm:$0xff] }
 0x28e   :  { %vm12392_vm3 = vmor %vm442_vm14, %vm762_vm10  ;;  %v9669_v31 = vsel %vm1588_vm15, 1.0, %v18415_v50  ;;  %vm1529_vm14 = vcmp.eq.f32.partialorder %v11139_v61, %v1404_v18  ;;  %vm447_vm15 = vcmp.eq.f32.partialorder %v11139_v61, %v18746_v20  ;;  %v18786_v18 = vld [vmem:[#allocation131_spill] sm:$0xff]  ;;  %v18811_v20 = vld [vmem:[#allocation140_spill] sm:$0xff] }
 0x28f   :  { %vm12398_vm4 = vmor %vm1207_vm13, %vm1527_vm7  ;;  %vm18739_vm7 = vcmp.eq.f32.partialorder %v11139_v61, %v11071_v32  ;;  %v1780_v10 = vadd.f32 %v10127_v62, %v9669_v31  ;;  %v10128_v32 = vld [vmem:[%s17572_s0 + $0x138] sm:$0xff]  ;;  %v18795_v31 = vld [vmem:[#allocation71_spill] sm:$0xff] }
 0x290   :  { %vm18734_vm11 = vmmov %vm18728_vm0  ;;  %v1781_v17 = vadd.f32 %v10128_v32, %v9670_v37  ;;  %v1416_v37 = vpop.permute.xlu1 %1415  ;;  %v18851_v15 = vld [vmem:[#allocation77_spill] sm:$0xff] }
 0x291   :  { %10019 = vmatmul.mubr.msk.f32.gmra.mrb[4].mxu1 %vm18734_vm11, %v1779_v6  ;;  %vm12409_vm10 = vmor %vm445_vm5, %vm18736_vm8  ;;  %vm1526_vm11 = vcmp.eq.f32.partialorder %v11139_v61, %v1392_v21  ;;  %vm444_vm8 = vcmp.eq.f32.partialorder %v11139_v61, %v18744_v56  ;;  %v10133_v6 = vld [vmem:[%s17572_s0 + $0x160] sm:$0xff]  ;;  %v1444_v56 = vpop.permute.xlu0 %1443  ;;  %v10142_v21 = vld [vmem:[%s17572_s0 + $0x1a8] sm:$0xff] }
 0x292   :  { %vm12418_vm13 = vmor %vm12268_vm9, %vm18739_vm7  ;;  %vm18743_vm9 = vcmp.eq.f32.partialorder %v11139_v61, %v11087_v39  ;;  %v9672_v39 = vsel %vm12398_vm4, 1.0, %v18415_v50 }
 0x293   :  { %vm1209_vm0 = vmor %vm12285_vm2, %vm18743_vm9  ;;  %vm18745_vm9 = vcmask 261120  }
 0x294   :  { %vm1590_vm2 = vmor %vm12418_vm13, %vm1526_vm11  ;;  %10021 = vmatprep.mubr.msk.f32.mxu1 %vm18745_vm9, %v1780_v10  ;;  %vm766_vm13 = vcmp.eq.f32.partialorder %v11139_v61, %v18752_v27  ;;  %vm18753_vm11 = vcmp.eq.f32.partialorder %v11139_v61, %v18742_v58  ;;  %v18803_v10 = vld [vmem:[#allocation4_spill] sm:$0xff]  ;;  %v18816_v27 = vld [vmem:[#allocation74_spill] sm:$0xff] }
 0x295   :  { %vm12454_vm5 = vmor %vm444_vm8, %vm764_vm6  ;;  %v9671_v53 = vsel %vm1590_vm2, 1.0, %v18415_v50  ;;  %vm1531_vm8 = vcmp.eq.f32.partialorder %v11139_v61, %v1412_v60  ;;  %vm449_vm2 = vcmp.eq.f32.partialorder %v11139_v61, %v18763_v8  ;;  %v10135_v58 = vld [vmem:[%s17572_s0 + $0x170] sm:$0xff]  ;;  %v18830_v8 = vld [vmem:[#allocation2_spill] sm:$0xff] }
 0x296   :  { %vm12460_vm7 = vmor %vm1209_vm0, %vm1529_vm14  ;;  %vm18756_vm14 = vcmp.eq.f32.partialorder %v11139_v61, %v11077_v34  ;;  %v1782_v52 = vadd.f32 %v10129_v45, %v9671_v53  ;;  %v10130_v34 = vld [vmem:[%s17572_s0 + $0x148] sm:$0xff]  ;;  %v18814_v53 = vld [vmem:[#allocation5_spill] sm:$0xff] }
 0x297   :  { %vm18751_vm4 = vmmov %vm18745_vm9  ;;  %v1783_v16 = vadd.f32 %v10130_v34, %v9672_v39  ;;  %v18810_v39 = vld [vmem:[#allocation134_spill] sm:$0xff] }
 0x298   :  { %10022 = vmatmul.mubr.msk.f32.gmra.mrb[6].mxu1 %vm18751_vm4, %v1781_v17  ;;  %vm12471_vm6 = vmor %vm447_vm15, %vm18753_vm11  ;;  %vm1528_vm4 = vcmp.eq.f32.partialorder %v11139_v61, %v1400_v11  ;;  %vm446_vm11 = vcmp.eq.f32.partialorder %v11139_v61, %v18761_v57  ;;  %v1424_v17 = vpop.permute.xlu1 %1423  ;;  %v1452_v57 = vpop.permute.xlu0 %1451 }
 0x299   :  { %vm12480_vm0 = vmor %vm12330_vm12, %vm18756_vm14  ;;  %vm18760_vm12 = vcmp.eq.f32.partialorder %v11139_v61, %v11093_v41  ;;  %v9674_v41 = vsel %vm12460_vm7, 1.0, %v18415_v50 }
 0x29a   :  { %vm1211_vm9 = vmor %vm12347_vm1, %vm18760_vm12  ;;  %vm18762_vm12 = vcmask 261120  }
 0x29b   :  { %vm1592_vm1 = vmor %vm12480_vm0, %vm1528_vm4  ;;  %10024 = vmatprep.mubr.msk.f32.mxu1 %vm18762_vm12, %v1782_v52  ;;  %vm768_vm0 = vcmp.eq.f32.partialorder %v11139_v61, %v18769_v28  ;;  %vm18770_vm4 = vcmp.eq.f32.partialorder %v11139_v61, %v18759_v42  ;;  %v18822_v52 = vld [vmem:[#allocation6_spill] sm:$0xff]  ;;  %v18833_v28 = vld [vmem:[#allocation7_spill] sm:$0xff] }
 0x29c   :  { %vm12516_vm15 = vmor %vm446_vm11, %vm766_vm13  ;;  %v9673_v12 = vsel %vm1592_vm1, 1.0, %v18415_v50  ;;  %vm1533_vm11 = vcmp.eq.f32.partialorder %v11139_v61, %v1420_v59  ;;  %vm451_vm1 = vcmp.eq.f32.partialorder %v11139_v61, %v18780_v3  ;;  %v10137_v42 = vld [vmem:[%s17572_s0 + $0x180] sm:$0xff]  ;;  %v1460_v3 = vpop.permute.xlu0 %1459 }
 0x29d   :  { %vm12522_vm14 = vmor %vm1211_vm9, %vm1531_vm8  ;;  %vm18773_vm8 = vcmp.eq.f32.partialorder %v11139_v61, %v11083_v36  ;;  %v1784_v1 = vadd.f32 %v10131_v35, %v9673_v12  ;;  %v10132_v36 = vld [vmem:[%s17572_s0 + $0x158] sm:$0xff]  ;;  %v18832_v12 = vld [vmem:[#allocation75_spill] sm:$0xff] }
 0x29e   :  { %vm18768_vm7 = vmmov %vm18762_vm12  ;;  %v1785_v7 = vadd.f32 %v10132_v36, %v9674_v41  ;;  %v18829_v41 = vld [vmem:[#allocation135_spill] sm:$0xff] }
 0x29f   :  { %10025 = vmatmul.mubr.msk.f32.gmra.mrb[8].mxu1 %vm18768_vm7, %v1783_v16  ;;  %vm12533_vm13 = vmor %vm449_vm2, %vm18770_vm4  ;;  %vm1530_vm7 = vcmp.eq.f32.partialorder %v11139_v61, %v1408_v29  ;;  %vm448_vm4 = vcmp.eq.f32.partialorder %v11139_v61, %v18778_v51  ;;  %v1432_v16 = vpop.permute.xlu1 %1431 }
 0x2a0   :  { %vm12542_vm9 = vmor %vm12392_vm3, %vm18773_vm8  ;;  %vm18777_vm3 = vcmp.eq.f32.partialorder %v11139_v61, %v11099_v43  ;;  %v9676_v43 = vsel %vm12522_vm14, 1.0, %v18415_v50  ;;  %v1468_v14 = vpop.permute.xlu0 %1467 }
 0x2a1   :  { %vm1213_vm12 = vmor %vm12409_vm10, %vm18777_vm3  ;;  %vm18779_vm3 = vcmask 261120  }
 0x2a2   :  { %vm1594_vm10 = vmor %vm12542_vm9, %vm1530_vm7  ;;  %10027 = vmatprep.mubr.msk.f32.mxu1 %vm18779_vm3, %v1784_v1  ;;  %vm770_vm9 = vcmp.eq.f32.partialorder %v11139_v61, %v18786_v18  ;;  %vm18787_vm7 = vcmp.eq.f32.partialorder %v11139_v61, %v18776_v19  ;;  %v18892_v1 = vld [vmem:[#allocation12_spill] sm:$0xff]  ;;  %v18894_v19 = vld [vmem:[#allocation145_spill] sm:$0xff] }
 0x2a3   :  { %vm12578_vm2 = vmor %vm448_vm4, %vm768_vm0  ;;  %v9675_v48 = vsel %vm1594_vm10, 1.0, %v18415_v50  ;;  %vm1535_vm4 = vcmp.eq.f32.partialorder %v11139_v61, %v1428_v5  ;;  %vm453_vm10 = vcmp.eq.f32.partialorder %v11139_v61, %v18797_v54  ;;  %v18841_v5 = vld [vmem:[#allocation8_spill] sm:$0xff] }
 0x2a4   :  { %vm12584_vm8 = vmor %vm1213_vm12, %vm1533_vm11  ;;  %vm18790_vm11 = vcmp.eq.f32.partialorder %v11139_v61, %v11089_v38  ;;  %v1786_v25 = vadd.f32 %v10133_v6, %v9675_v48  ;;  %v10134_v38 = vld [vmem:[%s17572_s0 + $0x168] sm:$0xff]  ;;  %v10140_v48 = vld [vmem:[%s17572_s0 + $0x198] sm:$0xff] }
 0x2a5   :  { %vm18785_vm14 = vmmov %vm18779_vm3  ;;  %v1787_v49 = vadd.f32 %v10134_v38, %v9676_v43  ;;  %v1440_v43 = vpop.permute.xlu1 %1439  ;;  %v18860_v38 = vld [vmem:[#allocation10_spill] sm:$0xff] }
 0x2a6   :  { %10028 = vmatmul.mubr.msk.f32.gmra.mrb[10].mxu1 %vm18785_vm14, %v1785_v7  ;;  %vm12595_vm0 = vmor %vm451_vm1, %vm18787_vm7  ;;  %vm1532_vm14 = vcmp.eq.f32.partialorder %v11139_v61, %v1416_v37  ;;  %vm450_vm7 = vcmp.eq.f32.partialorder %v11139_v61, %v18795_v31  ;;  %v10139_v7 = vld [vmem:[%s17572_s0 + $0x190] sm:$0xff] }
 0x2a7   :  { %vm12604_vm12 = vmor %vm12454_vm5, %vm18790_vm11  ;;  %vm18794_vm5 = vcmp.eq.f32.partialorder %v11139_v61, %v11105_v55  ;;  %v9678_v55 = vsel %vm12584_vm8, 1.0, %v18415_v50 }
 0x2a8   :  { %vm1215_vm3 = vmor %vm12471_vm6, %vm18794_vm5  ;;  %vm18796_vm5 = vcmask 261120  }
 0x2a9   :  { %vm1596_vm6 = vmor %vm12604_vm12, %vm1532_vm14  ;;  %10030 = vmatprep.mubr.msk.f32.mxu1 %vm18796_vm5, %v1786_v25  ;;  %vm772_vm12 = vcmp.eq.f32.partialorder %v11139_v61, %v18803_v10  ;;  %vm18804_vm14 = vcmp.eq.f32.partialorder %v11139_v61, %v18793_v63  ;;  %v18854_v25 = vld [vmem:[#allocation13_spill] sm:$0xff]  ;;  %v1448_v13 = vpop.permute.xlu1 %1447 }
 0x2aa   :  { %vm12640_vm1 = vmor %vm450_vm7, %vm770_vm9  ;;  %v9677_v62 = vsel %vm1596_vm6, 1.0, %v18415_v50  ;;  %vm1537_vm7 = vcmp.eq.f32.partialorder %v11139_v61, %v1436_v24  ;;  %vm455_vm6 = vcmp.eq.f32.partialorder %v11139_v61, %v18816_v27  ;;  %v18868_v10 = vld [vmem:[#allocation141_spill] sm:$0xff]  ;;  %v1476_v27 = vpop.permute.xlu0 %1475 }
 0x2ab   :  { %vm12646_vm11 = vmor %vm1215_vm3, %vm1535_vm4  ;;  %vm18807_vm4 = vcmp.eq.f32.partialorder %v11139_v61, %v11095_v40  ;;  %v1788_v32 = vadd.f32 %v10135_v58, %v9677_v62  ;;  %v10136_v40 = vld [vmem:[%s17572_s0 + $0x178] sm:$0xff]  ;;  %v18870_v58 = vld [vmem:[#allocation78_spill] sm:$0xff] }
 0x2ac   :  { %vm18802_vm8 = vmmov %vm18796_vm5  ;;  %v1789_v44 = vadd.f32 %v10136_v40, %v9678_v55  ;;  %v10141_v55 = vld [vmem:[%s17572_s0 + $0x1a0] sm:$0xff]  ;;  %v18867_v62 = vld [vmem:[#allocation137_spill] sm:$0xff] }
 0x2ad   :  { %10031 = vmatmul.mubr.msk.f32.gmra.mrb[12].mxu1 %vm18802_vm8, %v1787_v49  ;;  %vm12657_vm9 = vmor %vm453_vm10, %vm18804_vm14  ;;  %vm1534_vm8 = vcmp.eq.f32.partialorder %v11139_v61, %v1424_v17  ;;  %vm452_vm14 = vcmp.eq.f32.partialorder %v11139_v61, %v18813_v26  ;;  %v10143_v26 = vld [vmem:[%s17572_s0 + $0x1b0] sm:$0xff] }
 0x2ae   :  { %vm12666_vm3 = vmor %vm12516_vm15, %vm18807_vm4  ;;  %vm18812_vm15 = vcmp.eq.f32.partialorder %v11139_v61, %v11111_v0  ;;  %v9680_v0 = vsel %vm12646_vm11, 1.0, %v18415_v50 }
 0x2af   :  { %vm1217_vm5 = vmor %vm12533_vm13, %vm18812_vm15  ;;  %vm18815_vm15 = vcmask 261120   ;;  %v1791_v4 = vadd.f32 %v10138_v23, %v9680_v0  ;;  %v1456_v0 = vpop.permute.xlu1 %1455  ;;  %v1484_v23 = vpop.permute.xlu0 %1483 }
 0x2b0   :  { %vm1598_vm13 = vmor %vm12666_vm3, %vm1534_vm8  ;;  %10033 = vmatprep.mubr.msk.f32.mxu1 %vm18815_vm15, %v1788_v32  ;;  %vm774_vm3 = vcmp.eq.f32.partialorder %v11139_v61, %v18822_v52  ;;  %vm18823_vm8 = vcmp.eq.f32.partialorder %v11139_v61, %v18810_v39  ;;  %v18871_v32 = vld [vmem:[#allocation11_spill] sm:$0xff]  ;;  %v18885_v52 = vld [vmem:[#allocation80_spill] sm:$0xff] }
 0x2b1   :  { %vm12702_vm10 = vmor %vm452_vm14, %vm772_vm12  ;;  %v9679_v45 = vsel %vm1598_vm13, 1.0, %v18415_v50  ;;  %vm1539_vm14 = vcmp.eq.f32.partialorder %v11139_v61, %v1444_v56  ;;  %vm457_vm13 = vcmp.eq.f32.partialorder %v11139_v61, %v18835_v2  ;;  %v18873_v56 = vld [vmem:[#allocation14_spill] sm:$0xff] }
 0x2b2   :  { %vm12708_vm4 = vmor %vm1217_vm5, %vm1537_vm7  ;;  %vm18826_vm7 = vcmp.eq.f32.partialorder %v11139_v61, %v18811_v20  ;;  %v1790_v34 = vadd.f32 %v10137_v42, %v9679_v45  ;;  %v10145_v42 = vld [vmem:[%s17572_s0 + $0x1c0] sm:$0xff] }
 0x2b3   :  { %vm18821_vm11 = vmmov %vm18815_vm15  ;;  %v9682_v22 = vsel %vm12708_vm4, 1.0, %v18415_v50 }
 0x2b4   :  { %10034 = vmatmul.mubr.msk.f32.gmra.mrb[14].mxu1 %vm18821_vm11, %v1789_v44  ;;  %vm12719_vm12 = vmor %vm455_vm6, %vm18823_vm8  ;;  %vm1536_vm11 = vcmp.eq.f32.partialorder %v11139_v61, %v1432_v16  ;;  %vm454_vm8 = vcmp.eq.f32.partialorder %v11139_v61, %v18832_v12  ;;  %v1793_v18 = vadd.f32 %v10140_v48, %v9682_v22  ;;  %v18880_v44 = vmov 0  ;;  %v1464_v16 = vpop.permute.xlu1 %1463  ;;  %v10147_v22 = vld [vmem:[%s17572_s0 + $0x1d0] sm:$0xff] }
 0x2b5   :  { %vm12728_vm5 = vmor %vm12578_vm2, %vm18826_vm7  ;;  %vm18831_vm2 = vcmp.eq.f32.partialorder %v11139_v61, %v18814_v53 }
 0x2b6   :  { %vm1219_vm15 = vmor %vm12595_vm0, %vm18831_vm2  ;;  %vm18834_vm2 = vcmask 261120  }
 0x2b7   :  { %vm1600_vm0 = vmor %vm12728_vm5, %vm1536_vm11  ;;  %10036 = vmatprep.mubr.msk.f32.mxu1 %vm18834_vm2, %v1790_v34  ;;  %vm776_vm5 = vcmp.eq.f32.partialorder %v11139_v61, %v18841_v5  ;;  %vm18842_vm11 = vcmp.eq.f32.partialorder %v11139_v61, %v18829_v41  ;;  %v10146_v41 = vld [vmem:[%s17572_s0 + $0x1c8] sm:$0xff] }
 0x2b8   :  { %vm12764_vm6 = vmor %vm454_vm8, %vm774_vm3  ;;  %v9681_v29 = vsel %vm1600_vm0, 1.0, %v18415_v50  ;;  %vm1541_vm8 = vcmp.eq.f32.partialorder %v11139_v61, %v1452_v57  ;;  %vm459_vm0 = vcmp.eq.f32.partialorder %v11139_v61, %v18854_v25  ;;  %v18888_v57 = vld [vmem:[#allocation144_spill] sm:$0xff]  ;;  %v1472_v35 = vpop.permute.xlu1 %1471  ;;  %v10152_v25 = vld [vmem:[%s17572_s0 + $0x1f8] sm:$0xff] }
 0x2b9   :  { %vm12770_vm7 = vmor %vm1219_vm15, %vm1539_vm14  ;;  %vm18845_vm14 = vcmp.eq.f32.partialorder %v11139_v61, %v18830_v8  ;;  %v1792_v51 = vadd.f32 %v10139_v7, %v9681_v29  ;;  %v10148_v29 = vld [vmem:[%s17572_s0 + $0x1d8] sm:$0xff]  ;;  %v18896_v7 = vld [vmem:[#allocation79_spill] sm:$0xff] }
 0x2ba   :  { %vm18840_vm4 = vmmov %vm18834_vm2  ;;  %v9684_v6 = vsel %vm12770_vm7, 1.0, %v18415_v50 }
 0x2bb   :  { %10037 = vmatmul.mubr.msk.f32.gmra.mrb[16].mxu1 %vm18840_vm4, %v1791_v4  ;;  %vm12781_vm3 = vmor %vm457_vm13, %vm18842_vm11  ;;  %vm1538_vm4 = vcmp.eq.f32.partialorder %v11139_v61, %v1440_v43  ;;  %vm456_vm11 = vcmp.eq.f32.partialorder %v11139_v61, %v18851_v15  ;;  %v1795_v60 = vadd.f32 %v10142_v21, %v9684_v6  ;;  %v18889_v4 = vld [vmem:[#allocation19_spill] sm:$0xff]  ;;  %v10149_v43 = vld [vmem:[%s17572_s0 + $0x1e0] sm:$0xff] }
 0x2bc   :  { %vm12790_vm15 = vmor %vm12640_vm1, %vm18845_vm14  ;;  %vm18850_vm1 = vcmp.eq.f32.partialorder %v11139_v61, %v18833_v28 }
 0x2bd   :  { %vm1221_vm2 = vmor %vm12657_vm9, %vm18850_vm1  ;;  %vm18853_vm1 = vcmask 261120  }
 0x2be   :  { %vm1602_vm9 = vmor %vm12790_vm15, %vm1538_vm4  ;;  %10039 = vmatprep.mubr.msk.f32.mxu1 %vm18853_vm1, %v1792_v51  ;;  %vm778_vm15 = vcmp.eq.f32.partialorder %v11139_v61, %v18860_v38  ;;  %vm18861_vm4 = vcmp.eq.f32.partialorder %v11139_v61, %v18848_v9  ;;  %v1480_v9 = vpop.permute.xlu1 %1479 }
 0x2bf   :  { %vm12826_vm13 = vmor %vm456_vm11, %vm776_vm5  ;;  %v9683_v63 = vsel %vm1602_vm9, 1.0, %v18415_v50  ;;  %vm1543_vm11 = vcmp.eq.f32.partialorder %v11139_v61, %v1460_v3  ;;  %vm461_vm9 = vcmp.eq.f32.partialorder %v11139_v61, %v18873_v56 }
 0x2c0   :  { %vm12832_vm14 = vmor %vm1221_vm2, %vm1541_vm8  ;;  %vm18864_vm8 = vcmp.eq.f32.partialorder %v11139_v61, %v18849_v46  ;;  %v1794_v54 = vadd.f32 %v10141_v55, %v9683_v63  ;;  %v10150_v46 = vld [vmem:[%s17572_s0 + $0x1e8] sm:$0xff] }
 0x2c1   :  { %vm18859_vm7 = vmmov %vm18853_vm1  ;;  %v9686_v17 = vsel %vm12832_vm14, 1.0, %v18415_v50 }
 0x2c2   :  { %10040 = vmatmul.mubr.msk.f32.gmra.mrb[18].mxu1 %vm18859_vm7, %v1793_v18  ;;  %vm12843_vm5 = vmor %vm459_vm0, %vm18861_vm4  ;;  %vm1540_vm7 = vcmp.eq.f32.partialorder %v11139_v61, %v1448_v13  ;;  %vm458_vm4 = vcmp.eq.f32.partialorder %v11139_v61, %v18870_v58  ;;  %v1797_v45 = vadd.f32 %v10144_v47, %v9686_v17 }
 0x2c3   :  { %vm12852_vm2 = vmor %vm12702_vm10, %vm18864_vm8  ;;  %vm18869_vm10 = vcmp.eq.f32.partialorder %v11139_v61, %v18852_v30  ;;  %v10151_v30 = vld [vmem:[%s17572_s0 + $0x1f0] sm:$0xff] }
 0x2c4   :  { %vm1223_vm1 = vmor %vm12719_vm12, %vm18869_vm10  ;;  %vm18872_vm10 = vcmask 261120  }
 0x2c5   :  { %vm1604_vm12 = vmor %vm12852_vm2, %vm1540_vm7  ;;  %10042 = vmatprep.mubr.msk.f32.mxu1 %vm18872_vm10, %v1794_v54  ;;  %vm18879_vm2 = vcmp.eq.f32.partialorder %v11139_v61, %v18867_v62 }
 0x2c6   :  { %vm12888_vm0 = vmor %vm458_vm4, %vm778_vm15  ;;  %v9685_v40 = vsel %vm1604_vm12, 1.0, %v18415_v50  ;;  %vm18882_vm15 = vcmp.eq.f32.partialorder %v11139_v61, %v18868_v10  ;;  %vm18884_vm4 = vcmp.eq.f32.partialorder %v11139_v61, %v18871_v32 }
 0x2c7   :  { %vm12894_vm8 = vmor %vm1223_vm1, %vm1543_vm11  ;;  %v1796_v53 = vadd.f32 %v10143_v26, %v9685_v40  ;;  %vm1545_vm1 = vcmp.eq.f32.partialorder %v11139_v61, %v1468_v14 }
 0x2c8   :  { %vm18878_vm14 = vmmov %vm18872_vm10  ;;  %vm1163_vm10 = vcmp.eq.f32.partialorder %v11139_v61, %v18885_v52  ;;  %v9688_v11 = vsel %vm12894_vm8, 1.0, %v18415_v50  ;;  %vm1162_vm8 = vcmp.eq.f32.partialorder %v11139_v61, %v18888_v57  ;;  %v10158_v57 = vmov 0  }
 0x2c9   :  { %10043 = vmatmul.mubr.msk.f32.gmra.mrb[20].mxu1 %vm18878_vm14, %v1795_v60  ;;  %vm12903_vm7 = vmor %vm461_vm9, %vm18879_vm2  ;;  %vm1160_vm9 = vcmp.eq.f32.partialorder %v11139_v61, %v18883_v33  ;;  %vm18886_vm2 = vcmask 261120   ;;  %v1799_v8 = vadd.f32 %v10146_v41, %v9688_v11  ;;  %10087 = vset.pattern.permute.xlu0 %v10158_v57 }
 0x2ca   :  { %v18881_v44 = vsel %vm12903_vm7, 4294967295, %v18880_v44  ;;  %vm1222_vm11 = vmor %vm12764_vm6, %vm18882_vm15  ;;  %vm1542_vm6 = vcmp.eq.f32.partialorder %v11139_v61, %v1456_v0  ;;  %10045 = vmatprep.mubr.msk.f32.mxu1 %vm18886_vm2, %v1796_v53  ;;  %vm1547_vm7 = vcmp.eq.f32.partialorder %v11139_v61, %v1476_v27  ;;  %10088 = vset.pattern.permute.xlu1 %v10158_v57 }
 0x2cb   :  { %vm1225_vm12 = vmor %vm12781_vm3, %vm18884_vm4 }
 0x2cc   :  { %vm1606_vm14 = vmor %vm1222_vm11, %vm1542_vm6 }
 0x2cd   :  { %vm1609_vm15 = vmor %vm1225_vm12, %vm1545_vm1  ;;  %v9687_v59 = vsel %vm1606_vm14, 1.0, %v18415_v50  ;;  %vm1165_vm1 = vcmp.eq.f32.partialorder %v11139_v61, %v18889_v4  ;;  %vm1549_vm14 = vcmp.eq.f32.partialorder %v11139_v61, %v1484_v23 }
 0x2ce   :  { %vm18887_vm3 = vmmov %vm18886_vm2  ;;  %v1798_v34 = vadd.f32 %v10145_v42, %v9687_v59  ;;  %v9690_v12 = vsel %vm1609_vm15, 1.0, %v18415_v50 }
 0x2cf   :  { %10046 = vmatmul.mubr.msk.f32.gmra.mrb[22].mxu1 %vm18887_vm3, %v1797_v45  ;;  %vm1224_vm4 = vmor %vm12826_vm13, %vm1160_vm9  ;;  %vm1544_vm13 = vcmp.eq.f32.partialorder %v11139_v61, %v1464_v16  ;;  %v1801_v5 = vadd.f32 %v10148_v29, %v9690_v12  ;;  %vm1164_vm3 = vcmp.eq.f32.partialorder %v11139_v61, %v18894_v19 }
 0x2d0   :  { %vm1227_vm11 = vmor %vm12843_vm5, %vm1163_vm10 }
 0x2d1   :  { %vm1608_vm9 = vmor %vm1224_vm4, %vm1544_vm13 }
 0x2d2   :  { %vm18890_vm12 = vmmov %vm18886_vm2  ;;  %v9689_v28 = vsel %vm1608_vm9, 1.0, %v18415_v50 }
 0x2d3   :  { %10048 = vmatprep.mubr.msk.f32.mxu1 %vm18890_vm12, %v1798_v34  ;;  %vm1611_vm6 = vmor %vm1227_vm11, %vm1547_vm7  ;;  %v1800_v2 = vadd.f32 %v10147_v22, %v9689_v28  ;;  %vm18893_vm7 = vnez %v18881_v44  ;;  %vm460_vm11 = vcmp.eq.f32.partialorder %v11139_v61, %v18896_v7 }
 0x2d4   :  { %vm18891_vm5 = vmmov %vm18886_vm2  ;;  %vm780_vm2 = vcmp.eq.f32.partialorder %v11139_v61, %v18892_v1  ;;  %v9692_v36 = vsel %vm1611_vm6, 1.0, %v18415_v50  ;;  %vm1548_vm6 = vcmp.eq.f32.partialorder %v11139_v61, %v1480_v9 }
 0x2d5   :  { %10049 = vmatmul.mubr.msk.f32.gmra.mrb[24].mxu1 %vm18891_vm5, %v1799_v8  ;;  %vm1226_vm10 = vmor %vm12888_vm0, %vm1162_vm8  ;;  %vm1546_vm0 = vcmp.eq.f32.partialorder %v11139_v61, %v1472_v35  ;;  %v1803_v48 = vadd.f32 %v10150_v46, %v9692_v36  ;;  %v12999_v61 = vld [vmem:[%s17573_s1 + $0x20] ss:$0 sm:$0xff] }
 0x2d6   :  { %vm1229_vm15 = vmor %vm18893_vm7, %vm1165_vm1 }
 0x2d7   :  { %vm1610_vm4 = vmor %vm1226_vm10, %vm1546_vm0  ;;  %vm9267_vm0 = vcmask 195712  }
 0x2d8   :  { %vm18895_vm8 = vmmov %vm18891_vm5  ;;  %v9691_v51 = vsel %vm1610_vm4, 1.0, %v18415_v50  ;;  %vm9281_vm4 = vcmask 326912  }
 0x2d9   :  { %10051 = vmatprep.mubr.msk.f32.mxu1 %vm18895_vm8, %v1800_v2  ;;  %vm1613_vm13 = vmor %vm1229_vm15, %vm1549_vm14  ;;  %v1802_v3 = vadd.f32 %v10149_v43, %v9691_v51  ;;  %vm9260_vm15 = vcmask 130112   ;;  %vm9288_vm8 = vcmask 392512  }
 0x2da   :  { %vm18897_vm1 = vmmov %vm18891_vm5  ;;  %v9694_v18 = vsel %vm1613_vm13, 1.0, %v18415_v50  ;;  %vm9302_vm13 = vcmask 523712  }
 0x2db   :  { %10052 = vmatmul.mubr.msk.f32.gmra.mrb[26].mxu1 %vm18897_vm1, %v1801_v5  ;;  %vm844_vm9 = vmor %vm460_vm11, %vm780_vm2  ;;  %v1805_v37 = vadd.f32 %v10152_v25, %v9694_v18  ;;  %vm9295_vm11 = vcmask 458112  }
 0x2dc   :  { %vm1228_vm12 = vmor %vm844_vm9, %vm1164_vm3  ;;  %vm9274_vm3 = vcmask 261312   ;;  %vm9316_vm9 = vcmask 654912  }
 0x2dd   :  { %vm1612_vm5 = vmor %vm1228_vm12, %vm1548_vm6  ;;  %vm9323_vm12 = vcmask 720512   ;;  %vm9330_vm6 = vcmask 786112  }
 0x2de   :  { %vm18898_vm10 = vmmov %vm18897_vm1  ;;  %v9693_v15 = vsel %vm1612_vm5, 1.0, %v18415_v50  ;;  %vm9337_vm5 = vcmask 851712  }
 0x2df   :  { %10054 = vmatprep.mubr.msk.f32.mxu1 %vm18898_vm10, %v1802_v3  ;;  %vm18899_vm14 = vmmov %vm18897_vm1  ;;  %v1804_v6 = vadd.f32 %v10151_v30, %v9693_v15  ;;  %vm9344_vm10 = vcmask 917312  }
 0x2e0   :  { %10055 = vmatmul.mubr.msk.f32.gmra.mrb[28].mxu1 %vm18899_vm14, %v1803_v48  ;;  %vm18900_vm2 = vmmov %vm18897_vm1  ;;  %vm9351_vm14 = vcmask 982912  }
 0x2e1   :  { %10057 = vmatprep.mubr.msk.f32.mxu1 %vm18900_vm2, %v1804_v6  ;;  %vm18901_vm7 = vmmov %vm18897_vm1  ;;  %v9966_v50 = vpop.f32.mrb[0].mxu0  ;;  %vm9309_vm1 = vcmask 589312   ;;  %vm9358_vm2 = vcmask 1048512  }
 0x2e2   :  { %v2389_v24 = vmax.f32 %v9966_v50, 0.0  ;;  %v2069_v63 = vpop.f32.mrb[1].mxu0 }
 0x2e3   :  { %v2388_v38 = vmax.f32 %v2069_v63, 0.0 }
 0x2e4   :  { %10058 = vmatmul.mubr.msk.f32.gmra.mrb[30].mxu1 %vm18901_vm7, %v1805_v37  ;;  %v2458_v49 = vmul.f32 %v12999_v61, %v2389_v24 }
 0x2e5   :  { %v2457_v31 = vmul.f32 %v12999_v61, %v2388_v38 }
 0x2e6   :  { %2523 = vadd.xlane.f32.xlu0 %v2458_v49 }
 0x2e7   :  { %2521 = vadd.xlane.f32.xlu1 %v2457_v31 }
 0x2ed   :  { %v9969_v55 = vpop.f32.mrb[2].mxu0 }
 0x2ee   :  { %v2391_v54 = vmax.f32 %v9969_v55, 0.0  ;;  %v2079_v13 = vpop.f32.mrb[3].mxu0 }
 0x2ef   :  { %v2390_v14 = vmax.f32 %v2079_v13, 0.0 }
 0x2f0   :  { %v2460_v62 = vmul.f32 %v12999_v61, %v2391_v54 }
 0x2f1   :  { %v2459_v10 = vmul.f32 %v12999_v61, %v2390_v14 }
 0x2f2   :  { %2527 = vadd.xlane.f32.xlu1 %v2460_v62 }
 0x2f3   :  { %2525 = vadd.xlane.f32.xlu0 %v2459_v10 }
 0x2f4   :  { %v9972_v21 = vpop.f32.mrb[4].mxu0 }
 0x2f5   :  { %v2393_v60 = vmax.f32 %v9972_v21, 0.0  ;;  %v2089_v58 = vpop.f32.mrb[5].mxu0 }
 0x2f6   :  { %v2392_v32 = vmax.f32 %v2089_v58, 0.0 }
 0x2f7   :  { %v2462_v17 = vmul.f32 %v12999_v61, %v2393_v60 }
 0x2f8   :  { %v2461_v56 = vmul.f32 %v12999_v61, %v2392_v32 }
 0x2f9   :  { %2531 = vadd.xlane.f32.xlu1 %v2462_v17 }
 0x2fa   :  { %2529 = vadd.xlane.f32.xlu0 %v2461_v56 }
 0x2fb   :  { %v9975_v39 = vpop.f32.mrb[6].mxu0 }
 0x2fc   :  { %v2395_v20 = vmax.f32 %v9975_v39, 0.0  ;;  %v2099_v40 = vpop.f32.mrb[7].mxu0 }
 0x2fd   :  { %v2394_v44 = vmax.f32 %v2099_v40, 0.0 }
 0x2fe   :  { %v2464_v26 = vmul.f32 %v12999_v61, %v2395_v20 }
 0x2ff   :  { %v2463_v53 = vmul.f32 %v12999_v61, %v2394_v44 }
 0x300   :  { %2535 = vadd.xlane.f32.xlu1 %v2464_v26 }
 0x301   :  { %2533 = vadd.xlane.f32.xlu0 %v2463_v53 }
 0x302   :  { %v9978_v0 = vpop.f32.mrb[8].mxu0 }
 0x303   :  { %v2397_v27 = vmax.f32 %v9978_v0, 0.0  ;;  %v2109_v33 = vpop.f32.mrb[9].mxu0 }
 0x304   :  { %v2396_v47 = vmax.f32 %v2109_v33, 0.0 }
 0x305   :  { %v2466_v45 = vmul.f32 %v12999_v61, %v2397_v27 }
 0x306   :  { %v2465_v52 = vmul.f32 %v12999_v61, %v2396_v47 }
 0x307   :  { %2539 = vadd.xlane.f32.xlu1 %v2466_v45 }
 0x308   :  { %2537 = vadd.xlane.f32.xlu0 %v2465_v52 }
 0x309   :  { %v9981_v11 = vpop.f32.mrb[10].mxu0 }
 0x30a   :  { %v2399_v59 = vmax.f32 %v9981_v11, 0.0  ;;  %v2119_v42 = vpop.f32.mrb[11].mxu0 }
 0x30b   :  { %v2398_v34 = vmax.f32 %v2119_v42, 0.0 }
 0x30c   :  { %v2468_v16 = vmul.f32 %v12999_v61, %v2399_v59 }
 0x30d   :  { %v2467_v41 = vmul.f32 %v12999_v61, %v2398_v34 }
 0x30e   :  { %2543 = vadd.xlane.f32.xlu1 %v2468_v16 }
 0x30f   :  { %2541 = vadd.xlane.f32.xlu0 %v2467_v41 }
 0x310   :  { %v9984_v8 = vpop.f32.mrb[12].mxu0 }
 0x311   :  { %v2401_v23 = vmax.f32 %v9984_v8, 0.0  ;;  %v2129_v4 = vpop.f32.mrb[13].mxu0 }
 0x312   :  { %v2400_v12 = vmax.f32 %v2129_v4, 0.0 }
 0x313   :  { %v2470_v28 = vmul.f32 %v12999_v61, %v2401_v23 }
 0x314   :  { %v2469_v22 = vmul.f32 %v12999_v61, %v2400_v12 }
 0x315   :  { %2547 = vadd.xlane.f32.xlu1 %v2470_v28 }
 0x316   :  { %2545 = vadd.xlane.f32.xlu0 %v2469_v22 }
 0x317   :  { %v9987_v2 = vpop.f32.mrb[14].mxu0 }
 0x318   :  { %v2403_v35 = vmax.f32 %v9987_v2, 0.0  ;;  %v2139_v1 = vpop.f32.mrb[15].mxu0 }
 0x319   :  { %v2402_v29 = vmax.f32 %v2139_v1, 0.0 }
 0x31a   :  { %v2472_v5 = vmul.f32 %v12999_v61, %v2403_v35 }
 0x31b   :  { %v2471_v19 = vmul.f32 %v12999_v61, %v2402_v29 }
 0x31c   :  { %2551 = vadd.xlane.f32.xlu1 %v2472_v5 }
 0x31d   :  { %2549 = vadd.xlane.f32.xlu0 %v2471_v19 }
 0x31e   :  { %v9990_v36 = vpop.f32.mrb[16].mxu0 }
 0x31f   :  { %v2405_v7 = vmax.f32 %v9990_v36, 0.0  ;;  %v2149_v51 = vpop.f32.mrb[17].mxu0 }
 0x320   :  { %v2404_v43 = vmax.f32 %v2149_v51, 0.0 }
 0x321   :  { %v2474_v3 = vmul.f32 %v12999_v61, %v2405_v7 }
 0x322   :  { %v2473_v9 = vmul.f32 %v12999_v61, %v2404_v43 }
 0x323   :  { %2555 = vadd.xlane.f32.xlu1 %v2474_v3 }
 0x324   :  { %2553 = vadd.xlane.f32.xlu0 %v2473_v9 }
 0x325   :  { %v9993_v46 = vpop.f32.mrb[18].mxu0 }
 0x326   :  { %v2407_v48 = vmax.f32 %v9993_v46, 0.0  ;;  %v2159_v18 = vpop.f32.mrb[19].mxu0 }
 0x327   :  { %v2406_v15 = vmax.f32 %v2159_v18, 0.0 }
 0x328   :  { %v2476_v30 = vmul.f32 %v12999_v61, %v2407_v48 }
 0x329   :  { %v2475_v6 = vmul.f32 %v12999_v61, %v2406_v15 }
 0x32a   :  { %2559 = vadd.xlane.f32.xlu1 %v2476_v30 }
 0x32b   :  { %2557 = vadd.xlane.f32.xlu0 %v2475_v6 }
 0x32c   :  { %v9996_v25 = vpop.f32.mrb[20].mxu0 }
 0x32d   :  { %v2409_v37 = vmax.f32 %v9996_v25, 0.0  ;;  %v2169_v50 = vpop.f32.mrb[21].mxu0 }
 0x32e   :  { %v2408_v24 = vmax.f32 %v2169_v50, 0.0 }
 0x32f   :  { %v2478_v63 = vmul.f32 %v12999_v61, %v2409_v37 }
 0x330   :  { %v2477_v38 = vmul.f32 %v12999_v61, %v2408_v24 }
 0x331   :  { %2563 = vadd.xlane.f32.xlu1 %v2478_v63 }
 0x332   :  { %2561 = vadd.xlane.f32.xlu0 %v2477_v38 }
 0x333   :  { %v9999_v49 = vpop.f32.mrb[22].mxu0 }
 0x334   :  { %v2411_v31 = vmax.f32 %v9999_v49, 0.0  ;;  %v2179_v55 = vpop.f32.mrb[23].mxu0 }
 0x335   :  { %v2410_v54 = vmax.f32 %v2179_v55, 0.0 }
 0x336   :  { %v2480_v13 = vmul.f32 %v12999_v61, %v2411_v31 }
 0x337   :  { %v2479_v14 = vmul.f32 %v12999_v61, %v2410_v54 }
 0x338   :  { %2567 = vadd.xlane.f32.xlu1 %v2480_v13 }
 0x339   :  { %2565 = vadd.xlane.f32.xlu0 %v2479_v14 }
 0x33a   :  { %v10002_v62 = vpop.f32.mrb[24].mxu0 }
 0x33b   :  { %v2413_v10 = vmax.f32 %v10002_v62, 0.0  ;;  %v2189_v21 = vpop.f32.mrb[25].mxu0 }
 0x33c   :  { %v2412_v60 = vmax.f32 %v2189_v21, 0.0 }
 0x33d   :  { %v2482_v58 = vmul.f32 %v12999_v61, %v2413_v10 }
 0x33e   :  { %v2481_v32 = vmul.f32 %v12999_v61, %v2412_v60 }
 0x33f   :  { %2571 = vadd.xlane.f32.xlu1 %v2482_v58 }
 0x340   :  { %2569 = vadd.xlane.f32.xlu0 %v2481_v32 }
 0x341   :  { %v10005_v17 = vpop.f32.mrb[26].mxu0 }
 0x342   :  { %v2415_v56 = vmax.f32 %v10005_v17, 0.0  ;;  %v2199_v39 = vpop.f32.mrb[27].mxu0 }
 0x343   :  { %v2414_v20 = vmax.f32 %v2199_v39, 0.0 }
 0x344   :  { %v2484_v40 = vmul.f32 %v12999_v61, %v2415_v56 }
 0x345   :  { %v2483_v44 = vmul.f32 %v12999_v61, %v2414_v20 }
 0x346   :  { %2575 = vadd.xlane.f32.xlu1 %v2484_v40 }
 0x347   :  { %2573 = vadd.xlane.f32.xlu0 %v2483_v44 }
 0x348   :  { %v10008_v26 = vpop.f32.mrb[28].mxu0 }
 0x349   :  { %v2417_v53 = vmax.f32 %v10008_v26, 0.0  ;;  %v2209_v0 = vpop.f32.mrb[29].mxu0 }
 0x34a   :  { %v2416_v27 = vmax.f32 %v2209_v0, 0.0 }
 0x34b   :  { %v2486_v33 = vmul.f32 %v12999_v61, %v2417_v53 }
 0x34c   :  { %v2485_v47 = vmul.f32 %v12999_v61, %v2416_v27 }
 0x34d   :  { %2579 = vadd.xlane.f32.xlu1 %v2486_v33 }
 0x34e   :  { %2577 = vadd.xlane.f32.xlu0 %v2485_v47 }
 0x34f   :  { %v10011_v45 = vpop.f32.mrb[30].mxu0 }
 0x350   :  { %v2419_v52 = vmax.f32 %v10011_v45, 0.0  ;;  %v2219_v11 = vpop.f32.mrb[31].mxu0 }
 0x351   :  { %v2418_v59 = vmax.f32 %v2219_v11, 0.0 }
 0x352   :  { %v2488_v42 = vmul.f32 %v12999_v61, %v2419_v52 }
 0x353   :  { %v2487_v34 = vmul.f32 %v12999_v61, %v2418_v59 }
 0x354   :  { %2583 = vadd.xlane.f32.xlu1 %v2488_v42 }
 0x355   :  { %2581 = vadd.xlane.f32.xlu0 %v2487_v34 }
 0x356   :  { %v10014_v16 = vpop.f32.mrb[0].mxu1 }
 0x357   :  { %v2421_v57 = vmax.f32 %v10014_v16, 0.0  ;;  %v2229_v41 = vpop.f32.mrb[1].mxu1 }
 0x358   :  { %v2420_v8 = vmax.f32 %v2229_v41, 0.0 }
 0x359   :  { %v2490_v23 = vmul.f32 %v12999_v61, %v2421_v57 }
 0x35a   :  { %v2489_v4 = vmul.f32 %v12999_v61, %v2420_v8 }
 0x35b   :  { %2587 = vadd.xlane.f32.xlu1 %v2490_v23 }
 0x35c   :  { %2585 = vadd.xlane.f32.xlu0 %v2489_v4 }
 0x35d   :  { %v10017_v12 = vpop.f32.mrb[2].mxu1 }
 0x35e   :  { %v2423_v28 = vmax.f32 %v10017_v12, 0.0  ;;  %v2239_v22 = vpop.f32.mrb[3].mxu1 }
 0x35f   :  { %v2422_v2 = vmax.f32 %v2239_v22, 0.0 }
 0x360   :  { %v2492_v35 = vmul.f32 %v12999_v61, %v2423_v28 }
 0x361   :  { %v2491_v1 = vmul.f32 %v12999_v61, %v2422_v2 }
 0x362   :  { %2591 = vadd.xlane.f32.xlu1 %v2492_v35 }
 0x363   :  { %2589 = vadd.xlane.f32.xlu0 %v2491_v1 }
 0x364   :  { %v10020_v29 = vpop.f32.mrb[4].mxu1 }
 0x365   :  { %v2425_v5 = vmax.f32 %v10020_v29, 0.0  ;;  %v2249_v19 = vpop.f32.mrb[5].mxu1 }
 0x366   :  { %v2424_v36 = vmax.f32 %v2249_v19, 0.0 }
 0x367   :  { %v2494_v7 = vmul.f32 %v12999_v61, %v2425_v5 }
 0x368   :  { %v2493_v51 = vmul.f32 %v12999_v61, %v2424_v36 }
 0x369   :  { %2595 = vadd.xlane.f32.xlu1 %v2494_v7 }
 0x36a   :  { %2593 = vadd.xlane.f32.xlu0 %v2493_v51 }
 0x36b   :  { %v10023_v43 = vpop.f32.mrb[6].mxu1 }
 0x36c   :  { %v2427_v3 = vmax.f32 %v10023_v43, 0.0  ;;  %v2259_v9 = vpop.f32.mrb[7].mxu1 }
 0x36d   :  { %v2426_v46 = vmax.f32 %v2259_v9, 0.0 }
 0x36e   :  { %v2496_v48 = vmul.f32 %v12999_v61, %v2427_v3 }
 0x36f   :  { %v2495_v18 = vmul.f32 %v12999_v61, %v2426_v46 }
 0x370   :  { %2599 = vadd.xlane.f32.xlu1 %v2496_v48 }
 0x371   :  { %2597 = vadd.xlane.f32.xlu0 %v2495_v18 }
 0x372   :  { %v10026_v15 = vpop.f32.mrb[8].mxu1 }
 0x373   :  { %v2429_v30 = vmax.f32 %v10026_v15, 0.0  ;;  %v2269_v6 = vpop.f32.mrb[9].mxu1 }
 0x374   :  { %v2428_v25 = vmax.f32 %v2269_v6, 0.0 }
 0x375   :  { %v2498_v37 = vmul.f32 %v12999_v61, %v2429_v30 }
 0x376   :  { %v2497_v50 = vmul.f32 %v12999_v61, %v2428_v25 }
 0x377   :  { %2603 = vadd.xlane.f32.xlu1 %v2498_v37 }
 0x378   :  { %2601 = vadd.xlane.f32.xlu0 %v2497_v50 }
 0x379   :  { %v10029_v24 = vpop.f32.mrb[10].mxu1 }
 0x37a   :  { %v2431_v63 = vmax.f32 %v10029_v24, 0.0  ;;  %v2279_v38 = vpop.f32.mrb[11].mxu1 }
 0x37b   :  { %v2430_v49 = vmax.f32 %v2279_v38, 0.0 }
 0x37c   :  { %v2500_v31 = vmul.f32 %v12999_v61, %v2431_v63 }
 0x37d   :  { %v2499_v55 = vmul.f32 %v12999_v61, %v2430_v49  ;;  %v13065_v49 = vpop.xlane.xlu0 %2523 }
 0x37e   :  { %2607 = vadd.xlane.f32.xlu1 %v2500_v31  ;;  %v2649_v31 = vld [vmem:[%s17573_s1 + $0x21] sm:$0x1] }
 0x37f   :  { %2605 = vadd.xlane.f32.xlu0 %v2499_v55 }
 0x380   :  { %v10032_v54 = vpop.f32.mrb[12].mxu1 }
 0x381   :  { %v2433_v13 = vmax.f32 %v10032_v54, 0.0  ;;  %v2289_v14 = vpop.f32.mrb[13].mxu1  ;;  %v13070_v55 = vpop.xlane.xlu0 %2525 }
 0x382   :  { %v2432_v62 = vmax.f32 %v2289_v14, 0.0 }
 0x383   :  { %v2502_v10 = vmul.f32 %v12999_v61, %v2433_v13 }
 0x384   :  { %v2501_v21 = vmul.f32 %v12999_v61, %v2432_v62 }
 0x385   :  { %2611 = vadd.xlane.f32.xlu1 %v2502_v10 }
 0x386   :  { %2609 = vadd.xlane.f32.xlu0 %v2501_v21  ;;  %v13084_v21 = vpop.xlane.xlu1 %2521 }
 0x387   :  { %v10035_v60 = vpop.f32.mrb[14].mxu1  ;;  %v13072_v54 = vpop.xlane.xlu0 %2529 }
 0x388   :  { %v2435_v58 = vmax.f32 %v10035_v60, 0.0  ;;  %v2299_v32 = vpop.f32.mrb[15].mxu1 }
 0x389   :  { %v2434_v17 = vmax.f32 %v2299_v32, 0.0 }
 0x38a   :  { %v2504_v56 = vmul.f32 %v12999_v61, %v2435_v58  ;;  %v13088_v58 = vpop.xlane.xlu1 %2527 }
 0x38b   :  { %v2503_v39 = vmul.f32 %v12999_v61, %v2434_v17 }
 0x38c   :  { %2615 = vadd.xlane.f32.xlu1 %v2504_v56 }
 0x38d   :  { %2613 = vadd.xlane.f32.xlu0 %v2503_v39 }
 0x38e   :  { %v10038_v20 = vpop.f32.mrb[16].mxu1  ;;  %v13074_v13 = vpop.xlane.xlu0 %2533 }
 0x38f   :  { %v2437_v40 = vmax.f32 %v10038_v20, 0.0  ;;  %v2309_v44 = vpop.f32.mrb[17].mxu1  ;;  %v13094_v56 = vpop.xlane.xlu1 %2531 }
 0x390   :  { %v2436_v26 = vmax.f32 %v2309_v44, 0.0 }
 0x391   :  { %v2506_v53 = vmul.f32 %v12999_v61, %v2437_v40 }
 0x392   :  { %v2505_v0 = vmul.f32 %v12999_v61, %v2436_v26 }
 0x393   :  { %2619 = vadd.xlane.f32.xlu1 %v2506_v53  ;;  %v13098_v20 = vpop.xlane.xlu1 %2535 }
 0x394   :  { %2617 = vadd.xlane.f32.xlu0 %v2505_v0 }
 0x395   :  { %v10041_v27 = vpop.f32.mrb[18].mxu1  ;;  %v13076_v14 = vpop.xlane.xlu0 %2537 }
 0x396   :  { %v2439_v33 = vmax.f32 %v10041_v27, 0.0  ;;  %v2319_v47 = vpop.f32.mrb[19].mxu1 }
 0x397   :  { %v2438_v45 = vmax.f32 %v2319_v47, 0.0  ;;  %v13104_v26 = vpop.xlane.xlu1 %2539 }
 0x398   :  { %v2508_v52 = vmul.f32 %v12999_v61, %v2439_v33 }
 0x399   :  { %v2507_v11 = vmul.f32 %v12999_v61, %v2438_v45 }
 0x39a   :  { %2623 = vadd.xlane.f32.xlu1 %v2508_v52 }
 0x39b   :  { %2621 = vadd.xlane.f32.xlu0 %v2507_v11  ;;  %v13108_v0 = vpop.xlane.xlu1 %2543 }
 0x39c   :  { %v10044_v59 = vpop.f32.mrb[20].mxu1  ;;  %v13078_v62 = vpop.xlane.xlu0 %2541 }
 0x39d   :  { %v2441_v42 = vmax.f32 %v10044_v59, 0.0  ;;  %v2329_v34 = vpop.f32.mrb[21].mxu1 }
 0x39e   :  { %v2440_v16 = vmax.f32 %v2329_v34, 0.0 }
 0x39f   :  { %v2510_v57 = vmul.f32 %v12999_v61, %v2441_v42 }
 0x3a0   :  { %v2509_v41 = vmul.f32 %v12999_v61, %v2440_v16 }
 0x3a1   :  { %2627 = vadd.xlane.f32.xlu1 %v2510_v57 }
 0x3a2   :  { %v10047_v8 = vpop.f32.mrb[22].mxu1  ;;  %2625 = vadd.xlane.f32.xlu0 %v2509_v41  ;;  %v13114_v47 = vpop.xlane.xlu1 %2547 }
 0x3a3   :  { %v2443_v23 = vmax.f32 %v10047_v8, 0.0  ;;  %v2339_v4 = vpop.f32.mrb[23].mxu1 }
 0x3a4   :  { %v2442_v12 = vmax.f32 %v2339_v4, 0.0 }
 0x3a5   :  { %v2512_v28 = vmul.f32 %v12999_v61, %v2443_v23 }
 0x3a6   :  { %v2511_v22 = vmul.f32 %v12999_v61, %v2442_v12 }
 0x3a7   :  { %2631 = vadd.xlane.f32.xlu1 %v2512_v28 }
 0x3a8   :  { %v10050_v2 = vpop.f32.mrb[24].mxu1  ;;  %2629 = vadd.xlane.f32.xlu0 %v2511_v22 }
 0x3a9   :  { %v2445_v35 = vmax.f32 %v10050_v2, 0.0  ;;  %v2349_v1 = vpop.f32.mrb[25].mxu1  ;;  %v13118_v52 = vpop.xlane.xlu1 %2551 }
 0x3aa   :  { %v2444_v29 = vmax.f32 %v2349_v1, 0.0 }
 0x3ab   :  { %v2514_v5 = vmul.f32 %v12999_v61, %v2445_v35 }
 0x3ac   :  { %v2513_v19 = vmul.f32 %v12999_v61, %v2444_v29 }
 0x3ad   :  { %2635 = vadd.xlane.f32.xlu1 %v2514_v5 }
 0x3ae   :  { %v10053_v36 = vpop.f32.mrb[26].mxu1  ;;  %2633 = vadd.xlane.f32.xlu0 %v2513_v19 }
 0x3af   :  { %v2447_v7 = vmax.f32 %v10053_v36, 0.0  ;;  %v2359_v51 = vpop.f32.mrb[27].mxu1 }
 0x3b0   :  { %v2446_v43 = vmax.f32 %v2359_v51, 0.0  ;;  %v13122_v42 = vpop.xlane.xlu1 %2555 }
 0x3b1   :  { %v2516_v3 = vmul.f32 %v12999_v61, %v2447_v7 }
 0x3b2   :  { %v2515_v9 = vmul.f32 %v12999_v61, %v2446_v43  ;;  %v18902_v43 = vlaneseq }
 0x3b3   :  { %v10056_v46 = vpop.f32.mrb[28].mxu1  ;;  %2639 = vadd.xlane.f32.xlu1 %v2516_v3 }
 0x3b4   :  { %v2449_v48 = vmax.f32 %v10056_v46, 0.0  ;;  %v2369_v18 = vpop.f32.mrb[29].mxu1  ;;  %2637 = vadd.xlane.f32.xlu0 %v2515_v9  ;;  %v13141_v3 = vshrl.u32 %v18902_v43, 7 }
 0x3b5   :  { %v2448_v15 = vmax.f32 %v2369_v18, 0.0 }
 0x3b6   :  { %v2518_v30 = vmul.f32 %v12999_v61, %v2449_v48  ;;  %18903 = vst [vmem:[#allocation16_spill] sm:$0xff] %v13141_v3  ;;  %v2656_v48 = vsub.s32 0, %v13141_v3 }
 0x3b7   :  { %v2517_v6 = vmul.f32 %v12999_v61, %v2448_v15  ;;  %v10059_v25 = vpop.f32.mrb[30].mxu1  ;;  %v13124_v16 = vpop.xlane.xlu1 %2559 }
 0x3b8   :  { %v2451_v37 = vmax.f32 %v10059_v25, 0.0  ;;  %2643 = vadd.xlane.f32.xlu1 %v2518_v30  ;;  %v2379_v50 = vpop.f32.mrb[31].mxu1 }
 0x3b9   :  { %v2450_v24 = vmax.f32 %v2379_v50, 0.0  ;;  %2641 = vadd.xlane.f32.xlu0 %v2517_v6 }
 0x3ba   :  { %v2520_v63 = vmul.f32 %v12999_v61, %v2451_v37 }
 0x3bb   :  { %v2519_v38 = vmul.f32 %v12999_v61, %v2450_v24  ;;  %v13080_v61 = vpop.xlane.xlu0 %2545 }
 0x3bc   :  { %2647 = vadd.xlane.f32.xlu1 %v2520_v63 }
 0x3bd   :  { %2645 = vadd.xlane.f32.xlu0 %v2519_v38 }
 0x3be   :  { %v13126_v8 = vpop.xlane.xlu1 %2563 }
 0x3bf   :  { %v13082_v10 = vpop.xlane.xlu0 %2549 }
 0x3c3   :  { %v13086_v60 = vpop.xlane.xlu0 %2553 }
 0x3c5   :  { %v13128_v4 = vpop.xlane.xlu1 %2567 }
 0x3c7   :  { %v13090_v32 = vpop.xlane.xlu0 %2557 }
 0x3cb   :  { %v13092_v17 = vpop.xlane.xlu0 %2561 }
 0x3cc   :  { %v13130_v22 = vpop.xlane.xlu1 %2571 }
 0x3cf   :  { %v13096_v39 = vpop.xlane.xlu0 %2565 }
 0x3d3   :  { %2652 = vperm.xlu0 %10087, %v2649_v31   ;;  %v13100_v40 = vpop.xlane.xlu0 %2569  ;;  %v13132_v35 = vpop.xlane.xlu1 %2575 }
 0x3d7   :  { %v13102_v44 = vpop.xlane.xlu0 %2573 }
 0x3da   :  { %v13134_v29 = vpop.xlane.xlu1 %2579 }
 0x3db   :  { %v13106_v53 = vpop.xlane.xlu0 %2577 }
 0x3e1   :  { %v13136_v19 = vpop.xlane.xlu1 %2583 }
 0x3e2   :  { %v13110_v27 = vpop.xlane.xlu0 %2581 }
 0x3e8   :  { %v13138_v7 = vpop.xlane.xlu1 %2587 }
 0x3e9   :  { %v13112_v33 = vpop.xlane.xlu0 %2585 }
 0x3ef   :  { %v13143_v9 = vpop.xlane.xlu1 %2591 }
 0x3f0   :  { %v13116_v45 = vpop.xlane.xlu0 %2589 }
 0x3f6   :  { %v13146_v15 = vpop.xlane.xlu1 %2595 }
 0x3f7   :  { %v13120_v11 = vpop.xlane.xlu0 %2593 }
 0x3fd   :  { %v13150_v6 = vpop.xlane.xlu1 %2599 }
 0x3fe   :  { %v2598_v59 = vpop.xlane.xlu0 %2597 }
 0x405   :  { %v2602_v34 = vpop.xlane.xlu0 %2601 }
 0x40c   :  { %v2606_v57 = vpop.xlane.xlu0 %2605 }
 0x413   :  { %v2610_v41 = vpop.xlane.xlu0 %2609 }
 0x41a   :  { %v2614_v23 = vpop.xlane.xlu0 %2613 }
 0x421   :  { %v2618_v12 = vpop.xlane.xlu0 %2617 }
 0x428   :  { %v2622_v28 = vpop.xlane.xlu0 %2621 }
 0x42f   :  { %v2626_v2 = vpop.xlane.xlu0 %2625 }
 0x435   :  { %v2630_v1 = vpop.xlane.xlu0 %2629 }
 0x43b   :  { %v2634_v5 = vpop.xlane.xlu0 %2633 }
 0x441   :  { %v2638_v36 = vpop.xlane.xlu0 %2637 }
 0x446   :  { %v2642_v51 = vpop.xlane.xlu0 %2641 }
 0x44a   :  { %v2646_v46 = vpop.xlane.xlu0 %2645 }
 0x452   :  { %v2653_v18 = vpop.permute.xlu0 %2652 }
 0x453   :  { %v13148_v30 = vrot.slane %v2653_v18, %v2656_v48 }
 0x455   :  { %v13153_v25 = vadd.f32 %v13148_v30, %v2598_v59  ;;  %v13156_v37 = vadd.f32 %v13148_v30, %v2602_v34  ;;  %v13159_v50 = vadd.f32 %v13148_v30, %v2606_v57  ;;  %v13162_v24 = vadd.f32 %v13148_v30, %v2610_v41 }
 0x456   :  { %v13165_v63 = vadd.f32 %v13148_v30, %v2614_v23  ;;  %v13168_v38 = vadd.f32 %v13148_v30, %v2618_v12  ;;  %v13171_v31 = vadd.f32 %v13148_v30, %v2622_v28  ;;  %v13174_v59 = vadd.f32 %v13148_v30, %v2626_v2  ;;  %v13185_v23 = vpop.xlane.xlu1 %2603 }
 0x457   :  { %18904 = vst [vmem:[#allocation15_spill] sm:$0xff] %v13153_v25  ;;  %18905 = vst [vmem:[#allocation81_spill] sm:$0xff] %v13156_v37  ;;  %v13177_v34 = vadd.f32 %v13148_v30, %v2630_v1  ;;  %v13180_v57 = vadd.f32 %v13148_v30, %v2634_v5  ;;  %v13183_v41 = vadd.f32 %v13148_v30, %v2638_v36  ;;  %v10159_v1 = vmov 1966171168  }
 0x458   :  { %18906 = vst [vmem:[#allocation21_spill] sm:$0xff] %v13159_v50  ;;  %18907 = vst [vmem:[#allocation82_spill] sm:$0xff] %v13162_v24  ;;  %v13188_v12 = vadd.f32 %v13148_v30, %v2642_v51  ;;  %v13191_v28 = vadd.f32 %v13148_v30, %v2646_v46  ;;  %v2789_v18 = vunpack.c.l.s4 %v10159_v1  ;;  %v2667_v51 = vadd.f32 %v13148_v30, %v13076_v14 }
 0x459   :  { %18908 = vst [vmem:[#allocation18_spill] sm:$0xff] %v13165_v63  ;;  %18909 = vst [vmem:[#allocation83_spill] sm:$0xff] %v13168_v38 }
 0x45a   :  { %18910 = vst [vmem:[#allocation84_spill] sm:$0xff] %v13171_v31  ;;  %18911 = vst [vmem:[#allocation20_spill] sm:$0xff] %v13174_v59  ;;  %v13193_v48 = vpop.xlane.xlu1 %2607  ;;  %v2790_v5 = vunpack.c.0.s8 %v2789_v18 }
 0x45b   :  { %18912 = vst [vmem:[#allocation86_spill] sm:$0xff] %v13177_v34  ;;  %18913 = vst [vmem:[#allocation138_spill] sm:$0xff] %v13180_v57 }
 0x45c   :  { %18914 = vst [vmem:[#allocation17_spill] sm:$0xff] %v13183_v41  ;;  %18915 = vst [vmem:[#allocation22_spill] sm:$0xff] %v13188_v12  ;;  %v13202_v36 = vsub.s32 %v2790_v5, %v13141_v3  ;;  %v3179_v12 = vcombine.high %v2667_v51, %v2667_v51 }
 0x45d   :  { %18916 = vst [vmem:[#allocation23_spill] sm:$0xff] %v13191_v28 }
 0x45e   :  { %v13195_v2 = vpop.xlane.xlu1 %2611  ;;  %v3186_v46 = vrot.slane %v2667_v51, %v13202_v36  ;;  %v3193_v41 = vrot.slane %v3179_v12, %v13202_v36 }
 0x460   :  { %v3194_v34 = vcombine.high %v3186_v46, %v3186_v46  ;;  %v3195_v1 = vcombine.high %v3193_v41, %v3193_v41  ;;  %v3202_v59 = vrot.slane %v3186_v46, %v13202_v36  ;;  %v3209_v5 = vrot.slane %v3193_v41, %v13202_v36 }
 0x462   :  { %v13197_v43 = vpop.xlane.xlu1 %2615  ;;  %v3216_v18 = vrot.slane %v3194_v34, %v13202_v36  ;;  %v3223_v3 = vrot.slane %v3195_v1, %v13202_v36 }
 0x464   :  { %v6315_v14 = vcombine.low %v3202_v59, %v3216_v18  ;;  %v9776_v38 = vcombine.high %v3202_v59, %v3216_v18  ;;  %v6317_v63 = vcombine.low %v3209_v5, %v3223_v3  ;;  %v9777_v51 = vcombine.high %v3209_v5, %v3223_v3 }
 0x465   :  { %v13224_v3 = vadd.f32 %v13148_v30, %v13084_v21  ;;  %v13244_v21 = vadd.f32 %v13148_v30, %v13094_v56  ;;  %v13264_v56 = vadd.f32 %v13148_v30, %v13108_v0  ;;  %v13284_v0 = vadd.f32 %v13148_v30, %v13086_v60 }
 0x466   :  { %v13199_v57 = vpop.xlane.xlu1 %2619  ;;  %v6325_v24 = vrot.slane %v6315_v14, %v13202_v36  ;;  %v6332_v12 = vrot.slane %v9776_v38, %v13202_v36  ;;  %v6339_v50 = vrot.slane %v6317_v63, %v13202_v36  ;;  %v6346_v46 = vrot.slane %v9777_v51, %v13202_v36 }
 0x467   :  { %v13228_v63 = vadd.f32 %v13148_v30, %v13065_v49  ;;  %v13248_v49 = vadd.f32 %v13148_v30, %v13074_v13  ;;  %v13268_v13 = vadd.f32 %v13148_v30, %v13080_v61  ;;  %v13288_v61 = vadd.f32 %v13148_v30, %v13122_v42 }
 0x468   :  { %v6347_v37 = vcombine.low %v6325_v24, %v6332_v12  ;;  %v6348_v25 = vcombine.low %v6339_v50, %v6346_v46  ;;  %v13232_v24 = vadd.f32 %v13148_v30, %v13070_v55  ;;  %v13252_v55 = vadd.f32 %v13148_v30, %v13098_v20 }
 0x469   :  { %v13272_v20 = vadd.f32 %v13148_v30, %v13114_v47  ;;  %v13292_v47 = vadd.f32 %v13148_v30, %v13090_v32  ;;  %v13304_v60 = vadd.f32 %v13148_v30, %v13126_v8  ;;  %v13308_v42 = vadd.f32 %v13148_v30, %v13096_v39 }
 0x46a   :  { %v13207_v28 = vpop.xlane.xlu1 %2623  ;;  %v6362_v41 = vrot.slane %v6348_v25, %v13202_v36  ;;  %v13240_v25 = vadd.f32 %v13148_v30, %v13072_v54  ;;  %v13260_v54 = vadd.f32 %v13148_v30, %v13078_v62  ;;  %v13280_v62 = vadd.f32 %v13148_v30, %v13118_v52 }
 0x46b   :  { %18917 = vst [vmem:[#allocation24_spill] sm:$0xff] %v13207_v28  ;;  %v13300_v52 = vadd.f32 %v13148_v30, %v13092_v17  ;;  %v13312_v32 = vadd.f32 %v13148_v30, %v13128_v4  ;;  %v13320_v17 = vadd.f32 %v13148_v30, %v13130_v22  ;;  %v13324_v8 = vadd.f32 %v13148_v30, %v13102_v44 }
 0x46c   :  { %v13328_v39 = vadd.f32 %v13148_v30, %v13132_v35  ;;  %v13332_v4 = vadd.f32 %v13148_v30, %v13106_v53  ;;  %v13340_v22 = vadd.f32 %v13148_v30, %v13110_v27  ;;  %v13344_v44 = vadd.f32 %v13148_v30, %v13136_v19 }
 0x46d   :  { %18919 = vst [vmem:[#allocation88_spill] sm:$0xff] %v13324_v8  ;;  %v13348_v35 = vadd.f32 %v13148_v30, %v13112_v33  ;;  %v13352_v53 = vadd.f32 %v13148_v30, %v13138_v7  ;;  %v13360_v27 = vadd.f32 %v13148_v30, %v13143_v9  ;;  %v13364_v19 = vadd.f32 %v13148_v30, %v13120_v11 }
 0x46e   :  { %v13212_v31 = vpop.xlane.xlu1 %2627  ;;  %v13368_v33 = vadd.f32 %v13148_v30, %v13146_v15  ;;  %v13372_v7 = vadd.f32 %v13148_v30, %v13150_v6  ;;  %v13380_v9 = vadd.f32 %v13148_v30, %v13193_v48  ;;  %v13384_v11 = vadd.f32 %v13148_v30, %v13195_v2 }
 0x46f   :  { %18918 = vst [vmem:[#allocation85_spill] sm:$0xff] %v13212_v31  ;;  %v6355_v31 = vrot.slane %v6347_v37, %v13202_v36  ;;  %v13236_v37 = vadd.f32 %v13148_v30, %v13088_v58  ;;  %v13256_v58 = vadd.f32 %v13148_v30, %v13104_v26  ;;  %v13276_v26 = vadd.f32 %v13148_v30, %v13082_v10 }
 0x470   :  { %v13296_v10 = vadd.f32 %v13148_v30, %v13124_v16  ;;  %v13316_v16 = vadd.f32 %v13148_v30, %v13100_v40  ;;  %v13336_v40 = vadd.f32 %v13148_v30, %v13134_v29  ;;  %18920 = vst [vmem:[#allocation25_spill] sm:$0xff] %v13348_v35  ;;  %18921 = vst [vmem:[#allocation26_spill] sm:$0xff] %v13352_v53 }
 0x471   :  { %v6363_v1 = vcombine.low %v6355_v31, %v6362_v41  ;;  %v13356_v29 = vadd.f32 %v13148_v30, %v13116_v45  ;;  %18923 = vst [vmem:[#allocation90_spill] sm:$0xff] %v13360_v27  ;;  %18924 = vst [vmem:[#allocation139_spill] sm:$0xff] %v13364_v19  ;;  %v13376_v45 = vadd.f32 %v13148_v30, %v13185_v23 }
 0x472   :  { %v2632_v34 = vpop.xlane.xlu1 %2631  ;;  %18925 = vst [vmem:[#allocation27_spill] sm:$0xff] %v13372_v7  ;;  %v13388_v15 = vadd.f32 %v13148_v30, %v13197_v43  ;;  %v13392_v6 = vadd.f32 %v13148_v30, %v13199_v57  ;;  %v18927_v38 = vld [vmem:[#allocation24_spill] sm:$0xff]  ;;  %v2787_v51 = vcombine.high %v13224_v3, %v13224_v3  ;;  %v13421_v12 = vrot.slane %v13224_v3, %v13202_v36 }
 0x473   :  { %9084 = vperm.xlu0 %10087, %v6363_v1   ;;  %18922 = vst [vmem:[#allocation87_spill] sm:$0xff] %v13356_v29  ;;  %v13396_v31 = vadd.f32 %v13148_v30, %v18927_v38  ;;  %v13403_v2 = vadd.f32 %v13148_v30, %v2632_v34  ;;  %v13427_v46 = vrot.slane %v13228_v63, %v13202_v36 }
 0x474   :  { %18926 = vst [vmem:[#allocation28_spill] sm:$0xff] %v13388_v15  ;;  %v13439_v1 = vrot.slane %v13236_v37, %v13202_v36  ;;  %v13445_v3 = vrot.slane %v13240_v25, %v13202_v36  ;;  %v13451_v38 = vrot.slane %v13244_v21, %v13202_v36  ;;  %v13463_v41 = vrot.slane %v13252_v55, %v13202_v36 }
 0x475   :  { %v13469_v34 = vrot.slane %v13256_v58, %v13202_v36 }
 0x476   :  { %v2636_v28 = vpop.xlane.xlu1 %2635  ;;  %v18928_v18 = vld [vmem:[#allocation85_spill] sm:$0xff]  ;;  %18930 = vst [vmem:[#allocation92_spill] sm:$0xff] %v13451_v38  ;;  %18932 = vst [vmem:[#allocation30_spill] sm:$0xff] %v13463_v41  ;;  %v13481_v41 = vrot.slane %v13264_v56, %v13202_v36 }
 0x477   :  { %v13400_v48 = vadd.f32 %v13148_v30, %v18928_v18  ;;  %v13406_v5 = vadd.f32 %v13148_v30, %v2636_v28  ;;  %v13457_v18 = vrot.slane %v13248_v49, %v13202_v36  ;;  %18933 = vst [vmem:[#allocation91_spill] sm:$0xff] %v13469_v34  ;;  %v13475_v28 = vrot.slane %v13260_v54, %v13202_v36 }
 0x478   :  { %18935 = vst [vmem:[#allocation31_spill] sm:$0xff] %v13481_v41  ;;  %v13487_v34 = vrot.slane %v13268_v13, %v13202_v36  ;;  %v13499_v41 = vrot.slane %v13276_v26, %v13202_v36 }
 0x479   :  { %18931 = vst [vmem:[#allocation29_spill] sm:$0xff] %v13457_v18  ;;  %18934 = vst [vmem:[#allocation94_spill] sm:$0xff] %v13475_v28  ;;  %v13493_v28 = vrot.slane %v13272_v20, %v13202_v36 }
 0x47a   :  { %v2640_v59 = vpop.xlane.xlu1 %2639  ;;  %18936 = vst [vmem:[#allocation32_spill] sm:$0xff] %v13487_v34  ;;  %18938 = vst [vmem:[#allocation96_spill] sm:$0xff] %v13499_v41  ;;  %v13505_v34 = vrot.slane %v13280_v62, %v13202_v36  ;;  %v13517_v41 = vrot.slane %v13288_v61, %v13202_v36 }
 0x47b   :  { %v13409_v43 = vadd.f32 %v13148_v30, %v2640_v59  ;;  %18937 = vst [vmem:[#allocation93_spill] sm:$0xff] %v13493_v28  ;;  %v13511_v28 = vrot.slane %v13284_v0, %v13202_v36  ;;  %v2801_v59 = vrot.slane %v2787_v51, %v13202_v36 }
 0x47c   :  { %18939 = vst [vmem:[#allocation33_spill] sm:$0xff] %v13505_v34  ;;  %18941 = vst [vmem:[#allocation95_spill] sm:$0xff] %v13517_v41  ;;  %v13523_v34 = vrot.slane %v13292_v47, %v13202_v36  ;;  %v13535_v41 = vrot.slane %v13300_v52, %v13202_v36 }
 0x47d   :  { %18940 = vst [vmem:[#allocation34_spill] sm:$0xff] %v13511_v28  ;;  %v13529_v28 = vrot.slane %v13296_v10, %v13202_v36 }
 0x47e   :  { %v2644_v50 = vpop.xlane.xlu1 %2643  ;;  %18942 = vst [vmem:[#allocation98_spill] sm:$0xff] %v13523_v34  ;;  %18944 = vst [vmem:[#allocation36_spill] sm:$0xff] %v13535_v41  ;;  %v13541_v34 = vrot.slane %v13304_v60, %v13202_v36  ;;  %v13553_v41 = vrot.slane %v13312_v32, %v13202_v36 }
 0x47f   :  { %v13412_v57 = vadd.f32 %v13148_v30, %v2644_v50  ;;  %18943 = vst [vmem:[#allocation35_spill] sm:$0xff] %v13529_v28  ;;  %v13547_v28 = vrot.slane %v13308_v42, %v13202_v36  ;;  %v13592_v50 = vrot.slane %v13336_v40, %v13202_v36 }
 0x480   :  { %18945 = vst [vmem:[#allocation97_spill] sm:$0xff] %v13541_v34  ;;  %18947 = vst [vmem:[#allocation37_spill] sm:$0xff] %v13553_v41  ;;  %v13559_v34 = vrot.slane %v13316_v16, %v13202_v36  ;;  %v13571_v41 = vrot.slane %v13324_v8, %v13202_v36  ;;  %v2802_v8 = vcombine.high %v13421_v12, %v13421_v12 }
 0x481   :  { %18929 = vst [vmem:[#allocation89_spill] sm:$0xff] %v13412_v57  ;;  %18946 = vst [vmem:[#allocation100_spill] sm:$0xff] %v13547_v28  ;;  %v13565_v28 = vrot.slane %v13320_v17, %v13202_v36 }
 0x482   :  { %v2648_v23 = vpop.xlane.xlu1 %2647  ;;  %18948 = vst [vmem:[#allocation38_spill] sm:$0xff] %v13559_v34  ;;  %18950 = vst [vmem:[#allocation102_spill] sm:$0xff] %v13571_v41  ;;  %v13577_v34 = vrot.slane %v13328_v39, %v13202_v36  ;;  %v13685_v41 = vrot.slane %v13380_v9, %v13202_v36 }
 0x483   :  { %v13415_v14 = vadd.f32 %v13148_v30, %v2648_v23  ;;  %v13433_v30 = vrot.slane %v13232_v24, %v13202_v36  ;;  %18949 = vst [vmem:[#allocation99_spill] sm:$0xff] %v13565_v28  ;;  %v13583_v28 = vrot.slane %v13332_v4, %v13202_v36  ;;  %18953 = vst [vmem:[#allocation101_spill] sm:$0xff] %v13592_v50 }
 0x484   :  { %18951 = vst [vmem:[#allocation39_spill] sm:$0xff] %v13577_v34  ;;  %v13598_v23 = vrot.slane %v13340_v22, %v13202_v36  ;;  %v13610_v50 = vrot.slane %v13348_v35, %v13202_v36  ;;  %v2803_v35 = vcombine.high %v2801_v59, %v2801_v59  ;;  %v2824_v34 = vrot.slane %v2802_v8, %v13202_v36 }
 0x485   :  { %18952 = vst [vmem:[#allocation40_spill] sm:$0xff] %v13583_v28  ;;  %v13604_v28 = vrot.slane %v13344_v44, %v13202_v36  ;;  %18970 = vst [vmem:[#allocation47_spill] sm:$0xff] %v13685_v41 }
 0x486   :  { %18954 = vst [vmem:[#allocation104_spill] sm:$0xff] %v13598_v23  ;;  %18956 = vst [vmem:[#allocation42_spill] sm:$0xff] %v13610_v50  ;;  %v13616_v23 = vrot.slane %v13352_v53, %v13202_v36  ;;  %v2810_v50 = vrot.slane %v13421_v12, %v13202_v36  ;;  %v13631_v53 = vrot.slane %v13360_v27, %v13202_v36 }
 0x487   :  { %18955 = vst [vmem:[#allocation41_spill] sm:$0xff] %v13604_v28  ;;  %v13622_v28 = vrot.slane %v13356_v29, %v13202_v36  ;;  %v13637_v29 = vrot.slane %v13364_v19, %v13202_v36  ;;  %v2831_v12 = vrot.slane %v2803_v35, %v13202_v36  ;;  %v13645_v27 = vrot.slane %v13368_v33, %v13202_v36 }
 0x488   :  { %18957 = vst [vmem:[#allocation103_spill] sm:$0xff] %v13616_v23  ;;  %18959 = vst [vmem:[#allocation43_spill] sm:$0xff] %v13631_v53  ;;  %v5923_v23 = vcombine.low %v2810_v50, %v2824_v34  ;;  %v9760_v8 = vcombine.high %v2810_v50, %v2824_v34  ;;  %v18962_v53 = vld [vmem:[#allocation15_spill] sm:$0xff]  ;;  %v13659_v50 = vrot.slane %v13372_v7, %v13202_v36 }
 0x489   :  { %18958 = vst [vmem:[#allocation106_spill] sm:$0xff] %v13622_v28  ;;  %18960 = vst [vmem:[#allocation44_spill] sm:$0xff] %v13637_v29  ;;  %v2817_v28 = vrot.slane %v2801_v59, %v13202_v36  ;;  %v13651_v19 = vrot.slane %v18962_v53, %v13202_v36  ;;  %v13697_v7 = vrot.slane %v13384_v11, %v13202_v36 }
 0x48a   :  { %18961 = vst [vmem:[#allocation105_spill] sm:$0xff] %v13645_v27  ;;  %v5933_v35 = vrot.slane %v5923_v23, %v13202_v36  ;;  %v5940_v34 = vrot.slane %v9760_v8, %v13202_v36  ;;  %18964 = vst [vmem:[#allocation45_spill] sm:$0xff] %v13659_v50  ;;  %v18965_v27 = vld [vmem:[#allocation81_spill] sm:$0xff] }
 0x48b   :  { %18963 = vst [vmem:[#allocation108_spill] sm:$0xff] %v13651_v19  ;;  %v5925_v29 = vcombine.low %v2817_v28, %v2831_v12  ;;  %v9761_v59 = vcombine.high %v2817_v28, %v2831_v12  ;;  %v13665_v53 = vrot.slane %v18965_v27, %v13202_v36  ;;  %v13671_v28 = vrot.slane %v13376_v45, %v13202_v36  ;;  %v18968_v50 = vld [vmem:[#allocation21_spill] sm:$0xff] }
 0x48c   :  { %v5955_v8 = vcombine.low %v5933_v35, %v5940_v34  ;;  %v13679_v51 = vrot.slane %v18968_v50, %v13202_v36  ;;  %18973 = vst [vmem:[#allocation109_spill] sm:$0xff] %v13697_v7  ;;  %v18977_v35 = vld [vmem:[#allocation83_spill] sm:$0xff] }
 0x48d   :  { %18966 = vst [vmem:[#allocation46_spill] sm:$0xff] %v13665_v53  ;;  %18967 = vst [vmem:[#allocation107_spill] sm:$0xff] %v13671_v28  ;;  %v5947_v23 = vrot.slane %v5925_v29, %v13202_v36  ;;  %v5954_v12 = vrot.slane %v9761_v59, %v13202_v36  ;;  %v18971_v28 = vld [vmem:[#allocation82_spill] sm:$0xff]  ;;  %v13723_v29 = vrot.slane %v13392_v6, %v13202_v36 }
 0x48e   :  { %18969 = vst [vmem:[#allocation110_spill] sm:$0xff] %v13679_v51  ;;  %v13691_v59 = vrot.slane %v18971_v28, %v13202_v36  ;;  %v18974_v53 = vld [vmem:[#allocation18_spill] sm:$0xff]  ;;  %v13717_v51 = vrot.slane %v18977_v35, %v13202_v36  ;;  %v13759_v35 = vrot.slane %v13403_v2, %v13202_v36 }
 0x48f   :  { %v5956_v34 = vcombine.low %v5947_v23, %v5954_v12  ;;  %v13703_v41 = vrot.slane %v18974_v53, %v13202_v36  ;;  %v5963_v12 = vrot.slane %v5955_v8, %v13202_v36  ;;  %18979 = vst [vmem:[#allocation111_spill] sm:$0xff] %v13723_v29  ;;  %v18986_v8 = vld [vmem:[#allocation86_spill] sm:$0xff] }
 0x490   :  { %18972 = vst [vmem:[#allocation48_spill] sm:$0xff] %v13691_v59  ;;  %v13709_v59 = vrot.slane %v13388_v15, %v13202_v36  ;;  %18978 = vst [vmem:[#allocation50_spill] sm:$0xff] %v13717_v51  ;;  %v18980_v15 = vld [vmem:[#allocation84_spill] sm:$0xff] }
 0x491   :  { %18975 = vst [vmem:[#allocation112_spill] sm:$0xff] %v13703_v41  ;;  %v5970_v7 = vrot.slane %v5956_v34, %v13202_v36  ;;  %v13729_v23 = vrot.slane %v18980_v15, %v13202_v36  ;;  %v13735_v34 = vrot.slane %v13396_v31, %v13202_v36  ;;  %v18983_v41 = vld [vmem:[#allocation20_spill] sm:$0xff]  ;;  %18988 = vst [vmem:[#allocation53_spill] sm:$0xff] %v13759_v35 }
 0x492   :  { %18976 = vst [vmem:[#allocation49_spill] sm:$0xff] %v13709_v59  ;;  %v13741_v29 = vrot.slane %v18983_v41, %v13202_v36  ;;  %v18989_v59 = vld [vmem:[#allocation138_spill] sm:$0xff]  ;;  %v19003_v15 = vcombine.high %v13232_v24, %v13232_v24  ;;  %v13843_v24 = vrot.slane %v13439_v1, %v13202_v36 }
 0x493   :  { %18981 = vst [vmem:[#allocation114_spill] sm:$0xff] %v13729_v23  ;;  %18982 = vst [vmem:[#allocation51_spill] sm:$0xff] %v13735_v34  ;;  %v5971_v51 = vcombine.low %v5963_v12, %v5970_v7  ;;  %v13747_v23 = vrot.slane %v13400_v48, %v13202_v36  ;;  %v13753_v7 = vrot.slane %v18986_v8, %v13202_v36  ;;  %v18992_v12 = vld [vmem:[#allocation17_spill] sm:$0xff] }
 0x494   :  { %18984 = vst [vmem:[#allocation52_spill] sm:$0xff] %v13741_v29  ;;  %v19001_v8 = vcombine.high %v13228_v63, %v13228_v63  ;;  %v13831_v63 = vrot.slane %v13433_v30, %v13202_v36  ;;  %19006 = vst [vmem:[#allocation122_spill] sm:$0xff] %v13843_v24 }
 0x495   :  { %18985 = vst [vmem:[#allocation113_spill] sm:$0xff] %v13747_v23  ;;  %18987 = vst [vmem:[#allocation116_spill] sm:$0xff] %v13753_v7  ;;  %9060 = vperm.xlu1 %10088, %v5971_v51   ;;  %v13765_v23 = vrot.slane %v18989_v59, %v13202_v36  ;;  %v13771_v7 = vrot.slane %v13406_v5, %v13202_v36  ;;  %v13777_v51 = vrot.slane %v18992_v12, %v13202_v36  ;;  %v18995_v59 = vld [vmem:[#allocation22_spill] sm:$0xff]  ;;  %v18998_v12 = vld [vmem:[#allocation23_spill] sm:$0xff] }
 0x496   :  { %19004 = vst [vmem:[#allocation119_spill] sm:$0xff] %v13831_v63 }
 0x497   :  { %18990 = vst [vmem:[#allocation54_spill] sm:$0xff] %v13765_v23  ;;  %18991 = vst [vmem:[#allocation115_spill] sm:$0xff] %v13771_v7  ;;  %v13783_v23 = vrot.slane %v13409_v43, %v13202_v36  ;;  %v13789_v7 = vrot.slane %v18995_v59, %v13202_v36 }
 0x498   :  { %18993 = vst [vmem:[#allocation118_spill] sm:$0xff] %v13777_v51  ;;  %v13795_v51 = vrot.slane %v13412_v57, %v13202_v36  ;;  %v13813_v57 = vrot.slane %v19001_v8, %v13202_v36  ;;  %v19005_v8 = vcombine.high %v13236_v37, %v13236_v37  ;;  %v13855_v37 = vrot.slane %v13445_v3, %v13202_v36 }
 0x499   :  { %18994 = vst [vmem:[#allocation55_spill] sm:$0xff] %v13783_v23  ;;  %18996 = vst [vmem:[#allocation56_spill] sm:$0xff] %v13789_v7  ;;  %v13801_v23 = vrot.slane %v18998_v12, %v13202_v36  ;;  %v13807_v7 = vrot.slane %v13415_v14, %v13202_v36  ;;  %v13819_v12 = vrot.slane %v13427_v46, %v13202_v36 }
 0x49a   :  { %18997 = vst [vmem:[#allocation117_spill] sm:$0xff] %v13795_v51  ;;  %v13837_v29 = vrot.slane %v19005_v8, %v13202_v36  ;;  %19008 = vst [vmem:[#allocation59_spill] sm:$0xff] %v13855_v37  ;;  %v19009_v8 = vcombine.high %v13244_v21, %v13244_v21  ;;  %v13879_v21 = vrot.slane %v13457_v18, %v13202_v36 }
 0x49b   :  { %18999 = vst [vmem:[#allocation120_spill] sm:$0xff] %v13801_v23  ;;  %19000 = vst [vmem:[#allocation57_spill] sm:$0xff] %v13807_v7  ;;  %v13825_v23 = vrot.slane %v19003_v15, %v13202_v36  ;;  %v19007_v15 = vcombine.high %v13240_v25, %v13240_v25  ;;  %v13867_v25 = vrot.slane %v13451_v38, %v13202_v36 }
 0x49c   :  { %19002 = vst [vmem:[#allocation58_spill] sm:$0xff] %v13819_v12  ;;  %v13861_v12 = vrot.slane %v19009_v8, %v13202_v36  ;;  %19012 = vst [vmem:[#allocation121_spill] sm:$0xff] %v13879_v21  ;;  %v19013_v8 = vcombine.high %v13252_v55, %v13252_v55  ;;  %v19019_v21 = vld [vmem:[#allocation91_spill] sm:$0xff] }
 0x49d   :  { %v13849_v7 = vrot.slane %v19007_v15, %v13202_v36  ;;  %19010 = vst [vmem:[#allocation60_spill] sm:$0xff] %v13867_v25  ;;  %v19011_v15 = vcombine.high %v13248_v49, %v13248_v49  ;;  %v19015_v25 = vld [vmem:[#allocation30_spill] sm:$0xff]  ;;  %v13903_v55 = vrot.slane %v19019_v21, %v13202_v36 }
 0x49e   :  { %v13885_v24 = vrot.slane %v19013_v8, %v13202_v36  ;;  %v13891_v49 = vrot.slane %v19015_v25, %v13202_v36  ;;  %v19021_v8 = vcombine.high %v13260_v54, %v13260_v54 }
 0x49f   :  { %v13873_v63 = vrot.slane %v19011_v15, %v13202_v36  ;;  %v19017_v15 = vcombine.high %v13256_v58, %v13256_v58  ;;  %19020 = vst [vmem:[#allocation123_spill] sm:$0xff] %v13903_v55  ;;  %v19024_v55 = vld [vmem:[#allocation31_spill] sm:$0xff] }
 0x4a0   :  { %19014 = vst [vmem:[#allocation124_spill] sm:$0xff] %v13885_v24  ;;  %19016 = vst [vmem:[#allocation61_spill] sm:$0xff] %v13891_v49  ;;  %v13909_v38 = vrot.slane %v19021_v8, %v13202_v36  ;;  %v19022_v49 = vld [vmem:[#allocation94_spill] sm:$0xff]  ;;  %v13927_v54 = vrot.slane %v19024_v55, %v13202_v36  ;;  %v19026_v8 = vcombine.high %v13268_v13, %v13268_v13 }
 0x4a1   :  { %v13897_v37 = vrot.slane %v19017_v15, %v13202_v36  ;;  %v13915_v58 = vrot.slane %v19022_v49, %v13202_v36  ;;  %v19023_v15 = vcombine.high %v13264_v56, %v13264_v56 }
 0x4a2   :  { %19025 = vst [vmem:[#allocation126_spill] sm:$0xff] %v13927_v54  ;;  %v13933_v25 = vrot.slane %v19026_v8, %v13202_v36  ;;  %v19030_v54 = vld [vmem:[#allocation93_spill] sm:$0xff]  ;;  %v19032_v8 = vcombine.high %v13276_v26, %v13276_v26 }
 0x4a3   :  { %19018 = vst [vmem:[#allocation62_spill] sm:$0xff] %v13897_v37  ;;  %v13921_v18 = vrot.slane %v19023_v15, %v13202_v36  ;;  %v19027_v37 = vld [vmem:[#allocation32_spill] sm:$0xff]  ;;  %v19029_v15 = vcombine.high %v13272_v20, %v13272_v20  ;;  %v13951_v13 = vrot.slane %v19030_v54, %v13202_v36 }
 0x4a4   :  { %v13939_v56 = vrot.slane %v19027_v37, %v13202_v36  ;;  %v13957_v24 = vrot.slane %v19032_v8, %v13202_v36  ;;  %v19038_v8 = vcombine.high %v13284_v0, %v13284_v0 }
 0x4a5   :  { %v13945_v21 = vrot.slane %v19029_v15, %v13202_v36  ;;  %19031 = vst [vmem:[#allocation64_spill] sm:$0xff] %v13951_v13  ;;  %v19035_v15 = vcombine.high %v13280_v62, %v13280_v62  ;;  %v19036_v13 = vld [vmem:[#allocation33_spill] sm:$0xff] }
 0x4a6   :  { %19028 = vst [vmem:[#allocation63_spill] sm:$0xff] %v13939_v56  ;;  %v19033_v56 = vld [vmem:[#allocation96_spill] sm:$0xff]  ;;  %v13975_v26 = vrot.slane %v19036_v13, %v13202_v36  ;;  %v13981_v37 = vrot.slane %v19038_v8, %v13202_v36  ;;  %v19044_v8 = vcombine.high %v13292_v47, %v13292_v47 }
 0x4a7   :  { %v13963_v20 = vrot.slane %v19033_v56, %v13202_v36  ;;  %v13969_v55 = vrot.slane %v19035_v15, %v13202_v36  ;;  %v19041_v15 = vcombine.high %v13288_v61, %v13288_v61 }
 0x4a8   :  { %19037 = vst [vmem:[#allocation128_spill] sm:$0xff] %v13975_v26  ;;  %v19042_v26 = vld [vmem:[#allocation95_spill] sm:$0xff]  ;;  %v14005_v56 = vrot.slane %v19044_v8, %v13202_v36  ;;  %v19050_v8 = vcombine.high %v13300_v52, %v13300_v52 }
 0x4a9   :  { %19034 = vst [vmem:[#allocation125_spill] sm:$0xff] %v13963_v20  ;;  %v19039_v20 = vld [vmem:[#allocation34_spill] sm:$0xff]  ;;  %v13993_v54 = vrot.slane %v19041_v15, %v13202_v36  ;;  %v13999_v0 = vrot.slane %v19042_v26, %v13202_v36  ;;  %v19047_v15 = vcombine.high %v13296_v10, %v13296_v10 }
 0x4aa   :  { %v13987_v62 = vrot.slane %v19039_v20, %v13202_v36  ;;  %v14029_v20 = vrot.slane %v19050_v8, %v13202_v36  ;;  %v19056_v8 = vcombine.high %v13308_v42, %v13308_v42 }
 0x4ab   :  { %19043 = vst [vmem:[#allocation66_spill] sm:$0xff] %v13999_v0  ;;  %v14017_v13 = vrot.slane %v19047_v15, %v13202_v36  ;;  %v19048_v0 = vld [vmem:[#allocation35_spill] sm:$0xff]  ;;  %v19053_v15 = vcombine.high %v13304_v60, %v13304_v60 }
 0x4ac   :  { %19040 = vst [vmem:[#allocation65_spill] sm:$0xff] %v13987_v62  ;;  %v19045_v62 = vld [vmem:[#allocation98_spill] sm:$0xff]  ;;  %v14023_v47 = vrot.slane %v19048_v0, %v13202_v36 }
 0x4ad   :  { %v14011_v61 = vrot.slane %v19045_v62, %v13202_v36  ;;  %v14041_v26 = vrot.slane %v19053_v15, %v13202_v36  ;;  %v14053_v62 = vrot.slane %v19056_v8, %v13202_v36  ;;  %v19059_v15 = vcombine.high %v13312_v32, %v13312_v32 }
 0x4ae   :  { %19049 = vst [vmem:[#allocation130_spill] sm:$0xff] %v14023_v47  ;;  %v19054_v47 = vld [vmem:[#allocation97_spill] sm:$0xff]  ;;  %v19062_v8 = vcombine.high %v13316_v16, %v13316_v16 }
 0x4af   :  { %19046 = vst [vmem:[#allocation127_spill] sm:$0xff] %v14011_v61  ;;  %v19051_v61 = vld [vmem:[#allocation36_spill] sm:$0xff]  ;;  %v14047_v52 = vrot.slane %v19054_v47, %v13202_v36  ;;  %v14065_v0 = vrot.slane %v19059_v15, %v13202_v36  ;;  %v19066_v15 = vcombine.high %v13320_v17, %v13320_v17 }
 0x4b0   :  { %v14035_v10 = vrot.slane %v19051_v61, %v13202_v36  ;;  %v14077_v61 = vrot.slane %v19062_v8, %v13202_v36  ;;  %v19069_v8 = vld [vmem:[#allocation88_spill] sm:$0xff] }
 0x4b1   :  { %19055 = vst [vmem:[#allocation68_spill] sm:$0xff] %v14047_v52  ;;  %v19060_v52 = vld [vmem:[#allocation37_spill] sm:$0xff]  ;;  %v14089_v47 = vrot.slane %v19066_v15, %v13202_v36  ;;  %v19073_v15 = vcombine.high %v13328_v39, %v13328_v39 }
 0x4b2   :  { %19052 = vst [vmem:[#allocation67_spill] sm:$0xff] %v14035_v10  ;;  %v19057_v10 = vld [vmem:[#allocation100_spill] sm:$0xff]  ;;  %v14071_v42 = vrot.slane %v19060_v52, %v13202_v36  ;;  %19063 = vst [vmem:[#allocation69_spill] sm:$0xff] %v14077_v61 }
 0x4b3   :  { %v14059_v60 = vrot.slane %v19057_v10, %v13202_v36  ;;  %v19070_v10 = vcombine.high %v19069_v8, %v19069_v8  ;;  %v14113_v52 = vrot.slane %v19073_v15, %v13202_v36  ;;  %v19076_v8 = vcombine.high %v13332_v4, %v13332_v4 }
 0x4b4   :  { %19061 = vst [vmem:[#allocation132_spill] sm:$0xff] %v14071_v42  ;;  %v19067_v42 = vld [vmem:[#allocation99_spill] sm:$0xff]  ;;  %v19079_v15 = vcombine.high %v13336_v40, %v13336_v40 }
 0x4b5   :  { %19058 = vst [vmem:[#allocation129_spill] sm:$0xff] %v14059_v60  ;;  %v19064_v60 = vld [vmem:[#allocation38_spill] sm:$0xff]  ;;  %v14095_v16 = vrot.slane %v19067_v42, %v13202_v36  ;;  %v14101_v61 = vrot.slane %v19070_v10, %v13202_v36 }
 0x4b6   :  { %v14083_v32 = vrot.slane %v19064_v60, %v13202_v36  ;;  %v14125_v60 = vrot.slane %v19076_v8, %v13202_v36  ;;  %v14137_v42 = vrot.slane %v19079_v15, %v13202_v36  ;;  %v19082_v8 = vcombine.high %v13340_v22, %v13340_v22 }
 0x4b7   :  { %19068 = vst [vmem:[#allocation131_spill] sm:$0xff] %v14095_v16  ;;  %v19074_v16 = vld [vmem:[#allocation39_spill] sm:$0xff]  ;;  %v19086_v15 = vcombine.high %v13344_v44, %v13344_v44 }
 0x4b8   :  { %19065 = vst [vmem:[#allocation70_spill] sm:$0xff] %v14083_v32  ;;  %v19071_v32 = vld [vmem:[#allocation102_spill] sm:$0xff]  ;;  %v14119_v10 = vrot.slane %v19074_v16, %v13202_v36 }
 0x4b9   :  { %v14107_v17 = vrot.slane %v19071_v32, %v13202_v36  ;;  %v14149_v32 = vrot.slane %v19082_v8, %v13202_v36  ;;  %v14161_v16 = vrot.slane %v19086_v15, %v13202_v36  ;;  %v19090_v8 = vld [vmem:[#allocation25_spill] sm:$0xff]  ;;  %v19095_v15 = vld [vmem:[#allocation26_spill] sm:$0xff] }
 0x4ba   :  { %19075 = vst [vmem:[#allocation71_spill] sm:$0xff] %v14119_v10  ;;  %v19080_v10 = vld [vmem:[#allocation101_spill] sm:$0xff] }
 0x4bb   :  { %19072 = vst [vmem:[#allocation133_spill] sm:$0xff] %v14107_v17  ;;  %v19077_v17 = vld [vmem:[#allocation40_spill] sm:$0xff]  ;;  %v14143_v4 = vrot.slane %v19080_v10, %v13202_v36  ;;  %19083 = vst [vmem:[#allocation134_spill] sm:$0xff] %v14149_v32  ;;  %v19096_v10 = vcombine.high %v19095_v15, %v19095_v15  ;;  %v19105_v15 = vld [vmem:[#allocation90_spill] sm:$0xff] }
 0x4bc   :  { %v14131_v39 = vrot.slane %v19077_v17, %v13202_v36  ;;  %19087 = vst [vmem:[#allocation73_spill] sm:$0xff] %v14161_v16  ;;  %v19091_v17 = vcombine.high %v19090_v8, %v19090_v8  ;;  %v19100_v8 = vld [vmem:[#allocation87_spill] sm:$0xff] }
 0x4bd   :  { %19081 = vst [vmem:[#allocation4_spill] sm:$0xff] %v14143_v4  ;;  %v19088_v4 = vld [vmem:[#allocation41_spill] sm:$0xff]  ;;  %v14185_v16 = vrot.slane %v19096_v10, %v13202_v36 }
 0x4be   :  { %19078 = vst [vmem:[#allocation72_spill] sm:$0xff] %v14131_v39  ;;  %v19084_v39 = vld [vmem:[#allocation104_spill] sm:$0xff]  ;;  %v14167_v22 = vrot.slane %v19088_v4, %v13202_v36  ;;  %v14173_v32 = vrot.slane %v19091_v17, %v13202_v36  ;;  %v19106_v4 = vcombine.high %v19105_v15, %v19105_v15  ;;  %v19114_v15 = vcombine.high %v13368_v33, %v13368_v33 }
 0x4bf   :  { %v14155_v40 = vrot.slane %v19084_v39, %v13202_v36  ;;  %19097 = vst [vmem:[#allocation135_spill] sm:$0xff] %v14185_v16  ;;  %v19101_v39 = vcombine.high %v19100_v8, %v19100_v8  ;;  %v19109_v8 = vld [vmem:[#allocation139_spill] sm:$0xff]  ;;  %v14251_v33 = vrot.slane %v13651_v19, %v13202_v36 }
 0x4c0   :  { %19089 = vst [vmem:[#allocation5_spill] sm:$0xff] %v14167_v22  ;;  %19092 = vst [vmem:[#allocation74_spill] sm:$0xff] %v14173_v32  ;;  %v19098_v22 = vld [vmem:[#allocation103_spill] sm:$0xff]  ;;  %v14209_v16 = vrot.slane %v19106_v4, %v13202_v36 }
 0x4c1   :  { %19085 = vst [vmem:[#allocation140_spill] sm:$0xff] %v14155_v40  ;;  %v19093_v40 = vld [vmem:[#allocation42_spill] sm:$0xff]  ;;  %v14191_v17 = vrot.slane %v19098_v22, %v13202_v36  ;;  %v14197_v32 = vrot.slane %v19101_v39, %v13202_v36  ;;  %v14233_v22 = vrot.slane %v19114_v15, %v13202_v36  ;;  %19121 = vst [vmem:[#allocation13_spill] sm:$0xff] %v14251_v33  ;;  %v19122_v15 = vld [vmem:[#allocation27_spill] sm:$0xff] }
 0x4c2   :  { %v14179_v44 = vrot.slane %v19093_v40, %v13202_v36  ;;  %v19110_v40 = vcombine.high %v19109_v8, %v19109_v8  ;;  %v19118_v8 = vld [vmem:[#allocation15_spill] sm:$0xff] }
 0x4c3   :  { %19099 = vst [vmem:[#allocation2_spill] sm:$0xff] %v14191_v17  ;;  %19102 = vst [vmem:[#allocation75_spill] sm:$0xff] %v14197_v32  ;;  %v19107_v17 = vld [vmem:[#allocation43_spill] sm:$0xff] }
 0x4c4   :  { %19094 = vst [vmem:[#allocation6_spill] sm:$0xff] %v14179_v44  ;;  %v19103_v44 = vld [vmem:[#allocation106_spill] sm:$0xff]  ;;  %v14215_v39 = vrot.slane %v19107_v17, %v13202_v36  ;;  %v14221_v32 = vrot.slane %v19110_v40, %v13202_v36  ;;  %19115 = vst [vmem:[#allocation3_spill] sm:$0xff] %v14233_v22  ;;  %v19123_v17 = vcombine.high %v19122_v15, %v19122_v15 }
 0x4c5   :  { %v14203_v10 = vrot.slane %v19103_v44, %v13202_v36  ;;  %v19119_v44 = vcombine.high %v19118_v8, %v19118_v8  ;;  %v3293_v8 = vcombine.high %v13909_v38, %v13909_v38 }
 0x4c6   :  { %19108 = vst [vmem:[#allocation76_spill] sm:$0xff] %v14215_v39  ;;  %19111 = vst [vmem:[#allocation8_spill] sm:$0xff] %v14221_v32  ;;  %v19116_v39 = vld [vmem:[#allocation105_spill] sm:$0xff]  ;;  %v14257_v22 = vrot.slane %v19123_v17, %v13202_v36  ;;  %v19128_v17 = vcombine.high %v18965_v27, %v18965_v27 }
 0x4c7   :  { %19104 = vst [vmem:[#allocation7_spill] sm:$0xff] %v14203_v10  ;;  %v19112_v10 = vld [vmem:[#allocation44_spill] sm:$0xff]  ;;  %v14239_v40 = vrot.slane %v19116_v39, %v13202_v36  ;;  %v14245_v32 = vrot.slane %v19119_v44, %v13202_v36 }
 0x4c8   :  { %v14227_v4 = vrot.slane %v19112_v10, %v13202_v36  ;;  %19124 = vst [vmem:[#allocation10_spill] sm:$0xff] %v14257_v22  ;;  %v14275_v15 = vrot.slane %v19128_v17, %v13202_v36  ;;  %v19129_v22 = vld [vmem:[#allocation46_spill] sm:$0xff]  ;;  %v19134_v17 = vcombine.high %v18968_v50, %v18968_v50 }
 0x4c9   :  { %19117 = vst [vmem:[#allocation77_spill] sm:$0xff] %v14239_v40  ;;  %19120 = vst [vmem:[#allocation143_spill] sm:$0xff] %v14245_v32  ;;  %v19125_v40 = vld [vmem:[#allocation45_spill] sm:$0xff] }
 0x4ca   :  { %19113 = vst [vmem:[#allocation136_spill] sm:$0xff] %v14227_v4  ;;  %v14263_v44 = vrot.slane %v19125_v40, %v13202_v36  ;;  %v19127_v4 = vcombine.high %v19022_v49, %v19022_v49  ;;  %v19131_v40 = vcombine.high %v13376_v45, %v13376_v45  ;;  %v19132_v49 = vld [vmem:[#allocation107_spill] sm:$0xff]  ;;  %v14299_v39 = vrot.slane %v19134_v17, %v13202_v36 }
 0x4cb   :  { %v14293_v27 = vrot.slane %v19132_v49, %v13202_v36  ;;  %v3307_v17 = vrot.slane %v13909_v38, %v13202_v36  ;;  %v19144_v49 = vld [vmem:[#allocation48_spill] sm:$0xff]  ;;  %v19146_v38 = vcombine.high %v13384_v11, %v13384_v11 }
 0x4cc   :  { %19126 = vst [vmem:[#allocation137_spill] sm:$0xff] %v14263_v44  ;;  %v3314_v33 = vrot.slane %v19127_v4, %v13202_v36  ;;  %v14281_v44 = vrot.slane %v19129_v22, %v13202_v36  ;;  %v14287_v19 = vrot.slane %v19131_v40, %v13202_v36  ;;  %19135 = vst [vmem:[#allocation11_spill] sm:$0xff] %v14299_v39 }
 0x4cd   :  { %19133 = vst [vmem:[#allocation78_spill] sm:$0xff] %v14293_v27  ;;  %v19138_v40 = vcombine.high %v13380_v9, %v13380_v9  ;;  %v19140_v27 = vld [vmem:[#allocation47_spill] sm:$0xff]  ;;  %v3321_v22 = vrot.slane %v3293_v8, %v13202_v36  ;;  %v19142_v9 = vcombine.high %v18971_v28, %v18971_v28  ;;  %v14340_v8 = vrot.slane %v19146_v38, %v13202_v36  ;;  %v19151_v38 = vld [vmem:[#allocation112_spill] sm:$0xff] }
 0x4ce   :  { %19130 = vst [vmem:[#allocation141_spill] sm:$0xff] %v14281_v44  ;;  %v19136_v44 = vld [vmem:[#allocation110_spill] sm:$0xff]  ;;  %v14317_v50 = vrot.slane %v19140_v27, %v13202_v36 }
 0x4cf   :  { %v14305_v45 = vrot.slane %v19136_v44, %v13202_v36  ;;  %v14311_v4 = vrot.slane %v19138_v40, %v13202_v36  ;;  %v9780_v44 = vcombine.high %v13915_v58, %v3314_v33  ;;  %v14328_v40 = vrot.slane %v19142_v9, %v13202_v36  ;;  %19147 = vst [vmem:[#allocation12_spill] sm:$0xff] %v14340_v8  ;;  %v19148_v9 = vld [vmem:[#allocation109_spill] sm:$0xff] }
 0x4d0   :  { %19141 = vst [vmem:[#allocation80_spill] sm:$0xff] %v14317_v50  ;;  %v14334_v50 = vrot.slane %v19144_v49, %v13202_v36 }
 0x4d1   :  { %19137 = vst [vmem:[#allocation14_spill] sm:$0xff] %v14305_v45  ;;  %19139 = vst [vmem:[#allocation142_spill] sm:$0xff] %v14311_v4  ;;  %v6413_v45 = vcombine.low %v13915_v58, %v3314_v33  ;;  %v6415_v58 = vcombine.low %v3307_v17, %v3321_v22  ;;  %v9781_v33 = vcombine.high %v3307_v17, %v3321_v22 }
 0x4d2   :  { %19143 = vst [vmem:[#allocation144_spill] sm:$0xff] %v14328_v40  ;;  %19145 = vst [vmem:[#allocation19_spill] sm:$0xff] %v14334_v50  ;;  %v6430_v28 = vrot.slane %v9780_v44, %v13202_v36  ;;  %v14348_v4 = vrot.slane %v19148_v9, %v13202_v36  ;;  %v19150_v50 = vcombine.high %v18974_v53, %v18974_v53  ;;  %v19155_v53 = vld [vmem:[#allocation49_spill] sm:$0xff] }
 0x4d3   :  { %v6423_v27 = vrot.slane %v6413_v45, %v13202_v36  ;;  %v14360_v45 = vrot.slane %v19151_v38, %v13202_v36  ;;  %v6437_v44 = vrot.slane %v6415_v58, %v13202_v36  ;;  %v6444_v17 = vrot.slane %v9781_v33, %v13202_v36 }
 0x4d4   :  { %19149 = vst [vmem:[#allocation145_spill] sm:$0xff] %v14348_v4  ;;  %v14354_v11 = vrot.slane %v19150_v50, %v13202_v36  ;;  %v19153_v4 = vld [vmem:[#allocation28_spill] sm:$0xff]  ;;  %v14374_v22 = vrot.slane %v19155_v53, %v13202_v36 }
 0x4d5   :  { %19152 = vst [vmem:[#allocation79_spill] sm:$0xff] %v14360_v45  ;;  %v6445_v40 = vcombine.low %v6423_v27, %v6430_v28  ;;  %v19154_v9 = vcombine.high %v19153_v4, %v19153_v4  ;;  %v19157_v45 = vld [vmem:[#allocation83_spill] sm:$0xff]  ;;  %v19160_v27 = vld [vmem:[#allocation50_spill] sm:$0xff]  ;;  %v19162_v28 = vcombine.high %v13392_v6, %v13392_v6  ;;  %v6446_v50 = vcombine.low %v6437_v44, %v6444_v17 }
 0x4d6   :  { %19156 = vst [vmem:[#allocation24_spill] sm:$0xff] %v14374_v22  ;;  %v19158_v58 = vcombine.high %v19157_v45, %v19157_v45  ;;  %v14386_v4 = vrot.slane %v19160_v27, %v13202_v36  ;;  %v19163_v22 = vld [vmem:[#allocation111_spill] sm:$0xff]  ;;  %v19169_v44 = vcombine.high %v13396_v31, %v13396_v31  ;;  %v19173_v31 = vld [vmem:[#allocation52_spill] sm:$0xff] }
 0x4d7   :  { %v14368_v8 = vrot.slane %v19154_v9, %v13202_v36  ;;  %v14392_v9 = vrot.slane %v19162_v28, %v13202_v36  ;;  %v14398_v45 = vrot.slane %v19163_v22, %v13202_v36  ;;  %v6453_v28 = vrot.slane %v6445_v40, %v13202_v36 }
 0x4d8   :  { %v14380_v38 = vrot.slane %v19158_v58, %v13202_v36  ;;  %19161 = vst [vmem:[#allocation81_spill] sm:$0xff] %v14386_v4  ;;  %v19165_v58 = vld [vmem:[#allocation84_spill] sm:$0xff]  ;;  %v19167_v4 = vld [vmem:[#allocation114_spill] sm:$0xff]  ;;  %v14416_v17 = vrot.slane %v19169_v44, %v13202_v36  ;;  %v6460_v53 = vrot.slane %v6446_v50, %v13202_v36  ;;  %v14436_v40 = vrot.slane %v19173_v31, %v13202_v36 }
 0x4d9   :  { %19164 = vst [vmem:[#allocation21_spill] sm:$0xff] %v14398_v45  ;;  %v19166_v33 = vcombine.high %v19165_v58, %v19165_v58  ;;  %v14410_v6 = vrot.slane %v19167_v4, %v13202_v36  ;;  %v14424_v58 = vrot.slane %v13735_v34, %v13202_v36  ;;  %v19175_v50 = vcombine.high %v13400_v48, %v13400_v48 }
 0x4da   :  { %19159 = vst [vmem:[#allocation85_spill] sm:$0xff] %v14380_v38  ;;  %v19171_v38 = vcombine.high %v18983_v41, %v18983_v41  ;;  %19174 = vst [vmem:[#allocation22_spill] sm:$0xff] %v14436_v40  ;;  %v6461_v34 = vcombine.low %v6453_v28, %v6460_v53  ;;  %v19180_v40 = vld [vmem:[#allocation116_spill] sm:$0xff]  ;;  %v19182_v53 = vcombine.high %v13403_v2, %v13403_v2 }
 0x4db   :  { %v14404_v27 = vrot.slane %v19166_v33, %v13202_v36  ;;  %19168 = vst [vmem:[#allocation82_spill] sm:$0xff] %v14410_v6  ;;  %19170 = vst [vmem:[#allocation18_spill] sm:$0xff] %v14424_v58  ;;  %v14442_v33 = vrot.slane %v19175_v50, %v13202_v36  ;;  %v19176_v58 = vld [vmem:[#allocation113_spill] sm:$0xff]  ;;  %v14460_v48 = vrot.slane %v19180_v40, %v13202_v36 }
 0x4dc   :  { %v14430_v6 = vrot.slane %v19171_v38, %v13202_v36  ;;  %v14448_v41 = vrot.slane %v19176_v58, %v13202_v36  ;;  %v19178_v38 = vld [vmem:[#allocation86_spill] sm:$0xff]  ;;  %v14466_v28 = vrot.slane %v19182_v53, %v13202_v36  ;;  %9090 = vperm.xlu0 %10087, %v6461_v34   ;;  %v19188_v53 = vcombine.high %v13406_v5, %v13406_v5  ;;  %v19191_v34 = vld [vmem:[#allocation17_spill] sm:$0xff] }
 0x4dd   :  { %v19179_v44 = vcombine.high %v19178_v38, %v19178_v38  ;;  %19181 = vst [vmem:[#allocation88_spill] sm:$0xff] %v14460_v48  ;;  %v19184_v38 = vld [vmem:[#allocation138_spill] sm:$0xff] }
 0x4de   :  { %19172 = vst [vmem:[#allocation20_spill] sm:$0xff] %v14430_v6  ;;  %19177 = vst [vmem:[#allocation94_spill] sm:$0xff] %v14448_v41  ;;  %v19185_v6 = vcombine.high %v19184_v38, %v19184_v38  ;;  %v19186_v48 = vld [vmem:[#allocation54_spill] sm:$0xff]  ;;  %v14490_v50 = vrot.slane %v19188_v53, %v13202_v36  ;;  %v19192_v38 = vcombine.high %v19191_v34, %v19191_v34 }
 0x4df   :  { %v14454_v31 = vrot.slane %v19179_v44, %v13202_v36  ;;  %v14472_v44 = vrot.slane %v13759_v35, %v13202_v36  ;;  %v14484_v2 = vrot.slane %v19186_v48, %v13202_v36  ;;  %v19195_v53 = vcombine.high %v13409_v43, %v13409_v43 }
 0x4e0   :  { %v14478_v45 = vrot.slane %v19185_v6, %v13202_v36  ;;  %v14502_v41 = vrot.slane %v19192_v38, %v13202_v36  ;;  %v19199_v38 = vcombine.high %v18995_v59, %v18995_v59  ;;  %v14544_v59 = vrot.slane %v13795_v51, %v13202_v36 }
 0x4e1   :  { %19183 = vst [vmem:[#allocation25_spill] sm:$0xff] %v14472_v44  ;;  %19187 = vst [vmem:[#allocation26_spill] sm:$0xff] %v14484_v2  ;;  %v19189_v44 = vld [vmem:[#allocation115_spill] sm:$0xff]  ;;  %v19193_v2 = vld [vmem:[#allocation118_spill] sm:$0xff]  ;;  %v14514_v35 = vrot.slane %v19195_v53, %v13202_v36  ;;  %v19217_v51 = vcombine.high %v13433_v30, %v13433_v30  ;;  %v14606_v30 = vrot.slane %v13849_v7, %v13202_v36 }
 0x4e2   :  { %v14496_v6 = vrot.slane %v19189_v44, %v13202_v36  ;;  %v14508_v5 = vrot.slane %v19193_v2, %v13202_v36  ;;  %v14526_v48 = vrot.slane %v19199_v38, %v13202_v36  ;;  %v19203_v53 = vld [vmem:[#allocation89_spill] sm:$0xff]  ;;  %19206 = vst [vmem:[#allocation28_spill] sm:$0xff] %v14544_v59  ;;  %v19207_v38 = vld [vmem:[#allocation23_spill] sm:$0xff] }
 0x4e3   :  { %19196 = vst [vmem:[#allocation139_spill] sm:$0xff] %v14514_v35  ;;  %v19204_v44 = vcombine.high %v19203_v53, %v19203_v53  ;;  %v19208_v2 = vcombine.high %v19207_v38, %v19207_v38  ;;  %v19212_v53 = vcombine.high %v13415_v14, %v13415_v14  ;;  %v14570_v38 = vrot.slane %v13813_v57, %v13202_v36 }
 0x4e4   :  { %19190 = vst [vmem:[#allocation87_spill] sm:$0xff] %v14496_v6  ;;  %19194 = vst [vmem:[#allocation90_spill] sm:$0xff] %v14508_v5  ;;  %v19197_v6 = vld [vmem:[#allocation55_spill] sm:$0xff]  ;;  %v19201_v5 = vld [vmem:[#allocation56_spill] sm:$0xff] }
 0x4e5   :  { %v14520_v34 = vrot.slane %v19197_v6, %v13202_v36  ;;  %19200 = vst [vmem:[#allocation15_spill] sm:$0xff] %v14526_v48  ;;  %v14532_v43 = vrot.slane %v19201_v5, %v13202_v36  ;;  %v14538_v35 = vrot.slane %v19204_v44, %v13202_v36  ;;  %v14550_v48 = vrot.slane %v19208_v2, %v13202_v36 }
 0x4e6   :  { %v19215_v5 = vcombine.high %v13427_v46, %v13427_v46  ;;  %v14588_v2 = vrot.slane %v19217_v51, %v13202_v36  ;;  %v14594_v46 = vrot.slane %v13837_v29, %v13202_v36  ;;  %19222 = vst [vmem:[#allocation138_spill] sm:$0xff] %v14606_v30  ;;  %v19223_v51 = vcombine.high %v13445_v3, %v13445_v3 }
 0x4e7   :  { %19198 = vst [vmem:[#allocation44_spill] sm:$0xff] %v14520_v34  ;;  %19202 = vst [vmem:[#allocation27_spill] sm:$0xff] %v14532_v43  ;;  %v19210_v43 = vld [vmem:[#allocation120_spill] sm:$0xff]  ;;  %v14562_v34 = vrot.slane %v19212_v53, %v13202_v36  ;;  %v14582_v53 = vrot.slane %v13825_v23, %v13202_v36  ;;  %v14630_v3 = vrot.slane %v13873_v63, %v13202_v36 }
 0x4e8   :  { %19205 = vst [vmem:[#allocation48_spill] sm:$0xff] %v14538_v35  ;;  %19209 = vst [vmem:[#allocation83_spill] sm:$0xff] %v14550_v48  ;;  %v14556_v44 = vrot.slane %v19210_v43, %v13202_v36  ;;  %v14612_v59 = vrot.slane %v19223_v51, %v13202_v36  ;;  %v19230_v51 = vld [vmem:[#allocation29_spill] sm:$0xff] }
 0x4e9   :  { %19213 = vst [vmem:[#allocation84_spill] sm:$0xff] %v14562_v34  ;;  %19216 = vst [vmem:[#allocation114_spill] sm:$0xff] %v14582_v53  ;;  %v19231_v34 = vcombine.high %v19230_v51, %v19230_v51  ;;  %v19240_v51 = vld [vmem:[#allocation91_spill] sm:$0xff] }
 0x4ea   :  { %19211 = vst [vmem:[#allocation111_spill] sm:$0xff] %v14556_v44  ;;  %v14576_v44 = vrot.slane %v19215_v5, %v13202_v36  ;;  %19218 = vst [vmem:[#allocation113_spill] sm:$0xff] %v14588_v2  ;;  %v19220_v5 = vcombine.high %v13439_v1, %v13439_v1  ;;  %v14618_v1 = vrot.slane %v13861_v12, %v13202_v36 }
 0x4eb   :  { %19219 = vst [vmem:[#allocation86_spill] sm:$0xff] %v14594_v46  ;;  %19224 = vst [vmem:[#allocation17_spill] sm:$0xff] %v14612_v59  ;;  %v14636_v30 = vrot.slane %v19231_v34, %v13202_v36  ;;  %v19241_v46 = vcombine.high %v19240_v51, %v19240_v51  ;;  %v19248_v51 = vld [vmem:[#allocation32_spill] sm:$0xff] }
 0x4ec   :  { %v14600_v14 = vrot.slane %v19220_v5, %v13202_v36  ;;  %19225 = vst [vmem:[#allocation55_spill] sm:$0xff] %v14618_v1  ;;  %v19226_v5 = vld [vmem:[#allocation92_spill] sm:$0xff]  ;;  %19229 = vst [vmem:[#allocation23_spill] sm:$0xff] %v14630_v3  ;;  %v19238_v3 = vld [vmem:[#allocation62_spill] sm:$0xff] }
 0x4ed   :  { %v19227_v43 = vcombine.high %v19226_v5, %v19226_v5  ;;  %19232 = vst [vmem:[#allocation92_spill] sm:$0xff] %v14636_v30  ;;  %v19233_v1 = vld [vmem:[#allocation124_spill] sm:$0xff]  ;;  %v19235_v5 = vld [vmem:[#allocation30_spill] sm:$0xff]  ;;  %v14654_v34 = vrot.slane %v19238_v3, %v13202_v36  ;;  %v14660_v30 = vrot.slane %v19241_v46, %v13202_v36  ;;  %v14678_v46 = vrot.slane %v13933_v25, %v13202_v36 }
 0x4ee   :  { %19221 = vst [vmem:[#allocation116_spill] sm:$0xff] %v14600_v14  ;;  %v19236_v35 = vcombine.high %v19235_v5, %v19235_v5  ;;  %v19244_v5 = vld [vmem:[#allocation31_spill] sm:$0xff] }
 0x4ef   :  { %v14624_v48 = vrot.slane %v19227_v43, %v13202_v36  ;;  %v14642_v43 = vrot.slane %v19233_v1, %v13202_v36  ;;  %19239 = vst [vmem:[#allocation30_spill] sm:$0xff] %v14654_v34  ;;  %19242 = vst [vmem:[#allocation62_spill] sm:$0xff] %v14660_v30 }
 0x4f0   :  { %v14648_v53 = vrot.slane %v19236_v35, %v13202_v36  ;;  %v14666_v35 = vrot.slane %v13921_v18, %v13202_v36  ;;  %19247 = vst [vmem:[#allocation146_spill] sm:$0xff] %v14678_v46 }
 0x4f1   :  { %19228 = vst [vmem:[#allocation89_spill] sm:$0xff] %v14624_v48  ;;  %19234 = vst [vmem:[#allocation29_spill] sm:$0xff] %v14642_v43  ;;  %v19245_v48 = vcombine.high %v19244_v5, %v19244_v5  ;;  %v19249_v43 = vcombine.high %v19248_v51, %v19248_v51  ;;  %v19252_v5 = vld [vmem:[#allocation93_spill] sm:$0xff]  ;;  %v19256_v51 = vld [vmem:[#allocation96_spill] sm:$0xff] }
 0x4f2   :  { %19237 = vst [vmem:[#allocation124_spill] sm:$0xff] %v14648_v53  ;;  %19243 = vst [vmem:[#allocation91_spill] sm:$0xff] %v14666_v35  ;;  %v19253_v34 = vcombine.high %v19252_v5, %v19252_v5  ;;  %v19257_v35 = vcombine.high %v19256_v51, %v19256_v51  ;;  %v19260_v5 = vld [vmem:[#allocation33_spill] sm:$0xff]  ;;  %v19264_v51 = vld [vmem:[#allocation34_spill] sm:$0xff] }
 0x4f3   :  { %v14672_v53 = vrot.slane %v19245_v48, %v13202_v36  ;;  %v14684_v30 = vrot.slane %v19249_v43, %v13202_v36  ;;  %v14690_v48 = vrot.slane %v13945_v21, %v13202_v36  ;;  %v14702_v43 = vrot.slane %v13957_v24, %v13202_v36 }
 0x4f4   :  { %v19261_v46 = vcombine.high %v19260_v5, %v19260_v5  ;;  %v19268_v5 = vld [vmem:[#allocation95_spill] sm:$0xff] }
 0x4f5   :  { %19246 = vst [vmem:[#allocation31_spill] sm:$0xff] %v14672_v53  ;;  %19250 = vst [vmem:[#allocation32_spill] sm:$0xff] %v14684_v30  ;;  %v14696_v53 = vrot.slane %v19253_v34, %v13202_v36  ;;  %v14708_v30 = vrot.slane %v19257_v35, %v13202_v36  ;;  %v14714_v34 = vrot.slane %v13969_v55, %v13202_v36 }
 0x4f6   :  { %19251 = vst [vmem:[#allocation147_spill] sm:$0xff] %v14690_v48  ;;  %19255 = vst [vmem:[#allocation148_spill] sm:$0xff] %v14702_v43  ;;  %v14726_v35 = vrot.slane %v13981_v37, %v13202_v36  ;;  %v19265_v48 = vcombine.high %v19264_v51, %v19264_v51  ;;  %v19269_v43 = vcombine.high %v19268_v5, %v19268_v5  ;;  %v19272_v51 = vld [vmem:[#allocation98_spill] sm:$0xff]  ;;  %v19276_v5 = vld [vmem:[#allocation35_spill] sm:$0xff] }
 0x4f7   :  { %19254 = vst [vmem:[#allocation93_spill] sm:$0xff] %v14696_v53  ;;  %19258 = vst [vmem:[#allocation96_spill] sm:$0xff] %v14708_v30  ;;  %v14720_v53 = vrot.slane %v19261_v46, %v13202_v36  ;;  %v14738_v46 = vrot.slane %v13993_v54, %v13202_v36 }
 0x4f8   :  { %19259 = vst [vmem:[#allocation149_spill] sm:$0xff] %v14714_v34  ;;  %19263 = vst [vmem:[#allocation150_spill] sm:$0xff] %v14726_v35  ;;  %v14732_v30 = vrot.slane %v19265_v48, %v13202_v36  ;;  %v14750_v48 = vrot.slane %v14005_v56, %v13202_v36  ;;  %v19273_v34 = vcombine.high %v19272_v51, %v19272_v51  ;;  %v19280_v51 = vld [vmem:[#allocation36_spill] sm:$0xff] }
 0x4f9   :  { %19262 = vst [vmem:[#allocation33_spill] sm:$0xff] %v14720_v53  ;;  %19267 = vst [vmem:[#allocation151_spill] sm:$0xff] %v14738_v46  ;;  %v14744_v53 = vrot.slane %v19269_v43, %v13202_v36  ;;  %v14762_v43 = vrot.slane %v14017_v13, %v13202_v36  ;;  %v19277_v35 = vcombine.high %v19276_v5, %v19276_v5  ;;  %v19284_v5 = vld [vmem:[#allocation97_spill] sm:$0xff] }
 0x4fa   :  { %19266 = vst [vmem:[#allocation34_spill] sm:$0xff] %v14732_v30  ;;  %19271 = vst [vmem:[#allocation152_spill] sm:$0xff] %v14750_v48  ;;  %v14756_v30 = vrot.slane %v19273_v34, %v13202_v36  ;;  %v14774_v34 = vrot.slane %v14029_v20, %v13202_v36  ;;  %v19281_v46 = vcombine.high %v19280_v51, %v19280_v51  ;;  %v19288_v51 = vld [vmem:[#allocation100_spill] sm:$0xff] }
 0x4fb   :  { %19270 = vst [vmem:[#allocation95_spill] sm:$0xff] %v14744_v53  ;;  %19275 = vst [vmem:[#allocation153_spill] sm:$0xff] %v14762_v43  ;;  %v14768_v53 = vrot.slane %v19277_v35, %v13202_v36  ;;  %v14786_v35 = vrot.slane %v14041_v26, %v13202_v36  ;;  %v19285_v48 = vcombine.high %v19284_v5, %v19284_v5  ;;  %v19292_v5 = vld [vmem:[#allocation37_spill] sm:$0xff] }
 0x4fc   :  { %19274 = vst [vmem:[#allocation98_spill] sm:$0xff] %v14756_v30  ;;  %19279 = vst [vmem:[#allocation154_spill] sm:$0xff] %v14774_v34  ;;  %v14780_v30 = vrot.slane %v19281_v46, %v13202_v36  ;;  %v14798_v46 = vrot.slane %v14053_v62, %v13202_v36  ;;  %v19289_v43 = vcombine.high %v19288_v51, %v19288_v51  ;;  %v19297_v51 = vld [vmem:[#allocation38_spill] sm:$0xff] }
 0x4fd   :  { %19278 = vst [vmem:[#allocation35_spill] sm:$0xff] %v14768_v53  ;;  %19283 = vst [vmem:[#allocation155_spill] sm:$0xff] %v14786_v35  ;;  %v14792_v53 = vrot.slane %v19285_v48, %v13202_v36  ;;  %v14810_v48 = vrot.slane %v14065_v0, %v13202_v36  ;;  %v19293_v34 = vcombine.high %v19292_v5, %v19292_v5  ;;  %v19301_v5 = vld [vmem:[#allocation99_spill] sm:$0xff] }
 0x4fe   :  { %19282 = vst [vmem:[#allocation36_spill] sm:$0xff] %v14780_v30  ;;  %19287 = vst [vmem:[#allocation156_spill] sm:$0xff] %v14798_v46  ;;  %v14804_v30 = vrot.slane %v19289_v43, %v13202_v36  ;;  %v19295_v46 = vld [vmem:[#allocation69_spill] sm:$0xff]  ;;  %v19298_v35 = vcombine.high %v19297_v51, %v19297_v51  ;;  %v19302_v59 = vcombine.high %v19301_v5, %v19301_v5  ;;  %v19305_v51 = vld [vmem:[#allocation102_spill] sm:$0xff] }
 0x4ff   :  { %19286 = vst [vmem:[#allocation97_spill] sm:$0xff] %v14792_v53  ;;  %19291 = vst [vmem:[#allocation157_spill] sm:$0xff] %v14810_v48  ;;  %v14816_v53 = vrot.slane %v19293_v34, %v13202_v36  ;;  %v14822_v43 = vrot.slane %v19295_v46, %v13202_v36  ;;  %v14834_v34 = vrot.slane %v14089_v47, %v13202_v36  ;;  %v19309_v5 = vld [vmem:[#allocation39_spill] sm:$0xff] }
 0x500   :  { %19290 = vst [vmem:[#allocation100_spill] sm:$0xff] %v14804_v30  ;;  %v14828_v30 = vrot.slane %v19298_v35, %v13202_v36  ;;  %v14846_v35 = vrot.slane %v14101_v61, %v13202_v36  ;;  %v19306_v48 = vcombine.high %v19305_v51, %v19305_v51  ;;  %v19313_v51 = vld [vmem:[#allocation40_spill] sm:$0xff] }
 0x501   :  { %19294 = vst [vmem:[#allocation37_spill] sm:$0xff] %v14816_v53  ;;  %19296 = vst [vmem:[#allocation69_spill] sm:$0xff] %v14822_v43  ;;  %v14840_v53 = vrot.slane %v19302_v59, %v13202_v36  ;;  %v14858_v59 = vrot.slane %v14113_v52, %v13202_v36  ;;  %v19310_v43 = vcombine.high %v19309_v5, %v19309_v5  ;;  %v19317_v5 = vld [vmem:[#allocation101_spill] sm:$0xff] }
 0x502   :  { %19299 = vst [vmem:[#allocation38_spill] sm:$0xff] %v14828_v30  ;;  %19300 = vst [vmem:[#allocation158_spill] sm:$0xff] %v14834_v34  ;;  %v14852_v30 = vrot.slane %v19306_v48, %v13202_v36  ;;  %v14870_v48 = vrot.slane %v14125_v60, %v13202_v36  ;;  %v19314_v34 = vcombine.high %v19313_v51, %v19313_v51  ;;  %v19322_v51 = vld [vmem:[#allocation104_spill] sm:$0xff] }
 0x503   :  { %19303 = vst [vmem:[#allocation99_spill] sm:$0xff] %v14840_v53  ;;  %19304 = vst [vmem:[#allocation159_spill] sm:$0xff] %v14846_v35  ;;  %v14864_v53 = vrot.slane %v19310_v43, %v13202_v36  ;;  %v14882_v43 = vrot.slane %v14137_v42, %v13202_v36  ;;  %v19318_v35 = vcombine.high %v19317_v5, %v19317_v5  ;;  %v19327_v5 = vld [vmem:[#allocation41_spill] sm:$0xff] }
 0x504   :  { %19307 = vst [vmem:[#allocation102_spill] sm:$0xff] %v14852_v30  ;;  %19308 = vst [vmem:[#allocation160_spill] sm:$0xff] %v14858_v59  ;;  %v14876_v30 = vrot.slane %v19314_v34, %v13202_v36  ;;  %v19323_v59 = vcombine.high %v19322_v51, %v19322_v51  ;;  %v19328_v14 = vcombine.high %v19327_v5, %v19327_v5  ;;  %v19332_v51 = vld [vmem:[#allocation42_spill] sm:$0xff]  ;;  %v19337_v5 = vld [vmem:[#allocation103_spill] sm:$0xff] }
 0x505   :  { %19311 = vst [vmem:[#allocation39_spill] sm:$0xff] %v14864_v53  ;;  %19312 = vst [vmem:[#allocation161_spill] sm:$0xff] %v14870_v48  ;;  %v14888_v53 = vrot.slane %v19318_v35, %v13202_v36  ;;  %v19320_v48 = vld [vmem:[#allocation134_spill] sm:$0xff]  ;;  %v19333_v2 = vcombine.high %v19332_v51, %v19332_v51 }
 0x506   :  { %19315 = vst [vmem:[#allocation40_spill] sm:$0xff] %v14876_v30  ;;  %19316 = vst [vmem:[#allocation162_spill] sm:$0xff] %v14882_v43  ;;  %v14894_v34 = vrot.slane %v19320_v48, %v13202_v36  ;;  %v14900_v30 = vrot.slane %v19323_v59, %v13202_v36  ;;  %v19325_v43 = vld [vmem:[#allocation73_spill] sm:$0xff]  ;;  %v19338_v48 = vcombine.high %v19337_v5, %v19337_v5  ;;  %v19342_v51 = vld [vmem:[#allocation106_spill] sm:$0xff] }
 0x507   :  { %19319 = vst [vmem:[#allocation101_spill] sm:$0xff] %v14888_v53  ;;  %v14906_v35 = vrot.slane %v19325_v43, %v13202_v36  ;;  %v14912_v53 = vrot.slane %v19328_v14, %v13202_v36  ;;  %v19343_v43 = vcombine.high %v19342_v51, %v19342_v51  ;;  %v19346_v5 = vld [vmem:[#allocation43_spill] sm:$0xff]  ;;  %v19351_v51 = vcombine.high %v19112_v10, %v19112_v10 }
 0x508   :  { %19321 = vst [vmem:[#allocation163_spill] sm:$0xff] %v14894_v34  ;;  %19324 = vst [vmem:[#allocation104_spill] sm:$0xff] %v14900_v30  ;;  %v19330_v34 = vld [vmem:[#allocation74_spill] sm:$0xff]  ;;  %v14924_v30 = vrot.slane %v19333_v2, %v13202_v36  ;;  %v14990_v10 = vrot.slane %v14245_v32, %v13202_v36  ;;  %v19366_v32 = vld [vmem:[#allocation45_spill] sm:$0xff] }
 0x509   :  { %19326 = vst [vmem:[#allocation164_spill] sm:$0xff] %v14906_v35  ;;  %19329 = vst [vmem:[#allocation41_spill] sm:$0xff] %v14912_v53  ;;  %v14918_v59 = vrot.slane %v19330_v34, %v13202_v36  ;;  %v19335_v35 = vld [vmem:[#allocation135_spill] sm:$0xff]  ;;  %v14936_v53 = vrot.slane %v19338_v48, %v13202_v36  ;;  %v14954_v48 = vrot.slane %v14209_v16, %v13202_v36 }
 0x50a   :  { %19334 = vst [vmem:[#allocation42_spill] sm:$0xff] %v14924_v30  ;;  %v14930_v14 = vrot.slane %v19335_v35, %v13202_v36  ;;  %v14948_v30 = vrot.slane %v19343_v43, %v13202_v36  ;;  %v19347_v34 = vcombine.high %v19346_v5, %v19346_v5  ;;  %v19355_v5 = vld [vmem:[#allocation105_spill] sm:$0xff]  ;;  %19358 = vst [vmem:[#allocation170_spill] sm:$0xff] %v14990_v10 }
 0x50b   :  { %19331 = vst [vmem:[#allocation165_spill] sm:$0xff] %v14918_v59  ;;  %19339 = vst [vmem:[#allocation103_spill] sm:$0xff] %v14936_v53  ;;  %v19340_v59 = vld [vmem:[#allocation75_spill] sm:$0xff] }
 0x50c   :  { %19336 = vst [vmem:[#allocation135_spill] sm:$0xff] %v14930_v14  ;;  %v14942_v2 = vrot.slane %v19340_v59, %v13202_v36  ;;  %19344 = vst [vmem:[#allocation106_spill] sm:$0xff] %v14948_v30  ;;  %v14960_v53 = vrot.slane %v19347_v34, %v13202_v36  ;;  %v14972_v14 = vrot.slane %v19351_v51, %v13202_v36  ;;  %v19359_v51 = vld [vmem:[#allocation108_spill] sm:$0xff] }
 0x50d   :  { %19345 = vst [vmem:[#allocation167_spill] sm:$0xff] %v14954_v48  ;;  %v19353_v48 = vld [vmem:[#allocation3_spill] sm:$0xff]  ;;  %v19356_v59 = vcombine.high %v19355_v5, %v19355_v5  ;;  %v19360_v30 = vcombine.high %v19359_v51, %v19359_v51 }
 0x50e   :  { %19341 = vst [vmem:[#allocation166_spill] sm:$0xff] %v14942_v2  ;;  %19348 = vst [vmem:[#allocation43_spill] sm:$0xff] %v14960_v53  ;;  %v19349_v2 = vld [vmem:[#allocation8_spill] sm:$0xff]  ;;  %v14978_v34 = vrot.slane %v19353_v48, %v13202_v36  ;;  %v19364_v48 = vld [vmem:[#allocation10_spill] sm:$0xff] }
 0x50f   :  { %v14966_v43 = vrot.slane %v19349_v2, %v13202_v36  ;;  %19352 = vst [vmem:[#allocation168_spill] sm:$0xff] %v14972_v14  ;;  %v14984_v53 = vrot.slane %v19356_v59, %v13202_v36  ;;  %v14996_v14 = vrot.slane %v19360_v30, %v13202_v36  ;;  %v19363_v59 = vld [vmem:[#allocation58_spill] sm:$0xff]  ;;  %v15008_v10 = vrot.slane %v19364_v48, %v13202_v36 }
 0x510   :  { %19354 = vst [vmem:[#allocation169_spill] sm:$0xff] %v14978_v34  ;;  %v19362_v34 = vcombine.high %v13813_v57, %v13813_v57  ;;  %v19367_v30 = vcombine.high %v19366_v32, %v19366_v32  ;;  %v9762_v57 = vcombine.high %v19363_v59, %v14576_v44 }
 0x511   :  { %19350 = vst [vmem:[#allocation8_spill] sm:$0xff] %v14966_v43  ;;  %19357 = vst [vmem:[#allocation105_spill] sm:$0xff] %v14984_v53  ;;  %v5972_v53 = vcombine.low %v19363_v59, %v14576_v44  ;;  %v19370_v43 = vld [vmem:[#allocation46_spill] sm:$0xff]  ;;  %v19374_v44 = vld [vmem:[#allocation107_spill] sm:$0xff] }
 0x512   :  { %19361 = vst [vmem:[#allocation108_spill] sm:$0xff] %v14996_v14  ;;  %v2880_v5 = vrot.slane %v19362_v34, %v13202_v36  ;;  %19365 = vst [vmem:[#allocation58_spill] sm:$0xff] %v15008_v10  ;;  %v15014_v51 = vrot.slane %v19367_v30, %v13202_v36  ;;  %v15022_v14 = vrot.slane %v14275_v15, %v13202_v36 }
 0x513   :  { %v19371_v10 = vcombine.high %v19370_v43, %v19370_v43  ;;  %v15034_v30 = vrot.slane %v14287_v19, %v13202_v36  ;;  %v19375_v59 = vcombine.high %v19374_v44, %v19374_v44  ;;  %v15046_v43 = vrot.slane %v14299_v39, %v13202_v36 }
 0x514   :  { %19368 = vst [vmem:[#allocation45_spill] sm:$0xff] %v15014_v51  ;;  %19369 = vst [vmem:[#allocation171_spill] sm:$0xff] %v15022_v14  ;;  %v9763_v51 = vcombine.high %v14570_v38, %v2880_v5  ;;  %v5982_v44 = vrot.slane %v5972_v53, %v13202_v36 }
 0x515   :  { %v15028_v48 = vrot.slane %v19371_v10, %v13202_v36  ;;  %19373 = vst [vmem:[#allocation172_spill] sm:$0xff] %v15034_v30  ;;  %v15040_v34 = vrot.slane %v19375_v59, %v13202_v36  ;;  %19377 = vst [vmem:[#allocation173_spill] sm:$0xff] %v15046_v43  ;;  %v19378_v10 = vld [vmem:[#allocation110_spill] sm:$0xff]  ;;  %v5974_v30 = vcombine.low %v14570_v38, %v2880_v5  ;;  %v19383_v43 = vld [vmem:[#allocation47_spill] sm:$0xff] }
 0x516   :  { %v19379_v32 = vcombine.high %v19378_v10, %v19378_v10  ;;  %v19381_v59 = vld [vmem:[#allocation142_spill] sm:$0xff]  ;;  %v19384_v39 = vcombine.high %v19383_v43, %v19383_v43 }
 0x517   :  { %19372 = vst [vmem:[#allocation46_spill] sm:$0xff] %v15028_v48  ;;  %19376 = vst [vmem:[#allocation107_spill] sm:$0xff] %v15040_v34  ;;  %v15061_v14 = vrot.slane %v19381_v59, %v13202_v36  ;;  %v5996_v5 = vrot.slane %v5974_v30, %v13202_v36  ;;  %v6003_v34 = vrot.slane %v9763_v51, %v13202_v36 }
 0x518   :  { %v15052_v48 = vrot.slane %v19379_v32, %v13202_v36  ;;  %v15067_v10 = vrot.slane %v19384_v39, %v13202_v36  ;;  %v5989_v32 = vrot.slane %v9762_v57, %v13202_v36  ;;  %v19390_v39 = vld [vmem:[#allocation12_spill] sm:$0xff] }
 0x519   :  { %19382 = vst [vmem:[#allocation142_spill] sm:$0xff] %v15061_v14  ;;  %v19388_v14 = vcombine.high %v19144_v49, %v19144_v49  ;;  %v15088_v38 = vrot.slane %v19390_v39, %v13202_v36  ;;  %v15100_v49 = vrot.slane %v14354_v11, %v13202_v36  ;;  %v19396_v57 = vld [vmem:[#allocation112_spill] sm:$0xff] }
 0x51a   :  { %19380 = vst [vmem:[#allocation110_spill] sm:$0xff] %v15052_v48  ;;  %19385 = vst [vmem:[#allocation47_spill] sm:$0xff] %v15067_v10  ;;  %v19386_v48 = vld [vmem:[#allocation144_spill] sm:$0xff]  ;;  %v6004_v10 = vcombine.low %v5982_v44, %v5989_v32  ;;  %v15112_v32 = vrot.slane %v14368_v8, %v13202_v36 }
 0x51b   :  { %v15074_v53 = vrot.slane %v19386_v48, %v13202_v36  ;;  %v15082_v43 = vrot.slane %v19388_v14, %v13202_v36  ;;  %19391 = vst [vmem:[#allocation12_spill] sm:$0xff] %v15088_v38  ;;  %19395 = vst [vmem:[#allocation176_spill] sm:$0xff] %v15100_v49  ;;  %v6005_v14 = vcombine.low %v5996_v5, %v6003_v34  ;;  %v19403_v34 = vld [vmem:[#allocation85_spill] sm:$0xff]  ;;  %v19405_v49 = vld [vmem:[#allocation50_spill] sm:$0xff] }
 0x51c   :  { %19399 = vst [vmem:[#allocation177_spill] sm:$0xff] %v15112_v32  ;;  %v19406_v32 = vcombine.high %v19405_v49, %v19405_v49  ;;  %v19409_v5 = vcombine.high %v19163_v22, %v19163_v22  ;;  %v15150_v49 = vrot.slane %v14404_v27, %v13202_v36  ;;  %v15162_v22 = vrot.slane %v14416_v17, %v13202_v36 }
 0x51d   :  { %19387 = vst [vmem:[#allocation174_spill] sm:$0xff] %v15074_v53  ;;  %19389 = vst [vmem:[#allocation175_spill] sm:$0xff] %v15082_v43  ;;  %v19392_v53 = vld [vmem:[#allocation109_spill] sm:$0xff]  ;;  %v19397_v43 = vcombine.high %v19396_v57, %v19396_v57  ;;  %v6012_v57 = vrot.slane %v6004_v10, %v13202_v36  ;;  %v6019_v44 = vrot.slane %v6005_v14, %v13202_v36 }
 0x51e   :  { %v19393_v30 = vcombine.high %v19392_v53, %v19392_v53  ;;  %v19400_v53 = vld [vmem:[#allocation49_spill] sm:$0xff]  ;;  %v15144_v10 = vrot.slane %v19409_v5, %v13202_v36  ;;  %19411 = vst [vmem:[#allocation180_spill] sm:$0xff] %v15150_v49  ;;  %19414 = vst [vmem:[#allocation182_spill] sm:$0xff] %v15162_v22  ;;  %v19415_v5 = vld [vmem:[#allocation51_spill] sm:$0xff] }
 0x51f   :  { %v15106_v38 = vrot.slane %v19397_v43, %v13202_v36  ;;  %v15124_v43 = vrot.slane %v19403_v34, %v13202_v36  ;;  %v19416_v14 = vcombine.high %v19415_v5, %v19415_v5  ;;  %v19418_v49 = vld [vmem:[#allocation20_spill] sm:$0xff]  ;;  %v19424_v5 = vcombine.high %v19176_v58, %v19176_v58 }
 0x520   :  { %v15094_v48 = vrot.slane %v19393_v30, %v13202_v36  ;;  %v19401_v30 = vcombine.high %v19400_v53, %v19400_v53  ;;  %19410 = vst [vmem:[#allocation179_spill] sm:$0xff] %v15144_v10  ;;  %v15210_v58 = vrot.slane %v14466_v28, %v13202_v36 }
 0x521   :  { %19398 = vst [vmem:[#allocation112_spill] sm:$0xff] %v15106_v38  ;;  %19404 = vst [vmem:[#allocation85_spill] sm:$0xff] %v15124_v43  ;;  %v15132_v38 = vrot.slane %v19406_v32, %v13202_v36  ;;  %v19412_v32 = vcombine.high %v19167_v4, %v19167_v4  ;;  %v15168_v10 = vrot.slane %v19416_v14, %v13202_v36 }
 0x522   :  { %19394 = vst [vmem:[#allocation109_spill] sm:$0xff] %v15094_v48  ;;  %v15118_v51 = vrot.slane %v19401_v30, %v13202_v36  ;;  %v15138_v30 = vrot.slane %v14392_v9, %v13202_v36  ;;  %v15174_v4 = vrot.slane %v19418_v49, %v13202_v36  ;;  %v15186_v14 = vrot.slane %v14442_v33, %v13202_v36 }
 0x523   :  { %19407 = vst [vmem:[#allocation50_spill] sm:$0xff] %v15132_v38  ;;  %v15156_v53 = vrot.slane %v19412_v32, %v13202_v36  ;;  %19417 = vst [vmem:[#allocation51_spill] sm:$0xff] %v15168_v10  ;;  %v15192_v38 = vrot.slane %v19424_v5, %v13202_v36  ;;  %v19430_v5 = vld [vmem:[#allocation53_spill] sm:$0xff] }
 0x524   :  { %19402 = vst [vmem:[#allocation49_spill] sm:$0xff] %v15118_v51  ;;  %19408 = vst [vmem:[#allocation178_spill] sm:$0xff] %v15138_v30  ;;  %v6020_v30 = vcombine.low %v6012_v57, %v6019_v44  ;;  %v19420_v44 = vld [vmem:[#allocation52_spill] sm:$0xff]  ;;  %v19431_v22 = vcombine.high %v19430_v5, %v19430_v5  ;;  %v19438_v5 = vld [vmem:[#allocation115_spill] sm:$0xff] }
 0x525   :  { %19413 = vst [vmem:[#allocation181_spill] sm:$0xff] %v15156_v53  ;;  %19419 = vst [vmem:[#allocation20_spill] sm:$0xff] %v15174_v4  ;;  %v19421_v57 = vcombine.high %v19420_v44, %v19420_v44  ;;  %v15198_v44 = vrot.slane %v14454_v31, %v13202_v36 }
 0x526   :  { %19423 = vst [vmem:[#allocation183_spill] sm:$0xff] %v15186_v14  ;;  %9063 = vperm.xlu1 %10088, %v6020_v30   ;;  %19425 = vst [vmem:[#allocation184_spill] sm:$0xff] %v15192_v38  ;;  %v15216_v14 = vrot.slane %v19431_v22, %v13202_v36  ;;  %v15234_v22 = vrot.slane %v14490_v50, %v13202_v36 }
 0x527   :  { %v15180_v32 = vrot.slane %v19421_v57, %v13202_v36  ;;  %19426 = vst [vmem:[#allocation185_spill] sm:$0xff] %v15198_v44  ;;  %v19427_v57 = vcombine.high %v19180_v40, %v19180_v40  ;;  %19429 = vst [vmem:[#allocation187_spill] sm:$0xff] %v15210_v58  ;;  %v15222_v40 = vrot.slane %v14478_v45, %v13202_v36 }
 0x528   :  { %19432 = vst [vmem:[#allocation53_spill] sm:$0xff] %v15216_v14  ;;  %19437 = vst [vmem:[#allocation189_spill] sm:$0xff] %v15234_v22  ;;  %v19439_v44 = vcombine.high %v19438_v5, %v19438_v5  ;;  %v19445_v22 = vld [vmem:[#allocation139_spill] sm:$0xff]  ;;  %v19447_v5 = vcombine.high %v19197_v6, %v19197_v6 }
 0x529   :  { %19422 = vst [vmem:[#allocation52_spill] sm:$0xff] %v15180_v32  ;;  %v15204_v43 = vrot.slane %v19427_v57, %v13202_v36  ;;  %19433 = vst [vmem:[#allocation188_spill] sm:$0xff] %v15222_v40  ;;  %v19434_v57 = vld [vmem:[#allocation54_spill] sm:$0xff] }
 0x52a   :  { %v19435_v30 = vcombine.high %v19434_v57, %v19434_v57  ;;  %v15240_v14 = vrot.slane %v19439_v44, %v13202_v36  ;;  %v19442_v57 = vld [vmem:[#allocation118_spill] sm:$0xff]  ;;  %v15258_v44 = vrot.slane %v19445_v22, %v13202_v36  ;;  %v15264_v40 = vrot.slane %v19447_v5, %v13202_v36 }
 0x52b   :  { %19428 = vst [vmem:[#allocation186_spill] sm:$0xff] %v15204_v43  ;;  %v19443_v58 = vcombine.high %v19442_v57, %v19442_v57  ;;  %v5694_v43 = vcombine.high %v19445_v22, %v19445_v22  ;;  %v19451_v57 = vld [vmem:[#allocation56_spill] sm:$0xff]  ;;  %v19454_v22 = vcombine.high %v13825_v23, %v13825_v23  ;;  %v19455_v5 = vcombine.high %v13837_v29, %v13837_v29 }
 0x52c   :  { %v15228_v4 = vrot.slane %v19435_v30, %v13202_v36  ;;  %19440 = vst [vmem:[#allocation115_spill] sm:$0xff] %v15240_v14  ;;  %v15246_v30 = vrot.slane %v14502_v41, %v13202_v36  ;;  %19446 = vst [vmem:[#allocation139_spill] sm:$0xff] %v15258_v44  ;;  %v19458_v23 = vcombine.high %v13873_v63, %v13873_v63 }
 0x52d   :  { %19448 = vst [vmem:[#allocation191_spill] sm:$0xff] %v15264_v40  ;;  %v15282_v6 = vrot.slane %v19454_v22, %v13202_v36  ;;  %v15288_v14 = vrot.slane %v19455_v5, %v13202_v36  ;;  %v19459_v29 = vcombine.high %v19233_v1, %v19233_v1  ;;  %v19463_v63 = vcombine.high %v13933_v25, %v13933_v25 }
 0x52e   :  { %19436 = vst [vmem:[#allocation54_spill] sm:$0xff] %v15228_v4  ;;  %19441 = vst [vmem:[#allocation190_spill] sm:$0xff] %v15246_v30  ;;  %v15252_v4 = vrot.slane %v19443_v58, %v13202_v36  ;;  %v19449_v30 = vld [vmem:[#allocation15_spill] sm:$0xff]  ;;  %v15306_v22 = vrot.slane %v19458_v23, %v13202_v36  ;;  %v19464_v1 = vcombine.high %v13945_v21, %v13945_v21 }
 0x52f   :  { %v15270_v58 = vrot.slane %v19449_v30, %v13202_v36  ;;  %v15312_v5 = vrot.slane %v19459_v29, %v13202_v36  ;;  %v15330_v23 = vrot.slane %v19463_v63, %v13202_v36  ;;  %v19469_v25 = vcombine.high %v13981_v37, %v13981_v37 }
 0x530   :  { %19444 = vst [vmem:[#allocation118_spill] sm:$0xff] %v15252_v4  ;;  %v19452_v4 = vcombine.high %v19451_v57, %v19451_v57  ;;  %v15336_v29 = vrot.slane %v19464_v1, %v13202_v36  ;;  %v19470_v21 = vcombine.high %v13993_v54, %v13993_v54  ;;  %v19476_v37 = vcombine.high %v14029_v20, %v14029_v20 }
 0x531   :  { %19450 = vst [vmem:[#allocation192_spill] sm:$0xff] %v15270_v58  ;;  %v19456_v58 = vcombine.high %v13849_v7, %v13849_v7  ;;  %v19460_v7 = vcombine.high %v19238_v3, %v19238_v3  ;;  %v19466_v3 = vcombine.high %v13957_v24, %v13957_v24  ;;  %v15354_v63 = vrot.slane %v19469_v25, %v13202_v36 }
 0x532   :  { %v15276_v38 = vrot.slane %v19452_v4, %v13202_v36  ;;  %v19457_v4 = vcombine.high %v13861_v12, %v13861_v12  ;;  %v19461_v12 = vcombine.high %v13921_v18, %v13921_v18  ;;  %19465 = vst [vmem:[#allocation194_spill] sm:$0xff] %v15336_v29  ;;  %v19467_v18 = vcombine.high %v13969_v55, %v13969_v55 }
 0x533   :  { %v15294_v40 = vrot.slane %v19456_v58, %v13202_v36  ;;  %v15318_v58 = vrot.slane %v19460_v7, %v13202_v36  ;;  %v15342_v7 = vrot.slane %v19466_v3, %v13202_v36  ;;  %v15360_v1 = vrot.slane %v19470_v21, %v13202_v36 }
 0x534   :  { %19453 = vst [vmem:[#allocation56_spill] sm:$0xff] %v15276_v38  ;;  %v15300_v57 = vrot.slane %v19457_v4, %v13202_v36  ;;  %v15324_v4 = vrot.slane %v19461_v12, %v13202_v36  ;;  %v15348_v12 = vrot.slane %v19467_v18, %v13202_v36  ;;  %v19472_v24 = vcombine.high %v14005_v56, %v14005_v56 }
 0x535   :  { %19471 = vst [vmem:[#allocation196_spill] sm:$0xff] %v15360_v1  ;;  %v19474_v55 = vcombine.high %v14017_v13, %v14017_v13  ;;  %v15378_v25 = vrot.slane %v19476_v37, %v13202_v36  ;;  %v19478_v54 = vcombine.high %v14041_v26, %v14041_v26  ;;  %v19480_v56 = vcombine.high %v14053_v62, %v14053_v62 }
 0x536   :  { %19462 = vst [vmem:[#allocation193_spill] sm:$0xff] %v15324_v4  ;;  %19468 = vst [vmem:[#allocation195_spill] sm:$0xff] %v15348_v12  ;;  %v15366_v3 = vrot.slane %v19472_v24, %v13202_v36  ;;  %v19482_v13 = vcombine.high %v14065_v0, %v14065_v0  ;;  %v19484_v20 = vcombine.high %v19295_v46, %v19295_v46 }
 0x537   :  { %v15372_v18 = vrot.slane %v19474_v55, %v13202_v36  ;;  %19477 = vst [vmem:[#allocation199_spill] sm:$0xff] %v15378_v25  ;;  %v15384_v21 = vrot.slane %v19478_v54, %v13202_v36  ;;  %v15390_v24 = vrot.slane %v19480_v56, %v13202_v36  ;;  %v19486_v26 = vcombine.high %v14089_v47, %v14089_v47 }
 0x538   :  { %19473 = vst [vmem:[#allocation197_spill] sm:$0xff] %v15366_v3  ;;  %v15396_v55 = vrot.slane %v19482_v13, %v13202_v36  ;;  %v15402_v37 = vrot.slane %v19484_v20, %v13202_v36  ;;  %v19488_v62 = vcombine.high %v14101_v61, %v14101_v61  ;;  %v19490_v0 = vcombine.high %v14113_v52, %v14113_v52  ;;  %v19496_v61 = vld [vmem:[#allocation134_spill] sm:$0xff]  ;;  %v19499_v52 = vld [vmem:[#allocation73_spill] sm:$0xff] }
 0x539   :  { %19475 = vst [vmem:[#allocation198_spill] sm:$0xff] %v15372_v18  ;;  %19479 = vst [vmem:[#allocation200_spill] sm:$0xff] %v15384_v21  ;;  %v15408_v54 = vrot.slane %v19486_v26, %v13202_v36  ;;  %v19492_v46 = vcombine.high %v14125_v60, %v14125_v60  ;;  %v19494_v47 = vcombine.high %v14137_v42, %v14137_v42  ;;  %v19502_v60 = vld [vmem:[#allocation74_spill] sm:$0xff] }
 0x53a   :  { %19481 = vst [vmem:[#allocation201_spill] sm:$0xff] %v15390_v24  ;;  %19483 = vst [vmem:[#allocation202_spill] sm:$0xff] %v15396_v55  ;;  %v15414_v56 = vrot.slane %v19488_v62, %v13202_v36  ;;  %v15420_v13 = vrot.slane %v19490_v0, %v13202_v36  ;;  %v19497_v62 = vcombine.high %v19496_v61, %v19496_v61  ;;  %v19507_v61 = vld [vmem:[#allocation75_spill] sm:$0xff]  ;;  %v19641_v55 = vld [vmem:[#allocation14_spill] sm:$0xff] }
 0x53b   :  { %19485 = vst [vmem:[#allocation203_spill] sm:$0xff] %v15402_v37  ;;  %19487 = vst [vmem:[#allocation204_spill] sm:$0xff] %v15408_v54  ;;  %v15426_v20 = vrot.slane %v19492_v46, %v13202_v36  ;;  %v15432_v26 = vrot.slane %v19494_v47, %v13202_v36  ;;  %v19500_v0 = vcombine.high %v19499_v52, %v19499_v52  ;;  %v19665_v54 = vld [vmem:[#allocation114_spill] sm:$0xff] }
 0x53c   :  { %19489 = vst [vmem:[#allocation205_spill] sm:$0xff] %v15414_v56  ;;  %19491 = vst [vmem:[#allocation206_spill] sm:$0xff] %v15420_v13  ;;  %v15438_v38 = vrot.slane %v19497_v62, %v13202_v36  ;;  %v19503_v46 = vcombine.high %v19502_v60, %v19502_v60  ;;  %v19505_v42 = vcombine.high %v19335_v35, %v19335_v35  ;;  %v19514_v35 = vld [vmem:[#allocation3_spill] sm:$0xff]  ;;  %v19637_v13 = vld [vmem:[#allocation141_spill] sm:$0xff] }
 0x53d   :  { %19493 = vst [vmem:[#allocation207_spill] sm:$0xff] %v15426_v20  ;;  %19495 = vst [vmem:[#allocation208_spill] sm:$0xff] %v15432_v26  ;;  %v15444_v44 = vrot.slane %v19500_v0, %v13202_v36  ;;  %v19508_v62 = vcombine.high %v19507_v61, %v19507_v61  ;;  %v19510_v52 = vcombine.high %v14209_v16, %v14209_v16  ;;  %v19517_v61 = vld [vmem:[#allocation143_spill] sm:$0xff]  ;;  %v19520_v16 = vld [vmem:[#allocation10_spill] sm:$0xff] }
 0x53e   :  { %19498 = vst [vmem:[#allocation134_spill] sm:$0xff] %v15438_v38  ;;  %v15450_v30 = vrot.slane %v19503_v46, %v13202_v36  ;;  %v15456_v47 = vrot.slane %v19505_v42, %v13202_v36  ;;  %v19512_v60 = vcombine.high %v19349_v2, %v19349_v2  ;;  %v19515_v42 = vcombine.high %v19514_v35, %v19514_v35  ;;  %v19590_v20 = vld [vmem:[#allocation95_spill] sm:$0xff]  ;;  %v19646_v56 = vld [vmem:[#allocation145_spill] sm:$0xff]  ;;  %v19668_v18 = vld [vmem:[#allocation86_spill] sm:$0xff] }
 0x53f   :  { %19501 = vst [vmem:[#allocation73_spill] sm:$0xff] %v15444_v44  ;;  %v15462_v38 = vrot.slane %v19508_v62, %v13202_v36  ;;  %v15468_v0 = vrot.slane %v19510_v52, %v13202_v36  ;;  %v19518_v62 = vcombine.high %v19517_v61, %v19517_v61  ;;  %v19521_v52 = vcombine.high %v19520_v16, %v19520_v16  ;;  %v19527_v61 = vld [vmem:[#allocation11_spill] sm:$0xff]  ;;  %v19588_v44 = vld [vmem:[#allocation34_spill] sm:$0xff] }
 0x540   :  { %19504 = vst [vmem:[#allocation74_spill] sm:$0xff] %v15450_v30  ;;  %19506 = vst [vmem:[#allocation209_spill] sm:$0xff] %v15456_v47  ;;  %v15474_v46 = vrot.slane %v19512_v60, %v13202_v36  ;;  %v15480_v47 = vrot.slane %v19515_v42, %v13202_v36  ;;  %v19523_v2 = vcombine.high %v14275_v15, %v14275_v15  ;;  %v19532_v15 = vld [vmem:[#allocation144_spill] sm:$0xff] }
 0x541   :  { %19509 = vst [vmem:[#allocation75_spill] sm:$0xff] %v15462_v38  ;;  %19511 = vst [vmem:[#allocation210_spill] sm:$0xff] %v15468_v0  ;;  %v15486_v38 = vrot.slane %v19518_v62, %v13202_v36  ;;  %v15492_v0 = vrot.slane %v19521_v52, %v13202_v36  ;;  %v19525_v35 = vcombine.high %v14287_v19, %v14287_v19 }
 0x542   :  { %19513 = vst [vmem:[#allocation211_spill] sm:$0xff] %v15474_v46  ;;  %19516 = vst [vmem:[#allocation3_spill] sm:$0xff] %v15480_v47  ;;  %v15498_v60 = vrot.slane %v19523_v2, %v13202_v36  ;;  %v19528_v62 = vcombine.high %v19527_v61, %v19527_v61  ;;  %v19530_v16 = vcombine.high %v19381_v59, %v19381_v59  ;;  %v19586_v46 = vld [vmem:[#allocation33_spill] sm:$0xff] }
 0x543   :  { %19519 = vst [vmem:[#allocation143_spill] sm:$0xff] %v15486_v38  ;;  %19522 = vst [vmem:[#allocation10_spill] sm:$0xff] %v15492_v0  ;;  %v15504_v42 = vrot.slane %v19525_v35, %v13202_v36  ;;  %v19533_v2 = vcombine.high %v19532_v15, %v19532_v15  ;;  %v19535_v19 = vcombine.high %v19390_v39, %v19390_v39  ;;  %v19584_v0 = vld [vmem:[#allocation96_spill] sm:$0xff] }
 0x544   :  { %19524 = vst [vmem:[#allocation212_spill] sm:$0xff] %v15498_v60  ;;  %v15510_v38 = vrot.slane %v19528_v62, %v13202_v36  ;;  %v15516_v52 = vrot.slane %v19530_v16, %v13202_v36  ;;  %v19537_v61 = vcombine.high %v14354_v11, %v14354_v11  ;;  %v19539_v59 = vcombine.high %v14368_v8, %v14368_v8 }
 0x545   :  { %19526 = vst [vmem:[#allocation213_spill] sm:$0xff] %v15504_v42  ;;  %v15522_v60 = vrot.slane %v19533_v2, %v13202_v36  ;;  %v15528_v35 = vrot.slane %v19535_v19, %v13202_v36  ;;  %v19541_v15 = vcombine.high %v19403_v34, %v19403_v34  ;;  %v19543_v39 = vcombine.high %v14392_v9, %v14392_v9 }
 0x546   :  { %19529 = vst [vmem:[#allocation11_spill] sm:$0xff] %v15510_v38  ;;  %19531 = vst [vmem:[#allocation214_spill] sm:$0xff] %v15516_v52  ;;  %v15534_v62 = vrot.slane %v19537_v61, %v13202_v36  ;;  %v15540_v16 = vrot.slane %v19539_v59, %v13202_v36  ;;  %v19545_v11 = vcombine.high %v14404_v27, %v14404_v27  ;;  %v19582_v38 = vld [vmem:[#allocation93_spill] sm:$0xff] }
 0x547   :  { %19534 = vst [vmem:[#allocation144_spill] sm:$0xff] %v15522_v60  ;;  %19536 = vst [vmem:[#allocation215_spill] sm:$0xff] %v15528_v35  ;;  %v15546_v2 = vrot.slane %v19541_v15, %v13202_v36  ;;  %v15552_v19 = vrot.slane %v19543_v39, %v13202_v36  ;;  %v19547_v8 = vcombine.high %v14416_v17, %v14416_v17  ;;  %v19580_v60 = vld [vmem:[#allocation32_spill] sm:$0xff] }
 0x548   :  { %19538 = vst [vmem:[#allocation216_spill] sm:$0xff] %v15534_v62  ;;  %19540 = vst [vmem:[#allocation217_spill] sm:$0xff] %v15540_v16  ;;  %v15558_v61 = vrot.slane %v19545_v11, %v13202_v36  ;;  %v19549_v34 = vcombine.high %v19418_v49, %v19418_v49  ;;  %v19551_v9 = vcombine.high %v14442_v33, %v14442_v33  ;;  %v19578_v62 = vld [vmem:[#allocation31_spill] sm:$0xff]  ;;  %v19591_v16 = vld [vmem:[#allocation66_spill] sm:$0xff] }
 0x549   :  { %19542 = vst [vmem:[#allocation218_spill] sm:$0xff] %v15546_v2  ;;  %19544 = vst [vmem:[#allocation219_spill] sm:$0xff] %v15552_v19  ;;  %v15564_v59 = vrot.slane %v19547_v8, %v13202_v36  ;;  %v19553_v27 = vcombine.high %v14454_v31, %v14454_v31  ;;  %v19555_v17 = vcombine.high %v14466_v28, %v14466_v28  ;;  %v19569_v19 = vld [vmem:[#allocation59_spill] sm:$0xff]  ;;  %v19576_v2 = vld [vmem:[#allocation62_spill] sm:$0xff] }
 0x54a   :  { %19546 = vst [vmem:[#allocation220_spill] sm:$0xff] %v15558_v61  ;;  %v15570_v15 = vrot.slane %v19549_v34, %v13202_v36  ;;  %v15576_v39 = vrot.slane %v19551_v9, %v13202_v36  ;;  %v19557_v49 = vcombine.high %v14478_v45, %v14478_v45  ;;  %v19559_v33 = vcombine.high %v14490_v50, %v14490_v50  ;;  %v19579_v45 = vld [vmem:[#allocation126_spill] sm:$0xff]  ;;  %v19581_v50 = vld [vmem:[#allocation63_spill] sm:$0xff]  ;;  %v19589_v61 = vld [vmem:[#allocation65_spill] sm:$0xff] }
 0x54b   :  { %19548 = vst [vmem:[#allocation221_spill] sm:$0xff] %v15564_v59  ;;  %v15582_v11 = vrot.slane %v19553_v27, %v13202_v36  ;;  %v15588_v8 = vrot.slane %v19555_v17, %v13202_v36  ;;  %v19561_v31 = vcombine.high %v14502_v41, %v14502_v41  ;;  %v15609_v28 = vrot.slane %v5694_v43, %v13202_v36  ;;  %v19564_v17 = vld [vmem:[#allocation113_spill] sm:$0xff]  ;;  %v19567_v59 = vld [vmem:[#allocation122_spill] sm:$0xff]  ;;  %v19583_v41 = vld [vmem:[#allocation64_spill] sm:$0xff] }
 0x54c   :  { %19550 = vst [vmem:[#allocation222_spill] sm:$0xff] %v15570_v15  ;;  %19552 = vst [vmem:[#allocation223_spill] sm:$0xff] %v15576_v39  ;;  %v15594_v34 = vrot.slane %v19557_v49, %v13202_v36  ;;  %v15600_v9 = vrot.slane %v19559_v33, %v13202_v36  ;;  %v19566_v39 = vld [vmem:[#allocation116_spill] sm:$0xff]  ;;  %v19570_v43 = vld [vmem:[#allocation89_spill] sm:$0xff]  ;;  %v19672_v25 = vcombine.low %v19581_v50, %v19580_v60 }
 0x54d   :  { %19554 = vst [vmem:[#allocation224_spill] sm:$0xff] %v15582_v11  ;;  %19556 = vst [vmem:[#allocation225_spill] sm:$0xff] %v15588_v8  ;;  %v15606_v27 = vrot.slane %v19561_v31, %v13202_v36  ;;  %v19565_v8 = vld [vmem:[#allocation119_spill] sm:$0xff]  ;;  %v19573_v49 = vld [vmem:[#allocation121_spill] sm:$0xff]  ;;  %v19669_v53 = vcombine.low %v19567_v59, %v19566_v39 }
 0x54e   :  { %19558 = vst [vmem:[#allocation226_spill] sm:$0xff] %v15594_v34  ;;  %19560 = vst [vmem:[#allocation227_spill] sm:$0xff] %v15600_v9  ;;  %v19568_v9 = vld [vmem:[#allocation17_spill] sm:$0xff]  ;;  %v19572_v34 = vld [vmem:[#allocation92_spill] sm:$0xff]  ;;  %v19666_v51 = vcombine.low %v19565_v8, %v19564_v17  ;;  %v19667_v21 = vcombine.high %v19565_v8, %v19564_v17  ;;  %v6521_v35 = vrot.slane %v19672_v25, %v13202_v36 }
 0x54f   :  { %19562 = vst [vmem:[#allocation228_spill] sm:$0xff] %v15606_v27  ;;  %19563 = vst [vmem:[#allocation229_spill] sm:$0xff] %v15609_v28  ;;  %v19571_v28 = vld [vmem:[#allocation60_spill] sm:$0xff]  ;;  %v19575_v33 = vld [vmem:[#allocation61_spill] sm:$0xff]  ;;  %v15847_v26 = vrot.slane %v19669_v53, %v13202_v36  ;;  %v19673_v53 = vcombine.high %v19581_v50, %v19580_v60  ;;  %v19676_v25 = vcombine.high %v19569_v19, %v19568_v9 }
 0x550   :  { %v19574_v15 = vld [vmem:[#allocation124_spill] sm:$0xff]  ;;  %v19577_v31 = vld [vmem:[#allocation123_spill] sm:$0xff]  ;;  %v19585_v27 = vld [vmem:[#allocation125_spill] sm:$0xff]  ;;  %v15831_v10 = vrot.slane %v19666_v51, %v13202_v36  ;;  %v15837_v32 = vrot.slane %v19667_v21, %v13202_v36  ;;  %v19670_v51 = vcombine.high %v19567_v59, %v19566_v39 }
 0x551   :  { %v19587_v11 = vld [vmem:[#allocation128_spill] sm:$0xff]  ;;  %v19671_v21 = vld [vmem:[#allocation146_spill] sm:$0xff]  ;;  %v6528_v52 = vrot.slane %v19673_v53, %v13202_v36  ;;  %v15881_v48 = vrot.slane %v19676_v25, %v13202_v36  ;;  %v19677_v60 = vld [vmem:[#allocation55_spill] sm:$0xff]  ;;  %v19681_v53 = vcombine.low %v19573_v49, %v19572_v34 }
 0x552   :  { %v15853_v47 = vrot.slane %v19670_v51, %v13202_v36  ;;  %v6513_v8 = vcombine.low %v19671_v21, %v15330_v23  ;;  %v9785_v17 = vcombine.high %v19671_v21, %v15330_v23  ;;  %v19674_v59 = vld [vmem:[#allocation138_spill] sm:$0xff]  ;;  %v19675_v23 = vcombine.low %v19569_v19, %v19568_v9  ;;  %v19680_v19 = vld [vmem:[#allocation23_spill] sm:$0xff] }
 0x553   :  { %v19678_v51 = vcombine.low %v19571_v28, %v19570_v43  ;;  %v15907_v50 = vrot.slane %v19681_v53, %v13202_v36  ;;  %v6543_v25 = vcombine.low %v6521_v35, %v6528_v52  ;;  %v19684_v53 = vcombine.low %v19575_v33, %v19574_v15 }
 0x554   :  { %v15875_v21 = vrot.slane %v19675_v23, %v13202_v36  ;;  %v19679_v23 = vcombine.high %v19571_v28, %v19570_v43  ;;  %v19683_v28 = vld [vmem:[#allocation29_spill] sm:$0xff]  ;;  %v6542_v9 = vrot.slane %v9785_v17, %v13202_v36  ;;  %v19689_v35 = vcombine.low %v19577_v31, %v19576_v2 }
 0x555   :  { %v15891_v39 = vrot.slane %v19678_v51, %v13202_v36  ;;  %v19682_v51 = vcombine.high %v19573_v49, %v19572_v34  ;;  %v15925_v24 = vrot.slane %v19684_v53, %v13202_v36  ;;  %v19686_v34 = vcombine.high %v19575_v33, %v19574_v15 }
 0x556   :  { %v15897_v3 = vrot.slane %v19679_v23, %v13202_v36  ;;  %v6535_v23 = vrot.slane %v6513_v8, %v13202_v36  ;;  %v19688_v8 = vld [vmem:[#allocation30_spill] sm:$0xff]  ;;  %v15941_v17 = vrot.slane %v19689_v35, %v13202_v36  ;;  %v19691_v53 = vcombine.high %v19577_v31, %v19576_v2 }
 0x557   :  { %v15913_v30 = vrot.slane %v19682_v51, %v13202_v36  ;;  %19685 = vst [vmem:[#allocation113_spill] sm:$0xff] %v15925_v24  ;;  %v15931_v49 = vrot.slane %v19686_v34, %v13202_v36  ;;  %v19694_v52 = vcombine.low %v19579_v45, %v19578_v62  ;;  %v19696_v35 = vcombine.high %v19579_v45, %v19578_v62 }
 0x558   :  { %19690 = vst [vmem:[#allocation116_spill] sm:$0xff] %v15941_v17  ;;  %v15947_v42 = vrot.slane %v19691_v53, %v13202_v36  ;;  %v6544_v15 = vcombine.low %v6535_v23, %v6542_v9  ;;  %v6551_v53 = vrot.slane %v6543_v25, %v13202_v36  ;;  %v19701_v62 = vcombine.high %v19583_v41, %v19582_v38 }
 0x559   :  { %19687 = vst [vmem:[#allocation119_spill] sm:$0xff] %v15931_v49  ;;  %v15957_v43 = vrot.slane %v19694_v52, %v13202_v36  ;;  %v15963_v2 = vrot.slane %v19696_v35, %v13202_v36  ;;  %v19699_v52 = vcombine.low %v19583_v41, %v19582_v38  ;;  %v19703_v35 = vld [vmem:[#allocation148_spill] sm:$0xff]  ;;  %v19707_v25 = vcombine.low %v19587_v11, %v19586_v46 }
 0x55a   :  { %19692 = vst [vmem:[#allocation122_spill] sm:$0xff] %v15947_v42  ;;  %v6558_v51 = vrot.slane %v6544_v15, %v13202_v36  ;;  %v15981_v45 = vrot.slane %v19701_v62, %v13202_v36  ;;  %v19704_v15 = vcombine.low %v19585_v27, %v19584_v0 }
 0x55b   :  { %19695 = vst [vmem:[#allocation17_spill] sm:$0xff] %v15957_v43  ;;  %19697 = vst [vmem:[#allocation59_spill] sm:$0xff] %v15963_v2  ;;  %v15975_v34 = vrot.slane %v19699_v52, %v13202_v36  ;;  %v19705_v52 = vcombine.high %v19585_v27, %v19584_v0  ;;  %v19711_v27 = vld [vmem:[#allocation150_spill] sm:$0xff] }
 0x55c   :  { %19702 = vst [vmem:[#allocation60_spill] sm:$0xff] %v15981_v45  ;;  %v15991_v23 = vrot.slane %v19704_v15, %v13202_v36  ;;  %v6559_v62 = vcombine.low %v6551_v53, %v6558_v51  ;;  %v16007_v45 = vrot.slane %v19707_v25, %v13202_v36  ;;  %v19709_v15 = vcombine.high %v19587_v11, %v19586_v46  ;;  %v19722_v11 = vld [vmem:[#allocation98_spill] sm:$0xff] }
 0x55d   :  { %19700 = vst [vmem:[#allocation89_spill] sm:$0xff] %v15975_v34  ;;  %v15997_v34 = vrot.slane %v19705_v52, %v13202_v36  ;;  %v19712_v53 = vcombine.low %v19589_v61, %v19588_v44  ;;  %v19713_v25 = vcombine.high %v19589_v61, %v19588_v44  ;;  %v19715_v51 = vcombine.low %v19591_v16, %v19590_v20  ;;  %v19719_v61 = vld [vmem:[#allocation197_spill] sm:$0xff] }
 0x55e   :  { %19708 = vst [vmem:[#allocation92_spill] sm:$0xff] %v16007_v45  ;;  %v16013_v0 = vrot.slane %v19709_v15, %v13202_v36  ;;  %9096 = vperm.xlu0 %10087, %v6559_v62   ;;  %v19721_v15 = vld [vmem:[#allocation127_spill] sm:$0xff]  ;;  %v19727_v62 = vld [vmem:[#allocation130_spill] sm:$0xff] }
 0x55f   :  { %v16023_v9 = vrot.slane %v19712_v53, %v13202_v36  ;;  %v16029_v41 = vrot.slane %v19713_v25, %v13202_v36  ;;  %v16039_v52 = vrot.slane %v19715_v51, %v13202_v36  ;;  %v19717_v53 = vcombine.high %v19591_v16, %v19590_v20  ;;  %v19720_v25 = vld [vmem:[#allocation152_spill] sm:$0xff]  ;;  %v19735_v45 = vld [vmem:[#allocation67_spill] sm:$0xff] }
 0x560   :  { %19710 = vst [vmem:[#allocation121_spill] sm:$0xff] %v16013_v0  ;;  %v19723_v0 = vcombine.low %v19721_v15, %v19722_v11  ;;  %v19724_v51 = vcombine.high %v19721_v15, %v19722_v11  ;;  %v19733_v11 = vld [vmem:[#allocation199_spill] sm:$0xff]  ;;  %v19734_v15 = vld [vmem:[#allocation154_spill] sm:$0xff]  ;;  %v19736_v20 = vld [vmem:[#allocation36_spill] sm:$0xff] }
 0x561   :  { %19716 = vst [vmem:[#allocation124_spill] sm:$0xff] %v16039_v52  ;;  %v16045_v44 = vrot.slane %v19717_v53, %v13202_v36  ;;  %v19737_v16 = vcombine.low %v19735_v45, %v19736_v20  ;;  %v19741_v53 = vld [vmem:[#allocation68_spill] sm:$0xff] }
 0x562   :  { %v16055_v1 = vrot.slane %v19723_v0, %v13202_v36  ;;  %v16061_v52 = vrot.slane %v19724_v51, %v13202_v36  ;;  %v19749_v51 = vld [vmem:[#allocation129_spill] sm:$0xff] }
 0x563   :  { %19718 = vst [vmem:[#allocation61_spill] sm:$0xff] %v16045_v44  ;;  %v19728_v44 = vld [vmem:[#allocation35_spill] sm:$0xff]  ;;  %v16087_v43 = vrot.slane %v19737_v16, %v13202_v36 }
 0x564   :  { %v19729_v46 = vcombine.low %v19727_v62, %v19728_v44  ;;  %v19731_v0 = vcombine.high %v19727_v62, %v19728_v44  ;;  %v19750_v44 = vld [vmem:[#allocation100_spill] sm:$0xff] }
 0x565   :  { %v19751_v62 = vcombine.low %v19749_v51, %v19750_v44 }
 0x566   :  { %v16071_v12 = vrot.slane %v19729_v46, %v13202_v36  ;;  %v16077_v38 = vrot.slane %v19731_v0, %v13202_v36  ;;  %v19738_v46 = vcombine.high %v19735_v45, %v19736_v20  ;;  %v19747_v45 = vld [vmem:[#allocation201_spill] sm:$0xff]  ;;  %v19748_v20 = vld [vmem:[#allocation156_spill] sm:$0xff] }
 0x567   :  { %v16119_v17 = vrot.slane %v19751_v62, %v13202_v36  ;;  %v19755_v0 = vld [vmem:[#allocation132_spill] sm:$0xff] }
 0x568   :  { %19730 = vst [vmem:[#allocation62_spill] sm:$0xff] %v16071_v12  ;;  %19732 = vst [vmem:[#allocation123_spill] sm:$0xff] %v16077_v38  ;;  %v16093_v12 = vrot.slane %v19738_v46, %v13202_v36  ;;  %v19742_v38 = vld [vmem:[#allocation97_spill] sm:$0xff]  ;;  %v19763_v46 = vld [vmem:[#allocation70_spill] sm:$0xff] }
 0x569   :  { %v19743_v2 = vcombine.low %v19741_v53, %v19742_v38  ;;  %v19745_v16 = vcombine.high %v19741_v53, %v19742_v38  ;;  %v19764_v38 = vld [vmem:[#allocation38_spill] sm:$0xff] }
 0x56a   :  { %v19765_v53 = vcombine.low %v19763_v46, %v19764_v38 }
 0x56b   :  { %v16103_v29 = vrot.slane %v19743_v2, %v13202_v36  ;;  %v16109_v31 = vrot.slane %v19745_v16, %v13202_v36  ;;  %v19752_v2 = vcombine.high %v19749_v51, %v19750_v44  ;;  %v19761_v51 = vld [vmem:[#allocation203_spill] sm:$0xff]  ;;  %v19762_v44 = vld [vmem:[#allocation69_spill] sm:$0xff] }
 0x56c   :  { %v16151_v24 = vrot.slane %v19765_v53, %v13202_v36  ;;  %v19771_v16 = vld [vmem:[#allocation131_spill] sm:$0xff] }
 0x56d   :  { %19744 = vst [vmem:[#allocation31_spill] sm:$0xff] %v16103_v29  ;;  %19746 = vst [vmem:[#allocation126_spill] sm:$0xff] %v16109_v31  ;;  %v16125_v29 = vrot.slane %v19752_v2, %v13202_v36  ;;  %v19756_v31 = vld [vmem:[#allocation37_spill] sm:$0xff] }
 0x56e   :  { %v19757_v42 = vcombine.low %v19755_v0, %v19756_v31  ;;  %v19759_v62 = vcombine.high %v19755_v0, %v19756_v31  ;;  %19766 = vst [vmem:[#allocation93_spill] sm:$0xff] %v16151_v24  ;;  %v19779_v2 = vld [vmem:[#allocation133_spill] sm:$0xff]  ;;  %v19780_v31 = vld [vmem:[#allocation102_spill] sm:$0xff] }
 0x56f   :  { %v19781_v0 = vcombine.low %v19779_v2, %v19780_v31 }
 0x570   :  { %v16135_v4 = vrot.slane %v19757_v42, %v13202_v36  ;;  %v16141_v33 = vrot.slane %v19759_v62, %v13202_v36  ;;  %v19767_v42 = vcombine.high %v19763_v46, %v19764_v38  ;;  %v19787_v62 = vld [vmem:[#allocation71_spill] sm:$0xff] }
 0x572   :  { %19758 = vst [vmem:[#allocation32_spill] sm:$0xff] %v16135_v4  ;;  %19760 = vst [vmem:[#allocation63_spill] sm:$0xff] %v16141_v33  ;;  %v16157_v4 = vrot.slane %v19767_v42, %v13202_v36  ;;  %v19772_v33 = vld [vmem:[#allocation99_spill] sm:$0xff]  ;;  %v19795_v42 = vld [vmem:[#allocation72_spill] sm:$0xff] }
 0x573   :  { %v19773_v49 = vcombine.low %v19771_v16, %v19772_v33  ;;  %v19775_v53 = vcombine.high %v19771_v16, %v19772_v33  ;;  %v19796_v33 = vld [vmem:[#allocation40_spill] sm:$0xff] }
 0x574   :  { %19768 = vst [vmem:[#allocation64_spill] sm:$0xff] %v16157_v4  ;;  %v16183_v4 = vrot.slane %v19781_v0, %v13202_v36  ;;  %v19797_v16 = vcombine.low %v19795_v42, %v19796_v33 }
 0x575   :  { %v16167_v37 = vrot.slane %v19773_v49, %v13202_v36  ;;  %v16173_v24 = vrot.slane %v19775_v53, %v13202_v36  ;;  %v19783_v49 = vcombine.high %v19779_v2, %v19780_v31  ;;  %v19803_v53 = vld [vmem:[#allocation4_spill] sm:$0xff] }
 0x576   :  { %19782 = vst [vmem:[#allocation33_spill] sm:$0xff] %v16183_v4 }
 0x577   :  { %19774 = vst [vmem:[#allocation96_spill] sm:$0xff] %v16167_v37  ;;  %19776 = vst [vmem:[#allocation125_spill] sm:$0xff] %v16173_v24  ;;  %v16189_v37 = vrot.slane %v19783_v49, %v13202_v36  ;;  %v19788_v24 = vld [vmem:[#allocation39_spill] sm:$0xff]  ;;  %v19811_v49 = vld [vmem:[#allocation140_spill] sm:$0xff] }
 0x578   :  { %v19789_v46 = vcombine.low %v19787_v62, %v19788_v24  ;;  %v19791_v0 = vcombine.high %v19787_v62, %v19788_v24  ;;  %v19812_v24 = vld [vmem:[#allocation104_spill] sm:$0xff] }
 0x579   :  { %19784 = vst [vmem:[#allocation128_spill] sm:$0xff] %v16189_v37  ;;  %v16215_v37 = vrot.slane %v19797_v16, %v13202_v36  ;;  %v19813_v62 = vcombine.low %v19811_v49, %v19812_v24 }
 0x57a   :  { %v16199_v38 = vrot.slane %v19789_v46, %v13202_v36  ;;  %v16205_v4 = vrot.slane %v19791_v0, %v13202_v36  ;;  %v19799_v46 = vcombine.high %v19795_v42, %v19796_v33  ;;  %v19819_v0 = vld [vmem:[#allocation5_spill] sm:$0xff] }
 0x57b   :  { %19798 = vst [vmem:[#allocation95_spill] sm:$0xff] %v16215_v37 }
 0x57c   :  { %19790 = vst [vmem:[#allocation34_spill] sm:$0xff] %v16199_v38  ;;  %19792 = vst [vmem:[#allocation65_spill] sm:$0xff] %v16205_v4  ;;  %v16221_v38 = vrot.slane %v19799_v46, %v13202_v36  ;;  %v19804_v4 = vld [vmem:[#allocation101_spill] sm:$0xff]  ;;  %v19827_v46 = vld [vmem:[#allocation6_spill] sm:$0xff] }
 0x57d   :  { %v19805_v2 = vcombine.low %v19803_v53, %v19804_v4  ;;  %v19807_v16 = vcombine.high %v19803_v53, %v19804_v4  ;;  %v19828_v4 = vld [vmem:[#allocation42_spill] sm:$0xff] }
 0x57e   :  { %19800 = vst [vmem:[#allocation66_spill] sm:$0xff] %v16221_v38  ;;  %v16247_v38 = vrot.slane %v19813_v62, %v13202_v36  ;;  %v19829_v53 = vcombine.low %v19827_v46, %v19828_v4 }
 0x57f   :  { %v16231_v31 = vrot.slane %v19805_v2, %v13202_v36  ;;  %v16237_v37 = vrot.slane %v19807_v16, %v13202_v36  ;;  %v19815_v2 = vcombine.high %v19811_v49, %v19812_v24  ;;  %v19835_v16 = vld [vmem:[#allocation2_spill] sm:$0xff] }
 0x580   :  { %19814 = vst [vmem:[#allocation145_spill] sm:$0xff] %v16247_v38 }
 0x581   :  { %19806 = vst [vmem:[#allocation141_spill] sm:$0xff] %v16231_v31  ;;  %19808 = vst [vmem:[#allocation14_spill] sm:$0xff] %v16237_v37  ;;  %v16253_v31 = vrot.slane %v19815_v2, %v13202_v36  ;;  %v19820_v37 = vld [vmem:[#allocation41_spill] sm:$0xff]  ;;  %v19843_v2 = vld [vmem:[#allocation7_spill] sm:$0xff] }
 0x582   :  { %v19821_v42 = vcombine.low %v19819_v0, %v19820_v37  ;;  %v19823_v62 = vcombine.high %v19819_v0, %v19820_v37  ;;  %v19844_v37 = vld [vmem:[#allocation106_spill] sm:$0xff] }
 0x583   :  { %19816 = vst [vmem:[#allocation114_spill] sm:$0xff] %v16253_v31  ;;  %v16279_v31 = vrot.slane %v19829_v53, %v13202_v36  ;;  %v19845_v0 = vcombine.low %v19843_v2, %v19844_v37 }
 0x584   :  { %v16263_v33 = vrot.slane %v19821_v42, %v13202_v36  ;;  %v16269_v38 = vrot.slane %v19823_v62, %v13202_v36  ;;  %v19831_v42 = vcombine.high %v19827_v46, %v19828_v4  ;;  %v19851_v62 = vld [vmem:[#allocation76_spill] sm:$0xff] }
 0x585   :  { %19830 = vst [vmem:[#allocation138_spill] sm:$0xff] %v16279_v31 }
 0x586   :  { %19822 = vst [vmem:[#allocation86_spill] sm:$0xff] %v16263_v33  ;;  %19824 = vst [vmem:[#allocation146_spill] sm:$0xff] %v16269_v38  ;;  %v16285_v33 = vrot.slane %v19831_v42, %v13202_v36  ;;  %v19836_v38 = vld [vmem:[#allocation103_spill] sm:$0xff]  ;;  %v19859_v42 = vld [vmem:[#allocation136_spill] sm:$0xff] }
 0x587   :  { %v19837_v49 = vcombine.low %v19835_v16, %v19836_v38  ;;  %v19839_v53 = vcombine.high %v19835_v16, %v19836_v38  ;;  %v19860_v38 = vld [vmem:[#allocation168_spill] sm:$0xff] }
 0x588   :  { %19832 = vst [vmem:[#allocation55_spill] sm:$0xff] %v16285_v33  ;;  %v16311_v33 = vrot.slane %v19845_v0, %v13202_v36  ;;  %v19861_v16 = vcombine.low %v19859_v42, %v19860_v38 }
 0x589   :  { %v16295_v24 = vrot.slane %v19837_v49, %v13202_v36  ;;  %v16301_v31 = vrot.slane %v19839_v53, %v13202_v36  ;;  %v19847_v49 = vcombine.high %v19843_v2, %v19844_v37  ;;  %v19867_v53 = vld [vmem:[#allocation77_spill] sm:$0xff] }
 0x58a   :  { %19846 = vst [vmem:[#allocation30_spill] sm:$0xff] %v16311_v33 }
 0x58b   :  { %19838 = vst [vmem:[#allocation23_spill] sm:$0xff] %v16295_v24  ;;  %19840 = vst [vmem:[#allocation29_spill] sm:$0xff] %v16301_v31  ;;  %v16317_v24 = vrot.slane %v19847_v49, %v13202_v36  ;;  %v19852_v31 = vld [vmem:[#allocation43_spill] sm:$0xff]  ;;  %v19875_v49 = vld [vmem:[#allocation13_spill] sm:$0xff] }
 0x58c   :  { %v19853_v46 = vcombine.low %v19851_v62, %v19852_v31  ;;  %v19855_v0 = vcombine.high %v19851_v62, %v19852_v31  ;;  %v19876_v31 = vld [vmem:[#allocation108_spill] sm:$0xff] }
 0x58d   :  { %19848 = vst [vmem:[#allocation148_spill] sm:$0xff] %v16317_v24  ;;  %v16343_v24 = vrot.slane %v19861_v16, %v13202_v36  ;;  %v19877_v62 = vcombine.low %v19875_v49, %v19876_v31 }
 0x58e   :  { %v16327_v4 = vrot.slane %v19853_v46, %v13202_v36  ;;  %v16333_v33 = vrot.slane %v19855_v0, %v13202_v36  ;;  %v19863_v46 = vcombine.high %v19859_v42, %v19860_v38  ;;  %v19883_v0 = vld [vmem:[#allocation137_spill] sm:$0xff] }
 0x58f   :  { %19862 = vst [vmem:[#allocation152_spill] sm:$0xff] %v16343_v24 }
 0x590   :  { %19854 = vst [vmem:[#allocation150_spill] sm:$0xff] %v16327_v4  ;;  %19856 = vst [vmem:[#allocation197_spill] sm:$0xff] %v16333_v33  ;;  %v16349_v4 = vrot.slane %v19863_v46, %v13202_v36  ;;  %v19868_v33 = vld [vmem:[#allocation105_spill] sm:$0xff]  ;;  %v19891_v46 = vld [vmem:[#allocation46_spill] sm:$0xff] }
 0x591   :  { %v19869_v2 = vcombine.low %v19867_v53, %v19868_v33  ;;  %v19871_v16 = vcombine.high %v19867_v53, %v19868_v33  ;;  %v19892_v33 = vcombine.low %v19637_v13, %v19891_v46 }
 0x592   :  { %19864 = vst [vmem:[#allocation127_spill] sm:$0xff] %v16349_v4  ;;  %v16375_v4 = vrot.slane %v19877_v62, %v13202_v36 }
 0x593   :  { %v16359_v37 = vrot.slane %v19869_v2, %v13202_v36  ;;  %v16365_v24 = vrot.slane %v19871_v16, %v13202_v36  ;;  %v19879_v2 = vcombine.high %v19875_v49, %v19876_v31  ;;  %v19890_v31 = vld [vmem:[#allocation171_spill] sm:$0xff]  ;;  %v16407_v53 = vrot.slane %v19892_v33, %v13202_v36  ;;  %v19897_v16 = vld [vmem:[#allocation78_spill] sm:$0xff] }
 0x594   :  { %19878 = vst [vmem:[#allocation35_spill] sm:$0xff] %v16375_v4 }
 0x595   :  { %19870 = vst [vmem:[#allocation98_spill] sm:$0xff] %v16359_v37  ;;  %19872 = vst [vmem:[#allocation130_spill] sm:$0xff] %v16365_v24  ;;  %v16381_v37 = vrot.slane %v19879_v2, %v13202_v36  ;;  %v19884_v24 = vld [vmem:[#allocation45_spill] sm:$0xff]  ;;  %v19905_v2 = vld [vmem:[#allocation110_spill] sm:$0xff] }
 0x596   :  { %v19885_v42 = vcombine.low %v19883_v0, %v19884_v24  ;;  %v19887_v62 = vcombine.high %v19883_v0, %v19884_v24  ;;  %19893 = vst [vmem:[#allocation36_spill] sm:$0xff] %v16407_v53  ;;  %v19906_v24 = vcombine.low %v19641_v55, %v19905_v2 }
 0x597   :  { %19880 = vst [vmem:[#allocation199_spill] sm:$0xff] %v16381_v37 }
 0x598   :  { %v16391_v38 = vrot.slane %v19885_v42, %v13202_v36  ;;  %v16397_v4 = vrot.slane %v19887_v62, %v13202_v36  ;;  %v19894_v42 = vcombine.high %v19637_v13, %v19891_v46  ;;  %v16439_v0 = vrot.slane %v19906_v24, %v13202_v36  ;;  %v19912_v62 = vld [vmem:[#allocation80_spill] sm:$0xff] }
 0x599   :  { %v19916_v24 = vcombine.low %v19665_v54, %v15282_v6 }
 0x59a   :  { %19886 = vst [vmem:[#allocation154_spill] sm:$0xff] %v16391_v38  ;;  %19888 = vst [vmem:[#allocation67_spill] sm:$0xff] %v16397_v4  ;;  %v16413_v38 = vrot.slane %v19894_v42, %v13202_v36  ;;  %v19898_v4 = vld [vmem:[#allocation107_spill] sm:$0xff] }
 0x59b   :  { %v19899_v37 = vcombine.low %v19897_v16, %v19898_v4  ;;  %v19901_v33 = vcombine.high %v19897_v16, %v19898_v4  ;;  %19907 = vst [vmem:[#allocation201_spill] sm:$0xff] %v16439_v0  ;;  %v19911_v16 = vld [vmem:[#allocation142_spill] sm:$0xff]  ;;  %v6045_v0 = vrot.slane %v19916_v24, %v13202_v36 }
 0x59c   :  { %v19925_v4 = vld [vmem:[#allocation174_spill] sm:$0xff] }
 0x59d   :  { %v16423_v49 = vrot.slane %v19899_v37, %v13202_v36  ;;  %v16429_v53 = vrot.slane %v19901_v33, %v13202_v36  ;;  %v19908_v37 = vcombine.high %v19641_v55, %v19905_v2  ;;  %v19917_v55 = vcombine.high %v19665_v54, %v15282_v6 }
 0x59e   :  { %v19921_v6 = vcombine.high %v19703_v35, %v15342_v7 }
 0x59f   :  { %19900 = vst [vmem:[#allocation68_spill] sm:$0xff] %v16423_v49  ;;  %19902 = vst [vmem:[#allocation97_spill] sm:$0xff] %v16429_v53  ;;  %v16445_v49 = vrot.slane %v19908_v37, %v13202_v36  ;;  %v19913_v53 = vld [vmem:[#allocation47_spill] sm:$0xff]  ;;  %v6052_v2 = vrot.slane %v19917_v55, %v13202_v36  ;;  %v19918_v37 = vcombine.low %v19668_v18, %v15288_v14 }
 0x5a0   :  { %v19914_v13 = vcombine.low %v19912_v62, %v19913_v53  ;;  %v6640_v54 = vrot.slane %v19921_v6, %v13202_v36  ;;  %v19922_v55 = vcombine.high %v19912_v62, %v19913_v53  ;;  %v19928_v53 = vld [vmem:[#allocation19_spill] sm:$0xff] }
 0x5a1   :  { %19909 = vst [vmem:[#allocation156_spill] sm:$0xff] %v16445_v49  ;;  %v6094_v42 = vrot.slane %v19918_v37, %v13202_v36  ;;  %v19929_v62 = vld [vmem:[#allocation175_spill] sm:$0xff] }
 0x5a2   :  { %v16455_v46 = vrot.slane %v19914_v13, %v13202_v36  ;;  %v19919_v13 = vcombine.high %v19668_v18, %v15288_v14  ;;  %v16485_v37 = vrot.slane %v19922_v55, %v13202_v36  ;;  %v19926_v18 = vcombine.low %v19711_v27, %v15354_v63 }
 0x5a3   :  { %v19930_v6 = vcombine.low %v19928_v53, %v19929_v62  ;;  %v19932_v14 = vcombine.high %v19928_v53, %v19929_v62  ;;  %v6053_v53 = vcombine.low %v15831_v10, %v15837_v32  ;;  %v19937_v62 = vcombine.high %v19720_v25, %v19719_v61 }
 0x5a4   :  { %19915 = vst [vmem:[#allocation129_spill] sm:$0xff] %v16455_v46  ;;  %v6101_v33 = vrot.slane %v19919_v13, %v13202_v36  ;;  %v19920_v46 = vcombine.low %v19703_v35, %v15342_v7  ;;  %19923 = vst [vmem:[#allocation100_spill] sm:$0xff] %v16485_v37  ;;  %v6731_v13 = vrot.slane %v19926_v18, %v13202_v36 }
 0x5a5   :  { %v16503_v55 = vrot.slane %v19930_v6, %v13202_v36  ;;  %v16509_v37 = vrot.slane %v19932_v14, %v13202_v36  ;;  %v19935_v18 = vcombine.high %v19674_v59, %v15294_v40  ;;  %v19936_v6 = vcombine.low %v19720_v25, %v19719_v61 }
 0x5a6   :  { %v6633_v24 = vrot.slane %v19920_v46, %v13202_v36  ;;  %v19927_v46 = vcombine.high %v19711_v27, %v15354_v63  ;;  %v19934_v63 = vcombine.low %v19674_v59, %v15294_v40  ;;  %v6054_v14 = vcombine.low %v6045_v0, %v6052_v2 }
 0x5a7   :  { %19931 = vst [vmem:[#allocation132_spill] sm:$0xff] %v16503_v55  ;;  %19933 = vst [vmem:[#allocation37_spill] sm:$0xff] %v16509_v37  ;;  %v6829_v35 = vrot.slane %v19936_v6, %v13202_v36  ;;  %v6836_v55 = vrot.slane %v19937_v62, %v13202_v36  ;;  %v6103_v40 = vcombine.low %v6094_v42, %v6101_v33 }
 0x5a8   :  { %v6738_v7 = vrot.slane %v19927_v46, %v13202_v36  ;;  %v6143_v27 = vrot.slane %v19934_v63, %v13202_v36  ;;  %v6150_v46 = vrot.slane %v19935_v18, %v13202_v36  ;;  %v6641_v63 = vcombine.low %v15991_v23, %v15997_v34 }
 0x5a9   :  { %v6642_v37 = vcombine.low %v6633_v24, %v6640_v54  ;;  %v6061_v59 = vrot.slane %v6053_v53, %v13202_v36  ;;  %v6068_v18 = vrot.slane %v6054_v14, %v13202_v36  ;;  %v6102_v6 = vcombine.low %v15847_v26, %v15853_v47 }
 0x5aa   :  { %v6740_v49 = vcombine.low %v6731_v13, %v6738_v7  ;;  %v19938_v10 = vcombine.low %v19677_v60, %v15300_v57  ;;  %v6649_v61 = vrot.slane %v6641_v63, %v13202_v36  ;;  %v6739_v34 = vcombine.low %v16023_v9, %v16029_v41 }
 0x5ab   :  { %v6656_v25 = vrot.slane %v6642_v37, %v13202_v36  ;;  %v19939_v23 = vcombine.high %v19677_v60, %v15300_v57  ;;  %v19940_v26 = vcombine.low %v19734_v15, %v19733_v11  ;;  %v6069_v42 = vcombine.low %v6061_v59, %v6068_v18  ;;  %v19942_v37 = vld [vmem:[#allocation215_spill] sm:$0xff]  ;;  %v19943_v57 = vld [vmem:[#allocation12_spill] sm:$0xff] }
 0x5ac   :  { %v6192_v32 = vrot.slane %v19938_v10, %v13202_v36  ;;  %v6117_v33 = vrot.slane %v6103_v40, %v13202_v36  ;;  %v19941_v2 = vcombine.high %v19734_v15, %v19733_v11  ;;  %v6754_v9 = vrot.slane %v6740_v49, %v13202_v36 }
 0x5ad   :  { %v6199_v0 = vrot.slane %v19939_v23, %v13202_v36  ;;  %v6927_v47 = vrot.slane %v19940_v26, %v13202_v36  ;;  %v6657_v54 = vcombine.low %v6649_v61, %v6656_v25  ;;  %v6152_v41 = vcombine.low %v6143_v27, %v6150_v46  ;;  %9066 = vperm.xlu1 %10088, %v6069_v42  }
 0x5ae   :  { %v6934_v24 = vrot.slane %v19941_v2, %v13202_v36  ;;  %v8130_v60 = vcombine.low %v19943_v57, %v19942_v37  ;;  %v6110_v13 = vrot.slane %v6102_v6, %v13202_v36  ;;  %v6151_v7 = vcombine.low %v15875_v21, %v15881_v48 }
 0x5af   :  { %v6838_v53 = vcombine.low %v6829_v35, %v6836_v55  ;;  %v19944_v14 = vcombine.low %v19680_v19, %v15306_v22  ;;  %v19945_v15 = vcombine.high %v19680_v19, %v15306_v22  ;;  %9102 = vperm.xlu0 %10087, %v6657_v54   ;;  %v6747_v27 = vrot.slane %v6739_v34, %v13202_v36  ;;  %v19956_v54 = vld [vmem:[#allocation176_spill] sm:$0xff] }
 0x5b0   :  { %v6837_v46 = vcombine.low %v16055_v1, %v16061_v52  ;;  %v19946_v48 = vcombine.low %v19748_v20, %v19747_v45  ;;  %v6118_v35 = vcombine.low %v6110_v13, %v6117_v33  ;;  %v6166_v55 = vrot.slane %v6152_v41, %v13202_v36  ;;  %v19948_v52 = vld [vmem:[#allocation109_spill] sm:$0xff] }
 0x5b1   :  { %v6241_v11 = vrot.slane %v19944_v14, %v13202_v36  ;;  %v6248_v49 = vrot.slane %v19945_v15, %v13202_v36  ;;  %v6201_v62 = vcombine.low %v6192_v32, %v6199_v0  ;;  %v19947_v22 = vcombine.high %v19748_v20, %v19747_v45  ;;  %v19960_v15 = vld [vmem:[#allocation205_spill] sm:$0xff] }
 0x5b2   :  { %v7025_v21 = vrot.slane %v19946_v48, %v13202_v36  ;;  %v6755_v63 = vcombine.low %v6747_v27, %v6754_v9  ;;  %v6852_v40 = vrot.slane %v6838_v53, %v13202_v36  ;;  %v6936_v59 = vcombine.low %v6927_v47, %v6934_v24  ;;  %9069 = vperm.xlu1 %10088, %v6118_v35   ;;  %v19955_v24 = vld [vmem:[#allocation216_spill] sm:$0xff] }
 0x5b3   :  { %v7032_v19 = vrot.slane %v19947_v22, %v13202_v36  ;;  %v9851_v1 = vcombine.high %v19943_v57, %v19942_v37  ;;  %v19949_v18 = vcombine.low %v19646_v56, %v19948_v52  ;;  %v6159_v10 = vrot.slane %v6151_v7, %v13202_v36  ;;  %v20170_v57 = vld [vmem:[#allocation37_spill] sm:$0xff] }
 0x5b4   :  { %v6200_v45 = vcombine.low %v15891_v39, %v15897_v3  ;;  %v19950_v20 = vcombine.low %v19683_v28, %v15312_v5  ;;  %v19951_v61 = vcombine.high %v19683_v28, %v15312_v5  ;;  %9108 = vperm.xlu0 %10087, %v6755_v63   ;;  %v6845_v34 = vrot.slane %v6837_v46, %v13202_v36  ;;  %v19966_v63 = vld [vmem:[#allocation119_spill] sm:$0xff] }
 0x5b5   :  { %v16589_v6 = vrot.slane %v19949_v18, %v13202_v36  ;;  %v6935_v23 = vcombine.low %v16087_v43, %v16093_v12  ;;  %v19952_v3 = vcombine.low %v19762_v44, %v19761_v51  ;;  %v6167_v0 = vcombine.low %v6159_v10, %v6166_v55  ;;  %v19964_v55 = vld [vmem:[#allocation112_spill] sm:$0xff]  ;;  %v19969_v18 = vld [vmem:[#allocation193_spill] sm:$0xff] }
 0x5b6   :  { %v6290_v32 = vrot.slane %v19950_v20, %v13202_v36  ;;  %v6297_v25 = vrot.slane %v19951_v61, %v13202_v36  ;;  %v6215_v26 = vrot.slane %v6201_v62, %v13202_v36  ;;  %v6250_v47 = vcombine.low %v6241_v11, %v6248_v49  ;;  %v19959_v11 = vld [vmem:[#allocation159_spill] sm:$0xff]  ;;  %v19972_v61 = vld [vmem:[#allocation64_spill] sm:$0xff] }
 0x5b7   :  { %v7123_v39 = vrot.slane %v19952_v3, %v13202_v36  ;;  %v19953_v5 = vcombine.high %v19762_v44, %v19761_v51  ;;  %v6853_v42 = vcombine.low %v6845_v34, %v6852_v40  ;;  %v6950_v33 = vrot.slane %v6936_v59, %v13202_v36  ;;  %9072 = vperm.xlu1 %10088, %v6167_v0   ;;  %v19967_v40 = vld [vmem:[#allocation113_spill] sm:$0xff] }
 0x5b8   :  { %v7034_v2 = vcombine.low %v7025_v21, %v7032_v19  ;;  %v19954_v12 = vcombine.high %v19646_v56, %v19948_v52  ;;  %v8179_v9 = vcombine.low %v19956_v54, %v19955_v24  ;;  %v6208_v41 = vrot.slane %v6200_v45, %v13202_v36  ;;  %v19968_v52 = vld [vmem:[#allocation91_spill] sm:$0xff]  ;;  %v19974_v3 = vld [vmem:[#allocation161_spill] sm:$0xff] }
 0x5b9   :  { %v7130_v28 = vrot.slane %v19953_v5, %v13202_v36  ;;  %v6249_v51 = vcombine.low %v15907_v50, %v15913_v30  ;;  %v19957_v44 = vcombine.low %v19688_v8, %v15318_v58  ;;  %v19958_v56 = vcombine.high %v19688_v8, %v15318_v58  ;;  %9114 = vperm.xlu0 %10087, %v6853_v42  }
 0x5ba   :  { %v16619_v43 = vrot.slane %v19954_v12, %v13202_v36  ;;  %v6943_v53 = vrot.slane %v6935_v23, %v13202_v36  ;;  %v7033_v14 = vcombine.low %v16119_v17, %v16125_v29  ;;  %v19961_v30 = vcombine.low %v19959_v11, %v19960_v15  ;;  %v19963_v17 = vld [vmem:[#allocation79_spill] sm:$0xff] }
 0x5bb   :  { %v6388_v13 = vrot.slane %v19957_v44, %v13202_v36  ;;  %v6395_v7 = vrot.slane %v19958_v56, %v13202_v36  ;;  %v6216_v49 = vcombine.low %v6208_v41, %v6215_v26  ;;  %v6264_v27 = vrot.slane %v6250_v47, %v13202_v36  ;;  %v19979_v56 = vld [vmem:[#allocation217_spill] sm:$0xff] }
 0x5bc   :  { %v7221_v50 = vrot.slane %v19961_v30, %v13202_v36  ;;  %v6299_v46 = vcombine.low %v6290_v32, %v6297_v25  ;;  %v19962_v58 = vcombine.high %v19959_v11, %v19960_v15  ;;  %v6951_v48 = vcombine.low %v6943_v53, %v6950_v33  ;;  %v19973_v25 = vld [vmem:[#allocation93_spill] sm:$0xff]  ;;  %v19982_v11 = vld [vmem:[#allocation116_spill] sm:$0xff]  ;;  %v19983_v30 = vld [vmem:[#allocation147_spill] sm:$0xff] }
 0x5bd   :  { %v7048_v21 = vrot.slane %v7034_v2, %v13202_v36  ;;  %v7132_v35 = vcombine.low %v7123_v39, %v7130_v28  ;;  %v9853_v29 = vcombine.high %v19956_v54, %v19955_v24  ;;  %v19965_v62 = vcombine.low %v19963_v17, %v19964_v55  ;;  %9075 = vperm.xlu1 %10088, %v6216_v49   ;;  %v19975_v39 = vld [vmem:[#allocation207_spill] sm:$0xff]  ;;  %v19980_v53 = vld [vmem:[#allocation177_spill] sm:$0xff]  ;;  %v19984_v49 = vld [vmem:[#allocation194_spill] sm:$0xff] }
 0x5be   :  { %v7228_v8 = vrot.slane %v19962_v58, %v13202_v36  ;;  %v6257_v19 = vrot.slane %v6249_v51, %v13202_v36  ;;  %v6298_v59 = vcombine.low %v19967_v40, %v19966_v63  ;;  %v19970_v10 = vcombine.low %v19968_v52, %v19969_v18  ;;  %9120 = vperm.xlu0 %10087, %v6951_v48   ;;  %v19988_v48 = vld [vmem:[#allocation33_spill] sm:$0xff] }
 0x5bf   :  { %v16653_v22 = vrot.slane %v19965_v62, %v13202_v36  ;;  %v19971_v20 = vcombine.high %v19968_v52, %v19969_v18  ;;  %v7131_v34 = vcombine.low %v19973_v25, %v19972_v61  ;;  %v7041_v23 = vrot.slane %v7033_v14, %v13202_v36 }
 0x5c0   :  { %v6486_v45 = vrot.slane %v19970_v10, %v13202_v36  ;;  %v19976_v0 = vcombine.low %v19974_v3, %v19975_v39  ;;  %v6265_v47 = vcombine.low %v6257_v19, %v6264_v27  ;;  %v6313_v5 = vrot.slane %v6299_v46, %v13202_v36 }
 0x5c1   :  { %v6493_v32 = vrot.slane %v19971_v20, %v13202_v36  ;;  %v6397_v28 = vcombine.low %v6388_v13, %v6395_v7  ;;  %v19977_v42 = vcombine.high %v19974_v3, %v19975_v39  ;;  %v7049_v2 = vcombine.low %v7041_v23, %v7048_v21  ;;  %v19981_v7 = vld [vmem:[#allocation122_spill] sm:$0xff]  ;;  %v19994_v23 = vld [vmem:[#allocation49_spill] sm:$0xff] }
 0x5c2   :  { %v7319_v26 = vrot.slane %v19976_v0, %v13202_v36  ;;  %v7146_v12 = vrot.slane %v7132_v35, %v13202_v36  ;;  %v7230_v41 = vcombine.low %v7221_v50, %v7228_v8  ;;  %v19978_v51 = vcombine.high %v19963_v17, %v19964_v55  ;;  %9078 = vperm.xlu1 %10088, %v6265_v47   ;;  %v19987_v8 = vld [vmem:[#allocation128_spill] sm:$0xff]  ;;  %v19989_v17 = vld [vmem:[#allocation163_spill] sm:$0xff]  ;;  %v19990_v55 = vld [vmem:[#allocation134_spill] sm:$0xff] }
 0x5c3   :  { %v7326_v33 = vrot.slane %v19977_v42, %v13202_v36  ;;  %v8228_v14 = vcombine.low %v19980_v53, %v19979_v56  ;;  %v6306_v13 = vrot.slane %v6298_v59, %v13202_v36  ;;  %v6396_v15 = vcombine.low %v19982_v11, %v19981_v7  ;;  %9126 = vperm.xlu0 %10087, %v7049_v2   ;;  %v19997_v0 = vld [vmem:[#allocation17_spill] sm:$0xff]  ;;  %v20005_v11 = vld [vmem:[#allocation74_spill] sm:$0xff] }
 0x5c4   :  { %v16683_v44 = vrot.slane %v19978_v51, %v13202_v36  ;;  %v19985_v27 = vcombine.low %v19983_v30, %v19984_v49  ;;  %v19986_v46 = vcombine.high %v19983_v30, %v19984_v49  ;;  %v7229_v21 = vcombine.low %v19988_v48, %v19987_v8  ;;  %v20004_v7 = vld [vmem:[#allocation165_spill] sm:$0xff] }
 0x5c5   :  { %v7139_v35 = vrot.slane %v7131_v34, %v13202_v36  ;;  %v19991_v62 = vcombine.low %v19989_v17, %v19990_v55  ;;  %v6314_v63 = vcombine.low %v6306_v13, %v6313_v5  ;;  %v6411_v40 = vrot.slane %v6397_v28, %v13202_v36  ;;  %v19993_v34 = vld [vmem:[#allocation24_spill] sm:$0xff]  ;;  %v19998_v5 = vld [vmem:[#allocation149_spill] sm:$0xff]  ;;  %v19999_v28 = vld [vmem:[#allocation195_spill] sm:$0xff] }
 0x5c6   :  { %v6584_v50 = vrot.slane %v19985_v27, %v13202_v36  ;;  %v6591_v58 = vrot.slane %v19986_v46, %v13202_v36  ;;  %v6495_v59 = vcombine.low %v6486_v45, %v6493_v32  ;;  %v19992_v52 = vcombine.high %v19989_v17, %v19990_v55  ;;  %v19996_v32 = vld [vmem:[#allocation59_spill] sm:$0xff] }
 0x5c7   :  { %v7417_v19 = vrot.slane %v19991_v62, %v13202_v36  ;;  %v7147_v10 = vcombine.low %v7139_v35, %v7146_v12  ;;  %v7244_v20 = vrot.slane %v7230_v41, %v13202_v36  ;;  %v7328_v61 = vcombine.low %v7319_v26, %v7326_v33  ;;  %9081 = vperm.xlu1 %10088, %v6314_v63   ;;  %v20002_v12 = vld [vmem:[#allocation66_spill] sm:$0xff]  ;;  %v20003_v41 = vld [vmem:[#allocation95_spill] sm:$0xff] }
 0x5c8   :  { %v7424_v18 = vrot.slane %v19992_v52, %v13202_v36  ;;  %v19995_v3 = vcombine.low %v19993_v34, %v19994_v23  ;;  %v6404_v45 = vrot.slane %v6396_v15, %v13202_v36  ;;  %v6494_v47 = vcombine.low %v19997_v0, %v19996_v32  ;;  %v20008_v62 = vld [vmem:[#allocation218_spill] sm:$0xff]  ;;  %v20017_v32 = vld [vmem:[#allocation145_spill] sm:$0xff] }
 0x5c9   :  { %v20000_v42 = vcombine.low %v19998_v5, %v19999_v28  ;;  %v20001_v33 = vcombine.high %v19998_v5, %v19999_v28  ;;  %v7327_v51 = vcombine.low %v20003_v41, %v20002_v12  ;;  %9132 = vperm.xlu0 %10087, %v7147_v10   ;;  %v7237_v13 = vrot.slane %v7229_v21, %v13202_v36  ;;  %v20009_v21 = vld [vmem:[#allocation85_spill] sm:$0xff]  ;;  %v20012_v10 = vld [vmem:[#allocation151_spill] sm:$0xff] }
 0x5ca   :  { %v16717_v39 = vrot.slane %v19995_v3, %v13202_v36  ;;  %v20006_v15 = vcombine.low %v20004_v7, %v20005_v11  ;;  %v6412_v49 = vcombine.low %v6404_v45, %v6411_v40  ;;  %v6509_v27 = vrot.slane %v6495_v59, %v13202_v36  ;;  %v20010_v59 = vld [vmem:[#allocation60_spill] sm:$0xff]  ;;  %v20019_v28 = vld [vmem:[#allocation75_spill] sm:$0xff] }
 0x5cb   :  { %v6682_v26 = vrot.slane %v20000_v42, %v13202_v36  ;;  %v6689_v2 = vrot.slane %v20001_v33, %v13202_v36  ;;  %v6593_v46 = vcombine.low %v6584_v50, %v6591_v58  ;;  %v20007_v8 = vcombine.high %v20004_v7, %v20005_v11  ;;  %v20011_v50 = vld [vmem:[#allocation89_spill] sm:$0xff]  ;;  %v20013_v3 = vld [vmem:[#allocation196_spill] sm:$0xff] }
 0x5cc   :  { %v7515_v30 = vrot.slane %v20006_v15, %v13202_v36  ;;  %v7245_v35 = vcombine.low %v7237_v13, %v7244_v20  ;;  %v7342_v17 = vrot.slane %v7328_v61, %v13202_v36  ;;  %v7426_v55 = vcombine.low %v7417_v19, %v7424_v18  ;;  %9087 = vperm.xlu1 %10088, %v6412_v49   ;;  %v20016_v61 = vld [vmem:[#allocation114_spill] sm:$0xff] }
 0x5cd   :  { %v7522_v48 = vrot.slane %v20007_v8, %v13202_v36  ;;  %v8277_v63 = vcombine.low %v20009_v21, %v20008_v62  ;;  %v9857_v52 = vcombine.high %v20009_v21, %v20008_v62  ;;  %v6502_v40 = vrot.slane %v6494_v47, %v13202_v36  ;;  %v20018_v47 = vld [vmem:[#allocation166_spill] sm:$0xff]  ;;  %v20081_v21 = vld [vmem:[#allocation63_spill] sm:$0xff] }
 0x5ce   :  { %v6592_v58 = vcombine.low %v20011_v50, %v20010_v59  ;;  %v20014_v45 = vcombine.low %v20012_v10, %v20013_v3  ;;  %v20015_v19 = vcombine.high %v20012_v10, %v20013_v3  ;;  %v7425_v0 = vcombine.low %v20017_v32, %v20016_v61  ;;  %9138 = vperm.xlu0 %10087, %v7245_v35   ;;  %v20023_v35 = vld [vmem:[#allocation50_spill] sm:$0xff] }
 0x5cf   :  { %v7335_v5 = vrot.slane %v7327_v51, %v13202_v36  ;;  %v20020_v42 = vcombine.low %v20018_v47, %v20019_v28  ;;  %v6510_v12 = vcombine.low %v6502_v40, %v6509_v27  ;;  %v6607_v41 = vrot.slane %v6593_v46, %v13202_v36  ;;  %v20022_v51 = vld [vmem:[#allocation81_spill] sm:$0xff]  ;;  %v20033_v61 = vld [vmem:[#allocation138_spill] sm:$0xff] }
 0x5d0   :  { %v6780_v20 = vrot.slane %v20014_v45, %v13202_v36  ;;  %v6787_v18 = vrot.slane %v20015_v19, %v13202_v36  ;;  %v6691_v13 = vcombine.low %v6682_v26, %v6689_v2  ;;  %v20021_v7 = vcombine.high %v20018_v47, %v20019_v28  ;;  %v20026_v46 = vld [vmem:[#allocation121_spill] sm:$0xff]  ;;  %v20032_v19 = vld [vmem:[#allocation55_spill] sm:$0xff] }
 0x5d1   :  { %v7613_v33 = vrot.slane %v20020_v42, %v13202_v36  ;;  %v7343_v15 = vcombine.low %v7335_v5, %v7342_v17  ;;  %v7440_v49 = vrot.slane %v7426_v55, %v13202_v36  ;;  %v7524_v8 = vcombine.low %v7515_v30, %v7522_v48  ;;  %9093 = vperm.xlu1 %10088, %v6510_v12   ;;  %v20027_v17 = vld [vmem:[#allocation92_spill] sm:$0xff]  ;;  %v20028_v30 = vld [vmem:[#allocation153_spill] sm:$0xff]  ;;  %v20029_v48 = vld [vmem:[#allocation198_spill] sm:$0xff] }
 0x5d2   :  { %v7620_v11 = vrot.slane %v20021_v7, %v13202_v36  ;;  %v20024_v59 = vcombine.low %v20022_v51, %v20023_v35  ;;  %v20025_v27 = vcombine.high %v20022_v51, %v20023_v35  ;;  %v6600_v2 = vrot.slane %v6592_v58, %v13202_v36  ;;  %v20034_v58 = vld [vmem:[#allocation8_spill] sm:$0xff]  ;;  %v20035_v47 = vld [vmem:[#allocation211_spill] sm:$0xff] }
 0x5d3   :  { %v6690_v40 = vcombine.low %v20027_v17, %v20026_v46  ;;  %v20030_v55 = vcombine.low %v20028_v30, %v20029_v48  ;;  %v20031_v3 = vcombine.high %v20028_v30, %v20029_v48  ;;  %v7523_v32 = vcombine.low %v20033_v61, %v20032_v19  ;;  %9144 = vperm.xlu0 %10087, %v7343_v15   ;;  %v20038_v17 = vld [vmem:[#allocation220_spill] sm:$0xff]  ;;  %v20047_v19 = vld [vmem:[#allocation30_spill] sm:$0xff] }
 0x5d4   :  { %v16775_v50 = vrot.slane %v20024_v59, %v13202_v36  ;;  %v16781_v26 = vrot.slane %v20025_v27, %v13202_v36  ;;  %v7433_v5 = vrot.slane %v7425_v0, %v13202_v36  ;;  %v20036_v28 = vcombine.low %v20034_v58, %v20035_v47  ;;  %v20039_v0 = vld [vmem:[#allocation180_spill] sm:$0xff] }
 0x5d5   :  { %v6878_v10 = vrot.slane %v20030_v55, %v13202_v36  ;;  %v6885_v45 = vrot.slane %v20031_v3, %v13202_v36  ;;  %v6608_v12 = vcombine.low %v6600_v2, %v6607_v41  ;;  %v6705_v7 = vrot.slane %v6691_v13, %v13202_v36  ;;  %v20040_v13 = vld [vmem:[#allocation61_spill] sm:$0xff]  ;;  %v20042_v2 = vld [vmem:[#allocation155_spill] sm:$0xff]  ;;  %v20043_v55 = vld [vmem:[#allocation200_spill] sm:$0xff] }
 0x5d6   :  { %v7711_v42 = vrot.slane %v20036_v28, %v13202_v36  ;;  %v6789_v51 = vcombine.low %v6780_v20, %v6787_v18  ;;  %v20037_v35 = vcombine.high %v20034_v58, %v20035_v47  ;;  %v7441_v27 = vcombine.low %v7433_v5, %v7440_v49  ;;  %v20041_v20 = vld [vmem:[#allocation124_spill] sm:$0xff]  ;;  %v20049_v58 = vld [vmem:[#allocation143_spill] sm:$0xff] }
 0x5d7   :  { %v7538_v46 = vrot.slane %v7524_v8, %v13202_v36  ;;  %v7622_v15 = vcombine.low %v7613_v33, %v7620_v11  ;;  %v8375_v30 = vcombine.low %v20039_v0, %v20038_v17  ;;  %v9861_v48 = vcombine.high %v20039_v0, %v20038_v17  ;;  %9099 = vperm.xlu1 %10088, %v6608_v12   ;;  %v20046_v8 = vld [vmem:[#allocation148_spill] sm:$0xff] }
 0x5d8   :  { %v7718_v59 = vrot.slane %v20037_v35, %v13202_v36  ;;  %v6698_v41 = vrot.slane %v6690_v40, %v13202_v36  ;;  %v6788_v18 = vcombine.low %v20041_v20, %v20040_v13  ;;  %v20044_v3 = vcombine.low %v20042_v2, %v20043_v55  ;;  %9150 = vperm.xlu0 %10087, %v7441_v27   ;;  %v20048_v40 = vld [vmem:[#allocation170_spill] sm:$0xff]  ;;  %v20093_v17 = vld [vmem:[#allocation208_spill] sm:$0xff] }
 0x5d9   :  { %v20045_v33 = vcombine.high %v20042_v2, %v20043_v55  ;;  %v7621_v61 = vcombine.low %v20047_v19, %v20046_v8  ;;  %v7531_v5 = vrot.slane %v7523_v32, %v13202_v36  ;;  %v20050_v47 = vcombine.low %v20048_v40, %v20049_v58  ;;  %v20052_v32 = vld [vmem:[#allocation82_spill] sm:$0xff] }
 0x5da   :  { %v6976_v49 = vrot.slane %v20044_v3, %v13202_v36  ;;  %v6706_v12 = vcombine.low %v6698_v41, %v6705_v7  ;;  %v6803_v35 = vrot.slane %v6789_v51, %v13202_v36  ;;  %v6887_v13 = vcombine.low %v6878_v10, %v6885_v45  ;;  %v20056_v51 = vld [vmem:[#allocation123_spill] sm:$0xff] }
 0x5db   :  { %v6983_v11 = vrot.slane %v20045_v33, %v13202_v36  ;;  %v7809_v28 = vrot.slane %v20050_v47, %v13202_v36  ;;  %v20051_v20 = vcombine.high %v20048_v40, %v20049_v58  ;;  %v7539_v55 = vcombine.low %v7531_v5, %v7538_v46  ;;  %v20053_v33 = vld [vmem:[#allocation181_spill] sm:$0xff]  ;;  %v20057_v46 = vld [vmem:[#allocation62_spill] sm:$0xff]  ;;  %v20062_v47 = vld [vmem:[#allocation127_spill] sm:$0xff] }
 0x5dc   :  { %v7636_v3 = vrot.slane %v7622_v15, %v13202_v36  ;;  %v7720_v27 = vcombine.low %v7711_v42, %v7718_v59  ;;  %v20054_v8 = vcombine.low %v20052_v32, %v20053_v33  ;;  %v20055_v7 = vcombine.high %v20052_v32, %v20053_v33  ;;  %9105 = vperm.xlu1 %10088, %v6706_v12   ;;  %v20058_v42 = vld [vmem:[#allocation157_spill] sm:$0xff]  ;;  %v20059_v59 = vld [vmem:[#allocation202_spill] sm:$0xff] }
 0x5dd   :  { %v7816_v2 = vrot.slane %v20051_v20, %v13202_v36  ;;  %v6796_v45 = vrot.slane %v6788_v18, %v13202_v36  ;;  %v6886_v41 = vcombine.low %v20057_v46, %v20056_v51  ;;  %v20060_v15 = vcombine.low %v20058_v42, %v20059_v59  ;;  %v20063_v20 = vld [vmem:[#allocation152_spill] sm:$0xff]  ;;  %9156 = vperm.xlu0 %10087, %v7539_v55  }
 0x5de   :  { %v16839_v19 = vrot.slane %v20054_v8, %v13202_v36  ;;  %v16845_v10 = vrot.slane %v20055_v7, %v13202_v36  ;;  %v20061_v40 = vcombine.high %v20058_v42, %v20059_v59  ;;  %v7719_v32 = vcombine.low %v20063_v20, %v20062_v47  ;;  %v20064_v18 = vld [vmem:[#allocation212_spill] sm:$0xff]  ;;  %v20067_v47 = vld [vmem:[#allocation222_spill] sm:$0xff] }
 0x5df   :  { %v7074_v5 = vrot.slane %v20060_v15, %v13202_v36  ;;  %v7629_v12 = vrot.slane %v7621_v61, %v13202_v36  ;;  %v20065_v33 = vcombine.low %v19890_v31, %v20064_v18  ;;  %v6804_v7 = vcombine.low %v6796_v45, %v6803_v35  ;;  %v20068_v61 = vld [vmem:[#allocation20_spill] sm:$0xff]  ;;  %v20071_v45 = vld [vmem:[#allocation158_spill] sm:$0xff] }
 0x5e0   :  { %v7081_v58 = vrot.slane %v20061_v40, %v13202_v36  ;;  %v6901_v51 = vrot.slane %v6887_v13, %v13202_v36  ;;  %v6985_v46 = vcombine.low %v6976_v49, %v6983_v11  ;;  %v20066_v42 = vcombine.high %v19890_v31, %v20064_v18  ;;  %v20069_v13 = vld [vmem:[#allocation126_spill] sm:$0xff]  ;;  %v20070_v49 = vld [vmem:[#allocation31_spill] sm:$0xff]  ;;  %v20072_v31 = vld [vmem:[#allocation204_spill] sm:$0xff] }
 0x5e1   :  { %v7907_v8 = vrot.slane %v20065_v33, %v13202_v36  ;;  %v7637_v15 = vcombine.low %v7629_v12, %v7636_v3  ;;  %v7734_v40 = vrot.slane %v7720_v27, %v13202_v36  ;;  %v7818_v55 = vcombine.low %v7809_v28, %v7816_v2  ;;  %9111 = vperm.xlu1 %10088, %v6804_v7   ;;  %v20075_v27 = vld [vmem:[#allocation199_spill] sm:$0xff] }
 0x5e2   :  { %v7914_v59 = vrot.slane %v20066_v42, %v13202_v36  ;;  %v8473_v20 = vcombine.low %v20068_v61, %v20067_v47  ;;  %v9865_v25 = vcombine.high %v20068_v61, %v20067_v47  ;;  %v6894_v35 = vrot.slane %v6886_v41, %v13202_v36  ;;  %v20076_v12 = vld [vmem:[#allocation35_spill] sm:$0xff] }
 0x5e3   :  { %v6984_v11 = vcombine.low %v20070_v49, %v20069_v13  ;;  %v20073_v18 = vcombine.low %v20071_v45, %v20072_v31  ;;  %v20074_v28 = vcombine.high %v20071_v45, %v20072_v31  ;;  %v7817_v33 = vcombine.low %v20076_v12, %v20075_v27  ;;  %9162 = vperm.xlu0 %10087, %v7637_v15   ;;  %v20078_v31 = vld [vmem:[#allocation52_spill] sm:$0xff] }
 0x5e4   :  { %v7727_v7 = vrot.slane %v7719_v32, %v13202_v36  ;;  %v8299_v41 = vrot.slane %v8277_v63, %v13202_v36  ;;  %v6902_v42 = vcombine.low %v6894_v35, %v6901_v51  ;;  %v6999_v47 = vrot.slane %v6985_v46, %v13202_v36  ;;  %v20077_v32 = vld [vmem:[#allocation22_spill] sm:$0xff]  ;;  %v20087_v35 = vld [vmem:[#allocation36_spill] sm:$0xff] }
 0x5e5   :  { %v7172_v3 = vrot.slane %v20073_v18, %v13202_v36  ;;  %v7179_v2 = vrot.slane %v20074_v28, %v13202_v36  ;;  %v7083_v61 = vcombine.low %v7074_v5, %v7081_v58  ;;  %v8306_v13 = vrot.slane %v9857_v52, %v13202_v36  ;;  %v20082_v52 = vld [vmem:[#allocation32_spill] sm:$0xff]  ;;  %v20084_v51 = vld [vmem:[#allocation206_spill] sm:$0xff] }
 0x5e6   :  { %v7735_v49 = vcombine.low %v7727_v7, %v7734_v40  ;;  %v7832_v45 = vrot.slane %v7818_v55, %v13202_v36  ;;  %v7916_v15 = vcombine.low %v7907_v8, %v7914_v59  ;;  %v20079_v18 = vcombine.low %v20077_v32, %v20078_v31  ;;  %9117 = vperm.xlu1 %10088, %v6902_v42   ;;  %v20083_v8 = vld [vmem:[#allocation160_spill] sm:$0xff] }
 0x5e7   :  { %v20080_v63 = vcombine.high %v20077_v32, %v20078_v31  ;;  %v6992_v62 = vrot.slane %v6984_v11, %v13202_v36  ;;  %v7082_v58 = vcombine.low %v20082_v52, %v20081_v21  ;;  %v20085_v46 = vcombine.low %v20083_v8, %v20084_v51 }
 0x5e8   :  { %v16903_v28 = vrot.slane %v20079_v18, %v13202_v36  ;;  %v20086_v40 = vcombine.high %v20083_v8, %v20084_v51  ;;  %v7915_v27 = vcombine.low %v20087_v35, %v16413_v38  ;;  %9168 = vperm.xlu0 %10087, %v7735_v49   ;;  %v7825_v12 = vrot.slane %v7817_v33, %v13202_v36  ;;  %v20089_v33 = vld [vmem:[#allocation185_spill] sm:$0xff] }
 0x5e9   :  { %v16909_v5 = vrot.slane %v20080_v63, %v13202_v36  ;;  %v7270_v59 = vrot.slane %v20085_v46, %v13202_v36  ;;  %v8397_v11 = vrot.slane %v8375_v30, %v13202_v36  ;;  %v7000_v7 = vcombine.low %v6992_v62, %v6999_v47  ;;  %v20088_v63 = vld [vmem:[#allocation224_spill] sm:$0xff]  ;;  %v20090_v47 = vld [vmem:[#allocation125_spill] sm:$0xff] }
 0x5ea   :  { %v7277_v55 = vrot.slane %v20086_v40, %v13202_v36  ;;  %v7097_v42 = vrot.slane %v7083_v61, %v13202_v36  ;;  %v7181_v32 = vcombine.low %v7172_v3, %v7179_v2  ;;  %v8404_v31 = vrot.slane %v9861_v48, %v13202_v36  ;;  %v20091_v3 = vld [vmem:[#allocation96_spill] sm:$0xff]  ;;  %v20092_v61 = vld [vmem:[#allocation162_spill] sm:$0xff] }
 0x5eb   :  { %v7833_v18 = vcombine.low %v7825_v12, %v7832_v45  ;;  %v7930_v38 = vrot.slane %v7916_v15, %v13202_v36  ;;  %v8308_v49 = vcombine.low %v8299_v41, %v8306_v13  ;;  %v8571_v21 = vcombine.low %v20089_v33, %v20088_v63  ;;  %9123 = vperm.xlu1 %10088, %v7000_v7   ;;  %v20096_v7 = vld [vmem:[#allocation226_spill] sm:$0xff] }
 0x5ec   :  { %v9869_v52 = vcombine.high %v20089_v33, %v20088_v63  ;;  %v7090_v30 = vrot.slane %v7082_v58, %v13202_v36  ;;  %v7180_v2 = vcombine.low %v20091_v3, %v20090_v47  ;;  %v20094_v0 = vcombine.low %v20092_v61, %v20093_v17  ;;  %v20097_v63 = vld [vmem:[#allocation188_spill] sm:$0xff] }
 0x5ed   :  { %v20095_v41 = vcombine.high %v20092_v61, %v20093_v17  ;;  %v8307_v45 = vcombine.low %v16775_v50, %v16781_v26  ;;  %9174 = vperm.xlu0 %10087, %v7833_v18   ;;  %v7923_v15 = vrot.slane %v7915_v27, %v13202_v36  ;;  %v8495_v62 = vrot.slane %v8473_v20, %v13202_v36  ;;  %v20098_v20 = vld [vmem:[#allocation65_spill] sm:$0xff]  ;;  %v20099_v27 = vld [vmem:[#allocation34_spill] sm:$0xff] }
 0x5ee   :  { %v7368_v48 = vrot.slane %v20094_v0, %v13202_v36  ;;  %v7098_v58 = vcombine.low %v7090_v30, %v7097_v42  ;;  %v7195_v8 = vrot.slane %v7181_v32, %v13202_v36  ;;  %v7279_v51 = vcombine.low %v7270_v59, %v7277_v55  ;;  %v20100_v59 = vld [vmem:[#allocation164_spill] sm:$0xff]  ;;  %v20101_v55 = vld [vmem:[#allocation73_spill] sm:$0xff] }
 0x5ef   :  { %v7375_v13 = vrot.slane %v20095_v41, %v13202_v36  ;;  %v8502_v46 = vrot.slane %v9865_v25, %v13202_v36  ;;  %v7931_v40 = vcombine.low %v7923_v15, %v7930_v38  ;;  %v8322_v35 = vrot.slane %v8308_v49, %v13202_v36  ;;  %v20104_v41 = vld [vmem:[#allocation88_spill] sm:$0xff]  ;;  %v20105_v15 = vld [vmem:[#allocation186_spill] sm:$0xff] }
 0x5f0   :  { %v8406_v12 = vcombine.low %v8397_v11, %v8404_v31  ;;  %v8669_v33 = vcombine.low %v20097_v63, %v20096_v7  ;;  %v9873_v50 = vcombine.high %v20097_v63, %v20096_v7  ;;  %9129 = vperm.xlu1 %10088, %v7098_v58   ;;  %v7188_v26 = vrot.slane %v7180_v2, %v13202_v36 }
 0x5f1   :  { %v7278_v42 = vcombine.low %v20099_v27, %v20098_v20  ;;  %v20102_v25 = vcombine.low %v20100_v59, %v20101_v55  ;;  %v20103_v11 = vcombine.high %v20100_v59, %v20101_v55  ;;  %v8405_v18 = vcombine.low %v16839_v19, %v16845_v10  ;;  %9180 = vperm.xlu0 %10087, %v7931_v40  }
 0x5f2   :  { %v8315_v38 = vrot.slane %v8307_v45, %v13202_v36  ;;  %v8593_v49 = vrot.slane %v8571_v21, %v13202_v36  ;;  %v7196_v30 = vcombine.low %v7188_v26, %v7195_v8  ;;  %v7293_v47 = vrot.slane %v7279_v51, %v13202_v36  ;;  %v20110_v8 = vld [vmem:[#allocation135_spill] sm:$0xff]  ;;  %v20111_v51 = vld [vmem:[#allocation209_spill] sm:$0xff] }
 0x5f3   :  { %v7466_v32 = vrot.slane %v20102_v25, %v13202_v36  ;;  %v7473_v31 = vrot.slane %v20103_v11, %v13202_v36  ;;  %v7377_v3 = vcombine.low %v7368_v48, %v7375_v13  ;;  %v8600_v2 = vrot.slane %v9869_v52, %v13202_v36  ;;  %v20108_v48 = vld [vmem:[#allocation14_spill] sm:$0xff]  ;;  %v20109_v13 = vld [vmem:[#allocation141_spill] sm:$0xff] }
 0x5f4   :  { %v8323_v61 = vcombine.low %v8315_v38, %v8322_v35  ;;  %v8420_v17 = vrot.slane %v8406_v12, %v13202_v36  ;;  %v8504_v0 = vcombine.low %v8495_v62, %v8502_v46  ;;  %v20106_v58 = vcombine.low %v20104_v41, %v20105_v15  ;;  %9135 = vperm.xlu1 %10088, %v7196_v30   ;;  %v20114_v11 = vld [vmem:[#allocation26_spill] sm:$0xff] }
 0x5f5   :  { %v20107_v10 = vcombine.high %v20104_v41, %v20105_v15  ;;  %v7286_v45 = vrot.slane %v7278_v42, %v13202_v36  ;;  %v7376_v52 = vcombine.low %v20109_v13, %v20108_v48  ;;  %v20112_v62 = vcombine.low %v20110_v8, %v20111_v51  ;;  %v20115_v38 = vld [vmem:[#allocation54_spill] sm:$0xff]  ;;  %v20124_v15 = vld [vmem:[#allocation173_spill] sm:$0xff] }
 0x5f6   :  { %v8579_v19 = vrot.slane %v20106_v58, %v13202_v36  ;;  %v20113_v40 = vcombine.high %v20110_v8, %v20111_v51  ;;  %v8503_v12 = vcombine.low %v16903_v28, %v16909_v5  ;;  %9204 = vperm.xlu0 %10087, %v8323_v61   ;;  %v8413_v7 = vrot.slane %v8405_v18, %v13202_v36  ;;  %v20125_v58 = vld [vmem:[#allocation11_spill] sm:$0xff] }
 0x5f7   :  { %v8586_v21 = vrot.slane %v20107_v10, %v13202_v36  ;;  %v7564_v46 = vrot.slane %v20112_v62, %v13202_v36  ;;  %v8691_v63 = vrot.slane %v8669_v33, %v13202_v36  ;;  %v7294_v26 = vcombine.low %v7286_v45, %v7293_v47  ;;  %v20120_v47 = vld [vmem:[#allocation167_spill] sm:$0xff] }
 0x5f8   :  { %v7571_v35 = vrot.slane %v20113_v40, %v13202_v36  ;;  %v7391_v20 = vrot.slane %v7377_v3, %v13202_v36  ;;  %v7475_v27 = vcombine.low %v7466_v32, %v7473_v31  ;;  %v8698_v42 = vrot.slane %v9873_v50, %v13202_v36  ;;  %v20118_v32 = vld [vmem:[#allocation146_spill] sm:$0xff] }
 0x5f9   :  { %v8421_v59 = vcombine.low %v8413_v7, %v8420_v17  ;;  %v8518_v55 = vrot.slane %v8504_v0, %v13202_v36  ;;  %v8602_v25 = vcombine.low %v8593_v49, %v8600_v2  ;;  %v20116_v30 = vcombine.low %v20114_v11, %v20115_v38  ;;  %9141 = vperm.xlu1 %10088, %v7294_v26   ;;  %v20119_v31 = vld [vmem:[#allocation86_spill] sm:$0xff]  ;;  %v20129_v7 = vld [vmem:[#allocation219_spill] sm:$0xff] }
 0x5fa   :  { %v20117_v5 = vcombine.high %v20114_v11, %v20115_v38  ;;  %v7384_v18 = vrot.slane %v7376_v52, %v13202_v36  ;;  %v7474_v50 = vcombine.low %v20119_v31, %v20118_v32  ;;  %v20121_v3 = vld [vmem:[#allocation210_spill] sm:$0xff]  ;;  %v8601_v0 = vcombine.low %v8579_v19, %v8586_v21  ;;  %v20134_v11 = vld [vmem:[#allocation3_spill] sm:$0xff] }
 0x5fb   :  { %v8677_v28 = vrot.slane %v20116_v30, %v13202_v36  ;;  %v20122_v49 = vcombine.low %v20120_v47, %v20121_v3  ;;  %v20123_v61 = vcombine.high %v20120_v47, %v20121_v3  ;;  %9210 = vperm.xlu0 %10087, %v8421_v59   ;;  %v8511_v41 = vrot.slane %v8503_v12, %v13202_v36  ;;  %v20130_v26 = vld [vmem:[#allocation178_spill] sm:$0xff] }
 0x5fc   :  { %v8684_v33 = vrot.slane %v20117_v5, %v13202_v36  ;;  %v20126_v10 = vcombine.low %v20124_v15, %v20125_v58  ;;  %v7392_v48 = vcombine.low %v7384_v18, %v7391_v20  ;;  %v7489_v13 = vrot.slane %v7475_v27, %v13202_v36  ;;  %v20132_v27 = vld [vmem:[#allocation23_spill] sm:$0xff]  ;;  %v20137_v30 = vld [vmem:[#allocation214_spill] sm:$0xff] }
 0x5fd   :  { %v7662_v2 = vrot.slane %v20122_v49, %v13202_v36  ;;  %v7669_v17 = vrot.slane %v20123_v61, %v13202_v36  ;;  %v7573_v52 = vcombine.low %v7564_v46, %v7571_v35  ;;  %v20127_v8 = vcombine.high %v20124_v15, %v20125_v58  ;;  %v20131_v35 = vld [vmem:[#allocation29_spill] sm:$0xff] }
 0x5fe   :  { %v8005_v45 = vrot.slane %v20126_v10, %v13202_v36  ;;  %v8519_v62 = vcombine.low %v8511_v41, %v8518_v55  ;;  %v8616_v19 = vrot.slane %v8602_v25, %v13202_v36  ;;  %v8700_v21 = vcombine.low %v8691_v63, %v8698_v42  ;;  %9147 = vperm.xlu1 %10088, %v7392_v48   ;;  %v20133_v55 = vld [vmem:[#allocation169_spill] sm:$0xff]  ;;  %v20141_v41 = vld [vmem:[#allocation179_spill] sm:$0xff]  ;;  %v20144_v10 = vld [vmem:[#allocation150_spill] sm:$0xff] }
 0x5ff   :  { %v8012_v51 = vrot.slane %v20127_v8, %v13202_v36  ;;  %v20128_v40 = vcombine.high %v19993_v34, %v19994_v23  ;;  %v8326_v20 = vcombine.low %v20130_v26, %v20129_v7  ;;  %v7482_v46 = vrot.slane %v7474_v50, %v13202_v36  ;;  %v20145_v48 = vld [vmem:[#allocation58_spill] sm:$0xff] }
 0x600   :  { %v7572_v59 = vcombine.low %v20132_v27, %v20131_v35  ;;  %v20135_v25 = vcombine.low %v20133_v55, %v20134_v11  ;;  %v20136_v34 = vcombine.high %v20133_v55, %v20134_v11  ;;  %v8699_v42 = vcombine.low %v8677_v28, %v8684_v33  ;;  %9216 = vperm.xlu0 %10087, %v8519_v62   ;;  %v20149_v62 = vld [vmem:[#allocation156_spill] sm:$0xff] }
 0x601   :  { %v17039_v12 = vrot.slane %v20128_v40, %v13202_v36  ;;  %v8609_v38 = vrot.slane %v8601_v0, %v13202_v36  ;;  %v20138_v5 = vcombine.low %v19911_v16, %v20137_v30  ;;  %v7490_v32 = vcombine.low %v7482_v46, %v7489_v13  ;;  %v20140_v0 = vld [vmem:[#allocation21_spill] sm:$0xff]  ;;  %v20146_v13 = vld [vmem:[#allocation10_spill] sm:$0xff] }
 0x602   :  { %v7760_v63 = vrot.slane %v20135_v25, %v13202_v36  ;;  %v7767_v23 = vrot.slane %v20136_v34, %v13202_v36  ;;  %v7587_v31 = vrot.slane %v7573_v52, %v13202_v36  ;;  %v7671_v50 = vcombine.low %v7662_v2, %v7669_v17  ;;  %v20143_v17 = vld [vmem:[#allocation197_spill] sm:$0xff] }
 0x603   :  { %v8054_v18 = vrot.slane %v20138_v5, %v13202_v36  ;;  %v20139_v47 = vcombine.high %v19911_v16, %v20137_v30  ;;  %v8617_v49 = vcombine.low %v8609_v38, %v8616_v19  ;;  %v8714_v28 = vrot.slane %v8700_v21, %v13202_v36  ;;  %9153 = vperm.xlu1 %10088, %v7490_v32   ;;  %v20150_v19 = vld [vmem:[#allocation201_spill] sm:$0xff]  ;;  %v20156_v32 = vld [vmem:[#allocation182_spill] sm:$0xff] }
 0x604   :  { %v8014_v33 = vcombine.low %v8005_v45, %v8012_v51  ;;  %v9859_v61 = vcombine.high %v20130_v26, %v20129_v7  ;;  %v20142_v15 = vcombine.low %v20140_v0, %v20141_v41  ;;  %v7580_v2 = vrot.slane %v7572_v59, %v13202_v36  ;;  %v20151_v7 = vld [vmem:[#allocation144_spill] sm:$0xff]  ;;  %v20155_v5 = vld [vmem:[#allocation221_spill] sm:$0xff] }
 0x605   :  { %v8061_v3 = vrot.slane %v20139_v47, %v13202_v36  ;;  %v7670_v16 = vcombine.low %v20144_v10, %v20143_v17  ;;  %v20147_v52 = vcombine.low %v20145_v48, %v20146_v13  ;;  %v20148_v8 = vcombine.high %v20145_v48, %v20146_v13  ;;  %9222 = vperm.xlu0 %10087, %v8617_v49   ;;  %v20159_v47 = vld [vmem:[#allocation172_spill] sm:$0xff]  ;;  %v20160_v49 = vld [vmem:[#allocation213_spill] sm:$0xff] }
 0x606   :  { %v17071_v58 = vrot.slane %v20142_v15, %v13202_v36  ;;  %v8013_v21 = vcombine.low %v20150_v19, %v20149_v62  ;;  %v8707_v40 = vrot.slane %v8699_v42, %v13202_v36  ;;  %v20152_v26 = vcombine.low %v19925_v4, %v20151_v7 }
 0x607   :  { %v7858_v45 = vrot.slane %v20147_v52, %v13202_v36  ;;  %v7865_v51 = vrot.slane %v20148_v8, %v13202_v36  ;;  %v7588_v35 = vcombine.low %v7580_v2, %v7587_v31  ;;  %v7685_v27 = vrot.slane %v7671_v50, %v13202_v36  ;;  %v20158_v50 = vld [vmem:[#allocation98_spill] sm:$0xff] }
 0x608   :  { %v8103_v46 = vrot.slane %v20152_v26, %v13202_v36  ;;  %v7769_v59 = vcombine.low %v7760_v63, %v7767_v23  ;;  %v20153_v55 = vcombine.high %v19925_v4, %v20151_v7  ;;  %v8715_v25 = vcombine.low %v8707_v40, %v8714_v28  ;;  %v20157_v23 = vld [vmem:[#allocation130_spill] sm:$0xff]  ;;  %v20166_v40 = vld [vmem:[#allocation51_spill] sm:$0xff] }
 0x609   :  { %v8028_v34 = vrot.slane %v8014_v33, %v13202_v36  ;;  %v8063_v38 = vcombine.low %v8054_v18, %v8061_v3  ;;  %v20154_v42 = vcombine.high %v20140_v0, %v20141_v41  ;;  %v8424_v31 = vcombine.low %v20156_v32, %v20155_v5  ;;  %9159 = vperm.xlu1 %10088, %v7588_v35   ;;  %v20163_v0 = vld [vmem:[#allocation100_spill] sm:$0xff]  ;;  %v20164_v41 = vld [vmem:[#allocation129_spill] sm:$0xff]  ;;  %v20168_v26 = vld [vmem:[#allocation67_spill] sm:$0xff] }
 0x60a   :  { %v8110_v11 = vrot.slane %v20153_v55, %v13202_v36  ;;  %v7678_v63 = vrot.slane %v7670_v16, %v13202_v36  ;;  %v7768_v4 = vcombine.low %v20158_v50, %v20157_v23  ;;  %v20161_v28 = vcombine.low %v20159_v47, %v20160_v49  ;;  %9228 = vperm.xlu0 %10087, %v8715_v25   ;;  %v20175_v50 = vld [vmem:[#allocation68_spill] sm:$0xff] }
 0x60b   :  { %v17101_v30 = vrot.slane %v20154_v42, %v13202_v36  ;;  %v20162_v3 = vcombine.high %v20159_v47, %v20160_v49  ;;  %v8062_v15 = vcombine.low %v20164_v41, %v20163_v0  ;;  %v8021_v2 = vrot.slane %v8013_v21, %v13202_v36  ;;  %v20165_v21 = vld [vmem:[#allocation18_spill] sm:$0xff] }
 0x60c   :  { %v7956_v18 = vrot.slane %v20161_v28, %v13202_v36  ;;  %v8152_v17 = vrot.slane %v8130_v60, %v13202_v36  ;;  %v7686_v10 = vcombine.low %v7678_v63, %v7685_v27  ;;  %v7783_v16 = vrot.slane %v7769_v59, %v13202_v36 }
 0x60d   :  { %v7963_v33 = vrot.slane %v20162_v3, %v13202_v36  ;;  %v7867_v48 = vcombine.low %v7858_v45, %v7865_v51  ;;  %v8159_v13 = vrot.slane %v9851_v1, %v13202_v36  ;;  %v8029_v52 = vcombine.low %v8021_v2, %v8028_v34  ;;  %v20169_v45 = vld [vmem:[#allocation154_spill] sm:$0xff]  ;;  %v20171_v1 = vld [vmem:[#allocation132_spill] sm:$0xff]  ;;  %v20178_v2 = vld [vmem:[#allocation225_spill] sm:$0xff] }
 0x60e   :  { %v8077_v8 = vrot.slane %v8063_v38, %v13202_v36  ;;  %v8112_v62 = vcombine.low %v8103_v46, %v8110_v11  ;;  %v9863_v19 = vcombine.high %v20156_v32, %v20155_v5  ;;  %v20167_v60 = vcombine.low %v20165_v21, %v20166_v40  ;;  %9165 = vperm.xlu1 %10088, %v7686_v10   ;;  %v20172_v32 = vld [vmem:[#allocation223_spill] sm:$0xff] }
 0x60f   :  { %v7866_v51 = vcombine.low %v20169_v45, %v20168_v26  ;;  %v7776_v37 = vrot.slane %v7768_v4, %v13202_v36  ;;  %v8111_v35 = vcombine.low %v20171_v1, %v20170_v57  ;;  %v8201_v46 = vrot.slane %v8179_v9, %v13202_v36  ;;  %9186 = vperm.xlu0 %10087, %v8029_v52   ;;  %v20185_v57 = vld [vmem:[#allocation189_spill] sm:$0xff] }
 0x610   :  { %v17135_v7 = vrot.slane %v20167_v60, %v13202_v36  ;;  %v8348_v27 = vrot.slane %v8326_v20, %v13202_v36  ;;  %v8070_v59 = vrot.slane %v8062_v15, %v13202_v36  ;;  %v8355_v55 = vrot.slane %v9859_v61, %v13202_v36  ;;  %v20173_v20 = vld [vmem:[#allocation183_spill] sm:$0xff]  ;;  %v20174_v61 = vld [vmem:[#allocation97_spill] sm:$0xff] }
 0x611   :  { %v7784_v11 = vcombine.low %v7776_v37, %v7783_v16  ;;  %v7881_v25 = vrot.slane %v7867_v48, %v13202_v36  ;;  %v7965_v34 = vcombine.low %v7956_v18, %v7963_v33  ;;  %v8208_v38 = vrot.slane %v9853_v29, %v13202_v36  ;;  %v20184_v37 = vld [vmem:[#allocation227_spill] sm:$0xff] }
 0x612   :  { %v8078_v42 = vcombine.low %v8070_v59, %v8077_v8  ;;  %v8126_v5 = vrot.slane %v8112_v62, %v13202_v36  ;;  %v8161_v9 = vcombine.low %v8152_v17, %v8159_v13  ;;  %v8522_v63 = vcombine.low %v20173_v20, %v20172_v32  ;;  %v20179_v17 = vld [vmem:[#allocation187_spill] sm:$0xff] }
 0x613   :  { %v9867_v23 = vcombine.high %v20173_v20, %v20172_v32  ;;  %v7964_v4 = vcombine.low %v20175_v50, %v20174_v61  ;;  %9171 = vperm.xlu1 %10088, %v7784_v11   ;;  %v7874_v47 = vrot.slane %v7866_v51, %v13202_v36  ;;  %v8160_v24 = vcombine.low %v16589_v6, %v16619_v43 }
 0x614   :  { %v8250_v54 = vrot.slane %v8228_v14, %v13202_v36  ;;  %v8446_v29 = vrot.slane %v8424_v31, %v13202_v36  ;;  %9189 = vperm.xlu0 %10087, %v8078_v42   ;;  %v8119_v49 = vrot.slane %v8111_v35, %v13202_v36  ;;  %v8453_v28 = vrot.slane %v9863_v19, %v13202_v36  ;;  %v20186_v42 = vld [vmem:[#allocation115_spill] sm:$0xff] }
 0x615   :  { %v7882_v18 = vcombine.low %v7874_v47, %v7881_v25  ;;  %v7979_v3 = vrot.slane %v7965_v34, %v13202_v36  ;;  %v8357_v33 = vcombine.low %v8348_v27, %v8355_v55  ;;  %v20176_v6 = vcombine.high %v19980_v53, %v19979_v56 }
 0x616   :  { %v8127_v0 = vcombine.low %v8119_v49, %v8126_v5  ;;  %v8175_v41 = vrot.slane %v8161_v9, %v13202_v36  ;;  %v8210_v14 = vcombine.low %v8201_v46, %v8208_v38  ;;  %v20177_v31 = vcombine.high %v20165_v21, %v20166_v40  ;;  %v20181_v21 = vld [vmem:[#allocation184_spill] sm:$0xff]  ;;  %v20187_v5 = vld [vmem:[#allocation87_spill] sm:$0xff] }
 0x617   :  { %v8257_v43 = vrot.slane %v20176_v6, %v13202_v36  ;;  %v8620_v10 = vcombine.low %v20179_v17, %v20178_v2  ;;  %v8356_v16 = vcombine.low %v17071_v58, %v17101_v30  ;;  %9177 = vperm.xlu1 %10088, %v7882_v18   ;;  %v7972_v48 = vrot.slane %v7964_v4, %v13202_v36  ;;  %v20180_v30 = vld [vmem:[#allocation94_spill] sm:$0xff] }
 0x618   :  { %v8439_v15 = vrot.slane %v20177_v31, %v13202_v36  ;;  %v9871_v56 = vcombine.high %v20179_v17, %v20178_v2  ;;  %v8209_v53 = vcombine.low %v16653_v22, %v16683_v44  ;;  %v8544_v13 = vrot.slane %v8522_v63, %v13202_v36  ;;  %9192 = vperm.xlu0 %10087, %v8127_v0   ;;  %v20189_v63 = vld [vmem:[#allocation53_spill] sm:$0xff]  ;;  %v20195_v31 = vld [vmem:[#allocation118_spill] sm:$0xff] }
 0x619   :  { %v8168_v52 = vrot.slane %v8160_v24, %v13202_v36  ;;  %v8551_v8 = vrot.slane %v9867_v23, %v13202_v36  ;;  %v7980_v62 = vcombine.low %v7972_v48, %v7979_v3  ;;  %v8371_v19 = vrot.slane %v8357_v33, %v13202_v36 }
 0x61a   :  { %v8455_v58 = vcombine.low %v8446_v29, %v8453_v28  ;;  %v20182_v40 = vcombine.low %v20180_v30, %v20181_v21  ;;  %v8224_v45 = vrot.slane %v8210_v14, %v13202_v36  ;;  %v8259_v22 = vcombine.low %v8250_v54, %v8257_v43  ;;  %v20192_v54 = vld [vmem:[#allocation228_spill] sm:$0xff]  ;;  %v20193_v29 = vld [vmem:[#allocation190_spill] sm:$0xff] }
 0x61b   :  { %v8176_v26 = vcombine.low %v8168_v52, %v8175_v41  ;;  %v20183_v44 = vcombine.high %v20180_v30, %v20181_v21  ;;  %v8718_v1 = vcombine.low %v20185_v57, %v20184_v37  ;;  %v8454_v35 = vcombine.low %v17135_v7, %v8439_v15  ;;  %9183 = vperm.xlu1 %10088, %v7980_v62   ;;  %v20194_v41 = vld [vmem:[#allocation48_spill] sm:$0xff]  ;;  %v20196_v15 = vld [vmem:[#allocation90_spill] sm:$0xff]  ;;  %v20199_v62 = vld [vmem:[#allocation229_spill] sm:$0xff] }
 0x61c   :  { %v8530_v60 = vrot.slane %v20182_v40, %v13202_v36  ;;  %v8364_v46 = vrot.slane %v8356_v16, %v13202_v36  ;;  %v9875_v27 = vcombine.high %v20185_v57, %v20184_v37  ;;  %v8258_v59 = vcombine.low %v16717_v39, %v17039_v12  ;;  %v20188_v12 = vld [vmem:[#allocation25_spill] sm:$0xff]  ;;  %v20202_v37 = vld [vmem:[#allocation191_spill] sm:$0xff]  ;;  %v20203_v57 = vld [vmem:[#allocation44_spill] sm:$0xff] }
 0x61d   :  { %v8537_v51 = vrot.slane %v20183_v44, %v13202_v36  ;;  %v8642_v55 = vrot.slane %v8620_v10, %v13202_v36  ;;  %9195 = vperm.xlu0 %10087, %v8176_v26   ;;  %v8217_v11 = vrot.slane %v8209_v53, %v13202_v36  ;;  %v8649_v25 = vrot.slane %v9871_v56, %v13202_v36  ;;  %v20201_v44 = vld [vmem:[#allocation83_spill] sm:$0xff] }
 0x61e   :  { %v8372_v34 = vcombine.low %v8364_v46, %v8371_v19  ;;  %v8469_v38 = vrot.slane %v8455_v58, %v13202_v36  ;;  %v8553_v7 = vcombine.low %v8544_v13, %v8551_v8  ;;  %v8716_v9 = vcombine.low %v20187_v5, %v20186_v42  ;;  %v20197_v13 = vld [vmem:[#allocation15_spill] sm:$0xff] }
 0x61f   :  { %v9874_v32 = vcombine.high %v20187_v5, %v20186_v42  ;;  %v8225_v20 = vcombine.low %v8217_v11, %v8224_v45  ;;  %v8273_v39 = vrot.slane %v8259_v22, %v13202_v36  ;;  %v20190_v23 = vcombine.low %v20188_v12, %v20189_v63  ;;  %v20200_v19 = vld [vmem:[#allocation139_spill] sm:$0xff] }
 0x620   :  { %v20191_v50 = vcombine.high %v20188_v12, %v20189_v63  ;;  %v8552_v47 = vcombine.low %v8530_v60, %v8537_v51  ;;  %9207 = vperm.xlu1 %10088, %v8372_v34   ;;  %v8462_v24 = vrot.slane %v8454_v35, %v13202_v36  ;;  %v8767_v49 = vcombine.low %v20193_v29, %v20192_v54  ;;  %v20207_v63 = vld [vmem:[#allocation84_spill] sm:$0xff] }
 0x621   :  { %v8628_v61 = vrot.slane %v20190_v23, %v13202_v36  ;;  %v9877_v28 = vcombine.high %v20193_v29, %v20192_v54  ;;  %v8740_v18 = vrot.slane %v8718_v1, %v13202_v36  ;;  %9198 = vperm.xlu0 %10087, %v8225_v20   ;;  %v8266_v3 = vrot.slane %v8258_v59, %v13202_v36  ;;  %v20205_v20 = vld [vmem:[#allocation117_spill] sm:$0xff] }
 0x622   :  { %v8635_v4 = vrot.slane %v20191_v50, %v13202_v36  ;;  %v8747_v33 = vrot.slane %v9875_v27, %v13202_v36  ;;  %v8470_v6 = vcombine.low %v8462_v24, %v8469_v38  ;;  %v8567_v43 = vrot.slane %v8553_v7, %v13202_v36  ;;  %v20209_v50 = vld [vmem:[#allocation27_spill] sm:$0xff] }
 0x623   :  { %v8651_v0 = vcombine.low %v8642_v55, %v8649_v25  ;;  %v5792_v14 = vcombine.high %v20194_v41, %v20194_v41  ;;  %v8765_v2 = vcombine.low %v20196_v15, %v20195_v31  ;;  %v9876_v17 = vcombine.high %v20196_v15, %v20195_v31  ;;  %v20204_v25 = vld [vmem:[#allocation192_spill] sm:$0xff] }
 0x624   :  { %v8274_v10 = vcombine.low %v8266_v3, %v8273_v39  ;;  %v8726_v16 = vrot.slane %v8716_v9, %v13202_v36  ;;  %v8733_v48 = vrot.slane %v9874_v32, %v13202_v36  ;;  %v8650_v56 = vcombine.low %v8628_v61, %v8635_v4  ;;  %9213 = vperm.xlu1 %10088, %v8470_v6   ;;  %v20208_v61 = vld [vmem:[#allocation56_spill] sm:$0xff] }
 0x625   :  { %v8560_v53 = vrot.slane %v8552_v47, %v13202_v36  ;;  %v20198_v52 = vcombine.high %v20197_v13, %v20197_v13  ;;  %v8816_v58 = vcombine.low %v20200_v19, %v20199_v62  ;;  %v9879_v30 = vcombine.high %v20200_v19, %v20199_v62  ;;  %v20210_v31 = vld [vmem:[#allocation120_spill] sm:$0xff] }
 0x626   :  { %v8789_v21 = vrot.slane %v8767_v49, %v13202_v36  ;;  %9201 = vperm.xlu0 %10087, %v8274_v10   ;;  %v8796_v40 = vrot.slane %v9877_v28, %v13202_v36  ;;  %v8665_v26 = vrot.slane %v8651_v0, %v13202_v36  ;;  %v8749_v45 = vcombine.low %v8740_v18, %v8747_v33 }
 0x627   :  { %v5771_v8 = vrot.slane %v20198_v52, %v13202_v36  ;;  %v8568_v60 = vcombine.low %v8560_v53, %v8567_v43  ;;  %v5806_v22 = vrot.slane %v20194_v41, %v13202_v36  ;;  %v5841_v51 = vcombine.high %v20201_v44, %v20201_v44 }
 0x628   :  { %v8814_v1 = vcombine.low %v20203_v57, %v20202_v37  ;;  %v9878_v35 = vcombine.high %v20203_v57, %v20202_v37  ;;  %v8775_v46 = vrot.slane %v8765_v2, %v13202_v36  ;;  %v8782_v27 = vrot.slane %v9876_v17, %v13202_v36  ;;  %v20212_v17 = vld [vmem:[#allocation28_spill] sm:$0xff] }
 0x629   :  { %v8748_v59 = vcombine.low %v8726_v16, %v8733_v48  ;;  %9219 = vperm.xlu1 %10088, %v8568_v60   ;;  %v8658_v55 = vrot.slane %v8650_v56, %v13202_v36  ;;  %v5820_v11 = vrot.slane %v5792_v14, %v13202_v36  ;;  %v8865_v34 = vcombine.low %v20204_v25, %v5771_v8 }
 0x62a   :  { %v9881_v38 = vcombine.high %v20204_v25, %v5771_v8  ;;  %v8838_v7 = vrot.slane %v8816_v58, %v13202_v36  ;;  %v8845_v42 = vrot.slane %v9879_v30, %v13202_v36  ;;  %v8763_v9 = vrot.slane %v8749_v45, %v13202_v36  ;;  %v20213_v45 = vld [vmem:[#allocation57_spill] sm:$0xff] }
 0x62b   :  { %v8666_v5 = vcombine.low %v8658_v55, %v8665_v26  ;;  %v8798_v32 = vcombine.low %v8789_v21, %v8796_v40  ;;  %v20206_v39 = vcombine.high %v20205_v20, %v20205_v20  ;;  %v5890_v23 = vcombine.high %v20207_v63, %v20207_v63  ;;  %v17306_v40 = vpop.permute.xlu0 %9084 }
 0x62c   :  { %v8863_v4 = vcombine.low %v20209_v50, %v20208_v61  ;;  %v9880_v47 = vcombine.high %v20209_v50, %v20208_v61  ;;  %v8824_v24 = vrot.slane %v8814_v1, %v13202_v36  ;;  %v8831_v54 = vrot.slane %v9878_v35, %v13202_v36  ;;  %v20216_v50 = vld [vmem:[#allocation9_spill] sm:$0xff] }
 0x62d   :  { %v5813_v12 = vrot.slane %v20206_v39, %v13202_v36  ;;  %v8797_v29 = vcombine.low %v8775_v46, %v8782_v27  ;;  %9225 = vperm.xlu1 %10088, %v8666_v5   ;;  %v8756_v49 = vrot.slane %v8748_v59, %v13202_v36  ;;  %v5869_v28 = vrot.slane %v5841_v51, %v13202_v36  ;;  %v20215_v51 = vld [vmem:[#allocation111_spill] sm:$0xff] }
 0x62e   :  { %v8914_v18 = vcombine.low %v5806_v22, %v5820_v11  ;;  %v9883_v3 = vcombine.high %v5806_v22, %v5820_v11  ;;  %v8887_v33 = vrot.slane %v8865_v34, %v13202_v36  ;;  %v8894_v6 = vrot.slane %v9881_v38, %v13202_v36 }
 0x62f   :  { %v8764_v43 = vcombine.low %v8756_v49, %v8763_v9  ;;  %v8812_v0 = vrot.slane %v8798_v32, %v13202_v36  ;;  %v8847_v41 = vcombine.low %v8838_v7, %v8845_v42  ;;  %v5855_v14 = vrot.slane %v20201_v44, %v13202_v36  ;;  %v9061_v32 = vpop.permute.xlu1 %9060 }
 0x630   :  { %v20211_v15 = vcombine.high %v20210_v31, %v20210_v31  ;;  %v8912_v10 = vcombine.low %v20212_v17, %v5813_v12  ;;  %v9882_v16 = vcombine.high %v20212_v17, %v5813_v12  ;;  %v8873_v48 = vrot.slane %v8863_v4, %v13202_v36 }
 0x631   :  { %v8880_v56 = vrot.slane %v9880_v47, %v13202_v36  ;;  %v8846_v53 = vcombine.low %v8824_v24, %v8831_v54  ;;  %9231 = vperm.xlu1 %10088, %v8764_v43   ;;  %v8805_v13 = vrot.slane %v8797_v29, %v13202_v36  ;;  %v5918_v52 = vrot.slane %v5890_v23, %v13202_v36  ;;  %v17327_v23 = vpop.permute.xlu0 %9090 }
 0x632   :  { %v5862_v2 = vrot.slane %v20211_v15, %v13202_v36  ;;  %v8963_v8 = vcombine.low %v5855_v14, %v5869_v28  ;;  %v9885_v62 = vcombine.high %v5855_v14, %v5869_v28  ;;  %v8936_v19 = vrot.slane %v8914_v18, %v13202_v36 }
 0x633   :  { %v8943_v58 = vrot.slane %v9883_v3, %v13202_v36  ;;  %v8813_v30 = vcombine.low %v8805_v13, %v8812_v0  ;;  %v8861_v21 = vrot.slane %v8847_v41, %v13202_v36  ;;  %v8896_v60 = vcombine.low %v8887_v33, %v8894_v6  ;;  %v20217_v6 = vld [vmem:[#allocation16_spill] sm:$0xff]  ;;  %v9064_v0 = vpop.permute.xlu1 %9063 }
 0x634   :  { %v5904_v26 = vrot.slane %v20207_v63, %v13202_v36  ;;  %v20214_v22 = vcombine.high %v20213_v45, %v20213_v45  ;;  %v8961_v37 = vcombine.low %v20215_v51, %v5862_v2  ;;  %v9884_v57 = vcombine.high %v20215_v51, %v5862_v2 }
 0x635   :  { %v8922_v1 = vrot.slane %v8912_v10, %v13202_v36  ;;  %v8929_v35 = vrot.slane %v9882_v16, %v13202_v36  ;;  %v8895_v46 = vcombine.low %v8873_v48, %v8880_v56  ;;  %9234 = vperm.xlu1 %10088, %v8813_v30   ;;  %v8854_v27 = vrot.slane %v8846_v53, %v13202_v36  ;;  %v17340_v14 = vpop.permute.xlu0 %9096 }
 0x636   :  { %v5911_v44 = vrot.slane %v20214_v22, %v13202_v36  ;;  %v5897_v59 = vrot.slane %v20213_v45, %v13202_v36  ;;  %v9012_v55 = vcombine.low %v5904_v26, %v5918_v52  ;;  %v9887_v11 = vcombine.high %v5904_v26, %v5918_v52 }
 0x637   :  { %v8985_v25 = vrot.slane %v8963_v8, %v13202_v36  ;;  %v8992_v34 = vrot.slane %v9885_v62, %v13202_v36  ;;  %v8862_v38 = vcombine.low %v8854_v27, %v8861_v21  ;;  %v8910_v7 = vrot.slane %v8896_v60, %v13202_v36  ;;  %v9067_v8 = vpop.permute.xlu1 %9066 }
 0x638   :  { %v8945_v42 = vcombine.low %v8936_v19, %v8943_v58  ;;  %v9010_v5 = vcombine.low %v5897_v59, %v5911_v44  ;;  %v9886_v9 = vcombine.high %v5897_v59, %v5911_v44  ;;  %v8971_v20 = vrot.slane %v8961_v37, %v13202_v36 }
 0x639   :  { %v8978_v39 = vrot.slane %v9884_v57, %v13202_v36  ;;  %v8944_v12 = vcombine.low %v8922_v1, %v8929_v35  ;;  %9237 = vperm.xlu1 %10088, %v8862_v38   ;;  %v8903_v63 = vrot.slane %v8895_v46, %v13202_v36  ;;  %v9034_v61 = vrot.slane %v9012_v55, %v13202_v36  ;;  %v17356_v19 = vpop.permute.xlu0 %9102 }
 0x63a   :  { %v9255_v4 = vadd.s32 4294967288, %v20216_v50  ;;  %v9041_v47 = vrot.slane %v9887_v11, %v13202_v36  ;;  %v8959_v54 = vrot.slane %v8945_v42, %v13202_v36  ;;  %v8994_v29 = vcombine.low %v8985_v25, %v8992_v34 }
 0x63b   :  { %v8911_v24 = vcombine.low %v8903_v63, %v8910_v7  ;;  %v9020_v49 = vrot.slane %v9010_v5, %v13202_v36  ;;  %v9027_v28 = vrot.slane %v9886_v9, %v13202_v36  ;;  %v8993_v18 = vcombine.low %v8971_v20, %v8978_v39  ;;  %v9070_v22 = vpop.permute.xlu1 %9069 }
 0x63c   :  { %v8952_v3 = vrot.slane %v8944_v12, %v13202_v36  ;;  %v9262_v33 = vadd.s32 4294967280, %v20216_v50  ;;  %v17338_v43 = vsub.s32 %v9255_v4, %v20217_v6  ;;  %v9008_v31 = vrot.slane %v8994_v29, %v13202_v36 }
 0x63d   :  { %9240 = vperm.xlu1 %10088, %v8911_v24   ;;  %v9043_v15 = vcombine.low %v9034_v61, %v9041_v47  ;;  %v17345_v2 = vsub.s32 %v20216_v50, %v20217_v6  ;;  %v9042_v17 = vcombine.low %v9020_v49, %v9027_v28  ;;  %v9001_v16 = vrot.slane %v8993_v18, %v13202_v36  ;;  %v17366_v51 = vpop.permute.xlu0 %9108 }
 0x63e   :  { %v8960_v41 = vcombine.low %v8952_v3, %v8959_v54  ;;  %v17348_v10 = vsub.s32 %v9262_v33, %v20217_v6  ;;  %v9269_v48 = vadd.s32 4294967272, %v20216_v50  ;;  %v9259_v56 = vrot.slane %v9064_v0, %v17338_v43 }
 0x63f   :  { %v9009_v53 = vcombine.low %v9001_v16, %v9008_v31  ;;  %v9057_v13 = vrot.slane %v9043_v15, %v13202_v36  ;;  %v9254_v52 = vrot.slane %v9061_v32, %v17345_v2  ;;  %v9050_v30 = vrot.slane %v9042_v17, %v13202_v36  ;;  %v9073_v35 = vpop.permute.xlu1 %9072 }
 0x640   :  { %v9266_v62 = vrot.slane %v9067_v8, %v17348_v10  ;;  %v17359_v58 = vsub.s32 %v9269_v48, %v20217_v6  ;;  %v9276_v21 = vadd.s32 4294967264, %v20216_v50  ;;  %v9283_v57 = vadd.s32 4294967256, %v20216_v50 }
 0x641   :  { %9243 = vperm.xlu1 %10088, %v8960_v41   ;;  %v9261_v60 = vsel %vm9260_vm15, %v9259_v56, %v9254_v52  ;;  %v9058_v45 = vcombine.low %v9050_v30, %v9057_v13  ;;  %v17374_v27 = vpop.permute.xlu0 %9114  ;;  %v9290_v55 = vadd.s32 4294967248, %v20216_v50  ;;  %v9297_v42 = vadd.s32 4294967240, %v20216_v50 }
 0x642   :  { %v9268_v26 = vsel %vm9267_vm0, %v9266_v62, %v9261_v60  ;;  %v9273_v44 = vrot.slane %v9070_v22, %v17359_v58  ;;  %v17369_v37 = vsub.s32 %v9276_v21, %v20217_v6  ;;  %v17377_v59 = vsub.s32 %v9283_v57, %v20217_v6 }
 0x643   :  { %v9076_v25 = vpop.permute.xlu1 %9075  ;;  %v17385_v7 = vsub.s32 %v9290_v55, %v20217_v6  ;;  %v9304_v9 = vadd.s32 4294967232, %v20216_v50  ;;  %v17394_v12 = vsub.s32 %v9297_v42, %v20217_v6  ;;  %v9311_v63 = vadd.s32 4294967224, %v20216_v50 }
 0x644   :  { %v9275_v1 = vsel %vm9274_vm3, %v9273_v44, %v9268_v26  ;;  %v9280_v46 = vrot.slane %v9073_v35, %v17369_v37  ;;  %v9287_v34 = vrot.slane %v9076_v25, %v17377_v59  ;;  %v9318_v61 = vadd.s32 4294967216, %v20216_v50 }
 0x645   :  { %9246 = vperm.xlu1 %10088, %v9009_v53   ;;  %v17382_v38 = vpop.permute.xlu0 %9120  ;;  %v17400_v47 = vsub.s32 %v9304_v9, %v20217_v6  ;;  %v17406_v49 = vsub.s32 %v9311_v63, %v20217_v6  ;;  %v9325_v28 = vadd.s32 4294967208, %v20216_v50  ;;  %v9332_v3 = vadd.s32 4294967200, %v20216_v50 }
 0x646   :  { %v9282_v11 = vsel %vm9281_vm4, %v9280_v46, %v9275_v1  ;;  %v17410_v18 = vsub.s32 %v9318_v61, %v20217_v6  ;;  %v9339_v16 = vadd.s32 4294967192, %v20216_v50 }
 0x647   :  { %v9289_v5 = vsel %vm9288_vm8, %v9287_v34, %v9282_v11  ;;  %v9079_v32 = vpop.permute.xlu1 %9078  ;;  %v9308_v0 = vrot.slane %v17306_v40, %v17400_v47  ;;  %v17420_v17 = vsub.s32 %v9325_v28, %v20217_v6  ;;  %v17426_v56 = vsub.s32 %v9332_v3, %v20217_v6 }
 0x648   :  { %v9294_v20 = vrot.slane %v9079_v32, %v17385_v7  ;;  %v9322_v48 = vrot.slane %v17327_v23, %v17410_v18  ;;  %v9346_v40 = vadd.s32 4294967184, %v20216_v50  ;;  %v17434_v21 = vsub.s32 %v9339_v16, %v20217_v6 }
 0x649   :  { %9249 = vperm.xlu1 %10088, %v9058_v45   ;;  %v17391_v39 = vpop.permute.xlu0 %9126  ;;  %v9353_v23 = vadd.s32 4294967176, %v20216_v50  ;;  %v9336_v60 = vrot.slane %v17340_v14, %v17426_v56 }
 0x64a   :  { %v9296_v4 = vsel %vm9295_vm11, %v9294_v20, %v9289_v5  ;;  %v17440_v26 = vsub.s32 %v9346_v40, %v20217_v6 }
 0x64b   :  { %v9082_v24 = vpop.permute.xlu1 %9081  ;;  %v17446_v35 = vsub.s32 %v9353_v23, %v20217_v6  ;;  %v9363_v6 = vrot.slane %v17366_v51, %v17345_v2 }
 0x64c   :  { %v9301_v54 = vrot.slane %v9082_v24, %v17394_v12  ;;  %v9350_v50 = vrot.slane %v17356_v19, %v17440_v26  ;;  %v9372_v19 = vrot.slane %v17374_v27, %v17348_v10  ;;  %v9392_v27 = vrot.slane %v17391_v39, %v17385_v7 }
 0x64d   :  { %v17403_v29 = vpop.permute.xlu0 %9132 }
 0x64e   :  { %v9303_v33 = vsel %vm9302_vm13, %v9301_v54, %v9296_v4  ;;  %v9382_v4 = vrot.slane %v17382_v38, %v17369_v37  ;;  %v9402_v38 = vrot.slane %v17403_v29, %v17400_v47 }
 0x64f   :  { %v9088_v41 = vpop.permute.xlu1 %9087  ;;  %v9310_v53 = vsel %vm9309_vm1, %v9308_v0, %v9303_v33 }
 0x650   :  { %v9315_v31 = vrot.slane %v9088_v41, %v17406_v49 }
 0x651   :  { %v17417_v15 = vpop.permute.xlu0 %9138 }
 0x652   :  { %v9317_v13 = vsel %vm9316_vm9, %v9315_v31, %v9310_v53  ;;  %v9412_v39 = vrot.slane %v17417_v15, %v17410_v18 }
 0x653   :  { %v9324_v52 = vsel %vm9323_vm12, %v9322_v48, %v9317_v13  ;;  %v9094_v8 = vpop.permute.xlu1 %9093 }
 0x654   :  { %v9329_v62 = vrot.slane %v9094_v8, %v17420_v17 }
 0x655   :  { %v9145_v30 = vpop.permute.xlu0 %9144 }
 0x656   :  { %v9331_v45 = vsel %vm9330_vm6, %v9329_v62, %v9324_v52  ;;  %v9422_v29 = vrot.slane %v9145_v30, %v17426_v56 }
 0x657   :  { %v9338_v22 = vsel %vm9337_vm5, %v9336_v60, %v9331_v45  ;;  %v9100_v44 = vpop.permute.xlu1 %9099 }
 0x658   :  { %v9343_v57 = vrot.slane %v9100_v44, %v17434_v21 }
 0x659   :  { %v9151_v1 = vpop.permute.xlu0 %9150 }
 0x65a   :  { %v9345_v14 = vsel %vm9344_vm10, %v9343_v57, %v9338_v22  ;;  %v9432_v15 = vrot.slane %v9151_v1, %v17440_v26 }
 0x65b   :  { %v9352_v46 = vsel %vm9351_vm14, %v9350_v50, %v9345_v14  ;;  %v9106_v55 = vpop.permute.xlu1 %9105 }
 0x65c   :  { %v9357_v11 = vrot.slane %v9106_v55, %v17446_v35 }
 0x65d   :  { %v17453_v25 = vpop.permute.xlu0 %9156 }
 0x65e   :  { %v17456_v34 = vsel %vm9358_vm2, %v9357_v11, %v9352_v46 }
 0x660   :  { %v9112_v42 = vpop.permute.xlu1 %9111 }
 0x661   :  { %v9367_v5 = vrot.slane %v9112_v42, %v17338_v43 }
 0x662   :  { %v9163_v32 = vpop.permute.xlu0 %9162 }
 0x663   :  { %v9368_v9 = vsel %vm9260_vm15, %v9367_v5, %v9363_v6 }
 0x664   :  { %v9373_v20 = vsel %vm9267_vm0, %v9372_v19, %v9368_v9 }
 0x665   :  { %v9118_v63 = vpop.permute.xlu1 %9117 }
 0x666   :  { %v9377_v61 = vrot.slane %v9118_v63, %v17359_v58 }
 0x667   :  { %v9169_v3 = vpop.permute.xlu0 %9168 }
 0x668   :  { %v9378_v24 = vsel %vm9274_vm3, %v9377_v61, %v9373_v20 }
 0x669   :  { %v9383_v51 = vsel %vm9281_vm4, %v9382_v4, %v9378_v24 }
 0x66a   :  { %v9124_v54 = vpop.permute.xlu1 %9123 }
 0x66b   :  { %v9387_v28 = vrot.slane %v9124_v54, %v17377_v59 }
 0x66c   :  { %v9175_v48 = vpop.permute.xlu0 %9174 }
 0x66d   :  { %v9388_v33 = vsel %vm9288_vm8, %v9387_v28, %v9383_v51 }
 0x66e   :  { %v9393_v0 = vsel %vm9295_vm11, %v9392_v27, %v9388_v33  ;;  %v9442_v33 = vrot.slane %v17453_v25, %v17345_v2 }
 0x66f   :  { %v9130_v41 = vpop.permute.xlu1 %9129 }
 0x670   :  { %v9397_v31 = vrot.slane %v9130_v41, %v17394_v12  ;;  %v9181_v60 = vpop.permute.xlu0 %9180 }
 0x672   :  { %v9398_v16 = vsel %vm9302_vm13, %v9397_v31, %v9393_v0 }
 0x673   :  { %v9403_v40 = vsel %vm9309_vm1, %v9402_v38, %v9398_v16  ;;  %v9136_v53 = vpop.permute.xlu1 %9135  ;;  %v9451_v16 = vrot.slane %v9163_v32, %v17348_v10 }
 0x674   :  { %v9407_v13 = vrot.slane %v9136_v53, %v17406_v49 }
 0x675   :  { %v9205_v14 = vpop.permute.xlu0 %9204 }
 0x676   :  { %v9408_v52 = vsel %vm9316_vm9, %v9407_v13, %v9403_v40 }
 0x677   :  { %v9413_v8 = vsel %vm9323_vm12, %v9412_v39, %v9408_v52 }
 0x678   :  { %v9142_v62 = vpop.permute.xlu1 %9141 }
 0x679   :  { %v9417_v23 = vrot.slane %v9142_v62, %v17420_v17  ;;  %v9521_v62 = vrot.slane %v9205_v14, %v17345_v2 }
 0x67a   :  { %v9211_v5 = vpop.permute.xlu0 %9210 }
 0x67b   :  { %v9418_v45 = vsel %vm9330_vm6, %v9417_v23, %v9413_v8  ;;  %v9461_v8 = vrot.slane %v9169_v3, %v17369_v37 }
 0x67c   :  { %v9423_v22 = vsel %vm9337_vm5, %v9422_v29, %v9418_v45 }
 0x67d   :  { %v9148_v44 = vpop.permute.xlu1 %9147 }
 0x67e   :  { %v9427_v57 = vrot.slane %v9148_v44, %v17434_v21 }
 0x67f   :  { %v9217_v9 = vpop.permute.xlu0 %9216 }
 0x680   :  { %v9428_v50 = vsel %vm9344_vm10, %v9427_v57, %v9423_v22  ;;  %v9471_v57 = vrot.slane %v9175_v48, %v17385_v7  ;;  %v9540_v48 = vrot.slane %v9217_v9, %v17369_v37 }
 0x681   :  { %v9433_v11 = vsel %vm9351_vm14, %v9432_v15, %v9428_v50 }
 0x682   :  { %v9154_v46 = vpop.permute.xlu1 %9153 }
 0x683   :  { %v9437_v55 = vrot.slane %v9154_v46, %v17446_v35 }
 0x684   :  { %v9223_v61 = vpop.permute.xlu0 %9222 }
 0x685   :  { %v17495_v30 = vsel %vm9358_vm2, %v9437_v55, %v9433_v11 }
 0x686   :  { %v9597_v42 = vcombine.low %v17456_v34, %v17495_v30 }
 0x688   :  { %v9160_v6 = vpop.permute.xlu1 %9159 }
 0x689   :  { %v9229_v4 = vpop.permute.xlu0 %9228  ;;  %v9446_v27 = vrot.slane %v9160_v6, %v17338_v43 }
 0x68b   :  { %v9447_v31 = vsel %vm9260_vm15, %v9446_v27, %v9442_v33  ;;  %v9560_v33 = vrot.slane %v9229_v4, %v17400_v47 }
 0x68c   :  { %v9452_v40 = vsel %vm9267_vm0, %v9451_v16, %v9447_v31 }
 0x68d   :  { %v9166_v19 = vpop.permute.xlu1 %9165 }
 0x68e   :  { %v9187_v54 = vpop.permute.xlu0 %9186  ;;  %v9456_v38 = vrot.slane %v9166_v19, %v17359_v58 }
 0x690   :  { %v9457_v13 = vsel %vm9274_vm3, %v9456_v38, %v9452_v40 }
 0x691   :  { %v9462_v23 = vsel %vm9281_vm4, %v9461_v8, %v9457_v13 }
 0x692   :  { %v9172_v20 = vpop.permute.xlu1 %9171 }
 0x693   :  { %v9190_v0 = vpop.permute.xlu0 %9189  ;;  %v9466_v39 = vrot.slane %v9172_v20, %v17377_v59 }
 0x695   :  { %v9467_v45 = vsel %vm9288_vm8, %v9466_v39, %v9462_v23 }
 0x696   :  { %v9178_v63 = vpop.permute.xlu1 %9177  ;;  %v9472_v3 = vsel %vm9295_vm11, %v9471_v57, %v9467_v45  ;;  %v9605_v45 = vrot.slane %v9597_v42, %v13202_v36 }
 0x697   :  { %v9193_v25 = vpop.permute.xlu0 %9192  ;;  %v9476_v32 = vrot.slane %v9178_v63, %v17394_v12 }
 0x699   :  { %v9477_v14 = vsel %vm9302_vm13, %v9476_v32, %v9472_v3 }
 0x69a   :  { %v9184_v1 = vpop.permute.xlu1 %9183 }
 0x69b   :  { %v9486_v46 = vrot.slane %v9184_v1, %v17406_v49  ;;  %v9550_v1 = vrot.slane %v9223_v61, %v17385_v7 }
 0x69c   :  { %v9196_v50 = vpop.permute.xlu0 %9195 }
 0x69d   :  { %v9506_v16 = vrot.slane %v9196_v50, %v17434_v21 }
 0x69f   :  { %v9208_v24 = vpop.permute.xlu1 %9207 }
 0x6a0   :  { %v9525_v52 = vrot.slane %v9208_v24, %v17338_v43  ;;  %v9530_v43 = vrot.slane %v9211_v5, %v17348_v10  ;;  %v9491_v24 = vrot.slane %v9187_v54, %v17410_v18  ;;  %v9501_v54 = vrot.slane %v9193_v25, %v17426_v56 }
 0x6a2   :  { %v9526_v22 = vsel %vm9260_vm15, %v9525_v52, %v9521_v62 }
 0x6a3   :  { %v9214_v51 = vpop.permute.xlu1 %9213  ;;  %v9531_v2 = vsel %vm9267_vm0, %v9530_v43, %v9526_v22 }
 0x6a4   :  { %v9535_v44 = vrot.slane %v9214_v51, %v17359_v58  ;;  %v9481_v58 = vrot.slane %v9181_v60, %v17400_v47  ;;  %v9496_v51 = vrot.slane %v9190_v0, %v17420_v17 }
 0x6a6   :  { %v9536_v55 = vsel %vm9274_vm3, %v9535_v44, %v9531_v2  ;;  %v9482_v10 = vsel %vm9309_vm1, %v9481_v58, %v9477_v14  ;;  %v20218_v44 = vlaneseq }
 0x6a7   :  { %v9541_v6 = vsel %vm9281_vm4, %v9540_v48, %v9536_v55  ;;  %v9487_v19 = vsel %vm9316_vm9, %v9486_v46, %v9482_v10 }
 0x6a8   :  { %v9220_v28 = vpop.permute.xlu1 %9219  ;;  %v9492_v60 = vsel %vm9323_vm12, %v9491_v24, %v9487_v19  ;;  %vm9624_vm7 = vcmp.lt.s32.totalorder %v20218_v44, 512 }
 0x6a9   :  { %v9545_v11 = vrot.slane %v9220_v28, %v17377_v59  ;;  %v9199_v59 = vpop.permute.xlu0 %9198  ;;  %v9497_v7 = vsel %vm9330_vm6, %v9496_v51, %v9492_v60 }
 0x6aa   :  { %v9511_v4 = vrot.slane %v9199_v59, %v17440_v26 }
 0x6ab   :  { %v9546_v20 = vsel %vm9288_vm8, %v9545_v11, %v9541_v6 }
 0x6ac   :  { %v9226_v41 = vpop.permute.xlu1 %9225  ;;  %v9551_v37 = vsel %vm9295_vm11, %v9550_v1, %v9546_v20 }
 0x6ad   :  { %v9555_v63 = vrot.slane %v9226_v41, %v17394_v12  ;;  %v9202_v41 = vpop.permute.xlu0 %9201 }
 0x6af   :  { %v9556_v28 = vsel %vm9302_vm13, %v9555_v63, %v9551_v37 }
 0x6b0   :  { %v9232_v53 = vpop.permute.xlu1 %9231  ;;  %v9561_v31 = vsel %vm9309_vm1, %v9560_v33, %v9556_v28 }
 0x6b1   :  { %v9565_v27 = vrot.slane %v9232_v53, %v17406_v49  ;;  %v9516_v53 = vrot.slane %v9202_v41, %v17446_v35 }
 0x6b3   :  { %v9566_v49 = vsel %vm9316_vm9, %v9565_v27, %v9561_v31 }
 0x6b4   :  { %v9235_v29 = vpop.permute.xlu1 %9234 }
 0x6b5   :  { %v9570_v12 = vrot.slane %v9235_v29, %v17410_v18  ;;  %v9502_v18 = vsel %vm9337_vm5, %v9501_v54, %v9497_v7 }
 0x6b6   :  { %v9507_v52 = vsel %vm9344_vm10, %v9506_v16, %v9502_v18 }
 0x6b7   :  { %v9512_v25 = vsel %vm9351_vm14, %v9511_v4, %v9507_v52 }
 0x6b8   :  { %v9238_v15 = vpop.permute.xlu1 %9237  ;;  %v9517_v23 = vsel %vm9358_vm2, %v9516_v53, %v9512_v25 }
 0x6b9   :  { %v9575_v61 = vrot.slane %v9238_v15, %v17420_v17  ;;  %v9571_v17 = vsel %vm9323_vm12, %v9570_v12, %v9566_v49 }
 0x6bb   :  { %v9576_v13 = vsel %vm9330_vm6, %v9575_v61, %v9571_v17 }
 0x6bc   :  { %v9241_v5 = vpop.permute.xlu1 %9240 }
 0x6bd   :  { %v9580_v38 = vrot.slane %v9241_v5, %v17426_v56 }
 0x6bf   :  { %v9581_v56 = vsel %vm9337_vm5, %v9580_v38, %v9576_v13 }
 0x6c0   :  { %v9244_v9 = vpop.permute.xlu1 %9243 }
 0x6c1   :  { %v9585_v47 = vrot.slane %v9244_v9, %v17434_v21 }
 0x6c3   :  { %v9586_v8 = vsel %vm9344_vm10, %v9585_v47, %v9581_v56 }
 0x6c4   :  { %v9247_v0 = vpop.permute.xlu1 %9246 }
 0x6c5   :  { %v9590_v40 = vrot.slane %v9247_v0, %v17440_v26 }
 0x6c7   :  { %v9591_v62 = vsel %vm9351_vm14, %v9590_v40, %v9586_v8 }
 0x6c8   :  { %v9250_v39 = vpop.permute.xlu1 %9249 }
 0x6c9   :  { %v9595_v21 = vrot.slane %v9250_v39, %v17446_v35 }
 0x6cb   :  { %v9596_v26 = vsel %vm9358_vm2, %v9595_v21, %v9591_v62 }
 0x6cc   :  { %v9598_v29 = vcombine.low %v9517_v23, %v9596_v26 }
 0x6ce   :  { %v9612_v32 = vrot.slane %v9598_v29, %v13202_v36 }
 0x6d0   :  { %v9613_v22 = vcombine.low %v9605_v45, %v9612_v32 }
 0x6d2   :  { %v9620_v35 = vrot.slane %v9613_v22, %v13202_v36 }
 0x6d4   :  { %9626 = vst.msk [vmem:[%s17574_s2] sm:$0xf] %vm9624_vm7, %v9620_v35 }

</bundles_post_ra>
